<compile_context>
chip_gen: v7x
topology: tpu7x:2x2x1
jax: 0.10.0
libtpu: 0.0.40
codegen_flags: <defaults>
</compile_context>

<pallas_src>
import jax
import jax.numpy as jnp
from jax.experimental import pallas as pl
from jax.experimental.pallas import tpu as pltpu

IMAGE_SIZE = 784
H_DIM = 400
Z_DIM = 20


def _vae_kernel(x_ref, eps_ref,
                w1_ref, b1_ref, w23_ref, b23_ref,
                w4_ref, b4_ref, w5_ref, b5_ref,
                xr_ref, mulv_ref):
    x = x_ref[...]                                   # (tb, 784) bf16
    eps = eps_ref[...]                               # (tb, 20)  f32

    # ----- encode: h = relu(x @ W1 + b1)  (bf16 MXU inputs, f32 accumulation) -----
    h = jnp.dot(x, w1_ref[...], preferred_element_type=jnp.float32) + b1_ref[...]
    h = jnp.maximum(h, 0.0)                          # (tb, 400) f32

    # ----- fused fc2 || fc3: [mu | log_var] = h @ [W2 | W3] + [b2 | b3] -----
    mulv = jnp.dot(h.astype(jnp.bfloat16), w23_ref[...],
                   preferred_element_type=jnp.float32) + b23_ref[...]   # (tb, 40) f32
    mu = mulv[:, :Z_DIM]
    log_var = mulv[:, Z_DIM:]

    # ----- reparameterize (f32): z = mu + eps * exp(log_var / 2) -----
    z = mu + eps * jnp.exp(log_var * 0.5)            # (tb, 20) f32

    # ----- decode -----
    h2 = jnp.dot(z.astype(jnp.bfloat16), w4_ref[...],
                 preferred_element_type=jnp.float32) + b4_ref[...]
    h2 = jnp.maximum(h2, 0.0)                        # (tb, 400) f32
    logits = jnp.dot(h2.astype(jnp.bfloat16), w5_ref[...],
                     preferred_element_type=jnp.float32) + b5_ref[...]  # (tb, 784) f32

    xr_ref[...] = jax.nn.sigmoid(logits).astype(xr_ref.dtype)
    mulv_ref[...] = mulv.astype(mulv_ref.dtype)


def _round_up(n, m):
    return ((n + m - 1) // m) * m


def vae_forward(x, eps, params, *, batch_tile=256):
    """x: (B, 784) f32, eps: (B, 20) f32. Returns (x_reconst, mu, log_var), all f32."""
    B = x.shape[0]
    w1, b1, w2, b2, w3, b3, w4, b4, w5, b5 = params

    # Fuse fc2/fc3 and cast matmul weights to bf16 (accumulation is f32 in-kernel).
    w23 = jnp.concatenate([w2, w3], axis=1).astype(jnp.bfloat16)   # (400, 40)
    b23 = jnp.concatenate([b2, b3], axis=1)                        # (1, 40) f32
    w1b = w1.astype(jnp.bfloat16)
    w4b = w4.astype(jnp.bfloat16)
    w5b = w5.astype(jnp.bfloat16)

    # Batch tiling: tb rows per grid step; pad B up to a multiple of tb.
    tb = min(batch_tile, _round_up(B, 8))
    Bp = _round_up(B, tb)
    xb = x.astype(jnp.bfloat16)
    eps_p = eps
    if Bp != B:
        xb = jnp.pad(xb, ((0, Bp - B), (0, 0)))
        eps_p = jnp.pad(eps_p, ((0, Bp - B), (0, 0)))

    grid = (Bp // tb,)

    def full(shape):
        # Whole parameter resident in VMEM; constant block index => DMA'd only once
        # across the grid (no per-step re-fetch).
        nd = len(shape)
        return pl.BlockSpec(shape, lambda i, _nd=nd: (0,) * _nd)

    in_specs = [
        pl.BlockSpec((tb, IMAGE_SIZE), lambda i: (i, 0)),   # x
        pl.BlockSpec((tb, Z_DIM), lambda i: (i, 0)),        # eps
        full(w1b.shape), full(b1.shape),
        full(w23.shape), full(b23.shape),
        full(w4b.shape), full(b4.shape),
        full(w5b.shape), full(b5.shape),
    ]
    out_specs = [
        pl.BlockSpec((tb, IMAGE_SIZE), lambda i: (i, 0)),   # x_reconst
        pl.BlockSpec((tb, 2 * Z_DIM), lambda i: (i, 0)),    # mu || log_var slab
    ]
    out_shape = (
        jax.ShapeDtypeStruct((Bp, IMAGE_SIZE), jnp.float32),
        jax.ShapeDtypeStruct((Bp, 2 * Z_DIM), jnp.float32),
    )

    flops = 2 * Bp * (IMAGE_SIZE * H_DIM + H_DIM * 2 * Z_DIM
                      + Z_DIM * H_DIM + H_DIM * IMAGE_SIZE)
    transcendentals = Bp * (Z_DIM + IMAGE_SIZE)             # exp(log_var/2) + sigmoid
    bytes_accessed = (
        xb.size * 2 + eps_p.size * 4
        + (w1b.size + w23.size + w4b.size + w5b.size) * 2
        + (b1.size + b23.size + b4.size + b5.size) * 4
        + (Bp * IMAGE_SIZE + Bp * 2 * Z_DIM) * 4
    )

    x_reconst, mulv = pl.pallas_call(
        _vae_kernel,
        out_shape=out_shape,
        grid_spec=pltpu.PrefetchScalarGridSpec(
            num_scalar_prefetch=0,
            grid=grid,
            in_specs=in_specs,
            out_specs=out_specs,
        ),
        compiler_params=pltpu.CompilerParams(
            dimension_semantics=("parallel",),
        ),
        cost_estimate=pl.CostEstimate(
            flops=flops,
            transcendentals=transcendentals,
            bytes_accessed=bytes_accessed,
        ),
    )(xb, eps_p, w1b, b1, w23, b23, w4b, b4, w5b, b5)

    x_reconst = x_reconst[:B]
    mu = mulv[:B, :Z_DIM]
    log_var = mulv[:B, Z_DIM:]
    return x_reconst, mu, log_var


def init_params(key):
    """Deterministic init mimicking PyTorch nn.Linear default (U[-1/sqrt(fan_in), +])."""
    dims = [
        (IMAGE_SIZE, H_DIM),   # fc1
        (H_DIM, Z_DIM),        # fc2
        (H_DIM, Z_DIM),        # fc3
        (Z_DIM, H_DIM),        # fc4
        (H_DIM, IMAGE_SIZE),   # fc5
    ]
    params = []
    for (fan_in, fan_out) in dims:
        key, kw, kb = jax.random.split(key, 3)
        bound = 1.0 / jnp.sqrt(fan_in)
        w = jax.random.uniform(kw, (fan_in, fan_out), jnp.float32, -bound, bound)
        b = jax.random.uniform(kb, (1, fan_out), jnp.float32, -bound, bound)
        params += [w, b]
    return tuple(params)


def vae_reference(x, eps, params):
    """Pure-JAX reference with the same bf16-matmul / f32-accumulate precision."""
    w1, b1, w2, b2, w3, b3, w4, b4, w5, b5 = params
    bf = jnp.bfloat16

    def mm(a, w):
        return jnp.dot(a.astype(bf), w.astype(bf), preferred_element_type=jnp.float32)

    h = jnp.maximum(mm(x, w1) + b1, 0.0)
    mu = mm(h, w2) + b2
    log_var = mm(h, w3) + b3
    z = mu + eps * jnp.exp(log_var * 0.5)
    h2 = jnp.maximum(mm(z, w4) + b4, 0.0)
    x_reconst = jax.nn.sigmoid(mm(h2, w5) + b5)
    return x_reconst, mu, log_var


if __name__ == "__main__":
    key = jax.random.PRNGKey(0)
    k_param, k_x, k_eps = jax.random.split(key, 3)

    B = 512                      # 2 grid steps at the default batch_tile=256
    params = init_params(k_param)
    x = jax.random.uniform(k_x, (B, IMAGE_SIZE), jnp.float32)    # MNIST-like in [0,1)
    eps = jax.random.normal(k_eps, (B, Z_DIM), jnp.float32)      # reparameterization noise

    fwd = jax.jit(vae_forward)
    x_reconst, mu, log_var = jax.block_until_ready(fwd(x, eps, params))

    assert x_reconst.shape == (B, IMAGE_SIZE)
    assert mu.shape == (B, Z_DIM) and log_var.shape == (B, Z_DIM)

    # Sanity check against a pure-JAX reference with matching (bf16-in / f32-acc) precision.
    xr_ref, mu_ref, lv_ref = vae_reference(x, eps, params)
    assert jnp.allclose(x_reconst, xr_ref, atol=2e-3, rtol=2e-3)
    assert jnp.allclose(mu, mu_ref, atol=2e-3, rtol=2e-3)
    assert jnp.allclose(log_var, lv_ref, atol=2e-3, rtol=2e-3)

    print("KERNEL_OK")
</pallas_src>

<mosaic_0001>
module attributes {stable_mosaic.version = 11 : i64} {
  func.func @_vae_kernel(%arg0: i32, %arg1: memref<256x784xbf16, #tpu.memory_space<vmem>>, %arg2: memref<256x20xf32, #tpu.memory_space<vmem>>, %arg3: memref<784x400xbf16, #tpu.memory_space<vmem>>, %arg4: memref<1x400xf32, #tpu.memory_space<vmem>>, %arg5: memref<400x40xbf16, #tpu.memory_space<vmem>>, %arg6: memref<1x40xf32, #tpu.memory_space<vmem>>, %arg7: memref<20x400xbf16, #tpu.memory_space<vmem>>, %arg8: memref<1x400xf32, #tpu.memory_space<vmem>>, %arg9: memref<400x784xbf16, #tpu.memory_space<vmem>>, %arg10: memref<1x784xf32, #tpu.memory_space<vmem>>, %arg11: memref<256x784xf32, #tpu.memory_space<vmem>>, %arg12: memref<256x40xf32, #tpu.memory_space<vmem>>) attributes {dimension_semantics = [#tpu.dimension_semantics<parallel>], iteration_bounds = array<i64: 2>, scalar_prefetch = 0 : i64, scratch_operands = 0 : i64, tpu.core_type = #tpu.core_type<tc>, window_params = [{transform_indices = @transform_0, window_bounds = array<i64: 256, 784>}, {transform_indices = @transform_1, window_bounds = array<i64: 256, 20>}, {pipeline_mode = #tpu.pipeline_mode<synchronous>, transform_indices = @transform_2, window_bounds = array<i64: 784, 400>}, {pipeline_mode = #tpu.pipeline_mode<synchronous>, transform_indices = @transform_3, window_bounds = array<i64: 1, 400>}, {pipeline_mode = #tpu.pipeline_mode<synchronous>, transform_indices = @transform_4, window_bounds = array<i64: 400, 40>}, {pipeline_mode = #tpu.pipeline_mode<synchronous>, transform_indices = @transform_5, window_bounds = array<i64: 1, 40>}, {pipeline_mode = #tpu.pipeline_mode<synchronous>, transform_indices = @transform_6, window_bounds = array<i64: 20, 400>}, {pipeline_mode = #tpu.pipeline_mode<synchronous>, transform_indices = @transform_7, window_bounds = array<i64: 1, 400>}, {pipeline_mode = #tpu.pipeline_mode<synchronous>, transform_indices = @transform_8, window_bounds = array<i64: 400, 784>}, {pipeline_mode = #tpu.pipeline_mode<synchronous>, transform_indices = @transform_9, window_bounds = array<i64: 1, 784>}, {transform_indices = @transform_10, window_bounds = array<i64: 256, 784>}, {transform_indices = @transform_11, window_bounds = array<i64: 256, 40>}]} {
    %c0 = arith.constant 0 : index
    %c0_0 = arith.constant 0 : index
    %0 = vector.load %arg1[%c0, %c0_0] : memref<256x784xbf16, #tpu.memory_space<vmem>>, vector<256x784xbf16>
    %c0_1 = arith.constant 0 : index
    %c0_2 = arith.constant 0 : index
    %1 = vector.load %arg2[%c0_1, %c0_2] : memref<256x20xf32, #tpu.memory_space<vmem>>, vector<256x20xf32>
    %c0_3 = arith.constant 0 : index
    %c0_4 = arith.constant 0 : index
    %2 = vector.load %arg3[%c0_3, %c0_4] : memref<784x400xbf16, #tpu.memory_space<vmem>>, vector<784x400xbf16>
    %cst = arith.constant dense<0.000000e+00> : vector<256x400xf32>
    %3 = tpu.matmul %0, %2, %cst {dimension_numbers = #tpu.dot_dimension_numbers<[1], [0], [0], [1], [0, 0, 1, 1], [], []>} : vector<256x784xbf16>, vector<784x400xbf16>, vector<256x400xf32> -> vector<256x400xf32>
    %c0_5 = arith.constant 0 : index
    %c0_6 = arith.constant 0 : index
    %4 = vector.load %arg4[%c0_5, %c0_6] : memref<1x400xf32, #tpu.memory_space<vmem>>, vector<1x400xf32>
    %5 = vector.broadcast %4 : vector<1x400xf32> to vector<256x400xf32>
    %6 = arith.addf %3, %5 : vector<256x400xf32>
    %cst_7 = arith.constant 0.000000e+00 : f32
    %7 = vector.broadcast %cst_7 : f32 to vector<256x400xf32>
    %8 = arith.maximumf %6, %7 : vector<256x400xf32>
    %9 = arith.truncf %8 : vector<256x400xf32> to vector<256x400xbf16>
    %c0_8 = arith.constant 0 : index
    %c0_9 = arith.constant 0 : index
    %10 = vector.load %arg5[%c0_8, %c0_9] : memref<400x40xbf16, #tpu.memory_space<vmem>>, vector<400x40xbf16>
    %cst_10 = arith.constant dense<0.000000e+00> : vector<256x40xf32>
    %11 = tpu.matmul %9, %10, %cst_10 {dimension_numbers = #tpu.dot_dimension_numbers<[1], [0], [0], [1], [0, 0, 1, 1], [], []>} : vector<256x400xbf16>, vector<400x40xbf16>, vector<256x40xf32> -> vector<256x40xf32>
    %c0_11 = arith.constant 0 : index
    %c0_12 = arith.constant 0 : index
    %12 = vector.load %arg6[%c0_11, %c0_12] : memref<1x40xf32, #tpu.memory_space<vmem>>, vector<1x40xf32>
    %13 = vector.broadcast %12 : vector<1x40xf32> to vector<256x40xf32>
    %14 = arith.addf %11, %13 : vector<256x40xf32>
    %15 = vector.extract_strided_slice %14 {offsets = [0, 0], sizes = [256, 20], strides = [1, 1]} : vector<256x40xf32> to vector<256x20xf32>
    %16 = vector.extract_strided_slice %14 {offsets = [0, 20], sizes = [256, 20], strides = [1, 1]} : vector<256x40xf32> to vector<256x20xf32>
    %cst_13 = arith.constant 5.000000e-01 : f32
    %17 = vector.broadcast %cst_13 : f32 to vector<256x20xf32>
    %18 = arith.mulf %16, %17 : vector<256x20xf32>
    %19 = math.exp %18 : vector<256x20xf32>
    %20 = arith.mulf %1, %19 : vector<256x20xf32>
    %21 = arith.addf %15, %20 : vector<256x20xf32>
    %22 = arith.truncf %21 : vector<256x20xf32> to vector<256x20xbf16>
    %c0_14 = arith.constant 0 : index
    %c0_15 = arith.constant 0 : index
    %23 = vector.load %arg7[%c0_14, %c0_15] : memref<20x400xbf16, #tpu.memory_space<vmem>>, vector<20x400xbf16>
    %cst_16 = arith.constant dense<0.000000e+00> : vector<256x400xf32>
    %24 = tpu.matmul %22, %23, %cst_16 {dimension_numbers = #tpu.dot_dimension_numbers<[1], [0], [0], [1], [0, 0, 1, 1], [], []>} : vector<256x20xbf16>, vector<20x400xbf16>, vector<256x400xf32> -> vector<256x400xf32>
    %c0_17 = arith.constant 0 : index
    %c0_18 = arith.constant 0 : index
    %25 = vector.load %arg8[%c0_17, %c0_18] : memref<1x400xf32, #tpu.memory_space<vmem>>, vector<1x400xf32>
    %26 = vector.broadcast %25 : vector<1x400xf32> to vector<256x400xf32>
    %27 = arith.addf %24, %26 : vector<256x400xf32>
    %cst_19 = arith.constant 0.000000e+00 : f32
    %28 = vector.broadcast %cst_19 : f32 to vector<256x400xf32>
    %29 = arith.maximumf %27, %28 : vector<256x400xf32>
    %30 = arith.truncf %29 : vector<256x400xf32> to vector<256x400xbf16>
    %c0_20 = arith.constant 0 : index
    %c0_21 = arith.constant 0 : index
    %31 = vector.load %arg9[%c0_20, %c0_21] : memref<400x784xbf16, #tpu.memory_space<vmem>>, vector<400x784xbf16>
    %cst_22 = arith.constant dense<0.000000e+00> : vector<256x784xf32>
    %32 = tpu.matmul %30, %31, %cst_22 {dimension_numbers = #tpu.dot_dimension_numbers<[1], [0], [0], [1], [0, 0, 1, 1], [], []>} : vector<256x400xbf16>, vector<400x784xbf16>, vector<256x784xf32> -> vector<256x784xf32>
    %c0_23 = arith.constant 0 : index
    %c0_24 = arith.constant 0 : index
    %33 = vector.load %arg10[%c0_23, %c0_24] : memref<1x784xf32, #tpu.memory_space<vmem>>, vector<1x784xf32>
    %34 = vector.broadcast %33 : vector<1x784xf32> to vector<256x784xf32>
    %35 = arith.addf %32, %34 : vector<256x784xf32>
    %36 = arith.negf %35 : vector<256x784xf32>
    %37 = math.exp %36 : vector<256x784xf32>
    %cst_25 = arith.constant 1.000000e+00 : f32
    %38 = vector.broadcast %cst_25 : f32 to vector<256x784xf32>
    %39 = arith.addf %38, %37 : vector<256x784xf32>
    %40 = arith.divf %38, %39 : vector<256x784xf32>
    %c0_26 = arith.constant 0 : index
    %c0_27 = arith.constant 0 : index
    %41 = vector.load %arg11[%c0_26, %c0_27] : memref<256x784xf32, #tpu.memory_space<vmem>>, vector<256x784xf32>
    tpu.vector_store %arg11[%c0_26, %c0_27], %40 {strides = array<i32>} : memref<256x784xf32, #tpu.memory_space<vmem>>, vector<256x784xf32>,
    %c0_28 = arith.constant 0 : index
    %c0_29 = arith.constant 0 : index
    %42 = vector.load %arg12[%c0_28, %c0_29] : memref<256x40xf32, #tpu.memory_space<vmem>>, vector<256x40xf32>
    tpu.vector_store %arg12[%c0_28, %c0_29], %14 {strides = array<i32>} : memref<256x40xf32, #tpu.memory_space<vmem>>, vector<256x40xf32>,
    return
  }
  func.func @transform_0(%arg0: i32) -> (i32, i32) {
    %c0_i32 = arith.constant 0 : i32
    %c0_i32_0 = arith.constant 0 : i32
    return %arg0, %c0_i32 : i32, i32
  }
  func.func @transform_1(%arg0: i32) -> (i32, i32) {
    %c0_i32 = arith.constant 0 : i32
    %c0_i32_0 = arith.constant 0 : i32
    return %arg0, %c0_i32 : i32, i32
  }
  func.func @transform_2(%arg0: i32) -> (i32, i32) {
    %c0_i32 = arith.constant 0 : i32
    %c0_i32_0 = arith.constant 0 : i32
    %c0_i32_1 = arith.constant 0 : i32
    return %c0_i32, %c0_i32_0 : i32, i32
  }
  func.func @transform_3(%arg0: i32) -> (i32, i32) {
    %c0_i32 = arith.constant 0 : i32
    %c0_i32_0 = arith.constant 0 : i32
    %c0_i32_1 = arith.constant 0 : i32
    return %c0_i32, %c0_i32_0 : i32, i32
  }
  func.func @transform_4(%arg0: i32) -> (i32, i32) {
    %c0_i32 = arith.constant 0 : i32
    %c0_i32_0 = arith.constant 0 : i32
    %c0_i32_1 = arith.constant 0 : i32
    return %c0_i32, %c0_i32_0 : i32, i32
  }
  func.func @transform_5(%arg0: i32) -> (i32, i32) {
    %c0_i32 = arith.constant 0 : i32
    %c0_i32_0 = arith.constant 0 : i32
    %c0_i32_1 = arith.constant 0 : i32
    return %c0_i32, %c0_i32_0 : i32, i32
  }
  func.func @transform_6(%arg0: i32) -> (i32, i32) {
    %c0_i32 = arith.constant 0 : i32
    %c0_i32_0 = arith.constant 0 : i32
    %c0_i32_1 = arith.constant 0 : i32
    return %c0_i32, %c0_i32_0 : i32, i32
  }
  func.func @transform_7(%arg0: i32) -> (i32, i32) {
    %c0_i32 = arith.constant 0 : i32
    %c0_i32_0 = arith.constant 0 : i32
    %c0_i32_1 = arith.constant 0 : i32
    return %c0_i32, %c0_i32_0 : i32, i32
  }
  func.func @transform_8(%arg0: i32) -> (i32, i32) {
    %c0_i32 = arith.constant 0 : i32
    %c0_i32_0 = arith.constant 0 : i32
    %c0_i32_1 = arith.constant 0 : i32
    return %c0_i32, %c0_i32_0 : i32, i32
  }
  func.func @transform_9(%arg0: i32) -> (i32, i32) {
    %c0_i32 = arith.constant 0 : i32
    %c0_i32_0 = arith.constant 0 : i32
    %c0_i32_1 = arith.constant 0 : i32
    return %c0_i32, %c0_i32_0 : i32, i32
  }
  func.func @transform_10(%arg0: i32) -> (i32, i32) {
    %c0_i32 = arith.constant 0 : i32
    %c0_i32_0 = arith.constant 0 : i32
    return %arg0, %c0_i32 : i32, i32
  }
  func.func @transform_11(%arg0: i32) -> (i32, i32) {
    %c0_i32 = arith.constant 0 : i32
    %c0_i32_0 = arith.constant 0 : i32
    return %arg0, %c0_i32 : i32, i32
  }
}

</mosaic_0001>

<bundles_post_ra>
// kernel: vae_forward.1
= control target key start
LH: loop header
LB: loop body
LE: loop exit
PB: predicated region body
PF: predicated region fallthrough
CT: control target
= control target key end

     0   :  { %s13888_s17 = smov 0   ;;  %s17630_s0 = inlined_call_operand.vmem [shape: bf16[512,784], index: 0, kind: input, shape index: {}]   ;;  %s17631_s1 = inlined_call_operand.vmem [shape: f32[512,20], index: 1, kind: input, shape index: {}]   ;;  %s17632_s2 = inlined_call_operand.vmem [shape: bf16[784,400], index: 2, kind: input, shape index: {}]   ;;  %s17633_s3 = inlined_call_operand.vmem [shape: f32[1,400], index: 3, kind: input, shape index: {}]   ;;  %s17634_s4 = inlined_call_operand.vmem [shape: bf16[400,40], index: 4, kind: input, shape index: {}]   ;;  %s17635_s5 = inlined_call_operand.vmem [shape: f32[1,40], index: 5, kind: input, shape index: {}]   ;;  %s17636_s6 = inlined_call_operand.vmem [shape: bf16[20,400], index: 6, kind: input, shape index: {}]   ;;  %s17637_s7 = inlined_call_operand.vmem [shape: f32[1,400], index: 7, kind: input, shape index: {}]   ;;  %s17638_s8 = inlined_call_operand.vmem [shape: bf16[400,784], index: 8, kind: input, shape index: {}]   ;;  %s17639_s9 = inlined_call_operand.vmem [shape: f32[1,784], index: 9, kind: input, shape index: {}]   ;;  %s17640_s10 = inlined_call_operand.vmem [shape: f32[512,784], index: 10, kind: output, shape index: {0}]   ;;  %s17641_s11 = inlined_call_operand.vmem [shape: f32[512,40], index: 11, kind: output, shape index: {1}]  }
   0x1 LB: > { %s10084_s18 = sadd.s32 4294967295, %s13824_s17   ;;  %p10088_p0 = scmp.ge.s32.totalorder %s13824_s17, 1  ;;  %s13824_s17 = sphi %s13888_s17, %s22_s17  }
   0x2   : > { %p353_p1 = scmp.lt.s32.totalorder %s13824_s17, 3 }
   0x4   : > { %p354_p2 = pnand %p10088_p0, %p353_p1 }
   0x6   : > { %357 = sbr.rel (%p354_p2) target bundleno = 2084 (0x824), region = 60 }
   0xd   : > { %v12118_v0 = vld [vmem:[%s17632_s2 + $0x4] ss:$16 sps:$4 sm:$0xff]   ;;  %v12120_v1 = vld [vmem:[%s17632_s2 + $0xc] ss:$16 sps:$4 sm:$0xff]   ;;  %v12122_v2 = vld [vmem:[%s17632_s2] ss:$16 sps:$4 sm:$0xff]  }
   0xe   : > { %2399 = vmatprep.subr.bf16.mxu0 %v12118_v0  ;;  %v12123_v3 = vld [vmem:[%s17632_s2 + $0x8] ss:$16 sps:$4 sm:$0xff]   ;;  %3171 = vmatprep.subr.bf16.mxu1 %v12120_v1  ;;  %v12124_v4 = vld [vmem:[%s17632_s2 + $0x24] ss:$16 sps:$4 sm:$0xff]   ;;  %v12126_v5 = vld [vmem:[%s17632_s2 + $0x2c] ss:$16 sps:$4 sm:$0xff]  }
   0xf   : > { %2400 = vmatpush1.bf16.msra.mxu0 %v12122_v2  ;;  %3172 = vmatpush1.bf16.msra.mxu1 %v12123_v3  ;;  %v12128_v6 = vld [vmem:[%s17632_s2 + $0x20] ss:$16 sps:$4 sm:$0xff]   ;;  %v12129_v7 = vld [vmem:[%s17632_s2 + $0x28] ss:$16 sps:$4 sm:$0xff]   ;;  %v12130_v8 = vld [vmem:[%s17632_s2 + $0x44] ss:$16 sps:$4 sm:$0xff]  }
  0x10   : > { %2401 = vmatprep.subr.bf16.mxu0 %v12124_v4  ;;  %3173 = vmatprep.subr.bf16.mxu1 %v12126_v5  ;;  %v12132_v9 = vld [vmem:[%s17632_s2 + $0x4c] ss:$16 sps:$4 sm:$0xff]   ;;  %v12134_v10 = vld [vmem:[%s17632_s2 + $0x40] ss:$16 sps:$4 sm:$0xff]   ;;  %v12135_v11 = vld [vmem:[%s17632_s2 + $0x48] ss:$16 sps:$4 sm:$0xff]  }
  0x11   : > { %v12136_v12 = vld [vmem:[%s17632_s2 + $0x64] ss:$16 sps:$4 sm:$0xff]   ;;  %v12138_v13 = vld [vmem:[%s17632_s2 + $0x6c] ss:$16 sps:$4 sm:$0xff]   ;;  %v12140_v14 = vld [vmem:[%s17632_s2 + $0x60] ss:$16 sps:$4 sm:$0xff]  }
  0x12   : > { %v12141_v15 = vld [vmem:[%s17632_s2 + $0x68] ss:$16 sps:$4 sm:$0xff]   ;;  %v12142_v16 = vld [vmem:[%s17632_s2 + $0x84] ss:$16 sps:$4 sm:$0xff]   ;;  %v12144_v17 = vld [vmem:[%s17632_s2 + $0x8c] ss:$16 sps:$4 sm:$0xff]  }
  0x13   : > { %2402 = vmatpush1.bf16.msra.mxu0 %v12128_v6  ;;  %3174 = vmatpush1.bf16.msra.mxu1 %v12129_v7  ;;  %v12146_v18 = vld [vmem:[%s17632_s2 + $0x80] ss:$16 sps:$4 sm:$0xff]   ;;  %v12147_v19 = vld [vmem:[%s17632_s2 + $0x88] ss:$16 sps:$4 sm:$0xff]   ;;  %v12148_v20 = vld [vmem:[%s17632_s2 + $0xa4] ss:$16 sps:$4 sm:$0xff]  }
  0x14   : > { %2403 = vmatprep.subr.bf16.mxu0 %v12130_v8  ;;  %3175 = vmatprep.subr.bf16.mxu1 %v12132_v9  ;;  %v12150_v21 = vld [vmem:[%s17632_s2 + $0xac] ss:$16 sps:$4 sm:$0xff]   ;;  %v12152_v22 = vld [vmem:[%s17632_s2 + $0xa0] ss:$16 sps:$4 sm:$0xff]   ;;  %v12153_v23 = vld [vmem:[%s17632_s2 + $0xa8] ss:$16 sps:$4 sm:$0xff]  }
  0x15   : > { %v12154_v24 = vld [vmem:[%s17632_s2 + $0xc4] ss:$16 sps:$4 sm:$0xff]   ;;  %v12156_v25 = vld [vmem:[%s17632_s2 + $0xcc] ss:$16 sps:$4 sm:$0xff]   ;;  %v12158_v26 = vld [vmem:[%s17632_s2 + $0xc0] ss:$16 sps:$4 sm:$0xff]  }
  0x16   : > { %v12159_v27 = vld [vmem:[%s17632_s2 + $0xc8] ss:$16 sps:$4 sm:$0xff]   ;;  %v12160_v28 = vld [vmem:[%s17632_s2 + $0xe4] ss:$16 sps:$4 sm:$0xff]   ;;  %v12162_v29 = vld [vmem:[%s17632_s2 + $0xec] ss:$16 sps:$4 sm:$0xff]  }
  0x17   : > { %2404 = vmatpush1.bf16.msra.mxu0 %v12134_v10  ;;  %3176 = vmatpush1.bf16.msra.mxu1 %v12135_v11  ;;  %s10089_s28 = sshll.u32 %s10084_s18, 5  ;;  %v12164_v30 = vld [vmem:[%s17632_s2 + $0xe0] ss:$16 sps:$4 sm:$0xff]   ;;  %v12165_v31 = vld [vmem:[%s17632_s2 + $0xe8] ss:$16 sps:$4 sm:$0xff]   ;;  %vm2350_vm0 = vcmask 130048  }
  0x18   : > { %2405 = vmatprep.subr.bf16.mxu0 %v12136_v12  ;;  %3177 = vmatprep.subr.bf16.mxu1 %v12138_v13  ;;  %v12166_v32 = vld [vmem:[%s17632_s2 + $0x104] ss:$16 sps:$4 sm:$0xff]   ;;  %p406_p3 = scmp.lt.s32.totalorder %s10089_s28, 63  ;;  %v12168_v33 = vld [vmem:[%s17632_s2 + $0x10c] ss:$16 sps:$4 sm:$0xff]   ;;  %vm5123_vm1 = vcmask 1041408  }
  0x19   : > { %v12170_v34 = vld [vmem:[%s17632_s2 + $0x100] ss:$16 sps:$4 sm:$0xff]   ;;  %v12171_v35 = vld [vmem:[%s17632_s2 + $0x108] ss:$16 sps:$4 sm:$0xff]   ;;  %v12172_v36 = vld [vmem:[%s17632_s2 + $0x124] ss:$16 sps:$4 sm:$0xff]  }
  0x1a   : > { %s17826_s28 = smov (!%p406_p3, %s10089_s28), 63  ;;  %v12174_v37 = vld [vmem:[%s17632_s2 + $0x12c] ss:$16 sps:$4 sm:$0xff]   ;;  %v12176_v38 = vld [vmem:[%s17632_s2 + $0x120] ss:$16 sps:$4 sm:$0xff]   ;;  %vm9947_vm2 = vcmask 326656  }
  0x1b   : > { %2406 = vmatpush1.bf16.msra.mxu0 %v12140_v14  ;;  %3178 = vmatpush1.bf16.msra.mxu1 %v12141_v15  ;;  %v12177_v39 = vld [vmem:[%s17632_s2 + $0x128] ss:$16 sps:$4 sm:$0xff]   ;;  %v12178_v40 = vld [vmem:[%s17632_s2 + $0x144] ss:$16 sps:$4 sm:$0xff]   ;;  %s12106_s15 = smul.u32 28, %s17826_s28  ;;  %s10092_s24 = sshll.u32 %s17826_s28, 3 }
  0x1c   : > { %2407 = vmatprep.subr.bf16.mxu0 %v12142_v16  ;;  %3179 = vmatprep.subr.bf16.mxu1 %v12144_v17  ;;  %v12180_v41 = vld [vmem:[%s17632_s2 + $0x14c] ss:$16 sps:$4 sm:$0xff]   ;;  %v12182_v42 = vld [vmem:[%s17632_s2 + $0x140] ss:$16 sps:$4 sm:$0xff]   ;;  %v12183_v43 = vld [vmem:[%s17632_s2 + $0x148] ss:$16 sps:$4 sm:$0xff]   ;;  %s14958_s29 = scalar_lea.vmem %s17641_s11, %s10092_s24  ;;  %s15227_s20 = scalar_lea.vmem %s17631_s1, %s10092_s24 }
  0x1d   : > { %v12184_v44 = vld [vmem:[%s17632_s2 + $0x164] ss:$16 sps:$4 sm:$0xff]   ;;  %s14039_s27 = scalar_lea.vmem %s17630_s0, %s12106_s15  ;;  %v12186_v45 = vld [vmem:[%s17632_s2 + $0x16c] ss:$16 sps:$4 sm:$0xff]   ;;  %v12188_v46 = vld [vmem:[%s17632_s2 + $0x160] ss:$16 sps:$4 sm:$0xff]  }
  0x1e   : > { %v12189_v47 = vld [vmem:[%s17632_s2 + $0x168] ss:$16 sps:$4 sm:$0xff]   ;;  %v12216_v48 = vld [vmem:[%s14039_s27 + $0x4] ss:$28 sps:$4 sm:$0xff]   ;;  %v12192_v50 = vld [vmem:[%s17632_s2 + $0x18c] ss:$16 sps:$4 sm:$0xff]  }
  0x1f   : > { %2408 = vmatpush1.bf16.msra.mxu0 %v12146_v18  ;;  %3180 = vmatpush1.bf16.msra.mxu1 %v12147_v19  ;;  %v12190_v49 = vld [vmem:[%s17632_s2 + $0x184] ss:$16 sps:$4 sm:$0xff]   ;;  %v12194_v51 = vld [vmem:[%s17632_s2 + $0x180] ss:$16 sps:$4 sm:$0xff]   ;;  %v12195_v52 = vld [vmem:[%s17632_s2 + $0x188] ss:$16 sps:$4 sm:$0xff]  }
  0x20   : > { %2409 = vmatprep.subr.bf16.mxu0 %v12148_v20  ;;  %3181 = vmatprep.subr.bf16.mxu1 %v12150_v21  ;;  %v12196_v53 = vld [vmem:[%s17632_s2 + $0x1a4] ss:$16 sps:$4 sm:$0xff]   ;;  %v12198_v54 = vld [vmem:[%s17632_s2 + $0x1ac] ss:$16 sps:$4 sm:$0xff]   ;;  %v12200_v55 = vld [vmem:[%s17632_s2 + $0x1a0] ss:$16 sps:$4 sm:$0xff]  }
  0x21   : > { %2431 = vmatprep.mubr.bf16.mxu0 %v12216_v48  ;;  %3203 = vmatprep.mubr.bf16.mxu1 %v12216_v48  ;;  %v12201_v56 = vld [vmem:[%s17632_s2 + $0x1a8] ss:$16 sps:$4 sm:$0xff]   ;;  %v12202_v57 = vld [vmem:[%s17632_s2 + $0x1c4] ss:$16 sps:$4 sm:$0xff]   ;;  %v12204_v58 = vld [vmem:[%s17632_s2 + $0x1cc] ss:$16 sps:$4 sm:$0xff]  }
  0x22   : > { %v12206_v59 = vld [vmem:[%s17632_s2 + $0x1c0] ss:$16 sps:$4 sm:$0xff]   ;;  %v12207_v60 = vld [vmem:[%s17632_s2 + $0x1c8] ss:$16 sps:$4 sm:$0xff]   ;;  %v12208_v61 = vld [vmem:[%s17632_s2 + $0x1e4] ss:$16 sps:$4 sm:$0xff]  }
  0x23   : > { %2410 = vmatpush1.bf16.msra.mxu0 %v12152_v22  ;;  %3182 = vmatpush1.bf16.msra.mxu1 %v12153_v23  ;;  %v12210_v62 = vld [vmem:[%s17632_s2 + $0x1ec] ss:$16 sps:$4 sm:$0xff]   ;;  %v12212_v63 = vld [vmem:[%s17632_s2 + $0x1e0] ss:$16 sps:$4 sm:$0xff]   ;;  %v12213_v0 = vld [vmem:[%s17632_s2 + $0x1e8] ss:$16 sps:$4 sm:$0xff]  }
  0x24   : > { %2411 = vmatprep.subr.bf16.mxu0 %v12154_v24  ;;  %3183 = vmatprep.subr.bf16.mxu1 %v12156_v25  ;;  %v12219_v1 = vld [vmem:[%s17632_s2 + $0x204] ss:$16 sps:$4 sm:$0xff]   ;;  %v12222_v2 = vld [vmem:[%s17632_s2 + $0x20c] ss:$16 sps:$4 sm:$0xff]   ;;  %v12217_v4 = vld [vmem:[%s17632_s2 + $0x200] ss:$16 sps:$4 sm:$0xff]  }
  0x25   : > { %v12214_v3 = vld [vmem:[%s14039_s27] ss:$28 sps:$4 sm:$0xff]   ;;  %v12220_v5 = vld [vmem:[%s17632_s2 + $0x208] ss:$16 sps:$4 sm:$0xff]   ;;  %v12228_v7 = vld [vmem:[%s17632_s2 + $0x224] ss:$16 sps:$4 sm:$0xff]  }
  0x26   : > { %v12223_v6 = vld [vmem:[%s14039_s27 + $0x3c] ss:$28 sps:$4 sm:$0xff]   ;;  %v12226_v9 = vld [vmem:[%s17632_s2 + $0x220] ss:$16 sps:$4 sm:$0xff]   ;;  %v12237_v11 = vld [vmem:[%s17632_s2 + $0x244] ss:$16 sps:$4 sm:$0xff]  }
  0x27   : > { %2412 = vmatpush1.bf16.msra.mxu0 %v12158_v26  ;;  %3184 = vmatpush1.bf16.msra.mxu1 %v12159_v27  ;;  %v12231_v8 = vld [vmem:[%s17632_s2 + $0x22c] ss:$16 sps:$4 sm:$0xff]   ;;  %v12229_v10 = vld [vmem:[%s17632_s2 + $0x228] ss:$16 sps:$4 sm:$0xff]   ;;  %v12232_v14 = vld [vmem:[%s14039_s27 + $0x74] ss:$28 sps:$4 sm:$0xff]  }
  0x28   : > { %2413 = vmatprep.subr.bf16.mxu0 %v12160_v28  ;;  %3185 = vmatprep.subr.bf16.mxu1 %v12162_v29  ;;  %v12240_v12 = vld [vmem:[%s17632_s2 + $0x24c] ss:$16 sps:$4 sm:$0xff]   ;;  %v12225_v13 = vld [vmem:[%s14039_s27 + $0x38] ss:$28 sps:$4 sm:$0xff]   ;;  %v12235_v15 = vld [vmem:[%s17632_s2 + $0x240] ss:$16 sps:$4 sm:$0xff]  }
  0x29   : > { %v12238_v16 = vld [vmem:[%s17632_s2 + $0x248] ss:$16 sps:$4 sm:$0xff]   ;;  %v12246_v17 = vld [vmem:[%s17632_s2 + $0x264] ss:$16 sps:$4 sm:$0xff]   ;;  %v12249_v18 = vld [vmem:[%s17632_s2 + $0x26c] ss:$16 sps:$4 sm:$0xff]  }
  0x2a   : > { %v12244_v19 = vld [vmem:[%s17632_s2 + $0x260] ss:$16 sps:$4 sm:$0xff]   ;;  %v12247_v20 = vld [vmem:[%s17632_s2 + $0x268] ss:$16 sps:$4 sm:$0xff]   ;;  %v12255_v21 = vld [vmem:[%s17632_s2 + $0x284] ss:$16 sps:$4 sm:$0xff]  }
  0x2b   : > { %2414 = vmatpush1.bf16.msra.mxu0 %v12164_v30  ;;  %3186 = vmatpush1.bf16.msra.mxu1 %v12165_v31  ;;  %v12258_v22 = vld [vmem:[%s17632_s2 + $0x28c] ss:$16 sps:$4 sm:$0xff]   ;;  %v12253_v25 = vld [vmem:[%s17632_s2 + $0x280] ss:$16 sps:$4 sm:$0xff]   ;;  %v12256_v26 = vld [vmem:[%s17632_s2 + $0x288] ss:$16 sps:$4 sm:$0xff]  }
  0x2c   : > { %2415 = vmatprep.subr.bf16.mxu0 %v12166_v32  ;;  %3187 = vmatprep.subr.bf16.mxu1 %v12168_v33  ;;  %v12234_v23 = vld [vmem:[%s14039_s27 + $0x70] ss:$28 sps:$4 sm:$0xff]   ;;  %v12264_v27 = vld [vmem:[%s17632_s2 + $0x2a4] ss:$16 sps:$4 sm:$0xff]   ;;  %v12265_v30 = vld [vmem:[%s17632_s2 + $0x2a8] ss:$16 sps:$4 sm:$0xff]  }
  0x2d   : > { %v12241_v24 = vld [vmem:[%s14039_s27 + $0xac] ss:$28 sps:$4 sm:$0xff]   ;;  %v12262_v29 = vld [vmem:[%s17632_s2 + $0x2a0] ss:$16 sps:$4 sm:$0xff]   ;;  %v12273_v31 = vld [vmem:[%s17632_s2 + $0x2c4] ss:$16 sps:$4 sm:$0xff]  }
  0x2e   : > { %v12267_v28 = vld [vmem:[%s17632_s2 + $0x2ac] ss:$16 sps:$4 sm:$0xff]   ;;  %v12243_v33 = vld [vmem:[%s14039_s27 + $0xa8] ss:$28 sps:$4 sm:$0xff]   ;;  %s13827_s12 = smov 108   ;;  %vm5074_vm3 = vcmask 162816  }
  0x2f   : > { %2416 = vmatpush1.bf16.msra.mxu0 %v12170_v34  ;;  %3188 = vmatpush1.bf16.msra.mxu1 %v12171_v35  ;;  %v12276_v32 = vld [vmem:[%s17632_s2 + $0x2cc] ss:$16 sps:$4 sm:$0xff]   ;;  %v12250_v34 = vld [vmem:[%s14039_s27 + $0xe4] ss:$28 sps:$4 sm:$0xff]   ;;  %s12107_s21 = smul.u32 56, %s17826_s28 }
  0x30   : > { %2417 = vmatprep.subr.bf16.mxu0 %v12172_v36  ;;  %3189 = vmatprep.subr.bf16.mxu1 %v12174_v37  ;;  %v12271_v35 = vld [vmem:[%s17632_s2 + $0x2c0] ss:$16 sps:$4 sm:$0xff]   ;;  %v12274_v36 = vld [vmem:[%s17632_s2 + $0x2c8] ss:$16 sps:$4 sm:$0xff]   ;;  %v12282_v37 = vld [vmem:[%s17632_s2 + $0x2e4] ss:$16 sps:$4 sm:$0xff]  }
  0x31   : > { %v12303_v48 = vld [vmem:[%s17632_s2 + $0x32c] ss:$16 sps:$4 sm:$0xff]   ;;  %s16427_s23 = scalar_lea.vmem %s17640_s10, %s12107_s21 }
  0x33   : > { %2418 = vmatpush1.bf16.msra.mxu0 %v12176_v38  ;;  %3190 = vmatpush1.bf16.msra.mxu1 %v12177_v39  ;;  %v12285_v38 = vld [vmem:[%s17632_s2 + $0x2ec] ss:$16 sps:$4 sm:$0xff]   ;;  %v12280_v39 = vld [vmem:[%s17632_s2 + $0x2e0] ss:$16 sps:$4 sm:$0xff]  }
  0x34   : > { %2419 = vmatprep.subr.bf16.mxu0 %v12178_v40  ;;  %3191 = vmatprep.subr.bf16.mxu1 %v12180_v41  ;;  %v12283_v40 = vld [vmem:[%s17632_s2 + $0x2e8] ss:$16 sps:$4 sm:$0xff]   ;;  %v12291_v41 = vld [vmem:[%s17632_s2 + $0x304] ss:$16 sps:$4 sm:$0xff]  }
  0x37   : > { %2420 = vmatpush1.bf16.msra.mxu0 %v12182_v42  ;;  %3192 = vmatpush1.bf16.msra.mxu1 %v12183_v43  ;;  %v12294_v42 = vld [vmem:[%s17632_s2 + $0x30c] ss:$16 sps:$4 sm:$0xff]  }
  0x38   : > { %2421 = vmatprep.subr.bf16.mxu0 %v12184_v44  ;;  %3193 = vmatprep.subr.bf16.mxu1 %v12186_v45  ;;  %v12252_v43 = vld [vmem:[%s14039_s27 + $0xe0] ss:$28 sps:$4 sm:$0xff]  }
  0x39   : > { %v12259_v44 = vld [vmem:[%s14039_s27 + $0x11c] ss:$28 sps:$4 sm:$0xff]   ;;  %v12289_v45 = vld [vmem:[%s17632_s2 + $0x300] ss:$16 sps:$4 sm:$0xff]  }
  0x3b   : > { %2422 = vmatpush1.bf16.msra.mxu0 %v12188_v46  ;;  %3194 = vmatpush1.bf16.msra.mxu1 %v12189_v47  ;;  %v12292_v46 = vld [vmem:[%s17632_s2 + $0x308] ss:$16 sps:$4 sm:$0xff]   ;;  %v12300_v47 = vld [vmem:[%s17632_s2 + $0x324] ss:$16 sps:$4 sm:$0xff]  }
  0x3c   : > { %2423 = vmatprep.subr.bf16.mxu0 %v12190_v49  ;;  %3195 = vmatprep.subr.bf16.mxu1 %v12192_v50  ;;  %v12298_v49 = vld [vmem:[%s17632_s2 + $0x320] ss:$16 sps:$4 sm:$0xff]   ;;  %v12301_v50 = vld [vmem:[%s17632_s2 + $0x328] ss:$16 sps:$4 sm:$0xff]  }
  0x3f   : > { %2424 = vmatpush1.bf16.msra.mxu0 %v12194_v51  ;;  %3196 = vmatpush1.bf16.msra.mxu1 %v12195_v52  ;;  %v12309_v51 = vld [vmem:[%s17632_s2 + $0x344] ss:$16 sps:$4 sm:$0xff]   ;;  %v12312_v52 = vld [vmem:[%s17632_s2 + $0x34c] ss:$16 sps:$4 sm:$0xff]  }
  0x40   : > { %2425 = vmatprep.subr.bf16.mxu0 %v12196_v53  ;;  %3197 = vmatprep.subr.bf16.mxu1 %v12198_v54  ;;  %v12261_v53 = vld [vmem:[%s14039_s27 + $0x118] ss:$28 sps:$4 sm:$0xff]  }
  0x41   : > { %v12268_v54 = vld [vmem:[%s14039_s27 + $0x154] ss:$28 sps:$4 sm:$0xff]  }
  0x43   : > { %2426 = vmatpush1.bf16.msra.mxu0 %v12200_v55  ;;  %3198 = vmatpush1.bf16.msra.mxu1 %v12201_v56  ;;  %v12307_v55 = vld [vmem:[%s17632_s2 + $0x340] ss:$16 sps:$4 sm:$0xff]   ;;  %v12310_v56 = vld [vmem:[%s17632_s2 + $0x348] ss:$16 sps:$4 sm:$0xff]  }
  0x44   : > { %2427 = vmatprep.subr.bf16.mxu0 %v12202_v57  ;;  %3199 = vmatprep.subr.bf16.mxu1 %v12204_v58  ;;  %v12318_v57 = vld [vmem:[%s17632_s2 + $0x364] ss:$16 sps:$4 sm:$0xff]   ;;  %v12321_v58 = vld [vmem:[%s17632_s2 + $0x36c] ss:$16 sps:$4 sm:$0xff]  }
  0x47   : > { %2428 = vmatpush1.bf16.msra.mxu0 %v12206_v59  ;;  %3200 = vmatpush1.bf16.msra.mxu1 %v12207_v60  ;;  %v12316_v59 = vld [vmem:[%s17632_s2 + $0x360] ss:$16 sps:$4 sm:$0xff]   ;;  %v12319_v60 = vld [vmem:[%s17632_s2 + $0x368] ss:$16 sps:$4 sm:$0xff]  }
  0x48   : > { %2429 = vmatprep.subr.bf16.mxu0 %v12208_v61  ;;  %3201 = vmatprep.subr.bf16.mxu1 %v12210_v62  ;;  %v12327_v61 = vld [vmem:[%s17632_s2 + $0x384] ss:$16 sps:$4 sm:$0xff]   ;;  %v12330_v62 = vld [vmem:[%s17632_s2 + $0x38c] ss:$16 sps:$4 sm:$0xff]  }
  0x4b   : > { %2430 = vmatpush1.bf16.msra.mxu0 %v12212_v63  ;;  %3202 = vmatpush1.bf16.msra.mxu1 %v12213_v0  ;;  %v12270_v63 = vld [vmem:[%s14039_s27 + $0x150] ss:$28 sps:$4 sm:$0xff]  }
  0x4c   : > { %2592 = vmatprep.subr.bf16.mxu0 %v12219_v1  ;;  %3364 = vmatprep.subr.bf16.mxu1 %v12222_v2  ;;  %v12277_v0 = vld [vmem:[%s14039_s27 + $0x18c] ss:$28 sps:$4 sm:$0xff]   ;;  %v12325_v1 = vld [vmem:[%s17632_s2 + $0x380] ss:$16 sps:$4 sm:$0xff]  }
  0x4d   : > { %v12328_v2 = vld [vmem:[%s17632_s2 + $0x388] ss:$16 sps:$4 sm:$0xff]  }
  0x4e   : > { %2432 = vmatmul.mubr.bf16.vlgmr.msra.gmra.mrb[0].mxu0 %v12214_v3  ;;  %3204 = vmatmul.mubr.bf16.vlgmr.msra.gmra.mrb[0].mxu1 %v12214_v3  ;;  %v12336_v3 = vld [vmem:[%s17632_s2 + $0x3a4] ss:$16 sps:$4 sm:$0xff]  }
  0x4f   : > { %2593 = vmatpush1.bf16.msra.mxu0 %v12217_v4  ;;  %3365 = vmatpush1.bf16.msra.mxu1 %v12220_v5  ;;  %v12339_v4 = vld [vmem:[%s17632_s2 + $0x3ac] ss:$16 sps:$4 sm:$0xff]   ;;  %v12334_v5 = vld [vmem:[%s17632_s2 + $0x3a0] ss:$16 sps:$4 sm:$0xff]  }
  0x50   : > { %2441 = vmatprep.mubr.bf16.mxu0 %v12223_v6  ;;  %3213 = vmatprep.mubr.bf16.mxu1 %v12223_v6  ;;  %v12337_v6 = vld [vmem:[%s17632_s2 + $0x3a8] ss:$16 sps:$4 sm:$0xff]  }
  0x51   : > { %2594 = vmatprep.subr.bf16.mxu0 %v12228_v7  ;;  %3366 = vmatprep.subr.bf16.mxu1 %v12231_v8  ;;  %v12345_v7 = vld [vmem:[%s17632_s2 + $0x3c4] ss:$16 sps:$4 sm:$0xff]   ;;  %v12348_v8 = vld [vmem:[%s17632_s2 + $0x3cc] ss:$16 sps:$4 sm:$0xff]  }
  0x53   : > { %2595 = vmatpush1.bf16.msra.mxu0 %v12226_v9  ;;  %3367 = vmatpush1.bf16.msra.mxu1 %v12229_v10  ;;  %v12279_v9 = vld [vmem:[%s14039_s27 + $0x188] ss:$28 sps:$4 sm:$0xff]  }
  0x54   : > { %2596 = vmatprep.subr.bf16.mxu0 %v12237_v11  ;;  %3368 = vmatprep.subr.bf16.mxu1 %v12240_v12  ;;  %v12286_v10 = vld [vmem:[%s14039_s27 + $0x1c4] ss:$28 sps:$4 sm:$0xff]   ;;  %v12346_v12 = vld [vmem:[%s17632_s2 + $0x3c8] ss:$16 sps:$4 sm:$0xff]  }
  0x55   : > { %v12343_v11 = vld [vmem:[%s17632_s2 + $0x3c0] ss:$16 sps:$4 sm:$0xff]  }
  0x56   : > { %2442 = vmatmul.mubr.bf16.gmra.mrb[4].mxu0 %v12225_v13  ;;  %3214 = vmatmul.mubr.bf16.gmra.mrb[4].mxu1 %v12225_v13  ;;  %v12354_v13 = vld [vmem:[%s17632_s2 + $0x3e4] ss:$16 sps:$4 sm:$0xff]  }
  0x57   : > { %2451 = vmatprep.mubr.bf16.mxu0 %v12232_v14  ;;  %3223 = vmatprep.mubr.bf16.mxu1 %v12232_v14  ;;  %v12357_v14 = vld [vmem:[%s17632_s2 + $0x3ec] ss:$16 sps:$4 sm:$0xff]  }
  0x58   : > { %2597 = vmatpush1.bf16.msra.mxu0 %v12235_v15  ;;  %3369 = vmatpush1.bf16.msra.mxu1 %v12238_v16  ;;  %v12352_v15 = vld [vmem:[%s17632_s2 + $0x3e0] ss:$16 sps:$4 sm:$0xff]   ;;  %v12355_v16 = vld [vmem:[%s17632_s2 + $0x3e8] ss:$16 sps:$4 sm:$0xff]  }
  0x59   : > { %2598 = vmatprep.subr.bf16.mxu0 %v12246_v17  ;;  %3370 = vmatprep.subr.bf16.mxu1 %v12249_v18  ;;  %v12363_v17 = vld [vmem:[%s17632_s2 + $0x404] ss:$16 sps:$4 sm:$0xff]   ;;  %v12366_v18 = vld [vmem:[%s17632_s2 + $0x40c] ss:$16 sps:$4 sm:$0xff]  }
  0x5c   : > { %2599 = vmatpush1.bf16.msra.mxu0 %v12244_v19  ;;  %3371 = vmatpush1.bf16.msra.mxu1 %v12247_v20  ;;  %v12288_v19 = vld [vmem:[%s14039_s27 + $0x1c0] ss:$28 sps:$4 sm:$0xff]  }
  0x5d   : > { %2600 = vmatprep.subr.bf16.mxu0 %v12255_v21  ;;  %3372 = vmatprep.subr.bf16.mxu1 %v12258_v22  ;;  %v12295_v20 = vld [vmem:[%s14039_s27 + $0x1fc] ss:$28 sps:$4 sm:$0xff]   ;;  %v12304_v22 = vld [vmem:[%s14039_s27 + $0x234] ss:$28 sps:$4 sm:$0xff]  }
  0x5e   : > { %2452 = vmatmul.mubr.bf16.gmra.mrb[8].mxu0 %v12234_v23  ;;  %3224 = vmatmul.mubr.bf16.gmra.mrb[8].mxu1 %v12234_v23  ;;  %v12297_v21 = vld [vmem:[%s14039_s27 + $0x1f8] ss:$28 sps:$4 sm:$0xff]   ;;  %v12306_v23 = vld [vmem:[%s14039_s27 + $0x230] ss:$28 sps:$4 sm:$0xff]  }
  0x5f   : > { %2461 = vmatprep.mubr.bf16.mxu0 %v12241_v24  ;;  %3233 = vmatprep.mubr.bf16.mxu1 %v12241_v24  ;;  %v12313_v24 = vld [vmem:[%s14039_s27 + $0x26c] ss:$28 sps:$4 sm:$0xff]  }
  0x60   : > { %2601 = vmatpush1.bf16.msra.mxu0 %v12253_v25  ;;  %3373 = vmatpush1.bf16.msra.mxu1 %v12256_v26  ;;  %v12315_v25 = vld [vmem:[%s14039_s27 + $0x268] ss:$28 sps:$4 sm:$0xff]  }
  0x61   : > { %2602 = vmatprep.subr.bf16.mxu0 %v12264_v27  ;;  %3374 = vmatprep.subr.bf16.mxu1 %v12267_v28  ;;  %v12322_v26 = vld [vmem:[%s14039_s27 + $0x2a4] ss:$28 sps:$4 sm:$0xff]   ;;  %v12331_v28 = vld [vmem:[%s14039_s27 + $0x2dc] ss:$28 sps:$4 sm:$0xff]  }
  0x62   : > { %v12324_v27 = vld [vmem:[%s14039_s27 + $0x2a0] ss:$28 sps:$4 sm:$0xff]  }
  0x64   : > { %2603 = vmatpush1.bf16.msra.mxu0 %v12262_v29  ;;  %3375 = vmatpush1.bf16.msra.mxu1 %v12265_v30  ;;  %v12333_v29 = vld [vmem:[%s14039_s27 + $0x2d8] ss:$28 sps:$4 sm:$0xff]  }
  0x65   : > { %2604 = vmatprep.subr.bf16.mxu0 %v12273_v31  ;;  %3376 = vmatprep.subr.bf16.mxu1 %v12276_v32  ;;  %v12340_v30 = vld [vmem:[%s14039_s27 + $0x314] ss:$28 sps:$4 sm:$0xff]   ;;  %v12349_v32 = vld [vmem:[%s14039_s27 + $0x34c] ss:$28 sps:$4 sm:$0xff]  }
  0x66   : > { %2462 = vmatmul.mubr.bf16.gmra.mrb[12].mxu0 %v12243_v33  ;;  %3234 = vmatmul.mubr.bf16.gmra.mrb[12].mxu1 %v12243_v33  ;;  %v12342_v31 = vld [vmem:[%s14039_s27 + $0x310] ss:$28 sps:$4 sm:$0xff]   ;;  %v12351_v33 = vld [vmem:[%s14039_s27 + $0x348] ss:$28 sps:$4 sm:$0xff]  }
  0x67   : > { %2471 = vmatprep.mubr.bf16.mxu0 %v12250_v34  ;;  %3243 = vmatprep.mubr.bf16.mxu1 %v12250_v34  ;;  %v12360_v34 = vld [vmem:[%s14039_s27 + $0xc] ss:$28 sps:$4 sm:$0xff]  }
  0x68   : > { %2605 = vmatpush1.bf16.msra.mxu0 %v12271_v35  ;;  %3377 = vmatpush1.bf16.msra.mxu1 %v12274_v36  ;;  %v12358_v35 = vld [vmem:[%s14039_s27 + $0x8] ss:$28 sps:$4 sm:$0xff]   ;;  %v12361_v36 = vld [vmem:[%s17632_s2 + $0x400] ss:$16 sps:$4 sm:$0xff]  }
  0x69   : > { %2606 = vmatprep.subr.bf16.mxu0 %v12282_v37  ;;  %3378 = vmatprep.subr.bf16.mxu1 %v12285_v38  ;;  %v12364_v37 = vld [vmem:[%s17632_s2 + $0x408] ss:$16 sps:$4 sm:$0xff]   ;;  %v12367_v38 = vld [vmem:[%s14039_s27 + $0x44] ss:$28 sps:$4 sm:$0xff]  }
  0x6c   : > { %2607 = vmatpush1.bf16.msra.mxu0 %v12280_v39  ;;  %3379 = vmatpush1.bf16.msra.mxu1 %v12283_v40  ;;  %v12372_v39 = vld [vmem:[%s17632_s2 + $0x424] ss:$16 sps:$4 sm:$0xff]   ;;  %v12375_v40 = vld [vmem:[%s17632_s2 + $0x42c] ss:$16 sps:$4 sm:$0xff]  }
  0x6d   : > { %2608 = vmatprep.subr.bf16.mxu0 %v12291_v41  ;;  %3380 = vmatprep.subr.bf16.mxu1 %v12294_v42  ;;  %v12370_v41 = vld [vmem:[%s17632_s2 + $0x420] ss:$16 sps:$4 sm:$0xff]   ;;  %v12373_v42 = vld [vmem:[%s17632_s2 + $0x428] ss:$16 sps:$4 sm:$0xff]  }
  0x6e   : > { %2472 = vmatmul.mubr.bf16.gmra.mrb[16].mxu0 %v12252_v43  ;;  %3244 = vmatmul.mubr.bf16.gmra.mrb[16].mxu1 %v12252_v43  ;;  %v12381_v43 = vld [vmem:[%s17632_s2 + $0x444] ss:$16 sps:$4 sm:$0xff]  }
  0x6f   : > { %2481 = vmatprep.mubr.bf16.mxu0 %v12259_v44  ;;  %3253 = vmatprep.mubr.bf16.mxu1 %v12259_v44  ;;  %v12369_v44 = vld [vmem:[%s14039_s27 + $0x40] ss:$28 sps:$4 sm:$0xff]  }
  0x70   : > { %2609 = vmatpush1.bf16.msra.mxu0 %v12289_v45  ;;  %3381 = vmatpush1.bf16.msra.mxu1 %v12292_v46  ;;  %v12384_v45 = vld [vmem:[%s17632_s2 + $0x44c] ss:$16 sps:$4 sm:$0xff]  }
  0x71   : > { %2610 = vmatprep.subr.bf16.mxu0 %v12300_v47  ;;  %3382 = vmatprep.subr.bf16.mxu1 %v12303_v48  ;;  %v12376_v46 = vld [vmem:[%s14039_s27 + $0x7c] ss:$28 sps:$4 sm:$0xff]   ;;  %v12379_v47 = vld [vmem:[%s17632_s2 + $0x440] ss:$16 sps:$4 sm:$0xff]  }
  0x72   : > { %v12382_v48 = vld [vmem:[%s17632_s2 + $0x448] ss:$16 sps:$4 sm:$0xff]  }
  0x74   : > { %2611 = vmatpush1.bf16.msra.mxu0 %v12298_v49  ;;  %3383 = vmatpush1.bf16.msra.mxu1 %v12301_v50  ;;  %v12390_v49 = vld [vmem:[%s17632_s2 + $0x464] ss:$16 sps:$4 sm:$0xff]   ;;  %v12393_v50 = vld [vmem:[%s17632_s2 + $0x46c] ss:$16 sps:$4 sm:$0xff]  }
  0x75   : > { %2612 = vmatprep.subr.bf16.mxu0 %v12309_v51  ;;  %3384 = vmatprep.subr.bf16.mxu1 %v12312_v52  ;;  %v12388_v51 = vld [vmem:[%s17632_s2 + $0x460] ss:$16 sps:$4 sm:$0xff]   ;;  %v12391_v52 = vld [vmem:[%s17632_s2 + $0x468] ss:$16 sps:$4 sm:$0xff]  }
  0x76   : > { %2482 = vmatmul.mubr.bf16.gmra.mrb[20].mxu0 %v12261_v53  ;;  %3254 = vmatmul.mubr.bf16.gmra.mrb[20].mxu1 %v12261_v53  ;;  %v12399_v53 = vld [vmem:[%s17632_s2 + $0x484] ss:$16 sps:$4 sm:$0xff]  }
  0x77   : > { %2491 = vmatprep.mubr.bf16.mxu0 %v12268_v54  ;;  %3263 = vmatprep.mubr.bf16.mxu1 %v12268_v54  ;;  %v12402_v54 = vld [vmem:[%s17632_s2 + $0x48c] ss:$16 sps:$4 sm:$0xff]  }
  0x78   : > { %2613 = vmatpush1.bf16.msra.mxu0 %v12307_v55  ;;  %3385 = vmatpush1.bf16.msra.mxu1 %v12310_v56  ;;  %v12378_v55 = vld [vmem:[%s14039_s27 + $0x78] ss:$28 sps:$4 sm:$0xff]  }
  0x79   : > { %2614 = vmatprep.subr.bf16.mxu0 %v12318_v57  ;;  %3386 = vmatprep.subr.bf16.mxu1 %v12321_v58  ;;  %v12385_v56 = vld [vmem:[%s14039_s27 + $0xb4] ss:$28 sps:$4 sm:$0xff]   ;;  %v12400_v58 = vld [vmem:[%s17632_s2 + $0x488] ss:$16 sps:$4 sm:$0xff]  }
  0x7a   : > { %v12397_v57 = vld [vmem:[%s17632_s2 + $0x480] ss:$16 sps:$4 sm:$0xff]  }
  0x7c   : > { %2615 = vmatpush1.bf16.msra.mxu0 %v12316_v59  ;;  %3387 = vmatpush1.bf16.msra.mxu1 %v12319_v60  ;;  %v12408_v59 = vld [vmem:[%s17632_s2 + $0x4a4] ss:$16 sps:$4 sm:$0xff]   ;;  %v12411_v60 = vld [vmem:[%s17632_s2 + $0x4ac] ss:$16 sps:$4 sm:$0xff]  }
  0x7d   : > { %2616 = vmatprep.subr.bf16.mxu0 %v12327_v61  ;;  %3388 = vmatprep.subr.bf16.mxu1 %v12330_v62  ;;  %v12406_v61 = vld [vmem:[%s17632_s2 + $0x4a0] ss:$16 sps:$4 sm:$0xff]   ;;  %v12409_v62 = vld [vmem:[%s17632_s2 + $0x4a8] ss:$16 sps:$4 sm:$0xff]  }
  0x7e   : > { %2492 = vmatmul.mubr.bf16.gmra.mrb[24].mxu0 %v12270_v63  ;;  %3264 = vmatmul.mubr.bf16.gmra.mrb[24].mxu1 %v12270_v63  ;;  %v12417_v63 = vld [vmem:[%s17632_s2 + $0x4c4] ss:$16 sps:$4 sm:$0xff]  }
  0x7f   : > { %2501 = vmatprep.mubr.bf16.mxu0 %v12277_v0  ;;  %3273 = vmatprep.mubr.bf16.mxu1 %v12277_v0  ;;  %v12420_v0 = vld [vmem:[%s17632_s2 + $0x4cc] ss:$16 sps:$4 sm:$0xff]  }
  0x80   : > { %2617 = vmatpush1.bf16.msra.mxu0 %v12325_v1  ;;  %3389 = vmatpush1.bf16.msra.mxu1 %v12328_v2  ;;  %v12387_v1 = vld [vmem:[%s14039_s27 + $0xb0] ss:$28 sps:$4 sm:$0xff]  }
  0x81   : > { %2618 = vmatprep.subr.bf16.mxu0 %v12336_v3  ;;  %3390 = vmatprep.subr.bf16.mxu1 %v12339_v4  ;;  %v12394_v2 = vld [vmem:[%s14039_s27 + $0xec] ss:$28 sps:$4 sm:$0xff]   ;;  %v12415_v3 = vld [vmem:[%s17632_s2 + $0x4c0] ss:$16 sps:$4 sm:$0xff]  }
  0x82   : > { %v12418_v4 = vld [vmem:[%s17632_s2 + $0x4c8] ss:$16 sps:$4 sm:$0xff]  }
  0x84   : > { %2619 = vmatpush1.bf16.msra.mxu0 %v12334_v5  ;;  %3391 = vmatpush1.bf16.msra.mxu1 %v12337_v6  ;;  %v12426_v5 = vld [vmem:[%s17632_s2 + $0x4e4] ss:$16 sps:$4 sm:$0xff]   ;;  %v12429_v6 = vld [vmem:[%s17632_s2 + $0x4ec] ss:$16 sps:$4 sm:$0xff]  }
  0x85   : > { %2620 = vmatprep.subr.bf16.mxu0 %v12345_v7  ;;  %3392 = vmatprep.subr.bf16.mxu1 %v12348_v8  ;;  %v12424_v7 = vld [vmem:[%s17632_s2 + $0x4e0] ss:$16 sps:$4 sm:$0xff]   ;;  %v12427_v8 = vld [vmem:[%s17632_s2 + $0x4e8] ss:$16 sps:$4 sm:$0xff]  }
  0x86   : > { %2502 = vmatmul.mubr.bf16.gmra.mrb[28].mxu0 %v12279_v9  ;;  %3274 = vmatmul.mubr.bf16.gmra.mrb[28].mxu1 %v12279_v9  ;;  %v12435_v9 = vld [vmem:[%s17632_s2 + $0x504] ss:$16 sps:$4 sm:$0xff]  }
  0x87   : > { %2511 = vmatprep.mubr.bf16.mxu0 %v12286_v10  ;;  %3283 = vmatprep.mubr.bf16.mxu1 %v12286_v10  ;;  %v12438_v10 = vld [vmem:[%s17632_s2 + $0x50c] ss:$16 sps:$4 sm:$0xff]  }
  0x88   : > { %2621 = vmatpush1.bf16.msra.mxu0 %v12343_v11  ;;  %3393 = vmatpush1.bf16.msra.mxu1 %v12346_v12  ;;  %v12396_v11 = vld [vmem:[%s14039_s27 + $0xe8] ss:$28 sps:$4 sm:$0xff]  }
  0x89   : > { %2622 = vmatprep.subr.bf16.mxu0 %v12354_v13  ;;  %3394 = vmatprep.subr.bf16.mxu1 %v12357_v14  ;;  %v12403_v12 = vld [vmem:[%s14039_s27 + $0x124] ss:$28 sps:$4 sm:$0xff]   ;;  %v12436_v14 = vld [vmem:[%s17632_s2 + $0x508] ss:$16 sps:$4 sm:$0xff]  }
  0x8a   : > { %v12433_v13 = vld [vmem:[%s17632_s2 + $0x500] ss:$16 sps:$4 sm:$0xff]  }
  0x8c   : > { %2623 = vmatpush1.bf16.msra.mxu0 %v12352_v15  ;;  %3395 = vmatpush1.bf16.msra.mxu1 %v12355_v16  ;;  %v12444_v15 = vld [vmem:[%s17632_s2 + $0x524] ss:$16 sps:$4 sm:$0xff]   ;;  %v12447_v16 = vld [vmem:[%s17632_s2 + $0x52c] ss:$16 sps:$4 sm:$0xff]  }
  0x8d   : > { %2785 = vmatprep.subr.bf16.mxu0 %v12363_v17  ;;  %3557 = vmatprep.subr.bf16.mxu1 %v12366_v18  ;;  %v12442_v17 = vld [vmem:[%s17632_s2 + $0x520] ss:$16 sps:$4 sm:$0xff]   ;;  %v12445_v18 = vld [vmem:[%s17632_s2 + $0x528] ss:$16 sps:$4 sm:$0xff]  }
  0x8e   : > { %2512 = vmatmul.mubr.bf16.gmra.mrb[32].mxu0 %v12288_v19  ;;  %3284 = vmatmul.mubr.bf16.gmra.mrb[32].mxu1 %v12288_v19  ;;  %v12453_v19 = vld [vmem:[%s17632_s2 + $0x544] ss:$16 sps:$4 sm:$0xff]  }
  0x8f   : > { %2521 = vmatprep.mubr.bf16.mxu0 %v12295_v20  ;;  %3293 = vmatprep.mubr.bf16.mxu1 %v12295_v20  ;;  %v12456_v20 = vld [vmem:[%s17632_s2 + $0x54c] ss:$16 sps:$4 sm:$0xff]  }
  0x96   : > { %2522 = vmatmul.mubr.bf16.gmra.mrb[36].mxu0 %v12297_v21  ;;  %3294 = vmatmul.mubr.bf16.gmra.mrb[36].mxu1 %v12297_v21  ;;  %v12405_v21 = vld [vmem:[%s14039_s27 + $0x120] ss:$28 sps:$4 sm:$0xff]  }
  0x97   : > { %2531 = vmatprep.mubr.bf16.mxu0 %v12304_v22  ;;  %3303 = vmatprep.mubr.bf16.mxu1 %v12304_v22  ;;  %v12412_v22 = vld [vmem:[%s14039_s27 + $0x15c] ss:$28 sps:$4 sm:$0xff]  }
  0x9e   : > { %2532 = vmatmul.mubr.bf16.gmra.mrb[40].mxu0 %v12306_v23  ;;  %3304 = vmatmul.mubr.bf16.gmra.mrb[40].mxu1 %v12306_v23  ;;  %v12451_v23 = vld [vmem:[%s17632_s2 + $0x540] ss:$16 sps:$4 sm:$0xff]  }
  0x9f   : > { %2541 = vmatprep.mubr.bf16.mxu0 %v12313_v24  ;;  %3313 = vmatprep.mubr.bf16.mxu1 %v12313_v24  ;;  %v12454_v24 = vld [vmem:[%s17632_s2 + $0x548] ss:$16 sps:$4 sm:$0xff]  }
  0xa6   : > { %2542 = vmatmul.mubr.bf16.gmra.mrb[44].mxu0 %v12315_v25  ;;  %3314 = vmatmul.mubr.bf16.gmra.mrb[44].mxu1 %v12315_v25  ;;  %v12462_v25 = vld [vmem:[%s17632_s2 + $0x564] ss:$16 sps:$4 sm:$0xff]  }
  0xa7   : > { %2551 = vmatprep.mubr.bf16.mxu0 %v12322_v26  ;;  %3323 = vmatprep.mubr.bf16.mxu1 %v12322_v26  ;;  %v12465_v26 = vld [vmem:[%s17632_s2 + $0x56c] ss:$16 sps:$4 sm:$0xff]  }
  0xae   : > { %2552 = vmatmul.mubr.bf16.gmra.mrb[48].mxu0 %v12324_v27  ;;  %3324 = vmatmul.mubr.bf16.gmra.mrb[48].mxu1 %v12324_v27  ;;  %v12460_v27 = vld [vmem:[%s17632_s2 + $0x560] ss:$16 sps:$4 sm:$0xff]  }
  0xaf   : > { %2561 = vmatprep.mubr.bf16.mxu0 %v12331_v28  ;;  %3333 = vmatprep.mubr.bf16.mxu1 %v12331_v28  ;;  %v12463_v28 = vld [vmem:[%s17632_s2 + $0x568] ss:$16 sps:$4 sm:$0xff]  }
  0xb6   : > { %2562 = vmatmul.mubr.bf16.gmra.mrb[52].mxu0 %v12333_v29  ;;  %3334 = vmatmul.mubr.bf16.gmra.mrb[52].mxu1 %v12333_v29  ;;  %v12471_v29 = vld [vmem:[%s17632_s2 + $0x584] ss:$16 sps:$4 sm:$0xff]  }
  0xb7   : > { %2571 = vmatprep.mubr.bf16.mxu0 %v12340_v30  ;;  %3343 = vmatprep.mubr.bf16.mxu1 %v12340_v30  ;;  %v12474_v30 = vld [vmem:[%s17632_s2 + $0x58c] ss:$16 sps:$4 sm:$0xff]  }
  0xbe   : > { %2572 = vmatmul.mubr.bf16.gmra.mrb[56].mxu0 %v12342_v31  ;;  %3344 = vmatmul.mubr.bf16.gmra.mrb[56].mxu1 %v12342_v31  ;;  %v12414_v31 = vld [vmem:[%s14039_s27 + $0x158] ss:$28 sps:$4 sm:$0xff]  }
  0xbf   : > { %2581 = vmatprep.mubr.bf16.mxu0 %v12349_v32  ;;  %3353 = vmatprep.mubr.bf16.mxu1 %v12349_v32  ;;  %v12421_v32 = vld [vmem:[%s14039_s27 + $0x194] ss:$28 sps:$4 sm:$0xff]  }
  0xc6   : > { %2582 = vmatmul.mubr.bf16.gmra.mrb[60].mxu0 %v12351_v33  ;;  %3354 = vmatmul.mubr.bf16.gmra.mrb[60].mxu1 %v12351_v33  ;;  %v12469_v33 = vld [vmem:[%s17632_s2 + $0x580] ss:$16 sps:$4 sm:$0xff]  }
  0xc7   : > { %2624 = vmatprep.mubr.bf16.mxu0 %v12360_v34  ;;  %3396 = vmatprep.mubr.bf16.mxu1 %v12360_v34  ;;  %v12472_v34 = vld [vmem:[%s17632_s2 + $0x588] ss:$16 sps:$4 sm:$0xff]  }
  0xce   : > { %2625 = vmatmul.mubr.bf16.vlgmr.msra.gmra.mrb[0].mxu0 %v12358_v35  ;;  %3397 = vmatmul.mubr.bf16.vlgmr.msra.gmra.mrb[0].mxu1 %v12358_v35  ;;  %v12480_v35 = vld [vmem:[%s17632_s2 + $0x5a4] ss:$16 sps:$4 sm:$0xff]  }
  0xcf   : > { %2786 = vmatpush1.bf16.msra.mxu0 %v12361_v36  ;;  %3558 = vmatpush1.bf16.msra.mxu1 %v12364_v37  ;;  %v12483_v36 = vld [vmem:[%s17632_s2 + $0x5ac] ss:$16 sps:$4 sm:$0xff]   ;;  %v12478_v37 = vld [vmem:[%s17632_s2 + $0x5a0] ss:$16 sps:$4 sm:$0xff]  }
  0xd0   : > { %2634 = vmatprep.mubr.bf16.mxu0 %v12367_v38  ;;  %3406 = vmatprep.mubr.bf16.mxu1 %v12367_v38  ;;  %v12481_v38 = vld [vmem:[%s17632_s2 + $0x5a8] ss:$16 sps:$4 sm:$0xff]  }
  0xd1   : > { %2787 = vmatprep.subr.bf16.mxu0 %v12372_v39  ;;  %3559 = vmatprep.subr.bf16.mxu1 %v12375_v40  ;;  %v12489_v39 = vld [vmem:[%s17632_s2 + $0x5c4] ss:$16 sps:$4 sm:$0xff]   ;;  %v12492_v40 = vld [vmem:[%s17632_s2 + $0x5cc] ss:$16 sps:$4 sm:$0xff]  }
  0xd3   : > { %2788 = vmatpush1.bf16.msra.mxu0 %v12370_v41  ;;  %3560 = vmatpush1.bf16.msra.mxu1 %v12373_v42  ;;  %v12423_v41 = vld [vmem:[%s14039_s27 + $0x190] ss:$28 sps:$4 sm:$0xff]  }
  0xd4   : > { %2789 = vmatprep.subr.bf16.mxu0 %v12381_v43  ;;  %3561 = vmatprep.subr.bf16.mxu1 %v12384_v45  ;;  %v12430_v42 = vld [vmem:[%s14039_s27 + $0x1cc] ss:$28 sps:$4 sm:$0xff]   ;;  %v12487_v43 = vld [vmem:[%s17632_s2 + $0x5c0] ss:$16 sps:$4 sm:$0xff]   ;;  %v12498_v45 = vld [vmem:[%s17632_s2 + $0x5e4] ss:$16 sps:$4 sm:$0xff]  }
  0xd6   : > { %2635 = vmatmul.mubr.bf16.gmra.mrb[4].mxu0 %v12369_v44  ;;  %3407 = vmatmul.mubr.bf16.gmra.mrb[4].mxu1 %v12369_v44  ;;  %v12490_v44 = vld [vmem:[%s17632_s2 + $0x5c8] ss:$16 sps:$4 sm:$0xff]  }
  0xd7   : > { %2644 = vmatprep.mubr.bf16.mxu0 %v12376_v46  ;;  %3416 = vmatprep.mubr.bf16.mxu1 %v12376_v46  ;;  %v12501_v46 = vld [vmem:[%s17632_s2 + $0x5ec] ss:$16 sps:$4 sm:$0xff]  }
  0xd8   : > { %2790 = vmatpush1.bf16.msra.mxu0 %v12379_v47  ;;  %3562 = vmatpush1.bf16.msra.mxu1 %v12382_v48  ;;  %v12496_v47 = vld [vmem:[%s17632_s2 + $0x5e0] ss:$16 sps:$4 sm:$0xff]   ;;  %v12499_v48 = vld [vmem:[%s17632_s2 + $0x5e8] ss:$16 sps:$4 sm:$0xff]  }
  0xd9   : > { %2791 = vmatprep.subr.bf16.mxu0 %v12390_v49  ;;  %3563 = vmatprep.subr.bf16.mxu1 %v12393_v50  ;;  %v12507_v49 = vld [vmem:[%s17632_s2 + $0x604] ss:$16 sps:$4 sm:$0xff]   ;;  %v12510_v50 = vld [vmem:[%s17632_s2 + $0x60c] ss:$16 sps:$4 sm:$0xff]  }
  0xdc   : > { %2792 = vmatpush1.bf16.msra.mxu0 %v12388_v51  ;;  %3564 = vmatpush1.bf16.msra.mxu1 %v12391_v52  ;;  %v12432_v51 = vld [vmem:[%s14039_s27 + $0x1c8] ss:$28 sps:$4 sm:$0xff]  }
  0xdd   : > { %2793 = vmatprep.subr.bf16.mxu0 %v12399_v53  ;;  %3565 = vmatprep.subr.bf16.mxu1 %v12402_v54  ;;  %v12439_v52 = vld [vmem:[%s14039_s27 + $0x204] ss:$28 sps:$4 sm:$0xff]   ;;  %v12448_v54 = vld [vmem:[%s14039_s27 + $0x23c] ss:$28 sps:$4 sm:$0xff]  }
  0xde   : > { %2645 = vmatmul.mubr.bf16.gmra.mrb[8].mxu0 %v12378_v55  ;;  %3417 = vmatmul.mubr.bf16.gmra.mrb[8].mxu1 %v12378_v55  ;;  %v12441_v53 = vld [vmem:[%s14039_s27 + $0x200] ss:$28 sps:$4 sm:$0xff]   ;;  %v12450_v55 = vld [vmem:[%s14039_s27 + $0x238] ss:$28 sps:$4 sm:$0xff]  }
  0xdf   : > { %2654 = vmatprep.mubr.bf16.mxu0 %v12385_v56  ;;  %3426 = vmatprep.mubr.bf16.mxu1 %v12385_v56  ;;  %v12457_v56 = vld [vmem:[%s14039_s27 + $0x274] ss:$28 sps:$4 sm:$0xff]  }
  0xe0   : > { %2794 = vmatpush1.bf16.msra.mxu0 %v12397_v57  ;;  %3566 = vmatpush1.bf16.msra.mxu1 %v12400_v58  ;;  %v12459_v57 = vld [vmem:[%s14039_s27 + $0x270] ss:$28 sps:$4 sm:$0xff]  }
  0xe1   : > { %2795 = vmatprep.subr.bf16.mxu0 %v12408_v59  ;;  %3567 = vmatprep.subr.bf16.mxu1 %v12411_v60  ;;  %v12466_v58 = vld [vmem:[%s14039_s27 + $0x2ac] ss:$28 sps:$4 sm:$0xff]   ;;  %v12475_v60 = vld [vmem:[%s14039_s27 + $0x2e4] ss:$28 sps:$4 sm:$0xff]  }
  0xe2   : > { %v12468_v59 = vld [vmem:[%s14039_s27 + $0x2a8] ss:$28 sps:$4 sm:$0xff]  }
  0xe4   : > { %2796 = vmatpush1.bf16.msra.mxu0 %v12406_v61  ;;  %3568 = vmatpush1.bf16.msra.mxu1 %v12409_v62  ;;  %v12477_v61 = vld [vmem:[%s14039_s27 + $0x2e0] ss:$28 sps:$4 sm:$0xff]  }
  0xe5   : > { %2797 = vmatprep.subr.bf16.mxu0 %v12417_v63  ;;  %3569 = vmatprep.subr.bf16.mxu1 %v12420_v0  ;;  %v12484_v62 = vld [vmem:[%s14039_s27 + $0x31c] ss:$28 sps:$4 sm:$0xff]   ;;  %v12493_v0 = vld [vmem:[%s14039_s27 + $0x354] ss:$28 sps:$4 sm:$0xff]  }
  0xe6   : > { %2655 = vmatmul.mubr.bf16.gmra.mrb[12].mxu0 %v12387_v1  ;;  %3427 = vmatmul.mubr.bf16.gmra.mrb[12].mxu1 %v12387_v1  ;;  %v12486_v63 = vld [vmem:[%s14039_s27 + $0x318] ss:$28 sps:$4 sm:$0xff]   ;;  %v12495_v1 = vld [vmem:[%s14039_s27 + $0x350] ss:$28 sps:$4 sm:$0xff]  }
  0xe7   : > { %2664 = vmatprep.mubr.bf16.mxu0 %v12394_v2  ;;  %3436 = vmatprep.mubr.bf16.mxu1 %v12394_v2  ;;  %v12504_v2 = vld [vmem:[%s14039_s27 + $0x14] ss:$28 sps:$4 sm:$0xff]  }
  0xe8   : > { %2798 = vmatpush1.bf16.msra.mxu0 %v12415_v3  ;;  %3570 = vmatpush1.bf16.msra.mxu1 %v12418_v4  ;;  %v12502_v3 = vld [vmem:[%s14039_s27 + $0x10] ss:$28 sps:$4 sm:$0xff]  }
  0xe9   : > { %2799 = vmatprep.subr.bf16.mxu0 %v12426_v5  ;;  %3571 = vmatprep.subr.bf16.mxu1 %v12429_v6  ;;  %v12505_v4 = vld [vmem:[%s17632_s2 + $0x600] ss:$16 sps:$4 sm:$0xff]   ;;  %v12508_v5 = vld [vmem:[%s17632_s2 + $0x608] ss:$16 sps:$4 sm:$0xff]  }
  0xea   : > { %v12511_v6 = vld [vmem:[%s14039_s27 + $0x4c] ss:$28 sps:$4 sm:$0xff]  }
  0xec   : > { %2800 = vmatpush1.bf16.msra.mxu0 %v12424_v7  ;;  %3572 = vmatpush1.bf16.msra.mxu1 %v12427_v8  ;;  %v17642_v7 = vmov 0   ;;  %v12513_v8 = vld [vmem:[%s14039_s27 + $0x48] ss:$28 sps:$4 sm:$0xff]  }
  0xed   : > { %2801 = vmatprep.subr.bf16.mxu0 %v12435_v9  ;;  %3573 = vmatprep.subr.bf16.mxu1 %v12438_v10  ;;  %v12514_v9 = vld [vmem:[%s14039_s27 + $0x84] ss:$28 sps:$4 sm:$0xff]  }
  0xee   : > { %2665 = vmatmul.mubr.bf16.gmra.mrb[16].mxu0 %v12396_v11  ;;  %3437 = vmatmul.mubr.bf16.gmra.mrb[16].mxu1 %v12396_v11  ;;  %v12516_v10 = vld [vmem:[%s14039_s27 + $0x80] ss:$28 sps:$4 sm:$0xff]  }
  0xef   : > { %2674 = vmatprep.mubr.bf16.mxu0 %v12403_v12  ;;  %3446 = vmatprep.mubr.bf16.mxu1 %v12403_v12  ;;  %v12517_v11 = vld [vmem:[%s14039_s27 + $0xbc] ss:$28 sps:$4 sm:$0xff]  }
  0xf0   : > { %2802 = vmatpush1.bf16.msra.mxu0 %v12433_v13  ;;  %3574 = vmatpush1.bf16.msra.mxu1 %v12436_v14  ;;  %v12519_v12 = vld [vmem:[%s14039_s27 + $0xb8] ss:$28 sps:$4 sm:$0xff]   ;;  %v12522_v14 = vld [vmem:[%s14039_s27 + $0xf0] ss:$28 sps:$4 sm:$0xff]  }
  0xf1   : > { %2803 = vmatprep.subr.bf16.mxu0 %v12444_v15  ;;  %3575 = vmatprep.subr.bf16.mxu1 %v12447_v16  ;;  %v12520_v13 = vld [vmem:[%s14039_s27 + $0xf4] ss:$28 sps:$4 sm:$0xff]   ;;  %v12523_v15 = vld [vmem:[%s14039_s27 + $0x12c] ss:$28 sps:$4 sm:$0xff]  }
  0xf2   : > { %v12525_v16 = vld [vmem:[%s14039_s27 + $0x128] ss:$28 sps:$4 sm:$0xff]  }
  0xf4   : > { %2804 = vmatpush1.bf16.msra.mxu0 %v12442_v17  ;;  %3576 = vmatpush1.bf16.msra.mxu1 %v12445_v18  ;;  %v12526_v17 = vld [vmem:[%s14039_s27 + $0x164] ss:$28 sps:$4 sm:$0xff]  }
  0xf5   : > { %2805 = vmatprep.subr.bf16.mxu0 %v12453_v19  ;;  %3577 = vmatprep.subr.bf16.mxu1 %v12456_v20  ;;  %v12528_v18 = vld [vmem:[%s14039_s27 + $0x160] ss:$28 sps:$4 sm:$0xff]   ;;  %v12531_v20 = vld [vmem:[%s14039_s27 + $0x198] ss:$28 sps:$4 sm:$0xff]  }
  0xf6   : > { %2675 = vmatmul.mubr.bf16.gmra.mrb[20].mxu0 %v12405_v21  ;;  %3447 = vmatmul.mubr.bf16.gmra.mrb[20].mxu1 %v12405_v21  ;;  %v12529_v19 = vld [vmem:[%s14039_s27 + $0x19c] ss:$28 sps:$4 sm:$0xff]   ;;  %v12532_v21 = vld [vmem:[%s14039_s27 + $0x1d4] ss:$28 sps:$4 sm:$0xff]  }
  0xf7   : > { %2684 = vmatprep.mubr.bf16.mxu0 %v12412_v22  ;;  %3456 = vmatprep.mubr.bf16.mxu1 %v12412_v22  ;;  %v12534_v22 = vld [vmem:[%s14039_s27 + $0x1d0] ss:$28 sps:$4 sm:$0xff]  }
  0xf8   : > { %2806 = vmatpush1.bf16.msra.mxu0 %v12451_v23  ;;  %3578 = vmatpush1.bf16.msra.mxu1 %v12454_v24  ;;  %v12535_v23 = vld [vmem:[%s14039_s27 + $0x20c] ss:$28 sps:$4 sm:$0xff]  }
  0xf9   : > { %2807 = vmatprep.subr.bf16.mxu0 %v12462_v25  ;;  %3579 = vmatprep.subr.bf16.mxu1 %v12465_v26  ;;  %v12537_v24 = vld [vmem:[%s14039_s27 + $0x208] ss:$28 sps:$4 sm:$0xff]   ;;  %v12540_v26 = vld [vmem:[%s14039_s27 + $0x240] ss:$28 sps:$4 sm:$0xff]  }
  0xfa   : > { %v12538_v25 = vld [vmem:[%s14039_s27 + $0x244] ss:$28 sps:$4 sm:$0xff]  }
  0xfc   : > { %2808 = vmatpush1.bf16.msra.mxu0 %v12460_v27  ;;  %3580 = vmatpush1.bf16.msra.mxu1 %v12463_v28  ;;  %v12541_v27 = vld [vmem:[%s14039_s27 + $0x27c] ss:$28 sps:$4 sm:$0xff]  }
  0xfd   : > { %2809 = vmatprep.subr.bf16.mxu0 %v12471_v29  ;;  %3581 = vmatprep.subr.bf16.mxu1 %v12474_v30  ;;  %v12543_v28 = vld [vmem:[%s14039_s27 + $0x278] ss:$28 sps:$4 sm:$0xff]   ;;  %v12568_v30 = vld [vmem:[%s17634_s4 + $0x40] sm:$0xff]  }
  0xfe   : > { %2685 = vmatmul.mubr.bf16.gmra.mrb[24].mxu0 %v12414_v31  ;;  %3457 = vmatmul.mubr.bf16.gmra.mrb[24].mxu1 %v12414_v31  ;;  %v12544_v29 = vld [vmem:[%s14039_s27 + $0x2b4] ss:$28 sps:$4 sm:$0xff]  }
  0xff   : > { %2694 = vmatprep.mubr.bf16.mxu0 %v12421_v32  ;;  %3466 = vmatprep.mubr.bf16.mxu1 %v12421_v32  ;;  %v12546_v31 = vld [vmem:[%s14039_s27 + $0x2b0] ss:$28 sps:$4 sm:$0xff]  }
 0x100   : > { %2810 = vmatpush1.bf16.msra.mxu0 %v12469_v33  ;;  %3582 = vmatpush1.bf16.msra.mxu1 %v12472_v34  ;;  %v12547_v32 = vld [vmem:[%s14039_s27 + $0x2ec] ss:$28 sps:$4 sm:$0xff]   ;;  %v12550_v34 = vld [vmem:[%s14039_s27 + $0x324] ss:$28 sps:$4 sm:$0xff]  }
 0x101   : > { %2811 = vmatprep.subr.bf16.mxu0 %v12480_v35  ;;  %3583 = vmatprep.subr.bf16.mxu1 %v12483_v36  ;;  %v12549_v33 = vld [vmem:[%s14039_s27 + $0x2e8] ss:$28 sps:$4 sm:$0xff]   ;;  %v12552_v35 = vld [vmem:[%s14039_s27 + $0x320] ss:$28 sps:$4 sm:$0xff]  }
 0x102   : > { %v12553_v36 = vld [vmem:[%s14039_s27 + $0x35c] ss:$28 sps:$4 sm:$0xff]  }
 0x104   : > { %2812 = vmatpush1.bf16.msra.mxu0 %v12478_v37  ;;  %3584 = vmatpush1.bf16.msra.mxu1 %v12481_v38  ;;  %v12555_v37 = vld [vmem:[%s14039_s27 + $0x358] ss:$28 sps:$4 sm:$0xff]  }
 0x105   : > { %2813 = vmatprep.subr.bf16.mxu0 %v12489_v39  ;;  %3585 = vmatprep.subr.bf16.mxu1 %v12492_v40  ;;  %v12556_v38 = vld [vmem:[%s14039_s27 + $0x18] ss:$28 sps:$4 sm:$0xff]   ;;  %v12569_v39 = vld [vmem:[%s17634_s4] sm:$0xff]  }
 0x106   : > { %2695 = vmatmul.mubr.bf16.gmra.mrb[28].mxu0 %v12423_v41  ;;  %3467 = vmatmul.mubr.bf16.gmra.mrb[28].mxu1 %v12423_v41  ;;  %v12571_v40 = vld [vmem:[%s17634_s4 + $0x80] sm:$0xff]   ;;  %v12573_v41 = vld [vmem:[%s17634_s4 + $0x48] sm:$0xff]  }
 0x107   : > { %2704 = vmatprep.mubr.bf16.mxu0 %v12430_v42  ;;  %3476 = vmatprep.mubr.bf16.mxu1 %v12430_v42  ;;  %v12574_v42 = vld [vmem:[%s17634_s4 + $0x8] sm:$0xff]  }
 0x108   : > { %2814 = vmatpush1.bf16.msra.mxu0 %v12487_v43  ;;  %3586 = vmatpush1.bf16.msra.mxu1 %v12490_v44  ;;  %v12576_v43 = vld [vmem:[%s17634_s4 + $0x88] sm:$0xff]   ;;  %v12578_v44 = vld [vmem:[%s17634_s4 + $0x50] sm:$0xff]  }
 0x109   : > { %2815 = vmatprep.subr.bf16.mxu0 %v12498_v45  ;;  %3587 = vmatprep.subr.bf16.mxu1 %v12501_v46  ;;  %v12557_v45 = vld [vmem:[%s14039_s27 + $0x50] ss:$28 sps:$4 sm:$0xff]  }
 0x10a   : > { %v12579_v46 = vld [vmem:[%s17634_s4 + $0x10] sm:$0xff]  }
 0x10c   : > { %2816 = vmatpush1.bf16.msra.mxu0 %v12496_v47  ;;  %3588 = vmatpush1.bf16.msra.mxu1 %v12499_v48  ;;  %v12580_v47 = vld [vmem:[%s17634_s4 + $0x90] sm:$0xff]   ;;  %v12581_v48 = vld [vmem:[%s17634_s4 + $0x58] sm:$0xff]  }
 0x10d   : > { %2978 = vmatprep.subr.bf16.mxu0 %v12507_v49  ;;  %3750 = vmatprep.subr.bf16.mxu1 %v12510_v50  ;;  %v12582_v49 = vld [vmem:[%s17634_s4 + $0x18] sm:$0xff]  }
 0x10e   : > { %2705 = vmatmul.mubr.bf16.gmra.mrb[32].mxu0 %v12432_v51  ;;  %3477 = vmatmul.mubr.bf16.gmra.mrb[32].mxu1 %v12432_v51  ;;  %v12583_v50 = vld [vmem:[%s17634_s4 + $0x98] sm:$0xff]   ;;  %v12585_v51 = vld [vmem:[%s17634_s4 + $0x60] sm:$0xff]  }
 0x10f   : > { %2714 = vmatprep.mubr.bf16.mxu0 %v12439_v52  ;;  %3486 = vmatprep.mubr.bf16.mxu1 %v12439_v52  ;;  %v12558_v52 = vld [vmem:[%s14039_s27 + $0x88] ss:$28 sps:$4 sm:$0xff]  }
 0x116   : > { %2715 = vmatmul.mubr.bf16.gmra.mrb[36].mxu0 %v12441_v53  ;;  %3487 = vmatmul.mubr.bf16.gmra.mrb[36].mxu1 %v12441_v53  ;;  %v12584_v53 = vld [vmem:[%s17634_s4 + $0xa0] sm:$0xff]  }
 0x117   : > { %2724 = vmatprep.mubr.bf16.mxu0 %v12448_v54  ;;  %3496 = vmatprep.mubr.bf16.mxu1 %v12448_v54  ;;  %v12586_v54 = vld [vmem:[%s17634_s4 + $0x20] sm:$0xff]  }
 0x11e   : > { %2725 = vmatmul.mubr.bf16.gmra.mrb[40].mxu0 %v12450_v55  ;;  %3497 = vmatmul.mubr.bf16.gmra.mrb[40].mxu1 %v12450_v55  ;;  %v12588_v55 = vld [vmem:[%s17634_s4 + $0x68] sm:$0xff]  }
 0x11f   : > { %2734 = vmatprep.mubr.bf16.mxu0 %v12457_v56  ;;  %3506 = vmatprep.mubr.bf16.mxu1 %v12457_v56  ;;  %v12587_v56 = vld [vmem:[%s17634_s4 + $0xa8] sm:$0xff]  }
 0x126   : > { %2735 = vmatmul.mubr.bf16.gmra.mrb[44].mxu0 %v12459_v57  ;;  %3507 = vmatmul.mubr.bf16.gmra.mrb[44].mxu1 %v12459_v57  ;;  %v12589_v57 = vld [vmem:[%s17634_s4 + $0x28] sm:$0xff]  }
 0x127   : > { %2744 = vmatprep.mubr.bf16.mxu0 %v12466_v58  ;;  %3516 = vmatprep.mubr.bf16.mxu1 %v12466_v58  ;;  %v12591_v58 = vld [vmem:[%s17634_s4 + $0x70] sm:$0xff]  }
 0x12e   : > { %2745 = vmatmul.mubr.bf16.gmra.mrb[48].mxu0 %v12468_v59  ;;  %3517 = vmatmul.mubr.bf16.gmra.mrb[48].mxu1 %v12468_v59  ;;  %v12559_v59 = vld [vmem:[%s14039_s27 + $0xc0] ss:$28 sps:$4 sm:$0xff]  }
 0x12f   : > { %2754 = vmatprep.mubr.bf16.mxu0 %v12475_v60  ;;  %3526 = vmatprep.mubr.bf16.mxu1 %v12475_v60  ;;  %v12590_v60 = vld [vmem:[%s17634_s4 + $0xb0] sm:$0xff]  }
 0x136   : > { %2755 = vmatmul.mubr.bf16.gmra.mrb[52].mxu0 %v12477_v61  ;;  %3527 = vmatmul.mubr.bf16.gmra.mrb[52].mxu1 %v12477_v61  ;;  %v12592_v61 = vld [vmem:[%s17634_s4 + $0x30] sm:$0xff]  }
 0x137   : > { %2764 = vmatprep.mubr.bf16.mxu0 %v12484_v62  ;;  %3536 = vmatprep.mubr.bf16.mxu1 %v12484_v62  ;;  %v12594_v62 = vld [vmem:[%s17634_s4 + $0x78] sm:$0xff]  }
 0x13e   : > { %2765 = vmatmul.mubr.bf16.gmra.mrb[56].mxu0 %v12486_v63  ;;  %3537 = vmatmul.mubr.bf16.gmra.mrb[56].mxu1 %v12486_v63  ;;  %v12593_v63 = vld [vmem:[%s17634_s4 + $0xb8] sm:$0xff]  }
 0x13f   : > { %2774 = vmatprep.mubr.bf16.mxu0 %v12493_v0  ;;  %3546 = vmatprep.mubr.bf16.mxu1 %v12493_v0  ;;  %v12595_v0 = vld [vmem:[%s17634_s4 + $0x38] sm:$0xff]  }
 0x146   : > { %2775 = vmatmul.mubr.bf16.gmra.mrb[60].mxu0 %v12495_v1  ;;  %3547 = vmatmul.mubr.bf16.gmra.mrb[60].mxu1 %v12495_v1  ;;  %v12560_v1 = vld [vmem:[%s14039_s27 + $0xf8] ss:$28 sps:$4 sm:$0xff]  }
 0x147   : > { %2817 = vmatprep.mubr.bf16.mxu0 %v12504_v2  ;;  %3589 = vmatprep.mubr.bf16.mxu1 %v12504_v2  ;;  %v12561_v2 = vld [vmem:[%s14039_s27 + $0x130] ss:$28 sps:$4 sm:$0xff]  }
 0x14e   : > { %2818 = vmatmul.mubr.bf16.vlgmr.msra.gmra.mrb[0].mxu0 %v12502_v3  ;;  %3590 = vmatmul.mubr.bf16.vlgmr.msra.gmra.mrb[0].mxu1 %v12502_v3  ;;  %v12562_v3 = vld [vmem:[%s14039_s27 + $0x168] ss:$28 sps:$4 sm:$0xff]  }
 0x14f   : > { %2979 = vmatpush1.bf16.msra.mxu0 %v12505_v4  ;;  %3751 = vmatpush1.bf16.msra.mxu1 %v12508_v5  ;;  %v12563_v4 = vld [vmem:[%s14039_s27 + $0x1a0] ss:$28 sps:$4 sm:$0xff]   ;;  %v12564_v5 = vld [vmem:[%s14039_s27 + $0x1d8] ss:$28 sps:$4 sm:$0xff]  }
 0x150   : > { %2827 = vmatprep.mubr.bf16.mxu0 %v12511_v6  ;;  %3599 = vmatprep.mubr.bf16.mxu1 %v12511_v6  ;;  %v12565_v6 = vld [vmem:[%s14039_s27 + $0x210] ss:$28 sps:$4 sm:$0xff]  }
 0x151   : > { %4551 = vmatprep.subr.bf16.mxu1 %v17642_v7  ;;  %10986 = vmatprep.subr.bf16.mxu0 %v12568_v30 }
 0x156   : > { %2828 = vmatmul.mubr.bf16.gmra.mrb[4].mxu0 %v12513_v8  ;;  %3600 = vmatmul.mubr.bf16.gmra.mrb[4].mxu1 %v12513_v8  ;;  %v12566_v8 = vld [vmem:[%s14039_s27 + $0x248] ss:$28 sps:$4 sm:$0xff]  }
 0x157   : > { %2837 = vmatprep.mubr.bf16.mxu0 %v12514_v9  ;;  %3609 = vmatprep.mubr.bf16.mxu1 %v12514_v9  ;;  %v12567_v9 = vld [vmem:[%s14039_s27 + $0x280] ss:$28 sps:$4 sm:$0xff]  }
 0x15e   : > { %2838 = vmatmul.mubr.bf16.gmra.mrb[8].mxu0 %v12516_v10  ;;  %3610 = vmatmul.mubr.bf16.gmra.mrb[8].mxu1 %v12516_v10  ;;  %v12596_v10 = vld [vmem:[%s17634_s4 + $0xc0] sm:$0xff]  }
 0x15f   : > { %2847 = vmatprep.mubr.bf16.mxu0 %v12517_v11  ;;  %3619 = vmatprep.mubr.bf16.mxu1 %v12517_v11  ;;  %v12570_v11 = vld [vmem:[%s14039_s27 + $0x2b8] ss:$28 sps:$4 sm:$0xff]  }
 0x166   : > { %2848 = vmatmul.mubr.bf16.gmra.mrb[12].mxu0 %v12519_v12  ;;  %3620 = vmatmul.mubr.bf16.gmra.mrb[12].mxu1 %v12519_v12  ;;  %v12572_v12 = vld [vmem:[%s14039_s27 + $0x2f0] ss:$28 sps:$4 sm:$0xff]  }
 0x167   : > { %2857 = vmatprep.mubr.bf16.mxu0 %v12520_v13  ;;  %3629 = vmatprep.mubr.bf16.mxu1 %v12520_v13  ;;  %v12575_v13 = vld [vmem:[%s14039_s27 + $0x328] ss:$28 sps:$4 sm:$0xff]  }
 0x16e   : > { %2858 = vmatmul.mubr.bf16.gmra.mrb[16].mxu0 %v12522_v14  ;;  %3630 = vmatmul.mubr.bf16.gmra.mrb[16].mxu1 %v12522_v14  ;;  %v12577_v14 = vld [vmem:[%s14039_s27 + $0x360] ss:$28 sps:$4 sm:$0xff]  }
 0x16f   : > { %2867 = vmatprep.mubr.bf16.mxu0 %v12523_v15  ;;  %3639 = vmatprep.mubr.bf16.mxu1 %v12523_v15  ;;  %v790_v15 = vlaneseq }
 0x176   : > { %2868 = vmatmul.mubr.bf16.gmra.mrb[20].mxu0 %v12525_v16  ;;  %3640 = vmatmul.mubr.bf16.gmra.mrb[20].mxu1 %v12525_v16  ;;  %v14754_v16 = vshrl.u32 %v790_v15, 7 }
 0x177   : > { %2877 = vmatprep.mubr.bf16.mxu0 %v12526_v17  ;;  %3649 = vmatprep.mubr.bf16.mxu1 %v12526_v17 }
 0x178   : > { %17712 = vst [vmem:[#allocation2_spill] sm:$0xff] %v14754_v16  ;;  %v14757_v17 = vsub.s32 0, %v14754_v16 }
 0x17a   : > { %17713 = vst [vmem:[#allocation3_spill] sm:$0xff] %v14757_v17 }
 0x17e   : > { %2878 = vmatmul.mubr.bf16.gmra.mrb[24].mxu0 %v12528_v18  ;;  %3650 = vmatmul.mubr.bf16.gmra.mrb[24].mxu1 %v12528_v18  ;;  %v14760_v18 = vsub.s32 2, %v14754_v16 }
 0x17f   : > { %2887 = vmatprep.mubr.bf16.mxu0 %v12529_v19  ;;  %3659 = vmatprep.mubr.bf16.mxu1 %v12529_v19  ;;  %v788_v19 = vld [vmem:[%s17633_s3] sm:$0xf] }
 0x180   : > { %17714 = vst [vmem:[#allocation4_spill] sm:$0xff] %v14760_v18 }
 0x186   : > { %2888 = vmatmul.mubr.bf16.gmra.mrb[28].mxu0 %v12531_v20  ;;  %3660 = vmatmul.mubr.bf16.gmra.mrb[28].mxu1 %v12531_v20  ;;  %v14766_v20 = vsub.s32 1, %v14754_v16 }
 0x187   : > { %2897 = vmatprep.mubr.bf16.mxu0 %v12532_v21  ;;  %3669 = vmatprep.mubr.bf16.mxu1 %v12532_v21  ;;  %v14769_v21 = vsub.s32 3, %v14754_v16 }
 0x188   : > { %17715 = vst [vmem:[#allocation5_spill] sm:$0xff] %v14766_v20 }
 0x189   : > { %17716 = vst [vmem:[#allocation6_spill] sm:$0xff] %v14769_v21 }
 0x18e   : > { %2898 = vmatmul.mubr.bf16.gmra.mrb[32].mxu0 %v12534_v22  ;;  %3670 = vmatmul.mubr.bf16.gmra.mrb[32].mxu1 %v12534_v22  ;;  %v14772_v22 = vrot.slane %v788_v19, %v14757_v17 }
 0x18f   : > { %2907 = vmatprep.mubr.bf16.mxu0 %v12535_v23  ;;  %3679 = vmatprep.mubr.bf16.mxu1 %v12535_v23  ;;  %v14775_v23 = vrot.slane %v788_v19, %v14760_v18 }
 0x196   : > { %2908 = vmatmul.mubr.bf16.gmra.mrb[36].mxu0 %v12537_v24  ;;  %3680 = vmatmul.mubr.bf16.gmra.mrb[36].mxu1 %v12537_v24  ;;  %v14778_v24 = vrot.slane %v788_v19, %v14766_v20 }
 0x197   : > { %2917 = vmatprep.mubr.bf16.mxu0 %v12538_v25  ;;  %3689 = vmatprep.mubr.bf16.mxu1 %v12538_v25  ;;  %v14781_v25 = vrot.slane %v788_v19, %v14769_v21 }
 0x19e   : > { %2918 = vmatmul.mubr.bf16.gmra.mrb[40].mxu0 %v12540_v26  ;;  %3690 = vmatmul.mubr.bf16.gmra.mrb[40].mxu1 %v12540_v26 }
 0x19f   : > { %2927 = vmatprep.mubr.bf16.mxu0 %v12541_v27  ;;  %3699 = vmatprep.mubr.bf16.mxu1 %v12541_v27 }
 0x1a6   : > { %2928 = vmatmul.mubr.bf16.gmra.mrb[44].mxu0 %v12543_v28  ;;  %3700 = vmatmul.mubr.bf16.gmra.mrb[44].mxu1 %v12543_v28 }
 0x1a7   : > { %2937 = vmatprep.mubr.bf16.mxu0 %v12544_v29  ;;  %3709 = vmatprep.mubr.bf16.mxu1 %v12544_v29 }
 0x1ae   : > { %2938 = vmatmul.mubr.bf16.gmra.mrb[48].mxu0 %v12546_v31  ;;  %3710 = vmatmul.mubr.bf16.gmra.mrb[48].mxu1 %v12546_v31 }
 0x1af   : > { %2947 = vmatprep.mubr.bf16.mxu0 %v12547_v32  ;;  %3719 = vmatprep.mubr.bf16.mxu1 %v12547_v32 }
 0x1b6   : > { %2948 = vmatmul.mubr.bf16.gmra.mrb[52].mxu0 %v12549_v33  ;;  %3720 = vmatmul.mubr.bf16.gmra.mrb[52].mxu1 %v12549_v33 }
 0x1b7   : > { %2957 = vmatprep.mubr.bf16.mxu0 %v12550_v34  ;;  %3729 = vmatprep.mubr.bf16.mxu1 %v12550_v34 }
 0x1be   : > { %2958 = vmatmul.mubr.bf16.gmra.mrb[56].mxu0 %v12552_v35  ;;  %3730 = vmatmul.mubr.bf16.gmra.mrb[56].mxu1 %v12552_v35 }
 0x1bf   : > { %2967 = vmatprep.mubr.bf16.mxu0 %v12553_v36  ;;  %3739 = vmatprep.mubr.bf16.mxu1 %v12553_v36 }
 0x1c6   : > { %2968 = vmatmul.mubr.bf16.gmra.mrb[60].mxu0 %v12555_v37  ;;  %3740 = vmatmul.mubr.bf16.gmra.mrb[60].mxu1 %v12555_v37 }
 0x1c7   : > { %3010 = vmatprep.mubr.bf16.mxu0 %v17642_v7  ;;  %3782 = vmatprep.mubr.bf16.mxu1 %v17642_v7 }
 0x1ce   : > { %10405 = vmatmul.mubr.msk.bf16.vlgmr.msra.gmra.mrb[0].mxu0 %vm2350_vm0, %v12556_v38  ;;  %10421 = vmatmul.mubr.msk.bf16.vlgmr.msra.gmra.mrb[0].mxu1 %vm2350_vm0, %v12556_v38 }
 0x1cf   : > { %3020 = vmatprep.mubr.bf16.mxu0 %v17642_v7  ;;  %3792 = vmatprep.mubr.bf16.mxu1 %v17642_v7 }
 0x1d0   : > { %10987 = vmatpush3.bf16.msra.mxu0 %v12569_v39  ;;  %4552 = vmatpush1.bf16.msra.mxu1 %v12571_v40 }
 0x1d1   : > { %10988 = vmatprep.subr.bf16.mxu0 %v12573_v41  ;;  %4553 = vmatprep.subr.bf16.mxu1 %v17642_v7 }
 0x1d4   : > { %10989 = vmatpush3.bf16.msra.mxu0 %v12574_v42  ;;  %4554 = vmatpush1.bf16.msra.mxu1 %v12576_v43 }
 0x1d5   : > { %10990 = vmatprep.subr.bf16.mxu0 %v12578_v44  ;;  %4555 = vmatprep.subr.bf16.mxu1 %v17642_v7 }
 0x1d6   : > { %10406 = vmatmul.mubr.msk.bf16.gmra.mrb[4].mxu0 %vm2350_vm0, %v12557_v45  ;;  %10422 = vmatmul.mubr.msk.bf16.gmra.mrb[4].mxu1 %vm2350_vm0, %v12557_v45 }
 0x1d7   : > { %3030 = vmatprep.mubr.bf16.mxu0 %v17642_v7  ;;  %3802 = vmatprep.mubr.bf16.mxu1 %v17642_v7 }
 0x1d8   : > { %10991 = vmatpush3.bf16.msra.mxu0 %v12579_v46  ;;  %4556 = vmatpush1.bf16.msra.mxu1 %v12580_v47 }
 0x1d9   : > { %10992 = vmatprep.subr.bf16.mxu0 %v12581_v48  ;;  %4557 = vmatprep.subr.bf16.mxu1 %v17642_v7 }
 0x1dc   : > { %10993 = vmatpush3.bf16.msra.mxu0 %v12582_v49  ;;  %4558 = vmatpush1.bf16.msra.mxu1 %v12583_v50 }
 0x1dd   : > { %4559 = vmatprep.subr.bf16.mxu1 %v17642_v7  ;;  %10994 = vmatprep.subr.bf16.mxu0 %v12585_v51 }
 0x1de   : > { %10407 = vmatmul.mubr.msk.bf16.gmra.mrb[8].mxu0 %vm2350_vm0, %v12558_v52  ;;  %10423 = vmatmul.mubr.msk.bf16.gmra.mrb[8].mxu1 %vm2350_vm0, %v12558_v52 }
 0x1df   : > { %3040 = vmatprep.mubr.bf16.mxu0 %v17642_v7  ;;  %3812 = vmatprep.mubr.bf16.mxu1 %v17642_v7 }
 0x1e0   : > { %4560 = vmatpush1.bf16.msra.mxu1 %v12584_v53  ;;  %10995 = vmatpush3.bf16.msra.mxu0 %v12586_v54 }
 0x1e1   : > { %4561 = vmatprep.subr.bf16.mxu1 %v17642_v7  ;;  %10996 = vmatprep.subr.bf16.mxu0 %v12588_v55 }
 0x1e4   : > { %4562 = vmatpush1.bf16.msra.mxu1 %v12587_v56  ;;  %10997 = vmatpush3.bf16.msra.mxu0 %v12589_v57 }
 0x1e5   : > { %4563 = vmatprep.subr.bf16.mxu1 %v17642_v7  ;;  %10998 = vmatprep.subr.bf16.mxu0 %v12591_v58 }
 0x1e6   : > { %10408 = vmatmul.mubr.msk.bf16.gmra.mrb[12].mxu0 %vm2350_vm0, %v12559_v59  ;;  %10424 = vmatmul.mubr.msk.bf16.gmra.mrb[12].mxu1 %vm2350_vm0, %v12559_v59 }
 0x1e7   : > { %3050 = vmatprep.mubr.bf16.mxu0 %v17642_v7  ;;  %3822 = vmatprep.mubr.bf16.mxu1 %v17642_v7 }
 0x1e8   : > { %4564 = vmatpush1.bf16.msra.mxu1 %v12590_v60  ;;  %10999 = vmatpush3.bf16.msra.mxu0 %v12592_v61 }
 0x1e9   : > { %4565 = vmatprep.subr.bf16.mxu1 %v17642_v7  ;;  %11000 = vmatprep.subr.bf16.mxu0 %v12594_v62 }
 0x1ec   : > { %4566 = vmatpush1.bf16.msra.mxu1 %v12593_v63  ;;  %11001 = vmatpush3.bf16.msra.mxu0 %v12595_v0 }
 0x1ed   : > { %4567 = vmatprep.subr.bf16.mxu1 %v17642_v7 }
 0x1ee   : > { %10409 = vmatmul.mubr.msk.bf16.gmra.mrb[16].mxu0 %vm2350_vm0, %v12560_v1  ;;  %10425 = vmatmul.mubr.msk.bf16.gmra.mrb[16].mxu1 %vm2350_vm0, %v12560_v1 }
 0x1ef   : > { %3060 = vmatprep.mubr.bf16.mxu0 %v17642_v7  ;;  %3832 = vmatprep.mubr.bf16.mxu1 %v17642_v7 }
 0x1f0   : > { %4568 = vmatpush1.bf16.msra.mxu1 %v12596_v10 }
 0x1f6   : > { %10410 = vmatmul.mubr.msk.bf16.gmra.mrb[20].mxu0 %vm2350_vm0, %v12561_v2  ;;  %10426 = vmatmul.mubr.msk.bf16.gmra.mrb[20].mxu1 %vm2350_vm0, %v12561_v2 }
 0x1f7   : > { %3070 = vmatprep.mubr.bf16.mxu0 %v17642_v7  ;;  %3842 = vmatprep.mubr.bf16.mxu1 %v17642_v7 }
 0x1fe   : > { %10411 = vmatmul.mubr.msk.bf16.gmra.mrb[24].mxu0 %vm2350_vm0, %v12562_v3  ;;  %10427 = vmatmul.mubr.msk.bf16.gmra.mrb[24].mxu1 %vm2350_vm0, %v12562_v3 }
 0x1ff   : > { %3080 = vmatprep.mubr.bf16.mxu0 %v17642_v7  ;;  %3852 = vmatprep.mubr.bf16.mxu1 %v17642_v7 }
 0x206   : > { %10412 = vmatmul.mubr.msk.bf16.gmra.mrb[28].mxu0 %vm2350_vm0, %v12563_v4  ;;  %10428 = vmatmul.mubr.msk.bf16.gmra.mrb[28].mxu1 %vm2350_vm0, %v12563_v4 }
 0x207   : > { %3090 = vmatprep.mubr.bf16.mxu0 %v17642_v7  ;;  %3862 = vmatprep.mubr.bf16.mxu1 %v17642_v7 }
 0x20e   : > { %10413 = vmatmul.mubr.msk.bf16.gmra.mrb[32].mxu0 %vm2350_vm0, %v12564_v5  ;;  %10429 = vmatmul.mubr.msk.bf16.gmra.mrb[32].mxu1 %vm2350_vm0, %v12564_v5 }
 0x20f   : > { %3100 = vmatprep.mubr.bf16.mxu0 %v17642_v7  ;;  %3872 = vmatprep.mubr.bf16.mxu1 %v17642_v7 }
 0x216   : > { %10414 = vmatmul.mubr.msk.bf16.gmra.mrb[36].mxu0 %vm2350_vm0, %v12565_v6  ;;  %10430 = vmatmul.mubr.msk.bf16.gmra.mrb[36].mxu1 %vm2350_vm0, %v12565_v6 }
 0x217   : > { %3110 = vmatprep.mubr.bf16.mxu0 %v17642_v7  ;;  %3882 = vmatprep.mubr.bf16.mxu1 %v17642_v7 }
 0x21e   : > { %10415 = vmatmul.mubr.msk.bf16.gmra.mrb[40].mxu0 %vm2350_vm0, %v12566_v8  ;;  %10431 = vmatmul.mubr.msk.bf16.gmra.mrb[40].mxu1 %vm2350_vm0, %v12566_v8 }
 0x21f   : > { %3120 = vmatprep.mubr.bf16.mxu0 %v17642_v7  ;;  %3892 = vmatprep.mubr.bf16.mxu1 %v17642_v7 }
 0x226   : > { %10416 = vmatmul.mubr.msk.bf16.gmra.mrb[44].mxu0 %vm2350_vm0, %v12567_v9  ;;  %10432 = vmatmul.mubr.msk.bf16.gmra.mrb[44].mxu1 %vm2350_vm0, %v12567_v9 }
 0x227   : > { %3130 = vmatprep.mubr.bf16.mxu0 %v17642_v7  ;;  %3902 = vmatprep.mubr.bf16.mxu1 %v17642_v7 }
 0x22e   : > { %10417 = vmatmul.mubr.msk.bf16.gmra.mrb[48].mxu0 %vm2350_vm0, %v12570_v11  ;;  %10433 = vmatmul.mubr.msk.bf16.gmra.mrb[48].mxu1 %vm2350_vm0, %v12570_v11 }
 0x22f   : > { %3140 = vmatprep.mubr.bf16.mxu0 %v17642_v7  ;;  %3912 = vmatprep.mubr.bf16.mxu1 %v17642_v7 }
 0x236   : > { %10418 = vmatmul.mubr.msk.bf16.gmra.mrb[52].mxu0 %vm2350_vm0, %v12572_v12  ;;  %10434 = vmatmul.mubr.msk.bf16.gmra.mrb[52].mxu1 %vm2350_vm0, %v12572_v12 }
 0x237   : > { %3150 = vmatprep.mubr.bf16.mxu0 %v17642_v7  ;;  %3922 = vmatprep.mubr.bf16.mxu1 %v17642_v7 }
 0x23e   : > { %10419 = vmatmul.mubr.msk.bf16.gmra.mrb[56].mxu0 %vm2350_vm0, %v12575_v13  ;;  %10435 = vmatmul.mubr.msk.bf16.gmra.mrb[56].mxu1 %vm2350_vm0, %v12575_v13 }
 0x23f   : > { %3160 = vmatprep.mubr.bf16.mxu0 %v17642_v7  ;;  %3932 = vmatprep.mubr.bf16.mxu1 %v17642_v7 }
 0x246   : > { %10420 = vmatmul.mubr.msk.bf16.gmra.mrb[60].mxu0 %vm2350_vm0, %v12577_v14  ;;  %10436 = vmatmul.mubr.msk.bf16.gmra.mrb[60].mxu1 %vm2350_vm0, %v12577_v14 }
 0x2a1   : > { %v3012_v26 = vpop.f32.mrb[0].mxu0  ;;  %v3784_v27 = vpop.f32.mrb[0].mxu1 }
 0x2a2   : > { %v11210_v28 = vadd.f32 %v3012_v26, %v14772_v22  ;;  %v11274_v29 = vadd.f32 %v3784_v27, %v14775_v23  ;;  %v3014_v30 = vpop.f32.mrb[1].mxu0  ;;  %v3786_v31 = vpop.f32.mrb[1].mxu1 }
 0x2a3   : > { %v11211_v32 = vadd.f32 %v3014_v30, %v14778_v24  ;;  %v11275_v33 = vadd.f32 %v3786_v31, %v14781_v25  ;;  %v3016_v34 = vpop.f32.mrb[2].mxu0  ;;  %v3788_v35 = vpop.f32.mrb[2].mxu1 }
 0x2a4   : > { %v11212_v36 = vadd.f32 %v3016_v34, %v14772_v22  ;;  %v11276_v37 = vadd.f32 %v3788_v35, %v14775_v23  ;;  %v3018_v38 = vpop.f32.mrb[3].mxu0  ;;  %v3790_v39 = vpop.f32.mrb[3].mxu1  ;;  %v3943_v42 = vmax.f32 %v11210_v28, 0.0  ;;  %v3945_v43 = vmax.f32 %v11274_v29, 0.0 }
 0x2a5   : > { %v11213_v40 = vadd.f32 %v3018_v38, %v14778_v24  ;;  %v11277_v41 = vadd.f32 %v3790_v39, %v14781_v25  ;;  %v3946_v46 = vmax.f32 %v11275_v33, 0.0  ;;  %v3944_v48 = vmax.f32 %v11211_v32, 0.0 }
 0x2a6   : > { %v3947_v44 = vmax.f32 %v11212_v36, 0.0  ;;  %v3949_v45 = vmax.f32 %v11276_v37, 0.0 }
 0x2a7   : > { %v3950_v47 = vmax.f32 %v11277_v41, 0.0  ;;  %v3948_v49 = vmax.f32 %v11213_v40, 0.0 }
 0x2a8   : > { %v4071_v50 = vpack.c.bf16 %v3947_v44, %v3943_v42  ;;  %v4073_v51 = vpack.c.bf16 %v3949_v45, %v3945_v43 }
 0x2a9   : > { %v4074_v52 = vpack.c.bf16 %v3950_v47, %v3946_v46  ;;  %v3022_v53 = vpop.f32.mrb[4].mxu0  ;;  %v3794_v54 = vpop.f32.mrb[4].mxu1  ;;  %v4072_v55 = vpack.c.bf16 %v3948_v49, %v3944_v48 }
 0x2aa   : > { %v11214_v56 = vadd.f32 %v3022_v53, %v14772_v22  ;;  %v11278_v57 = vadd.f32 %v3794_v54, %v14775_v23  ;;  %v3024_v58 = vpop.f32.mrb[5].mxu0  ;;  %v3796_v59 = vpop.f32.mrb[5].mxu1 }
 0x2ab   : > { %v11215_v60 = vadd.f32 %v3024_v58, %v14778_v24  ;;  %v11279_v61 = vadd.f32 %v3796_v59, %v14781_v25  ;;  %v3026_v62 = vpop.f32.mrb[6].mxu0  ;;  %v3798_v63 = vpop.f32.mrb[6].mxu1  ;;  %4422 = vmatprep.mubr.bf16.mxu0 %v4072_v55  ;;  %10463 = vmatprep.mubr.msk.bf16.mxu1 %vm2350_vm0, %v4074_v52 }
 0x2ac   : > { %v11216_v0 = vadd.f32 %v3026_v62, %v14772_v22  ;;  %v11280_v1 = vadd.f32 %v3798_v63, %v14775_v23  ;;  %v3028_v2 = vpop.f32.mrb[7].mxu0  ;;  %v3800_v3 = vpop.f32.mrb[7].mxu1  ;;  %4423 = vmatmul.mubr.bf16.vlgmr.msra.gmra.mrb[64].mxu0 %v4071_v50  ;;  %4584 = vmatmul.mubr.bf16.vlgmr.msra.gmra.mrb[64].mxu1 %v4073_v51  ;;  %v3953_v6 = vmax.f32 %v11278_v57, 0.0  ;;  %v3951_v9 = vmax.f32 %v11214_v56, 0.0 }
 0x2ad   : > { %v11217_v4 = vadd.f32 %v3028_v2, %v14778_v24  ;;  %v11281_v5 = vadd.f32 %v3800_v3, %v14781_v25  ;;  %v3954_v11 = vmax.f32 %v11279_v61, 0.0  ;;  %v3952_v13 = vmax.f32 %v11215_v60, 0.0 }
 0x2ae   : > { %v3957_v8 = vmax.f32 %v11280_v1, 0.0  ;;  %v3955_v10 = vmax.f32 %v11216_v0, 0.0 }
 0x2af   : > { %v3958_v12 = vmax.f32 %v11281_v5, 0.0  ;;  %v3956_v14 = vmax.f32 %v11217_v4, 0.0 }
 0x2b0   : > { %v4075_v15 = vpack.c.bf16 %v3955_v10, %v3951_v9  ;;  %v4077_v19 = vpack.c.bf16 %v3957_v8, %v3953_v6 }
 0x2b1   : > { %v4078_v26 = vpack.c.bf16 %v3958_v12, %v3954_v11  ;;  %v3032_v27 = vpop.f32.mrb[8].mxu0  ;;  %v3804_v28 = vpop.f32.mrb[8].mxu1  ;;  %v4076_v29 = vpack.c.bf16 %v3956_v14, %v3952_v13 }
 0x2b2   : > { %v11218_v30 = vadd.f32 %v3032_v27, %v14772_v22  ;;  %v11282_v31 = vadd.f32 %v3804_v28, %v14775_v23  ;;  %v3034_v32 = vpop.f32.mrb[9].mxu0  ;;  %v3806_v33 = vpop.f32.mrb[9].mxu1 }
 0x2b3   : > { %v11219_v34 = vadd.f32 %v3034_v32, %v14778_v24  ;;  %v11283_v35 = vadd.f32 %v3806_v33, %v14781_v25  ;;  %v3036_v36 = vpop.f32.mrb[10].mxu0  ;;  %v3808_v37 = vpop.f32.mrb[10].mxu1  ;;  %4430 = vmatprep.mubr.bf16.mxu0 %v4076_v29  ;;  %10464 = vmatprep.mubr.msk.bf16.mxu1 %vm2350_vm0, %v4078_v26 }
 0x2b4   : > { %v11220_v38 = vadd.f32 %v3036_v36, %v14772_v22  ;;  %v11284_v39 = vadd.f32 %v3808_v37, %v14775_v23  ;;  %v3038_v40 = vpop.f32.mrb[11].mxu0  ;;  %v3810_v41 = vpop.f32.mrb[11].mxu1  ;;  %4431 = vmatmul.mubr.bf16.gmra.mrb[68].mxu0 %v4075_v15  ;;  %4592 = vmatmul.mubr.bf16.gmra.mrb[68].mxu1 %v4077_v19  ;;  %v3961_v44 = vmax.f32 %v11282_v31, 0.0  ;;  %v3959_v46 = vmax.f32 %v11218_v30, 0.0 }
 0x2b5   : > { %v11221_v42 = vadd.f32 %v3038_v40, %v14778_v24  ;;  %v11285_v43 = vadd.f32 %v3810_v41, %v14781_v25  ;;  %v3962_v48 = vmax.f32 %v11283_v35, 0.0  ;;  %v3960_v50 = vmax.f32 %v11219_v34, 0.0 }
 0x2b6   : > { %v3965_v45 = vmax.f32 %v11284_v39, 0.0  ;;  %v3963_v47 = vmax.f32 %v11220_v38, 0.0 }
 0x2b7   : > { %v3966_v49 = vmax.f32 %v11285_v43, 0.0  ;;  %v3964_v51 = vmax.f32 %v11221_v42, 0.0 }
 0x2b8   : > { %v4079_v52 = vpack.c.bf16 %v3963_v47, %v3959_v46  ;;  %v4081_v53 = vpack.c.bf16 %v3965_v45, %v3961_v44 }
 0x2b9   : > { %v4082_v54 = vpack.c.bf16 %v3966_v49, %v3962_v48  ;;  %v3042_v55 = vpop.f32.mrb[12].mxu0  ;;  %v3814_v56 = vpop.f32.mrb[12].mxu1  ;;  %v4080_v57 = vpack.c.bf16 %v3964_v51, %v3960_v50 }
 0x2ba   : > { %v11222_v58 = vadd.f32 %v3042_v55, %v14772_v22  ;;  %v11286_v59 = vadd.f32 %v3814_v56, %v14775_v23  ;;  %v3044_v60 = vpop.f32.mrb[13].mxu0  ;;  %v3816_v61 = vpop.f32.mrb[13].mxu1 }
 0x2bb   : > { %v11223_v62 = vadd.f32 %v3044_v60, %v14778_v24  ;;  %v11287_v63 = vadd.f32 %v3816_v61, %v14781_v25  ;;  %v3046_v0 = vpop.f32.mrb[14].mxu0  ;;  %v3818_v1 = vpop.f32.mrb[14].mxu1  ;;  %4438 = vmatprep.mubr.bf16.mxu0 %v4080_v57  ;;  %10465 = vmatprep.mubr.msk.bf16.mxu1 %vm2350_vm0, %v4082_v54 }
 0x2bc   : > { %v11224_v2 = vadd.f32 %v3046_v0, %v14772_v22  ;;  %v11288_v3 = vadd.f32 %v3818_v1, %v14775_v23  ;;  %v3048_v4 = vpop.f32.mrb[15].mxu0  ;;  %v3820_v5 = vpop.f32.mrb[15].mxu1  ;;  %4439 = vmatmul.mubr.bf16.gmra.mrb[72].mxu0 %v4079_v52  ;;  %4600 = vmatmul.mubr.bf16.gmra.mrb[72].mxu1 %v4081_v53  ;;  %v3969_v9 = vmax.f32 %v11286_v59, 0.0  ;;  %v3967_v11 = vmax.f32 %v11222_v58, 0.0 }
 0x2bd   : > { %v11225_v6 = vadd.f32 %v3048_v4, %v14778_v24  ;;  %v11289_v8 = vadd.f32 %v3820_v5, %v14781_v25  ;;  %v3970_v13 = vmax.f32 %v11287_v63, 0.0  ;;  %v3968_v15 = vmax.f32 %v11223_v62, 0.0 }
 0x2be   : > { %v3973_v10 = vmax.f32 %v11288_v3, 0.0  ;;  %v3971_v12 = vmax.f32 %v11224_v2, 0.0 }
 0x2bf   : > { %v3974_v14 = vmax.f32 %v11289_v8, 0.0  ;;  %v3972_v19 = vmax.f32 %v11225_v6, 0.0 }
 0x2c0   : > { %v4083_v26 = vpack.c.bf16 %v3971_v12, %v3967_v11  ;;  %v4085_v27 = vpack.c.bf16 %v3973_v10, %v3969_v9 }
 0x2c1   : > { %v4086_v28 = vpack.c.bf16 %v3974_v14, %v3970_v13  ;;  %v3052_v29 = vpop.f32.mrb[16].mxu0  ;;  %v3824_v30 = vpop.f32.mrb[16].mxu1  ;;  %v4084_v31 = vpack.c.bf16 %v3972_v19, %v3968_v15 }
 0x2c2   : > { %v11226_v32 = vadd.f32 %v3052_v29, %v14772_v22  ;;  %v11290_v33 = vadd.f32 %v3824_v30, %v14775_v23  ;;  %v3054_v34 = vpop.f32.mrb[17].mxu0  ;;  %v3826_v35 = vpop.f32.mrb[17].mxu1 }
 0x2c3   : > { %v11227_v36 = vadd.f32 %v3054_v34, %v14778_v24  ;;  %v11291_v37 = vadd.f32 %v3826_v35, %v14781_v25  ;;  %v3056_v38 = vpop.f32.mrb[18].mxu0  ;;  %v3828_v39 = vpop.f32.mrb[18].mxu1  ;;  %4446 = vmatprep.mubr.bf16.mxu0 %v4084_v31  ;;  %10466 = vmatprep.mubr.msk.bf16.mxu1 %vm2350_vm0, %v4086_v28 }
 0x2c4   : > { %v11228_v40 = vadd.f32 %v3056_v38, %v14772_v22  ;;  %v11292_v41 = vadd.f32 %v3828_v39, %v14775_v23  ;;  %v3058_v42 = vpop.f32.mrb[19].mxu0  ;;  %v3830_v43 = vpop.f32.mrb[19].mxu1  ;;  %4447 = vmatmul.mubr.bf16.gmra.mrb[76].mxu0 %v4083_v26  ;;  %4608 = vmatmul.mubr.bf16.gmra.mrb[76].mxu1 %v4085_v27  ;;  %v3977_v46 = vmax.f32 %v11290_v33, 0.0  ;;  %v3975_v48 = vmax.f32 %v11226_v32, 0.0 }
 0x2c5   : > { %v11229_v44 = vadd.f32 %v3058_v42, %v14778_v24  ;;  %v11293_v45 = vadd.f32 %v3830_v43, %v14781_v25  ;;  %v3978_v50 = vmax.f32 %v11291_v37, 0.0  ;;  %v3976_v52 = vmax.f32 %v11227_v36, 0.0 }
 0x2c6   : > { %v3981_v47 = vmax.f32 %v11292_v41, 0.0  ;;  %v3979_v49 = vmax.f32 %v11228_v40, 0.0 }
 0x2c7   : > { %v3982_v51 = vmax.f32 %v11293_v45, 0.0  ;;  %v3980_v53 = vmax.f32 %v11229_v44, 0.0 }
 0x2c8   : > { %v4087_v54 = vpack.c.bf16 %v3979_v49, %v3975_v48  ;;  %v4089_v55 = vpack.c.bf16 %v3981_v47, %v3977_v46 }
 0x2c9   : > { %v4090_v56 = vpack.c.bf16 %v3982_v51, %v3978_v50  ;;  %v3062_v57 = vpop.f32.mrb[20].mxu0  ;;  %v3834_v58 = vpop.f32.mrb[20].mxu1  ;;  %v4088_v59 = vpack.c.bf16 %v3980_v53, %v3976_v52 }
 0x2ca   : > { %v11230_v60 = vadd.f32 %v3062_v57, %v14772_v22  ;;  %v11294_v61 = vadd.f32 %v3834_v58, %v14775_v23  ;;  %v3064_v62 = vpop.f32.mrb[21].mxu0  ;;  %v3836_v63 = vpop.f32.mrb[21].mxu1 }
 0x2cb   : > { %v11231_v0 = vadd.f32 %v3064_v62, %v14778_v24  ;;  %v11295_v1 = vadd.f32 %v3836_v63, %v14781_v25  ;;  %v3066_v2 = vpop.f32.mrb[22].mxu0  ;;  %v3838_v3 = vpop.f32.mrb[22].mxu1  ;;  %4454 = vmatprep.mubr.bf16.mxu0 %v4088_v59  ;;  %10467 = vmatprep.mubr.msk.bf16.mxu1 %vm2350_vm0, %v4090_v56 }
 0x2cc   : > { %v11232_v4 = vadd.f32 %v3066_v2, %v14772_v22  ;;  %v11296_v5 = vadd.f32 %v3838_v3, %v14775_v23  ;;  %v3068_v6 = vpop.f32.mrb[23].mxu0  ;;  %v3840_v8 = vpop.f32.mrb[23].mxu1  ;;  %4455 = vmatmul.mubr.bf16.gmra.mrb[80].mxu0 %v4087_v54  ;;  %4616 = vmatmul.mubr.bf16.gmra.mrb[80].mxu1 %v4089_v55  ;;  %v3985_v11 = vmax.f32 %v11294_v61, 0.0  ;;  %v3983_v13 = vmax.f32 %v11230_v60, 0.0 }
 0x2cd   : > { %v11233_v9 = vadd.f32 %v3068_v6, %v14778_v24  ;;  %v11297_v10 = vadd.f32 %v3840_v8, %v14781_v25  ;;  %v3986_v15 = vmax.f32 %v11295_v1, 0.0  ;;  %v3984_v26 = vmax.f32 %v11231_v0, 0.0 }
 0x2ce   : > { %v3989_v12 = vmax.f32 %v11296_v5, 0.0  ;;  %v3987_v14 = vmax.f32 %v11232_v4, 0.0 }
 0x2cf   : > { %v3990_v19 = vmax.f32 %v11297_v10, 0.0  ;;  %v3988_v27 = vmax.f32 %v11233_v9, 0.0 }
 0x2d0   : > { %v4091_v28 = vpack.c.bf16 %v3987_v14, %v3983_v13  ;;  %v4093_v29 = vpack.c.bf16 %v3989_v12, %v3985_v11 }
 0x2d1   : > { %v4094_v30 = vpack.c.bf16 %v3990_v19, %v3986_v15  ;;  %v3072_v31 = vpop.f32.mrb[24].mxu0  ;;  %v3844_v32 = vpop.f32.mrb[24].mxu1  ;;  %v4092_v33 = vpack.c.bf16 %v3988_v27, %v3984_v26 }
 0x2d2   : > { %v11234_v34 = vadd.f32 %v3072_v31, %v14772_v22  ;;  %v11298_v35 = vadd.f32 %v3844_v32, %v14775_v23  ;;  %v3074_v36 = vpop.f32.mrb[25].mxu0  ;;  %v3846_v37 = vpop.f32.mrb[25].mxu1 }
 0x2d3   : > { %v11235_v38 = vadd.f32 %v3074_v36, %v14778_v24  ;;  %v11299_v39 = vadd.f32 %v3846_v37, %v14781_v25  ;;  %v3076_v40 = vpop.f32.mrb[26].mxu0  ;;  %v3848_v41 = vpop.f32.mrb[26].mxu1  ;;  %4462 = vmatprep.mubr.bf16.mxu0 %v4092_v33  ;;  %10468 = vmatprep.mubr.msk.bf16.mxu1 %vm2350_vm0, %v4094_v30 }
 0x2d4   : > { %v11236_v42 = vadd.f32 %v3076_v40, %v14772_v22  ;;  %v11300_v43 = vadd.f32 %v3848_v41, %v14775_v23  ;;  %v3078_v44 = vpop.f32.mrb[27].mxu0  ;;  %v3850_v45 = vpop.f32.mrb[27].mxu1  ;;  %4463 = vmatmul.mubr.bf16.gmra.mrb[84].mxu0 %v4091_v28  ;;  %4624 = vmatmul.mubr.bf16.gmra.mrb[84].mxu1 %v4093_v29  ;;  %v3993_v48 = vmax.f32 %v11298_v35, 0.0  ;;  %v3991_v50 = vmax.f32 %v11234_v34, 0.0 }
 0x2d5   : > { %v11237_v46 = vadd.f32 %v3078_v44, %v14778_v24  ;;  %v11301_v47 = vadd.f32 %v3850_v45, %v14781_v25  ;;  %v3994_v52 = vmax.f32 %v11299_v39, 0.0  ;;  %v3992_v54 = vmax.f32 %v11235_v38, 0.0 }
 0x2d6   : > { %v3997_v49 = vmax.f32 %v11300_v43, 0.0  ;;  %v3995_v51 = vmax.f32 %v11236_v42, 0.0 }
 0x2d7   : > { %v3998_v53 = vmax.f32 %v11301_v47, 0.0  ;;  %v3996_v55 = vmax.f32 %v11237_v46, 0.0 }
 0x2d8   : > { %v4095_v56 = vpack.c.bf16 %v3995_v51, %v3991_v50  ;;  %v4097_v57 = vpack.c.bf16 %v3997_v49, %v3993_v48 }
 0x2d9   : > { %v4098_v58 = vpack.c.bf16 %v3998_v53, %v3994_v52  ;;  %v3082_v59 = vpop.f32.mrb[28].mxu0  ;;  %v3854_v60 = vpop.f32.mrb[28].mxu1  ;;  %v4096_v61 = vpack.c.bf16 %v3996_v55, %v3992_v54 }
 0x2da   : > { %v11238_v62 = vadd.f32 %v3082_v59, %v14772_v22  ;;  %v11302_v63 = vadd.f32 %v3854_v60, %v14775_v23  ;;  %v3084_v0 = vpop.f32.mrb[29].mxu0  ;;  %v3856_v1 = vpop.f32.mrb[29].mxu1 }
 0x2db   : > { %v11239_v2 = vadd.f32 %v3084_v0, %v14778_v24  ;;  %v11303_v3 = vadd.f32 %v3856_v1, %v14781_v25  ;;  %v3086_v4 = vpop.f32.mrb[30].mxu0  ;;  %v3858_v5 = vpop.f32.mrb[30].mxu1  ;;  %4470 = vmatprep.mubr.bf16.mxu0 %v4096_v61  ;;  %10469 = vmatprep.mubr.msk.bf16.mxu1 %vm2350_vm0, %v4098_v58 }
 0x2dc   : > { %v11240_v6 = vadd.f32 %v3086_v4, %v14772_v22  ;;  %v11304_v8 = vadd.f32 %v3858_v5, %v14775_v23  ;;  %v3088_v9 = vpop.f32.mrb[31].mxu0  ;;  %v3860_v10 = vpop.f32.mrb[31].mxu1  ;;  %4471 = vmatmul.mubr.bf16.gmra.mrb[88].mxu0 %v4095_v56  ;;  %4632 = vmatmul.mubr.bf16.gmra.mrb[88].mxu1 %v4097_v57  ;;  %v4001_v13 = vmax.f32 %v11302_v63, 0.0  ;;  %v3999_v15 = vmax.f32 %v11238_v62, 0.0 }
 0x2dd   : > { %v11241_v11 = vadd.f32 %v3088_v9, %v14778_v24  ;;  %v11305_v12 = vadd.f32 %v3860_v10, %v14781_v25  ;;  %v4002_v26 = vmax.f32 %v11303_v3, 0.0  ;;  %v4000_v28 = vmax.f32 %v11239_v2, 0.0 }
 0x2de   : > { %v4005_v14 = vmax.f32 %v11304_v8, 0.0  ;;  %v4003_v19 = vmax.f32 %v11240_v6, 0.0 }
 0x2df   : > { %v4006_v27 = vmax.f32 %v11305_v12, 0.0  ;;  %v4004_v29 = vmax.f32 %v11241_v11, 0.0 }
 0x2e0   : > { %v4099_v30 = vpack.c.bf16 %v4003_v19, %v3999_v15  ;;  %v4101_v31 = vpack.c.bf16 %v4005_v14, %v4001_v13 }
 0x2e1   : > { %v4102_v32 = vpack.c.bf16 %v4006_v27, %v4002_v26  ;;  %v3092_v33 = vpop.f32.mrb[32].mxu0  ;;  %v3864_v34 = vpop.f32.mrb[32].mxu1  ;;  %v4100_v35 = vpack.c.bf16 %v4004_v29, %v4000_v28 }
 0x2e2   : > { %v11242_v36 = vadd.f32 %v3092_v33, %v14772_v22  ;;  %v11306_v37 = vadd.f32 %v3864_v34, %v14775_v23  ;;  %v3094_v38 = vpop.f32.mrb[33].mxu0  ;;  %v3866_v39 = vpop.f32.mrb[33].mxu1 }
 0x2e3   : > { %v11243_v40 = vadd.f32 %v3094_v38, %v14778_v24  ;;  %v11307_v41 = vadd.f32 %v3866_v39, %v14781_v25  ;;  %v3096_v42 = vpop.f32.mrb[34].mxu0  ;;  %v3868_v43 = vpop.f32.mrb[34].mxu1  ;;  %4478 = vmatprep.mubr.bf16.mxu0 %v4100_v35  ;;  %10470 = vmatprep.mubr.msk.bf16.mxu1 %vm2350_vm0, %v4102_v32 }
 0x2e4   : > { %v11244_v44 = vadd.f32 %v3096_v42, %v14772_v22  ;;  %v11308_v45 = vadd.f32 %v3868_v43, %v14775_v23  ;;  %v3098_v46 = vpop.f32.mrb[35].mxu0  ;;  %v3870_v47 = vpop.f32.mrb[35].mxu1  ;;  %4479 = vmatmul.mubr.bf16.gmra.mrb[92].mxu0 %v4099_v30  ;;  %4640 = vmatmul.mubr.bf16.gmra.mrb[92].mxu1 %v4101_v31  ;;  %v4009_v50 = vmax.f32 %v11306_v37, 0.0  ;;  %v4007_v52 = vmax.f32 %v11242_v36, 0.0 }
 0x2e5   : > { %v11245_v48 = vadd.f32 %v3098_v46, %v14778_v24  ;;  %v11309_v49 = vadd.f32 %v3870_v47, %v14781_v25  ;;  %v4010_v54 = vmax.f32 %v11307_v41, 0.0  ;;  %v4008_v56 = vmax.f32 %v11243_v40, 0.0 }
 0x2e6   : > { %v4013_v51 = vmax.f32 %v11308_v45, 0.0  ;;  %v4011_v53 = vmax.f32 %v11244_v44, 0.0 }
 0x2e7   : > { %v4014_v55 = vmax.f32 %v11309_v49, 0.0  ;;  %v4012_v57 = vmax.f32 %v11245_v48, 0.0 }
 0x2e8   : > { %v4103_v58 = vpack.c.bf16 %v4011_v53, %v4007_v52  ;;  %v4105_v59 = vpack.c.bf16 %v4013_v51, %v4009_v50 }
 0x2e9   : > { %v4106_v60 = vpack.c.bf16 %v4014_v55, %v4010_v54  ;;  %v3102_v61 = vpop.f32.mrb[36].mxu0  ;;  %v3874_v62 = vpop.f32.mrb[36].mxu1  ;;  %v4104_v63 = vpack.c.bf16 %v4012_v57, %v4008_v56 }
 0x2ea   : > { %v11246_v0 = vadd.f32 %v3102_v61, %v14772_v22  ;;  %v11310_v1 = vadd.f32 %v3874_v62, %v14775_v23  ;;  %v3104_v2 = vpop.f32.mrb[37].mxu0  ;;  %v3876_v3 = vpop.f32.mrb[37].mxu1 }
 0x2eb   : > { %v11247_v4 = vadd.f32 %v3104_v2, %v14778_v24  ;;  %v11311_v5 = vadd.f32 %v3876_v3, %v14781_v25  ;;  %v3106_v6 = vpop.f32.mrb[38].mxu0  ;;  %v3878_v8 = vpop.f32.mrb[38].mxu1  ;;  %4486 = vmatprep.mubr.bf16.mxu0 %v4104_v63  ;;  %10471 = vmatprep.mubr.msk.bf16.mxu1 %vm2350_vm0, %v4106_v60 }
 0x2ec   : > { %v11248_v9 = vadd.f32 %v3106_v6, %v14772_v22  ;;  %v11312_v10 = vadd.f32 %v3878_v8, %v14775_v23  ;;  %v3108_v11 = vpop.f32.mrb[39].mxu0  ;;  %v3880_v12 = vpop.f32.mrb[39].mxu1  ;;  %4487 = vmatmul.mubr.bf16.gmra.mrb[96].mxu0 %v4103_v58  ;;  %4648 = vmatmul.mubr.bf16.gmra.mrb[96].mxu1 %v4105_v59  ;;  %v4017_v15 = vmax.f32 %v11310_v1, 0.0  ;;  %v4015_v26 = vmax.f32 %v11246_v0, 0.0 }
 0x2ed   : > { %v11249_v13 = vadd.f32 %v3108_v11, %v14778_v24  ;;  %v11313_v14 = vadd.f32 %v3880_v12, %v14781_v25  ;;  %v4018_v28 = vmax.f32 %v11311_v5, 0.0  ;;  %v4016_v30 = vmax.f32 %v11247_v4, 0.0 }
 0x2ee   : > { %v4021_v19 = vmax.f32 %v11312_v10, 0.0  ;;  %v4019_v27 = vmax.f32 %v11248_v9, 0.0 }
 0x2ef   : > { %v4022_v29 = vmax.f32 %v11313_v14, 0.0  ;;  %v4020_v31 = vmax.f32 %v11249_v13, 0.0 }
 0x2f0   : > { %v4107_v32 = vpack.c.bf16 %v4019_v27, %v4015_v26  ;;  %v4109_v33 = vpack.c.bf16 %v4021_v19, %v4017_v15 }
 0x2f1   : > { %v4110_v34 = vpack.c.bf16 %v4022_v29, %v4018_v28  ;;  %v3112_v35 = vpop.f32.mrb[40].mxu0  ;;  %v3884_v36 = vpop.f32.mrb[40].mxu1  ;;  %v4108_v37 = vpack.c.bf16 %v4020_v31, %v4016_v30 }
 0x2f2   : > { %v11250_v38 = vadd.f32 %v3112_v35, %v14772_v22  ;;  %v11314_v39 = vadd.f32 %v3884_v36, %v14775_v23  ;;  %v3114_v40 = vpop.f32.mrb[41].mxu0  ;;  %v3886_v41 = vpop.f32.mrb[41].mxu1 }
 0x2f3   : > { %v11251_v42 = vadd.f32 %v3114_v40, %v14778_v24  ;;  %v11315_v43 = vadd.f32 %v3886_v41, %v14781_v25  ;;  %v3116_v44 = vpop.f32.mrb[42].mxu0  ;;  %v3888_v45 = vpop.f32.mrb[42].mxu1  ;;  %4494 = vmatprep.mubr.bf16.mxu0 %v4108_v37  ;;  %10472 = vmatprep.mubr.msk.bf16.mxu1 %vm2350_vm0, %v4110_v34 }
 0x2f4   : > { %v11252_v46 = vadd.f32 %v3116_v44, %v14772_v22  ;;  %v11316_v47 = vadd.f32 %v3888_v45, %v14775_v23  ;;  %v3118_v48 = vpop.f32.mrb[43].mxu0  ;;  %v3890_v49 = vpop.f32.mrb[43].mxu1  ;;  %4495 = vmatmul.mubr.bf16.gmra.mrb[100].mxu0 %v4107_v32  ;;  %4656 = vmatmul.mubr.bf16.gmra.mrb[100].mxu1 %v4109_v33  ;;  %v4025_v52 = vmax.f32 %v11314_v39, 0.0  ;;  %v4023_v54 = vmax.f32 %v11250_v38, 0.0 }
 0x2f5   : > { %v11253_v50 = vadd.f32 %v3118_v48, %v14778_v24  ;;  %v11317_v51 = vadd.f32 %v3890_v49, %v14781_v25  ;;  %v4026_v56 = vmax.f32 %v11315_v43, 0.0  ;;  %v4024_v58 = vmax.f32 %v11251_v42, 0.0 }
 0x2f6   : > { %v4029_v53 = vmax.f32 %v11316_v47, 0.0  ;;  %v4027_v55 = vmax.f32 %v11252_v46, 0.0 }
 0x2f7   : > { %v4030_v57 = vmax.f32 %v11317_v51, 0.0  ;;  %v4028_v59 = vmax.f32 %v11253_v50, 0.0 }
 0x2f8   : > { %v4111_v60 = vpack.c.bf16 %v4027_v55, %v4023_v54  ;;  %v4113_v61 = vpack.c.bf16 %v4029_v53, %v4025_v52 }
 0x2f9   : > { %v4114_v62 = vpack.c.bf16 %v4030_v57, %v4026_v56  ;;  %v3122_v63 = vpop.f32.mrb[44].mxu0  ;;  %v3894_v0 = vpop.f32.mrb[44].mxu1  ;;  %v4112_v1 = vpack.c.bf16 %v4028_v59, %v4024_v58 }
 0x2fa   : > { %v11254_v2 = vadd.f32 %v3122_v63, %v14772_v22  ;;  %v11318_v3 = vadd.f32 %v3894_v0, %v14775_v23  ;;  %v3124_v4 = vpop.f32.mrb[45].mxu0  ;;  %v3896_v5 = vpop.f32.mrb[45].mxu1 }
 0x2fb   : > { %v11255_v6 = vadd.f32 %v3124_v4, %v14778_v24  ;;  %v11319_v8 = vadd.f32 %v3896_v5, %v14781_v25  ;;  %v3126_v9 = vpop.f32.mrb[46].mxu0  ;;  %v3898_v10 = vpop.f32.mrb[46].mxu1  ;;  %4502 = vmatprep.mubr.bf16.mxu0 %v4112_v1  ;;  %10473 = vmatprep.mubr.msk.bf16.mxu1 %vm2350_vm0, %v4114_v62 }
 0x2fc   : > { %v11256_v11 = vadd.f32 %v3126_v9, %v14772_v22  ;;  %v11320_v12 = vadd.f32 %v3898_v10, %v14775_v23  ;;  %v3128_v13 = vpop.f32.mrb[47].mxu0  ;;  %v3900_v14 = vpop.f32.mrb[47].mxu1  ;;  %4503 = vmatmul.mubr.bf16.gmra.mrb[104].mxu0 %v4111_v60  ;;  %4664 = vmatmul.mubr.bf16.gmra.mrb[104].mxu1 %v4113_v61  ;;  %v4033_v26 = vmax.f32 %v11318_v3, 0.0  ;;  %v4031_v28 = vmax.f32 %v11254_v2, 0.0 }
 0x2fd   : > { %v11257_v15 = vadd.f32 %v3128_v13, %v14778_v24  ;;  %v11321_v19 = vadd.f32 %v3900_v14, %v14781_v25  ;;  %v4034_v30 = vmax.f32 %v11319_v8, 0.0  ;;  %v4032_v32 = vmax.f32 %v11255_v6, 0.0 }
 0x2fe   : > { %v4037_v27 = vmax.f32 %v11320_v12, 0.0  ;;  %v4035_v29 = vmax.f32 %v11256_v11, 0.0 }
 0x2ff   : > { %v4038_v31 = vmax.f32 %v11321_v19, 0.0  ;;  %v4036_v33 = vmax.f32 %v11257_v15, 0.0 }
 0x300   : > { %v4115_v34 = vpack.c.bf16 %v4035_v29, %v4031_v28  ;;  %v4117_v35 = vpack.c.bf16 %v4037_v27, %v4033_v26 }
 0x301   : > { %v4118_v36 = vpack.c.bf16 %v4038_v31, %v4034_v30  ;;  %v3132_v37 = vpop.f32.mrb[48].mxu0  ;;  %v3904_v38 = vpop.f32.mrb[48].mxu1  ;;  %v4116_v39 = vpack.c.bf16 %v4036_v33, %v4032_v32 }
 0x302   : > { %v11258_v40 = vadd.f32 %v3132_v37, %v14772_v22  ;;  %v11322_v41 = vadd.f32 %v3904_v38, %v14775_v23  ;;  %v3134_v42 = vpop.f32.mrb[49].mxu0  ;;  %v3906_v43 = vpop.f32.mrb[49].mxu1 }
 0x303   : > { %v11259_v44 = vadd.f32 %v3134_v42, %v14778_v24  ;;  %v11323_v45 = vadd.f32 %v3906_v43, %v14781_v25  ;;  %v3136_v46 = vpop.f32.mrb[50].mxu0  ;;  %v3908_v47 = vpop.f32.mrb[50].mxu1  ;;  %4510 = vmatprep.mubr.bf16.mxu0 %v4116_v39  ;;  %10474 = vmatprep.mubr.msk.bf16.mxu1 %vm2350_vm0, %v4118_v36 }
 0x304   : > { %v11260_v48 = vadd.f32 %v3136_v46, %v14772_v22  ;;  %v11324_v49 = vadd.f32 %v3908_v47, %v14775_v23  ;;  %v3138_v50 = vpop.f32.mrb[51].mxu0  ;;  %v3910_v51 = vpop.f32.mrb[51].mxu1  ;;  %4511 = vmatmul.mubr.bf16.gmra.mrb[108].mxu0 %v4115_v34  ;;  %4672 = vmatmul.mubr.bf16.gmra.mrb[108].mxu1 %v4117_v35  ;;  %v4041_v54 = vmax.f32 %v11322_v41, 0.0  ;;  %v4039_v56 = vmax.f32 %v11258_v40, 0.0 }
 0x305   : > { %v11261_v52 = vadd.f32 %v3138_v50, %v14778_v24  ;;  %v11325_v53 = vadd.f32 %v3910_v51, %v14781_v25  ;;  %v4042_v58 = vmax.f32 %v11323_v45, 0.0  ;;  %v4040_v60 = vmax.f32 %v11259_v44, 0.0 }
 0x306   : > { %v4045_v55 = vmax.f32 %v11324_v49, 0.0  ;;  %v4043_v57 = vmax.f32 %v11260_v48, 0.0 }
 0x307   : > { %v4046_v59 = vmax.f32 %v11325_v53, 0.0  ;;  %v4044_v61 = vmax.f32 %v11261_v52, 0.0 }
 0x308   : > { %v4119_v62 = vpack.c.bf16 %v4043_v57, %v4039_v56  ;;  %v4121_v63 = vpack.c.bf16 %v4045_v55, %v4041_v54 }
 0x309   : > { %v4122_v0 = vpack.c.bf16 %v4046_v59, %v4042_v58  ;;  %v3142_v1 = vpop.f32.mrb[52].mxu0  ;;  %v3914_v2 = vpop.f32.mrb[52].mxu1  ;;  %v4120_v3 = vpack.c.bf16 %v4044_v61, %v4040_v60 }
 0x30a   : > { %v11262_v4 = vadd.f32 %v3142_v1, %v14772_v22  ;;  %v11326_v5 = vadd.f32 %v3914_v2, %v14775_v23  ;;  %v3144_v6 = vpop.f32.mrb[53].mxu0  ;;  %v3916_v8 = vpop.f32.mrb[53].mxu1 }
 0x30b   : > { %v11263_v9 = vadd.f32 %v3144_v6, %v14778_v24  ;;  %v11327_v10 = vadd.f32 %v3916_v8, %v14781_v25  ;;  %v3146_v11 = vpop.f32.mrb[54].mxu0  ;;  %v3918_v12 = vpop.f32.mrb[54].mxu1  ;;  %4518 = vmatprep.mubr.bf16.mxu0 %v4120_v3  ;;  %10475 = vmatprep.mubr.msk.bf16.mxu1 %vm2350_vm0, %v4122_v0 }
 0x30c   : > { %v11264_v13 = vadd.f32 %v3146_v11, %v14772_v22  ;;  %v11328_v14 = vadd.f32 %v3918_v12, %v14775_v23  ;;  %v3148_v15 = vpop.f32.mrb[55].mxu0  ;;  %v3920_v19 = vpop.f32.mrb[55].mxu1  ;;  %4519 = vmatmul.mubr.bf16.gmra.mrb[112].mxu0 %v4119_v62  ;;  %4680 = vmatmul.mubr.bf16.gmra.mrb[112].mxu1 %v4121_v63  ;;  %v4049_v28 = vmax.f32 %v11326_v5, 0.0  ;;  %v4047_v30 = vmax.f32 %v11262_v4, 0.0 }
 0x30d   : > { %v11265_v26 = vadd.f32 %v3148_v15, %v14778_v24  ;;  %v11329_v27 = vadd.f32 %v3920_v19, %v14781_v25  ;;  %v4050_v32 = vmax.f32 %v11327_v10, 0.0  ;;  %v4048_v34 = vmax.f32 %v11263_v9, 0.0 }
 0x30e   : > { %v4053_v29 = vmax.f32 %v11328_v14, 0.0  ;;  %v4051_v31 = vmax.f32 %v11264_v13, 0.0 }
 0x30f   : > { %v4054_v33 = vmax.f32 %v11329_v27, 0.0  ;;  %v4052_v35 = vmax.f32 %v11265_v26, 0.0 }
 0x310   : > { %v4123_v36 = vpack.c.bf16 %v4051_v31, %v4047_v30  ;;  %v4125_v37 = vpack.c.bf16 %v4053_v29, %v4049_v28  ;;  %v12597_v30 = vld [vmem:[%s17636_s6] ss:$16 sps:$4 sm:$0xff]   ;;  %v12599_v31 = vld [vmem:[%s17636_s6 + $0x4] ss:$16 sps:$4 sm:$0xff]  }
 0x311   : > { %v4126_v38 = vpack.c.bf16 %v4054_v33, %v4050_v32  ;;  %v3152_v39 = vpop.f32.mrb[56].mxu0  ;;  %v3924_v40 = vpop.f32.mrb[56].mxu1  ;;  %v4124_v41 = vpack.c.bf16 %v4052_v35, %v4048_v34  ;;  %5136 = vmatprep.subr.bf16.mxu0 %v12599_v31 }
 0x312   : > { %v11266_v42 = vadd.f32 %v3152_v39, %v14772_v22  ;;  %v11330_v43 = vadd.f32 %v3924_v40, %v14775_v23  ;;  %v3154_v44 = vpop.f32.mrb[57].mxu0  ;;  %v3926_v45 = vpop.f32.mrb[57].mxu1  ;;  %5137 = vmatpush1.bf16.msra.mxu0 %v12597_v30  ;;  %v5020_v40 = vld [vmem:[%s17636_s6 + $0x20] sm:$0x33] }
 0x313   : > { %v11267_v46 = vadd.f32 %v3154_v44, %v14778_v24  ;;  %v11331_v47 = vadd.f32 %v3926_v45, %v14781_v25  ;;  %v3156_v48 = vpop.f32.mrb[58].mxu0  ;;  %v3928_v49 = vpop.f32.mrb[58].mxu1  ;;  %4526 = vmatprep.mubr.bf16.mxu0 %v4124_v41  ;;  %10476 = vmatprep.mubr.msk.bf16.mxu1 %vm2350_vm0, %v4126_v38  ;;  %v10484_v41 = vcombine.high %v5020_v40, %v5020_v40  ;;  %v12602_v44 = vld [vmem:[%s17636_s6 + $0x8] ss:$16 sps:$4 sm:$0xff]   ;;  %v12604_v45 = vld [vmem:[%s17636_s6 + $0xc] ss:$16 sps:$4 sm:$0xff]  }
 0x314   : > { %v11268_v50 = vadd.f32 %v3156_v48, %v14772_v22  ;;  %v11332_v51 = vadd.f32 %v3928_v49, %v14775_v23  ;;  %v3158_v52 = vpop.f32.mrb[59].mxu0  ;;  %v3930_v53 = vpop.f32.mrb[59].mxu1  ;;  %4527 = vmatmul.mubr.bf16.gmra.mrb[116].mxu0 %v4123_v36  ;;  %4688 = vmatmul.mubr.bf16.gmra.mrb[116].mxu1 %v4125_v37  ;;  %v4057_v56 = vmax.f32 %v11330_v43, 0.0  ;;  %v4055_v58 = vmax.f32 %v11266_v42, 0.0  ;;  %v14949_v48 = vld [vmem:[%s17635_s5] ss:$0 sm:$0xff] }
 0x315   : > { %v11269_v54 = vadd.f32 %v3158_v52, %v14778_v24  ;;  %v11333_v55 = vadd.f32 %v3930_v53, %v14781_v25  ;;  %v4058_v60 = vmax.f32 %v11331_v47, 0.0  ;;  %v4056_v62 = vmax.f32 %v11267_v46, 0.0  ;;  %10487 = vmatprep.subr.msk.bf16.mxu0 %vm5123_vm1, %v10484_v41  ;;  %5329 = vmatprep.subr.bf16.mxu1 %v12604_v45 }
 0x316   : > { %v4061_v57 = vmax.f32 %v11332_v51, 0.0  ;;  %v4059_v59 = vmax.f32 %v11268_v50, 0.0  ;;  %v10483_v42 = vcombine.low %v5020_v40, %v5020_v40  ;;  %5330 = vmatpush1.bf16.msra.mxu1 %v12602_v44 }
 0x317   : > { %v4062_v61 = vmax.f32 %v11333_v55, 0.0  ;;  %v4060_v63 = vmax.f32 %v11269_v54, 0.0 }
 0x318   : > { %v4127_v0 = vpack.c.bf16 %v4059_v59, %v4055_v58  ;;  %v4129_v1 = vpack.c.bf16 %v4061_v57, %v4057_v56  ;;  %v5125_v43 = vsel %vm5123_vm1, %v10483_v42, 0 }
 0x319   : > { %v4130_v2 = vpack.c.bf16 %v4062_v61, %v4058_v60  ;;  %v3162_v3 = vpop.f32.mrb[60].mxu0  ;;  %v3934_v4 = vpop.f32.mrb[60].mxu1  ;;  %v4128_v5 = vpack.c.bf16 %v4060_v63, %v4056_v62  ;;  %5139 = vmatpush1.bf16.msra.mxu0 %v5125_v43 }
 0x31a   : > { %v11270_v6 = vadd.f32 %v3162_v3, %v14772_v22  ;;  %v11334_v8 = vadd.f32 %v3934_v4, %v14775_v23  ;;  %v3164_v9 = vpop.f32.mrb[61].mxu0  ;;  %v3936_v10 = vpop.f32.mrb[61].mxu1 }
 0x31b   : > { %v11271_v11 = vadd.f32 %v3164_v9, %v14778_v24  ;;  %v11335_v12 = vadd.f32 %v3936_v10, %v14781_v25  ;;  %v3166_v13 = vpop.f32.mrb[62].mxu0  ;;  %v3938_v14 = vpop.f32.mrb[62].mxu1  ;;  %4534 = vmatprep.mubr.bf16.mxu0 %v4128_v5  ;;  %10477 = vmatprep.mubr.msk.bf16.mxu1 %vm2350_vm0, %v4130_v2 }
 0x31c   : > { %v11272_v15 = vadd.f32 %v3166_v13, %v14772_v22  ;;  %v11336_v19 = vadd.f32 %v3938_v14, %v14775_v23  ;;  %v3168_v26 = vpop.f32.mrb[63].mxu0  ;;  %v3940_v27 = vpop.f32.mrb[63].mxu1  ;;  %4535 = vmatmul.mubr.bf16.gmra.mrb[120].mxu0 %v4127_v0  ;;  %4696 = vmatmul.mubr.bf16.gmra.mrb[120].mxu1 %v4129_v1  ;;  %v4065_v32 = vmax.f32 %v11334_v8, 0.0  ;;  %v4063_v33 = vmax.f32 %v11270_v6, 0.0  ;;  %v5021_v13 = vld [vmem:[%s17636_s6 + $0x28] sm:$0x33] }
 0x31d   : > { %v11273_v28 = vadd.f32 %v3168_v26, %v14778_v24  ;;  %v11337_v29 = vadd.f32 %v3940_v27, %v14781_v25  ;;  %v4066_v34 = vmax.f32 %v11335_v12, 0.0  ;;  %v4064_v36 = vmax.f32 %v11271_v11, 0.0 }
 0x31e   : > { %v4069_v22 = vmax.f32 %v11336_v19, 0.0  ;;  %v4067_v23 = vmax.f32 %v11272_v15, 0.0  ;;  %v10486_v19 = vcombine.high %v5021_v13, %v5021_v13  ;;  %v10485_v26 = vcombine.low %v5021_v13, %v5021_v13 }
 0x31f   : > { %v4070_v35 = vmax.f32 %v11337_v29, 0.0  ;;  %v4068_v37 = vmax.f32 %v11273_v28, 0.0 }
 0x320   : > { %v4131_v24 = vpack.c.bf16 %v4067_v23, %v4063_v33  ;;  %v4133_v38 = vpack.c.bf16 %v4069_v22, %v4065_v32  ;;  %10504 = vmatprep.subr.msk.bf16.mxu1 %vm5123_vm1, %v10486_v19  ;;  %v5131_v22 = vsel %vm5123_vm1, %v10485_v26, 0 }
 0x321   : > { %v4134_v25 = vpack.c.bf16 %v4070_v35, %v4066_v34  ;;  %v4132_v39 = vpack.c.bf16 %v4068_v37, %v4064_v36  ;;  %5332 = vmatpush1.bf16.msra.mxu1 %v5131_v22 }
 0x323   : > { %4542 = vmatprep.mubr.bf16.mxu0 %v4132_v39  ;;  %10478 = vmatprep.mubr.msk.bf16.mxu1 %vm2350_vm0, %v4134_v25 }
 0x324   : > { %4543 = vmatmul.mubr.bf16.gmra.mrb[124].mxu0 %v4131_v24  ;;  %4704 = vmatmul.mubr.bf16.gmra.mrb[124].mxu1 %v4133_v38 }
 0x325   : > { %5168 = vmatprep.mubr.bf16.mxu0 %v17642_v7  ;;  %5361 = vmatprep.mubr.bf16.mxu1 %v17642_v7 }
 0x37f   : > { %v11002_v46 = vpop.f32.mrb[64].mxu0  ;;  %v4585_v47 = vpop.f32.mrb[64].mxu1 }
 0x380   : > { %v11003_v49 = vpop.f32.mrb[65].mxu0  ;;  %v4587_v50 = vpop.f32.mrb[65].mxu1 }
 0x381   : > { %v11004_v51 = vadd.f32 %v11003_v49, %v11002_v46  ;;  %v11005_v52 = vpop.f32.mrb[66].mxu0  ;;  %v4588_v53 = vpop.f32.mrb[66].mxu1 }
 0x382   : > { %v11006_v54 = vpop.f32.mrb[67].mxu0  ;;  %v4590_v55 = vpop.f32.mrb[67].mxu1 }
 0x383   : > { %v4425_v56 = vadd.f32 %v11004_v51, %v14949_v48  ;;  %v11007_v57 = vadd.f32 %v11006_v54, %v11005_v52 }
 0x385   : > { %v14960_v58 = vadd.f32 %v4585_v47, %v4425_v56  ;;  %v4428_v59 = vadd.f32 %v11007_v57, %v14949_v48 }
 0x387   : > { %v4712_v60 = vmul.f32 0.5, %v14960_v58  ;;  %9948 = vst.msk [vmem:[%s14958_s29] sm:$0xff] %vm9947_vm2, %v14960_v58  ;;  %v14967_v61 = vadd.f32 %v4588_v53, %v4428_v59  ;;  %v11008_v62 = vpop.f32.mrb[68].mxu0  ;;  %v4593_v63 = vpop.f32.mrb[68].mxu1 }
 0x388   : > { %v11009_v0 = vpop.f32.mrb[69].mxu0  ;;  %v4595_v1 = vpop.f32.mrb[69].mxu1 }
 0x389   : > { %v4744_v2 = vmul.f32 1.442695, %v4712_v60  ;;  %v4713_v3 = vmul.f32 0.5, %v14967_v61  ;;  %9949 = vst.msk [vmem:[%s14958_s29 + $0x8] sm:$0xff] %vm9947_vm2, %v14967_v61  ;;  %v11010_v4 = vadd.f32 %v11009_v0, %v11008_v62  ;;  %v11011_v5 = vpop.f32.mrb[70].mxu0  ;;  %v4596_v6 = vpop.f32.mrb[70].mxu1 }
 0x38a   : > { %v11012_v8 = vpop.f32.mrb[71].mxu0  ;;  %v4598_v9 = vpop.f32.mrb[71].mxu1 }
 0x38b   : > { %12857 = vpow2.f32 %v4744_v2  ;;  %v4746_v10 = vmul.f32 1.442695, %v4713_v3  ;;  %v4433_v11 = vadd.f32 %v11010_v4, %v14949_v48  ;;  %v11013_v12 = vadd.f32 %v11012_v8, %v11011_v5 }
 0x38d   : > { %v14977_v14 = vadd.f32 %v4593_v63, %v4433_v11  ;;  %v4436_v15 = vadd.f32 %v11013_v12, %v14949_v48  ;;  %12859 = vpow2.f32 %v4746_v10 }
 0x38f   : > { %v4714_v27 = vmul.f32 0.5, %v14977_v14  ;;  %9950 = vst.msk [vmem:[%s14958_s29 + $0x10] sm:$0xff] %vm9947_vm2, %v14977_v14  ;;  %v14984_v28 = vadd.f32 %v4596_v6, %v4436_v15  ;;  %v11014_v29 = vpop.f32.mrb[72].mxu0  ;;  %v4601_v30 = vpop.f32.mrb[72].mxu1 }
 0x390   : > { %v11015_v31 = vpop.f32.mrb[73].mxu0  ;;  %v4603_v32 = vpop.f32.mrb[73].mxu1 }
 0x391   : > { %v4748_v33 = vmul.f32 1.442695, %v4714_v27  ;;  %v4715_v23 = vmul.f32 0.5, %v14984_v28  ;;  %9951 = vst.msk [vmem:[%s14958_s29 + $0x18] sm:$0xff] %vm9947_vm2, %v14984_v28  ;;  %v11016_v34 = vadd.f32 %v11015_v31, %v11014_v29  ;;  %v11017_v35 = vpop.f32.mrb[74].mxu0  ;;  %v4604_v36 = vpop.f32.mrb[74].mxu1 }
 0x392   : > { %v11018_v37 = vpop.f32.mrb[75].mxu0  ;;  %v4606_v24 = vpop.f32.mrb[75].mxu1 }
 0x393   : > { %12861 = vpow2.f32 %v4748_v33  ;;  %v4750_v38 = vmul.f32 1.442695, %v4715_v23  ;;  %v4441_v25 = vadd.f32 %v11016_v34, %v14949_v48  ;;  %v11019_v39 = vadd.f32 %v11018_v37, %v11017_v35 }
 0x395   : > { %v12858_v40 = vpop.eup %12857  ;;  %v14993_v41 = vadd.f32 %v4601_v30, %v4441_v25  ;;  %v4444_v42 = vadd.f32 %v11019_v39, %v14949_v48  ;;  %12863 = vpow2.f32 %v4750_v38 }
 0x396   : > { %4840 = vrot.lane.b32.xlu0 %v12858_v40, %s13827_s12 }
 0x397   : > { %v4716_v43 = vmul.f32 0.5, %v14993_v41  ;;  %9952 = vst.msk [vmem:[%s14958_s29 + $0x20] sm:$0xff] %vm9947_vm2, %v14993_v41  ;;  %v15001_v44 = vadd.f32 %v4604_v36, %v4444_v42  ;;  %v11020_v45 = vpop.f32.mrb[76].mxu0  ;;  %v4609_v46 = vpop.f32.mrb[76].mxu1 }
 0x398   : > { %v11021_v47 = vpop.f32.mrb[77].mxu0  ;;  %v4611_v49 = vpop.f32.mrb[77].mxu1 }
 0x399   : > { %v12860_v50 = vpop.eup %12859  ;;  %v4752_v51 = vmul.f32 1.442695, %v4716_v43  ;;  %v4717_v52 = vmul.f32 0.5, %v15001_v44  ;;  %9953 = vst.msk [vmem:[%s14958_s29 + $0x28] sm:$0xff] %vm9947_vm2, %v15001_v44  ;;  %v11022_v53 = vadd.f32 %v11021_v47, %v11020_v45  ;;  %v11023_v54 = vpop.f32.mrb[78].mxu0 }
 0x39a   : > { %v4612_v55 = vpop.f32.mrb[78].mxu1  ;;  %v11024_v56 = vpop.f32.mrb[79].mxu0  ;;  %4842 = vrot.lane.b32.xlu0 %v12860_v50, %s13827_s12 }
 0x39b   : > { %v4614_v57 = vpop.f32.mrb[79].mxu1  ;;  %12865 = vpow2.f32 %v4752_v51  ;;  %v4754_v59 = vmul.f32 1.442695, %v4717_v52  ;;  %v4449_v60 = vadd.f32 %v11022_v53, %v14949_v48  ;;  %v11025_v62 = vadd.f32 %v11024_v56, %v11023_v54 }
 0x39d   : > { %v12862_v63 = vpop.eup %12861  ;;  %12867 = vpow2.f32 %v4754_v59  ;;  %v15009_v0 = vadd.f32 %v4609_v46, %v4449_v60  ;;  %v4452_v1 = vadd.f32 %v11025_v62, %v14949_v48 }
 0x39e   : > { %4844 = vrot.lane.b32.xlu1 %v12862_v63, %s13827_s12 }
 0x39f   : > { %v4718_v2 = vmul.f32 0.5, %v15009_v0  ;;  %9954 = vst.msk [vmem:[%s14958_s29 + $0x30] sm:$0xff] %vm9947_vm2, %v15009_v0  ;;  %v15017_v3 = vadd.f32 %v4612_v55, %v4452_v1  ;;  %v11026_v4 = vpop.f32.mrb[80].mxu0  ;;  %v4617_v5 = vpop.f32.mrb[80].mxu1 }
 0x3a0   : > { %v11027_v6 = vpop.f32.mrb[81].mxu0  ;;  %v4619_v8 = vpop.f32.mrb[81].mxu1 }
 0x3a1   : > { %v12864_v9 = vpop.eup %12863  ;;  %v4756_v10 = vmul.f32 1.442695, %v4718_v2  ;;  %v4719_v11 = vmul.f32 0.5, %v15017_v3  ;;  %9955 = vst.msk [vmem:[%s14958_s29 + $0x38] sm:$0xff] %vm9947_vm2, %v15017_v3  ;;  %v11028_v12 = vadd.f32 %v11027_v6, %v11026_v4  ;;  %v11029_v13 = vpop.f32.mrb[82].mxu0 }
 0x3a2   : > { %v4620_v15 = vpop.f32.mrb[82].mxu1  ;;  %v11030_v19 = vpop.f32.mrb[83].mxu0  ;;  %4846 = vrot.lane.b32.xlu1 %v12864_v9, %s13827_s12 }
 0x3a3   : > { %v4622_v26 = vpop.f32.mrb[83].mxu1  ;;  %12869 = vpow2.f32 %v4756_v10  ;;  %v4758_v27 = vmul.f32 1.442695, %v4719_v11  ;;  %v4457_v29 = vadd.f32 %v11028_v12, %v14949_v48  ;;  %v11031_v30 = vadd.f32 %v11030_v19, %v11029_v13 }
 0x3a5   : > { %v12866_v31 = vpop.eup %12865  ;;  %12871 = vpow2.f32 %v4758_v27  ;;  %v15025_v32 = vadd.f32 %v4617_v5, %v4457_v29  ;;  %v4460_v22 = vadd.f32 %v11031_v30, %v14949_v48 }
 0x3a6   : > { %4848 = vrot.lane.b32.xlu0 %v12866_v31, %s13827_s12 }
 0x3a7   : > { %v12868_v33 = vpop.eup %12867  ;;  %v4720_v23 = vmul.f32 0.5, %v15025_v32  ;;  %9956 = vst.msk [vmem:[%s14958_s29 + $0x40] sm:$0xff] %vm9947_vm2, %v15025_v32  ;;  %v15033_v34 = vadd.f32 %v4620_v15, %v4460_v22  ;;  %v11032_v35 = vpop.f32.mrb[84].mxu0 }
 0x3a8   : > { %v4625_v36 = vpop.f32.mrb[84].mxu1  ;;  %v11033_v37 = vpop.f32.mrb[85].mxu0  ;;  %4850 = vrot.lane.b32.xlu1 %v12868_v33, %s13827_s12 }
 0x3a9   : > { %v4627_v24 = vpop.f32.mrb[85].mxu1  ;;  %v4760_v38 = vmul.f32 1.442695, %v4720_v23  ;;  %v4721_v25 = vmul.f32 0.5, %v15033_v34  ;;  %9957 = vst.msk [vmem:[%s14958_s29 + $0x48] sm:$0xff] %vm9947_vm2, %v15033_v34  ;;  %v11034_v39 = vadd.f32 %v11033_v37, %v11032_v35  ;;  %v11035_v40 = vpop.f32.mrb[86].mxu0 }
 0x3aa   : > { %v4628_v42 = vpop.f32.mrb[86].mxu1  ;;  %v11036_v43 = vpop.f32.mrb[87].mxu0 }
 0x3ab   : > { %v4630_v45 = vpop.f32.mrb[87].mxu1  ;;  %12873 = vpow2.f32 %v4760_v38  ;;  %v4762_v46 = vmul.f32 1.442695, %v4721_v25  ;;  %v4465_v47 = vadd.f32 %v11034_v39, %v14949_v48  ;;  %v11037_v49 = vadd.f32 %v11036_v43, %v11035_v40 }
 0x3ad   : > { %v12870_v50 = vpop.eup %12869  ;;  %12875 = vpow2.f32 %v4762_v46  ;;  %v15041_v51 = vadd.f32 %v4625_v36, %v4465_v47  ;;  %v4468_v52 = vadd.f32 %v11037_v49, %v14949_v48 }
 0x3ae   : > { %4852 = vrot.lane.b32.xlu0 %v12870_v50, %s13827_s12 }
 0x3af   : > { %v12872_v53 = vpop.eup %12871  ;;  %v4722_v54 = vmul.f32 0.5, %v15041_v51  ;;  %9958 = vst.msk [vmem:[%s14958_s29 + $0x50] sm:$0xff] %vm9947_vm2, %v15041_v51  ;;  %v15049_v55 = vadd.f32 %v4628_v42, %v4468_v52  ;;  %v11038_v56 = vpop.f32.mrb[88].mxu0 }
 0x3b0   : > { %v4633_v57 = vpop.f32.mrb[88].mxu1  ;;  %v11039_v59 = vpop.f32.mrb[89].mxu0  ;;  %4854 = vrot.lane.b32.xlu1 %v12872_v53, %s13827_s12 }
 0x3b1   : > { %v4635_v60 = vpop.f32.mrb[89].mxu1  ;;  %v4764_v62 = vmul.f32 1.442695, %v4722_v54  ;;  %v4723_v63 = vmul.f32 0.5, %v15049_v55  ;;  %9959 = vst.msk [vmem:[%s14958_s29 + $0x58] sm:$0xff] %vm9947_vm2, %v15049_v55  ;;  %v11040_v1 = vadd.f32 %v11039_v59, %v11038_v56  ;;  %v11041_v2 = vpop.f32.mrb[90].mxu0 }
 0x3b2   : > { %v4636_v4 = vpop.f32.mrb[90].mxu1  ;;  %v11042_v5 = vpop.f32.mrb[91].mxu0 }
 0x3b3   : > { %v4638_v6 = vpop.f32.mrb[91].mxu1  ;;  %12877 = vpow2.f32 %v4764_v62  ;;  %v4766_v8 = vmul.f32 1.442695, %v4723_v63  ;;  %v4473_v9 = vadd.f32 %v11040_v1, %v14949_v48  ;;  %v11043_v10 = vadd.f32 %v11042_v5, %v11041_v2 }
 0x3b5   : > { %v12874_v11 = vpop.eup %12873  ;;  %12879 = vpow2.f32 %v4766_v8  ;;  %v15057_v12 = vadd.f32 %v4633_v57, %v4473_v9  ;;  %v4476_v13 = vadd.f32 %v11043_v10, %v14949_v48 }
 0x3b6   : > { %4856 = vrot.lane.b32.xlu0 %v12874_v11, %s13827_s12 }
 0x3b7   : > { %v12876_v15 = vpop.eup %12875  ;;  %v4724_v19 = vmul.f32 0.5, %v15057_v12  ;;  %9960 = vst.msk [vmem:[%s14958_s29 + $0x60] sm:$0xff] %vm9947_vm2, %v15057_v12  ;;  %v15065_v26 = vadd.f32 %v4636_v4, %v4476_v13  ;;  %v11044_v27 = vpop.f32.mrb[92].mxu0 }
 0x3b8   : > { %v4641_v29 = vpop.f32.mrb[92].mxu1  ;;  %v11045_v30 = vpop.f32.mrb[93].mxu0  ;;  %4858 = vrot.lane.b32.xlu1 %v12876_v15, %s13827_s12 }
 0x3b9   : > { %v4643_v31 = vpop.f32.mrb[93].mxu1  ;;  %v4768_v22 = vmul.f32 1.442695, %v4724_v19  ;;  %v4725_v33 = vmul.f32 0.5, %v15065_v26  ;;  %9961 = vst.msk [vmem:[%s14958_s29 + $0x68] sm:$0xff] %vm9947_vm2, %v15065_v26  ;;  %v11046_v23 = vadd.f32 %v11045_v30, %v11044_v27  ;;  %v11047_v35 = vpop.f32.mrb[94].mxu0 }
 0x3ba   : > { %v4644_v36 = vpop.f32.mrb[94].mxu1  ;;  %v11048_v37 = vpop.f32.mrb[95].mxu0 }
 0x3bb   : > { %v4646_v24 = vpop.f32.mrb[95].mxu1  ;;  %12881 = vpow2.f32 %v4768_v22  ;;  %v4770_v38 = vmul.f32 1.442695, %v4725_v33  ;;  %v4481_v25 = vadd.f32 %v11046_v23, %v14949_v48  ;;  %v11049_v39 = vadd.f32 %v11048_v37, %v11047_v35 }
 0x3bd   : > { %v12878_v40 = vpop.eup %12877  ;;  %12883 = vpow2.f32 %v4770_v38  ;;  %v15073_v42 = vadd.f32 %v4641_v29, %v4481_v25  ;;  %v4484_v43 = vadd.f32 %v11049_v39, %v14949_v48 }
 0x3be   : > { %4860 = vrot.lane.b32.xlu0 %v12878_v40, %s13827_s12 }
 0x3bf   : > { %v12880_v45 = vpop.eup %12879  ;;  %v4726_v46 = vmul.f32 0.5, %v15073_v42  ;;  %9962 = vst.msk [vmem:[%s14958_s29 + $0x70] sm:$0xff] %vm9947_vm2, %v15073_v42  ;;  %v15081_v47 = vadd.f32 %v4644_v36, %v4484_v43  ;;  %v11050_v49 = vpop.f32.mrb[96].mxu0 }
 0x3c0   : > { %v4649_v50 = vpop.f32.mrb[96].mxu1  ;;  %v11051_v52 = vpop.f32.mrb[97].mxu0  ;;  %4862 = vrot.lane.b32.xlu1 %v12880_v45, %s13827_s12 }
 0x3c1   : > { %v4651_v53 = vpop.f32.mrb[97].mxu1  ;;  %v4772_v54 = vmul.f32 1.442695, %v4726_v46  ;;  %v4727_v56 = vmul.f32 0.5, %v15081_v47  ;;  %9963 = vst.msk [vmem:[%s14958_s29 + $0x78] sm:$0xff] %vm9947_vm2, %v15081_v47  ;;  %v11052_v57 = vadd.f32 %v11051_v52, %v11050_v49  ;;  %v11053_v59 = vpop.f32.mrb[98].mxu0 }
 0x3c2   : > { %v4652_v60 = vpop.f32.mrb[98].mxu1  ;;  %v11054_v62 = vpop.f32.mrb[99].mxu0 }
 0x3c3   : > { %v4654_v63 = vpop.f32.mrb[99].mxu1  ;;  %12885 = vpow2.f32 %v4772_v54  ;;  %v4774_v1 = vmul.f32 1.442695, %v4727_v56  ;;  %v4489_v2 = vadd.f32 %v11052_v57, %v14949_v48  ;;  %v11055_v4 = vadd.f32 %v11054_v62, %v11053_v59 }
 0x3c5   : > { %v12882_v5 = vpop.eup %12881  ;;  %12887 = vpow2.f32 %v4774_v1  ;;  %v15089_v6 = vadd.f32 %v4649_v50, %v4489_v2  ;;  %v4492_v8 = vadd.f32 %v11055_v4, %v14949_v48 }
 0x3c6   : > { %4864 = vrot.lane.b32.xlu0 %v12882_v5, %s13827_s12 }
 0x3c7   : > { %v12884_v9 = vpop.eup %12883  ;;  %v4728_v10 = vmul.f32 0.5, %v15089_v6  ;;  %9964 = vst.msk [vmem:[%s14958_s29 + $0x80] sm:$0xff] %vm9947_vm2, %v15089_v6  ;;  %v15097_v11 = vadd.f32 %v4652_v60, %v4492_v8  ;;  %v11056_v13 = vpop.f32.mrb[100].mxu0 }
 0x3c8   : > { %v4657_v15 = vpop.f32.mrb[100].mxu1  ;;  %v11057_v19 = vpop.f32.mrb[101].mxu0  ;;  %4866 = vrot.lane.b32.xlu1 %v12884_v9, %s13827_s12 }
 0x3c9   : > { %v4659_v27 = vpop.f32.mrb[101].mxu1  ;;  %v4776_v29 = vmul.f32 1.442695, %v4728_v10  ;;  %v4729_v30 = vmul.f32 0.5, %v15097_v11  ;;  %9965 = vst.msk [vmem:[%s14958_s29 + $0x88] sm:$0xff] %vm9947_vm2, %v15097_v11  ;;  %v11058_v31 = vadd.f32 %v11057_v19, %v11056_v13  ;;  %v11059_v22 = vpop.f32.mrb[102].mxu0 }
 0x3ca   : > { %v4660_v33 = vpop.f32.mrb[102].mxu1  ;;  %v11060_v23 = vpop.f32.mrb[103].mxu0 }
 0x3cb   : > { %v4662_v35 = vpop.f32.mrb[103].mxu1  ;;  %12889 = vpow2.f32 %v4776_v29  ;;  %v4778_v36 = vmul.f32 1.442695, %v4729_v30  ;;  %v4497_v37 = vadd.f32 %v11058_v31, %v14949_v48  ;;  %v11061_v24 = vadd.f32 %v11060_v23, %v11059_v22 }
 0x3cd   : > { %v12886_v38 = vpop.eup %12885  ;;  %12891 = vpow2.f32 %v4778_v36  ;;  %v15105_v25 = vadd.f32 %v4657_v15, %v4497_v37  ;;  %v4500_v39 = vadd.f32 %v11061_v24, %v14949_v48 }
 0x3ce   : > { %4868 = vrot.lane.b32.xlu0 %v12886_v38, %s13827_s12 }
 0x3cf   : > { %v12888_v40 = vpop.eup %12887  ;;  %v4730_v43 = vmul.f32 0.5, %v15105_v25  ;;  %9966 = vst.msk [vmem:[%s14958_s29 + $0x90] sm:$0xff] %vm9947_vm2, %v15105_v25  ;;  %v15113_v45 = vadd.f32 %v4660_v33, %v4500_v39  ;;  %v11062_v46 = vpop.f32.mrb[104].mxu0 }
 0x3d0   : > { %v4665_v49 = vpop.f32.mrb[104].mxu1  ;;  %v11063_v50 = vpop.f32.mrb[105].mxu0  ;;  %4870 = vrot.lane.b32.xlu1 %v12888_v40, %s13827_s12 }
 0x3d1   : > { %v4667_v52 = vpop.f32.mrb[105].mxu1  ;;  %v4780_v53 = vmul.f32 1.442695, %v4730_v43  ;;  %v4731_v54 = vmul.f32 0.5, %v15113_v45  ;;  %9967 = vst.msk [vmem:[%s14958_s29 + $0x98] sm:$0xff] %vm9947_vm2, %v15113_v45  ;;  %v11064_v56 = vadd.f32 %v11063_v50, %v11062_v46  ;;  %v11065_v57 = vpop.f32.mrb[106].mxu0 }
 0x3d2   : > { %v4668_v59 = vpop.f32.mrb[106].mxu1  ;;  %v11066_v60 = vpop.f32.mrb[107].mxu0 }
 0x3d3   : > { %v4670_v62 = vpop.f32.mrb[107].mxu1  ;;  %12893 = vpow2.f32 %v4780_v53  ;;  %v4782_v63 = vmul.f32 1.442695, %v4731_v54  ;;  %v4505_v1 = vadd.f32 %v11064_v56, %v14949_v48  ;;  %v11067_v2 = vadd.f32 %v11066_v60, %v11065_v57 }
 0x3d5   : > { %v12890_v4 = vpop.eup %12889  ;;  %12895 = vpow2.f32 %v4782_v63  ;;  %v15121_v5 = vadd.f32 %v4665_v49, %v4505_v1  ;;  %v4508_v8 = vadd.f32 %v11067_v2, %v14949_v48 }
 0x3d6   : > { %4872 = vrot.lane.b32.xlu0 %v12890_v4, %s13827_s12 }
 0x3d7   : > { %v12892_v9 = vpop.eup %12891  ;;  %v4732_v10 = vmul.f32 0.5, %v15121_v5  ;;  %9968 = vst.msk [vmem:[%s14958_s29 + $0xa0] sm:$0xff] %vm9947_vm2, %v15121_v5  ;;  %v15129_v13 = vadd.f32 %v4668_v59, %v4508_v8  ;;  %v11068_v15 = vpop.f32.mrb[108].mxu0 }
 0x3d8   : > { %v4673_v19 = vpop.f32.mrb[108].mxu1  ;;  %v11069_v27 = vpop.f32.mrb[109].mxu0  ;;  %4874 = vrot.lane.b32.xlu1 %v12892_v9, %s13827_s12 }
 0x3d9   : > { %v4675_v29 = vpop.f32.mrb[109].mxu1  ;;  %v4784_v30 = vmul.f32 1.442695, %v4732_v10  ;;  %v4733_v31 = vmul.f32 0.5, %v15129_v13  ;;  %9969 = vst.msk [vmem:[%s14958_s29 + $0xa8] sm:$0xff] %vm9947_vm2, %v15129_v13  ;;  %v11070_v22 = vadd.f32 %v11069_v27, %v11068_v15  ;;  %v11071_v33 = vpop.f32.mrb[110].mxu0 }
 0x3da   : > { %v4676_v23 = vpop.f32.mrb[110].mxu1  ;;  %v11072_v35 = vpop.f32.mrb[111].mxu0 }
 0x3db   : > { %v4678_v36 = vpop.f32.mrb[111].mxu1  ;;  %12897 = vpow2.f32 %v4784_v30  ;;  %v4786_v37 = vmul.f32 1.442695, %v4733_v31  ;;  %v4513_v24 = vadd.f32 %v11070_v22, %v14949_v48  ;;  %v11073_v38 = vadd.f32 %v11072_v35, %v11071_v33 }
 0x3dd   : > { %v12894_v39 = vpop.eup %12893  ;;  %12899 = vpow2.f32 %v4786_v37  ;;  %v15137_v40 = vadd.f32 %v4673_v19, %v4513_v24  ;;  %v4516_v43 = vadd.f32 %v11073_v38, %v14949_v48 }
 0x3de   : > { %4876 = vrot.lane.b32.xlu0 %v12894_v39, %s13827_s12 }
 0x3df   : > { %v12896_v46 = vpop.eup %12895  ;;  %v4734_v49 = vmul.f32 0.5, %v15137_v40  ;;  %9970 = vst.msk [vmem:[%s14958_s29 + $0xb0] sm:$0xff] %vm9947_vm2, %v15137_v40  ;;  %v15145_v50 = vadd.f32 %v4676_v23, %v4516_v43  ;;  %v11074_v52 = vpop.f32.mrb[112].mxu0 }
 0x3e0   : > { %v4681_v53 = vpop.f32.mrb[112].mxu1  ;;  %v11075_v54 = vpop.f32.mrb[113].mxu0  ;;  %4878 = vrot.lane.b32.xlu1 %v12896_v46, %s13827_s12 }
 0x3e1   : > { %v4683_v56 = vpop.f32.mrb[113].mxu1  ;;  %v4788_v57 = vmul.f32 1.442695, %v4734_v49  ;;  %v4735_v59 = vmul.f32 0.5, %v15145_v50  ;;  %9971 = vst.msk [vmem:[%s14958_s29 + $0xb8] sm:$0xff] %vm9947_vm2, %v15145_v50  ;;  %v11076_v60 = vadd.f32 %v11075_v54, %v11074_v52  ;;  %v11077_v62 = vpop.f32.mrb[114].mxu0 }
 0x3e2   : > { %v4684_v63 = vpop.f32.mrb[114].mxu1  ;;  %v11078_v1 = vpop.f32.mrb[115].mxu0 }
 0x3e3   : > { %v4686_v2 = vpop.f32.mrb[115].mxu1  ;;  %12901 = vpow2.f32 %v4788_v57  ;;  %v4790_v4 = vmul.f32 1.442695, %v4735_v59  ;;  %v4521_v8 = vadd.f32 %v11076_v60, %v14949_v48  ;;  %v11079_v9 = vadd.f32 %v11078_v1, %v11077_v62 }
 0x3e5   : > { %v12898_v10 = vpop.eup %12897  ;;  %12903 = vpow2.f32 %v4790_v4  ;;  %v15153_v15 = vadd.f32 %v4681_v53, %v4521_v8  ;;  %v4524_v19 = vadd.f32 %v11079_v9, %v14949_v48 }
 0x3e6   : > { %4880 = vrot.lane.b32.xlu0 %v12898_v10, %s13827_s12 }
 0x3e7   : > { %v12900_v27 = vpop.eup %12899  ;;  %v4736_v29 = vmul.f32 0.5, %v15153_v15  ;;  %9972 = vst.msk [vmem:[%s14958_s29 + $0xc0] sm:$0xff] %vm9947_vm2, %v15153_v15  ;;  %v15161_v30 = vadd.f32 %v4684_v63, %v4524_v19  ;;  %v11080_v31 = vpop.f32.mrb[116].mxu0 }
 0x3e8   : > { %v4689_v22 = vpop.f32.mrb[116].mxu1  ;;  %v11081_v33 = vpop.f32.mrb[117].mxu0  ;;  %4882 = vrot.lane.b32.xlu1 %v12900_v27, %s13827_s12 }
 0x3e9   : > { %v4691_v23 = vpop.f32.mrb[117].mxu1  ;;  %v4792_v35 = vmul.f32 1.442695, %v4736_v29  ;;  %v4737_v36 = vmul.f32 0.5, %v15161_v30  ;;  %9973 = vst.msk [vmem:[%s14958_s29 + $0xc8] sm:$0xff] %vm9947_vm2, %v15161_v30  ;;  %v11082_v37 = vadd.f32 %v11081_v33, %v11080_v31  ;;  %v11083_v24 = vpop.f32.mrb[118].mxu0 }
 0x3ea   : > { %v4692_v38 = vpop.f32.mrb[118].mxu1  ;;  %v11084_v39 = vpop.f32.mrb[119].mxu0  ;;  %v12609_v23 = vld [vmem:[%s17638_s8 + $0x4] ss:$28 sps:$4 sm:$0xff]  }
 0x3eb   : > { %v4694_v43 = vpop.f32.mrb[119].mxu1  ;;  %12905 = vpow2.f32 %v4792_v35  ;;  %v4794_v46 = vmul.f32 1.442695, %v4737_v36  ;;  %v4529_v49 = vadd.f32 %v11082_v37, %v14949_v48  ;;  %v11085_v52 = vadd.f32 %v11084_v39, %v11083_v24  ;;  %v12612_v35 = vld [vmem:[%s17638_s8 + $0xc] ss:$28 sps:$4 sm:$0xff]   ;;  %6899 = vmatprep.subr.bf16.mxu0 %v12609_v23 }
 0x3ec   : > { %7285 = vmatprep.subr.bf16.mxu1 %v12612_v35 }
 0x3ed   : > { %v12902_v53 = vpop.eup %12901  ;;  %12907 = vpow2.f32 %v4794_v46  ;;  %v15169_v54 = vadd.f32 %v4689_v22, %v4529_v49  ;;  %v4532_v56 = vadd.f32 %v11085_v52, %v14949_v48 }
 0x3ee   : > { %4884 = vrot.lane.b32.xlu0 %v12902_v53, %s13827_s12 }
 0x3ef   : > { %v12904_v57 = vpop.eup %12903  ;;  %v4738_v59 = vmul.f32 0.5, %v15169_v54  ;;  %9974 = vst.msk [vmem:[%s14958_s29 + $0xd0] sm:$0xff] %vm9947_vm2, %v15169_v54  ;;  %v15177_v60 = vadd.f32 %v4692_v38, %v4532_v56  ;;  %v11086_v62 = vpop.f32.mrb[120].mxu0 }
 0x3f0   : > { %v4697_v63 = vpop.f32.mrb[120].mxu1  ;;  %v11087_v1 = vpop.f32.mrb[121].mxu0  ;;  %4886 = vrot.lane.b32.xlu1 %v12904_v57, %s13827_s12 }
 0x3f1   : > { %v4699_v2 = vpop.f32.mrb[121].mxu1  ;;  %v4796_v4 = vmul.f32 1.442695, %v4738_v59  ;;  %v4739_v8 = vmul.f32 0.5, %v15177_v60  ;;  %9975 = vst.msk [vmem:[%s14958_s29 + $0xd8] sm:$0xff] %vm9947_vm2, %v15177_v60  ;;  %v11088_v9 = vadd.f32 %v11087_v1, %v11086_v62  ;;  %v11089_v10 = vpop.f32.mrb[122].mxu0 }
 0x3f2   : > { %v4700_v19 = vpop.f32.mrb[122].mxu1  ;;  %v11090_v27 = vpop.f32.mrb[123].mxu0 }
 0x3f3   : > { %v4702_v29 = vpop.f32.mrb[123].mxu1  ;;  %12909 = vpow2.f32 %v4796_v4  ;;  %v4798_v31 = vmul.f32 1.442695, %v4739_v8  ;;  %v4537_v22 = vadd.f32 %v11088_v9, %v14949_v48  ;;  %v11091_v33 = vadd.f32 %v11090_v27, %v11089_v10 }
 0x3f5   : > { %v12906_v36 = vpop.eup %12905  ;;  %12911 = vpow2.f32 %v4798_v31  ;;  %v15191_v37 = vadd.f32 %v4697_v63, %v4537_v22  ;;  %v4540_v24 = vadd.f32 %v11091_v33, %v14949_v48 }
 0x3f6   : > { %4888 = vrot.lane.b32.xlu0 %v12906_v36, %s13827_s12 }
 0x3f7   : > { %v12908_v38 = vpop.eup %12907  ;;  %v4740_v39 = vmul.f32 0.5, %v15191_v37  ;;  %9976 = vst.msk [vmem:[%s14958_s29 + $0xe0] sm:$0xff] %vm9947_vm2, %v15191_v37  ;;  %v15199_v43 = vadd.f32 %v4700_v19, %v4540_v24  ;;  %v11092_v46 = vpop.f32.mrb[124].mxu0  ;;  %v560_v24 = vld [vmem:[%s15227_s20] sm:$0xff] }
 0x3f8   : > { %v4705_v49 = vpop.f32.mrb[124].mxu1  ;;  %v11093_v52 = vpop.f32.mrb[125].mxu0  ;;  %4890 = vrot.lane.b32.xlu1 %v12908_v38, %s13827_s12 }
 0x3f9   : > { %v4707_v53 = vpop.f32.mrb[125].mxu1  ;;  %v4800_v56 = vmul.f32 1.442695, %v4740_v39  ;;  %v4741_v57 = vmul.f32 0.5, %v15199_v43  ;;  %9977 = vst.msk [vmem:[%s14958_s29 + $0xe8] sm:$0xff] %vm9947_vm2, %v15199_v43  ;;  %v11094_v59 = vadd.f32 %v11093_v52, %v11092_v46  ;;  %v11095_v62 = vpop.f32.mrb[126].mxu0 }
 0x3fa   : > { %v4708_v63 = vpop.f32.mrb[126].mxu1  ;;  %v11096_v1 = vpop.f32.mrb[127].mxu0  ;;  %v561_v39 = vld [vmem:[%s15227_s20 + $0x8] sm:$0xff] }
 0x3fb   : > { %v4710_v2 = vpop.f32.mrb[127].mxu1  ;;  %12913 = vpow2.f32 %v4800_v56  ;;  %v4802_v4 = vmul.f32 1.442695, %v4741_v57  ;;  %v4545_v8 = vadd.f32 %v11094_v59, %v14949_v48  ;;  %v11097_v9 = vadd.f32 %v11096_v1, %v11095_v62  ;;  %v562_v62 = vld [vmem:[%s15227_s20 + $0x10] sm:$0xff] }
 0x3fc   : > { %v12607_v2 = vld [vmem:[%s17638_s8] ss:$28 sps:$4 sm:$0xff]  }
 0x3fd   : > { %v12910_v10 = vpop.eup %12909  ;;  %12915 = vpow2.f32 %v4802_v4  ;;  %v15207_v19 = vadd.f32 %v4705_v49, %v4545_v8  ;;  %v4548_v27 = vadd.f32 %v11097_v9, %v14949_v48  ;;  %v12610_v4 = vld [vmem:[%s17638_s8 + $0x8] ss:$28 sps:$4 sm:$0xff]   ;;  %v563_v8 = vld [vmem:[%s15227_s20 + $0x18] sm:$0xff] }
 0x3fe   : > { %4892 = vrot.lane.b32.xlu0 %v12910_v10, %s13827_s12 }
 0x3ff   : > { %v12912_v29 = vpop.eup %12911  ;;  %v4742_v31 = vmul.f32 0.5, %v15207_v19  ;;  %9978 = vst.msk [vmem:[%s14958_s29 + $0xf0] sm:$0xff] %vm9947_vm2, %v15207_v19  ;;  %v15215_v22 = vadd.f32 %v4708_v63, %v4548_v27 }
 0x400   : > { %4894 = vrot.lane.b32.xlu1 %v12912_v29, %s13827_s12  ;;  %v12613_v29 = vld [vmem:[%s17638_s8 + $0x38] ss:$28 sps:$4 sm:$0xff]  }
 0x401   : > { %v4804_v33 = vmul.f32 1.442695, %v4742_v31  ;;  %v4743_v23 = vmul.f32 0.5, %v15215_v22  ;;  %9979 = vst.msk [vmem:[%s14958_s29 + $0xf8] sm:$0xff] %vm9947_vm2, %v15215_v22  ;;  %v12616_v31 = vld [vmem:[%s17638_s8 + $0x40] ss:$28 sps:$4 sm:$0xff]  }
 0x403   : > { %12917 = vpow2.f32 %v4804_v33  ;;  %v4806_v48 = vmul.f32 1.442695, %v4743_v23  ;;  %v12621_v33 = vld [vmem:[%s17638_s8 + $0x74] ss:$28 sps:$4 sm:$0xff]   ;;  %v12624_v23 = vld [vmem:[%s17638_s8 + $0x7c] ss:$28 sps:$4 sm:$0xff]  }
 0x405   : > { %v12914_v35 = vpop.eup %12913  ;;  %12919 = vpow2.f32 %v4806_v48 }
 0x406   : > { %4896 = vrot.lane.b32.xlu0 %v12914_v35, %s13827_s12 }
 0x407   : > { %v12916_v36 = vpop.eup %12915 }
 0x408   : > { %4898 = vrot.lane.b32.xlu1 %v12916_v36, %s13827_s12  ;;  %v4841_v38 = vpop.permute.xlu0 %4840  ;;  %v564_v36 = vld [vmem:[%s15227_s20 + $0x20] sm:$0xff] }
 0x409   : > { %v4936_v46 = vmul.f32 %v4841_v38, %v560_v24  ;;  %v565_v38 = vld [vmem:[%s15227_s20 + $0x28] sm:$0xff] }
 0x40b   : > { %v4968_v57 = vadd.f32 %v4936_v46, %v14960_v58  ;;  %v12615_v58 = vld [vmem:[%s17638_s8 + $0x3c] ss:$28 sps:$4 sm:$0xff]   ;;  %v12619_v46 = vld [vmem:[%s17638_s8 + $0x70] ss:$28 sps:$4 sm:$0xff]  }
 0x40c   : > { %v4843_v49 = vpop.permute.xlu0 %4842 }
 0x40d   : > { %v12918_v52 = vpop.eup %12917  ;;  %v4937_v53 = vmul.f32 %v4843_v49, %v561_v39  ;;  %v12622_v49 = vld [vmem:[%s17638_s8 + $0x78] ss:$28 sps:$4 sm:$0xff]  }
 0x40e   : > { %4900 = vrot.lane.b32.xlu0 %v12918_v52, %s13827_s12 }
 0x40f   : > { %v12920_v56 = vpop.eup %12919  ;;  %v4969_v59 = vadd.f32 %v4937_v53, %v14967_v61  ;;  %v12618_v61 = vld [vmem:[%s17638_s8 + $0x44] ss:$28 sps:$4 sm:$0xff]  }
 0x410   : > { %4902 = vrot.lane.b32.xlu1 %v12920_v56, %s13827_s12  ;;  %v4845_v63 = vpop.permute.xlu1 %4844 }
 0x411   : > { %v5000_v1 = vpack.c.bf16 %v4969_v59, %v4968_v57  ;;  %v4938_v9 = vmul.f32 %v4845_v63, %v562_v62  ;;  %v12625_v59 = vld [vmem:[%s17638_s8 + $0xa8] ss:$28 sps:$4 sm:$0xff]   ;;  %v12628_v62 = vld [vmem:[%s17638_s8 + $0xb0] ss:$28 sps:$4 sm:$0xff]  }
 0x412   : > { %v12633_v63 = vld [vmem:[%s17638_s8 + $0xe4] ss:$28 sps:$4 sm:$0xff]  }
 0x413   : > { %10488 = vmatmul.mubr.msk.bf16.vlgmr.msra.gmra.mrb[128].mxu0 %vm5074_vm3, %v5000_v1  ;;  %10505 = vmatmul.mubr.msk.bf16.vlgmr.msra.gmra.mrb[128].mxu1 %vm5074_vm3, %v5000_v1  ;;  %v4970_v48 = vadd.f32 %v4938_v9, %v14977_v14  ;;  %v12627_v14 = vld [vmem:[%s17638_s8 + $0xac] ss:$28 sps:$4 sm:$0xff]  }
 0x414   : > { %v4847_v10 = vpop.permute.xlu1 %4846  ;;  %5178 = vmatprep.mubr.bf16.mxu0 %v17642_v7  ;;  %5371 = vmatprep.mubr.bf16.mxu1 %v17642_v7  ;;  %v12634_v9 = vld [vmem:[%s17638_s8 + $0xe8] ss:$28 sps:$4 sm:$0xff]  }
 0x415   : > { %v4939_v27 = vmul.f32 %v4847_v10, %v563_v8  ;;  %6900 = vmatpush1.bf16.msra.mxu0 %v12607_v2  ;;  %7286 = vmatpush1.bf16.msra.mxu1 %v12610_v4  ;;  %v566_v2 = vld [vmem:[%s15227_s20 + $0x30] sm:$0xff]  ;;  %v567_v8 = vld [vmem:[%s15227_s20 + $0x38] sm:$0xff] }
 0x416   : > { %6901 = vmatprep.subr.bf16.mxu0 %v12615_v58  ;;  %7287 = vmatprep.subr.bf16.mxu1 %v12618_v61  ;;  %v12631_v61 = vld [vmem:[%s17638_s8 + $0xe0] ss:$28 sps:$4 sm:$0xff]  }
 0x417   : > { %v4971_v35 = vadd.f32 %v4939_v27, %v14984_v28  ;;  %v12630_v28 = vld [vmem:[%s17638_s8 + $0xb4] ss:$28 sps:$4 sm:$0xff]   ;;  %v12642_v27 = vld [vmem:[%s17638_s8 + $0x124] ss:$28 sps:$4 sm:$0xff]  }
 0x418   : > { %v4849_v24 = vpop.permute.xlu0 %4848 }
 0x419   : > { %v5001_v39 = vpack.c.bf16 %v4971_v35, %v4970_v48  ;;  %6902 = vmatpush1.bf16.msra.mxu0 %v12613_v29  ;;  %7288 = vmatpush1.bf16.msra.mxu1 %v12616_v31  ;;  %v4940_v53 = vmul.f32 %v4849_v24, %v564_v36  ;;  %v12640_v48 = vld [vmem:[%s17638_s8 + $0x120] ss:$28 sps:$4 sm:$0xff]   ;;  %v12645_v35 = vld [vmem:[%s17638_s8 + $0x154] ss:$28 sps:$4 sm:$0xff]  }
 0x41a   : > { %v4851_v52 = vpop.permute.xlu1 %4850  ;;  %6903 = vmatprep.subr.bf16.mxu0 %v12621_v33  ;;  %7289 = vmatprep.subr.bf16.mxu1 %v12624_v23  ;;  %v12637_v23 = vld [vmem:[%s17638_s8 + $0x118] ss:$28 sps:$4 sm:$0xff]   ;;  %v568_v24 = vld [vmem:[%s15227_s20 + $0x40] sm:$0xff] }
 0x41b   : > { %v4941_v56 = vmul.f32 %v4851_v52, %v565_v38  ;;  %10489 = vmatmul.mubr.msk.bf16.gmra.mrb[132].mxu0 %vm5074_vm3, %v5001_v39  ;;  %10506 = vmatmul.mubr.msk.bf16.gmra.mrb[132].mxu1 %vm5074_vm3, %v5001_v39  ;;  %v4972_v1 = vadd.f32 %v4940_v53, %v14993_v41  ;;  %v12639_v41 = vld [vmem:[%s17638_s8 + $0x11c] ss:$28 sps:$4 sm:$0xff]   ;;  %v569_v39 = vld [vmem:[%s15227_s20 + $0x48] sm:$0xff] }
 0x41c   : > { %5188 = vmatprep.mubr.bf16.mxu0 %v17642_v7  ;;  %5381 = vmatprep.mubr.bf16.mxu1 %v17642_v7  ;;  %v12646_v52 = vld [vmem:[%s17638_s8 + $0x158] ss:$28 sps:$4 sm:$0xff]  }
 0x41d   : > { %v4973_v57 = vadd.f32 %v4941_v56, %v15001_v44  ;;  %6904 = vmatpush1.bf16.msra.mxu0 %v12619_v46  ;;  %7290 = vmatpush1.bf16.msra.mxu1 %v12622_v49  ;;  %v12636_v44 = vld [vmem:[%s17638_s8 + $0xec] ss:$28 sps:$4 sm:$0xff]  }
 0x41e   : > { %6905 = vmatprep.subr.bf16.mxu0 %v12627_v14  ;;  %7291 = vmatprep.subr.bf16.mxu1 %v12630_v28  ;;  %v12643_v49 = vld [vmem:[%s17638_s8 + $0x150] ss:$28 sps:$4 sm:$0xff]  }
 0x41f   : > { %v5002_v58 = vpack.c.bf16 %v4973_v57, %v4972_v1  ;;  %v12654_v28 = vld [vmem:[%s17638_s8 + $0x194] ss:$28 sps:$4 sm:$0xff]  }
 0x420   : > { %v4853_v4 = vpop.permute.xlu0 %4852  ;;  %v570_v1 = vld [vmem:[%s15227_s20 + $0x50] sm:$0xff] }
 0x421   : > { %6906 = vmatpush1.bf16.msra.mxu0 %v12625_v59  ;;  %7292 = vmatpush1.bf16.msra.mxu1 %v12628_v62  ;;  %v4942_v29 = vmul.f32 %v4853_v4, %v566_v2  ;;  %v12649_v59 = vld [vmem:[%s17638_s8 + $0x188] ss:$28 sps:$4 sm:$0xff]   ;;  %v12652_v62 = vld [vmem:[%s17638_s8 + $0x190] ss:$28 sps:$4 sm:$0xff]   ;;  %v571_v4 = vld [vmem:[%s15227_s20 + $0x58] sm:$0xff] }
 0x422   : > { %v4855_v10 = vpop.permute.xlu1 %4854  ;;  %6907 = vmatprep.subr.bf16.mxu0 %v12633_v63  ;;  %7293 = vmatprep.subr.bf16.mxu1 %v12636_v44  ;;  %v12657_v63 = vld [vmem:[%s17638_s8 + $0x1c4] ss:$28 sps:$4 sm:$0xff]  }
 0x423   : > { %v4943_v31 = vmul.f32 %v4855_v10, %v567_v8  ;;  %10490 = vmatmul.mubr.msk.bf16.gmra.mrb[136].mxu0 %vm5074_vm3, %v5002_v58  ;;  %10507 = vmatmul.mubr.msk.bf16.gmra.mrb[136].mxu1 %vm5074_vm3, %v5002_v58  ;;  %v4974_v36 = vadd.f32 %v4942_v29, %v15009_v0  ;;  %v12651_v0 = vld [vmem:[%s17638_s8 + $0x18c] ss:$28 sps:$4 sm:$0xff]   ;;  %v12655_v58 = vld [vmem:[%s17638_s8 + $0x1c0] ss:$28 sps:$4 sm:$0xff]  }
 0x424   : > { %5198 = vmatprep.mubr.bf16.mxu0 %v17642_v7  ;;  %5391 = vmatprep.mubr.bf16.mxu1 %v17642_v7  ;;  %v12666_v10 = vld [vmem:[%s17638_s8 + $0x204] ss:$28 sps:$4 sm:$0xff]  }
 0x425   : > { %v4975_v33 = vadd.f32 %v4943_v31, %v15017_v3  ;;  %6908 = vmatpush1.bf16.msra.mxu0 %v12631_v61  ;;  %7294 = vmatpush1.bf16.msra.mxu1 %v12634_v9  ;;  %v12648_v3 = vld [vmem:[%s17638_s8 + $0x15c] ss:$28 sps:$4 sm:$0xff]   ;;  %v12658_v61 = vld [vmem:[%s17638_s8 + $0x1c8] ss:$28 sps:$4 sm:$0xff]  }
 0x426   : > { %6909 = vmatprep.subr.bf16.mxu0 %v12639_v41  ;;  %7295 = vmatprep.subr.bf16.mxu1 %v12642_v27  ;;  %v12661_v31 = vld [vmem:[%s17638_s8 + $0x1f8] ss:$28 sps:$4 sm:$0xff]  }
 0x427   : > { %v5003_v46 = vpack.c.bf16 %v4975_v33, %v4974_v36  ;;  %v12664_v33 = vld [vmem:[%s17638_s8 + $0x200] ss:$28 sps:$4 sm:$0xff]   ;;  %v573_v36 = vld [vmem:[%s15227_s20 + $0x68] sm:$0xff] }
 0x428   : > { %v4857_v38 = vpop.permute.xlu0 %4856 }
 0x429   : > { %6910 = vmatpush1.bf16.msra.mxu0 %v12637_v23  ;;  %7296 = vmatpush1.bf16.msra.mxu1 %v12640_v48  ;;  %v4944_v53 = vmul.f32 %v4857_v38, %v568_v24  ;;  %v12669_v23 = vld [vmem:[%s17638_s8 + $0x234] ss:$28 sps:$4 sm:$0xff]  }
 0x42a   : > { %v4859_v14 = vpop.permute.xlu1 %4858  ;;  %6911 = vmatprep.subr.bf16.mxu0 %v12645_v35  ;;  %7297 = vmatprep.subr.bf16.mxu1 %v12648_v3  ;;  %v572_v35 = vld [vmem:[%s15227_s20 + $0x60] sm:$0xff]  ;;  %v12667_v38 = vld [vmem:[%s17638_s8 + $0x230] ss:$28 sps:$4 sm:$0xff]  }
 0x42b   : > { %v4945_v56 = vmul.f32 %v4859_v14, %v569_v39  ;;  %10491 = vmatmul.mubr.msk.bf16.gmra.mrb[140].mxu0 %vm5074_vm3, %v5003_v46  ;;  %10508 = vmatmul.mubr.msk.bf16.gmra.mrb[140].mxu1 %vm5074_vm3, %v5003_v46  ;;  %v4976_v44 = vadd.f32 %v4944_v53, %v15025_v32  ;;  %v12663_v32 = vld [vmem:[%s17638_s8 + $0x1fc] ss:$28 sps:$4 sm:$0xff]   ;;  %v12676_v53 = vld [vmem:[%s17638_s8 + $0x270] ss:$28 sps:$4 sm:$0xff]  }
 0x42c   : > { %5208 = vmatprep.mubr.bf16.mxu0 %v17642_v7  ;;  %5401 = vmatprep.mubr.bf16.mxu1 %v17642_v7  ;;  %v12670_v39 = vld [vmem:[%s17638_s8 + $0x238] ss:$28 sps:$4 sm:$0xff]  }
 0x42d   : > { %v4977_v57 = vadd.f32 %v4945_v56, %v15033_v34  ;;  %6912 = vmatpush1.bf16.msra.mxu0 %v12643_v49  ;;  %7298 = vmatpush1.bf16.msra.mxu1 %v12646_v52  ;;  %v12660_v34 = vld [vmem:[%s17638_s8 + $0x1cc] ss:$28 sps:$4 sm:$0xff]   ;;  %v12678_v49 = vld [vmem:[%s17638_s8 + $0x274] ss:$28 sps:$4 sm:$0xff]   ;;  %v12681_v56 = vld [vmem:[%s17638_s8 + $0x2a4] ss:$28 sps:$4 sm:$0xff]  }
 0x42e   : > { %6913 = vmatprep.subr.bf16.mxu0 %v12651_v0  ;;  %7299 = vmatprep.subr.bf16.mxu1 %v12654_v28  ;;  %v12673_v28 = vld [vmem:[%s17638_s8 + $0x268] ss:$28 sps:$4 sm:$0xff]  }
 0x42f   : > { %v5004_v8 = vpack.c.bf16 %v4977_v57, %v4976_v44  ;;  %v12679_v44 = vld [vmem:[%s17638_s8 + $0x2a0] ss:$28 sps:$4 sm:$0xff]  }
 0x430   : > { %v4861_v2 = vpop.permute.xlu0 %4860 }
 0x431   : > { %6914 = vmatpush1.bf16.msra.mxu0 %v12649_v59  ;;  %7300 = vmatpush1.bf16.msra.mxu1 %v12652_v62  ;;  %v4946_v41 = vmul.f32 %v4861_v2, %v570_v1  ;;  %v574_v59 = vld [vmem:[%s15227_s20 + $0x70] sm:$0xff]  ;;  %v12682_v1 = vld [vmem:[%s17638_s8 + $0x2a8] ss:$28 sps:$4 sm:$0xff]  }
 0x432   : > { %v4863_v9 = vpop.permute.xlu1 %4862  ;;  %6915 = vmatprep.subr.bf16.mxu0 %v12657_v63  ;;  %7301 = vmatprep.subr.bf16.mxu1 %v12660_v34  ;;  %v575_v63 = vld [vmem:[%s15227_s20 + $0x78] sm:$0xff] }
 0x433   : > { %v4947_v27 = vmul.f32 %v4863_v9, %v571_v4  ;;  %10492 = vmatmul.mubr.msk.bf16.gmra.mrb[144].mxu0 %vm5074_vm3, %v5004_v8  ;;  %10509 = vmatmul.mubr.msk.bf16.gmra.mrb[144].mxu1 %vm5074_vm3, %v5004_v8  ;;  %v4978_v48 = vadd.f32 %v4946_v41, %v15041_v51  ;;  %v12675_v51 = vld [vmem:[%s17638_s8 + $0x26c] ss:$28 sps:$4 sm:$0xff]   ;;  %v12690_v4 = vld [vmem:[%s17638_s8 + $0x2e4] ss:$28 sps:$4 sm:$0xff]   ;;  %v12685_v9 = vld [vmem:[%s17638_s8 + $0x2d8] ss:$28 sps:$4 sm:$0xff]  }
 0x434   : > { %5218 = vmatprep.mubr.bf16.mxu0 %v17642_v7  ;;  %5411 = vmatprep.mubr.bf16.mxu1 %v17642_v7 }
 0x435   : > { %v4979_v29 = vadd.f32 %v4947_v27, %v15049_v55  ;;  %6916 = vmatpush1.bf16.msra.mxu0 %v12655_v58  ;;  %7302 = vmatpush1.bf16.msra.mxu1 %v12658_v61  ;;  %v12672_v55 = vld [vmem:[%s17638_s8 + $0x23c] ss:$28 sps:$4 sm:$0xff]   ;;  %v576_v27 = vld [vmem:[%s15227_s20 + $0x80] sm:$0xff] }
 0x436   : > { %6917 = vmatprep.subr.bf16.mxu0 %v12663_v32  ;;  %7303 = vmatprep.subr.bf16.mxu1 %v12666_v10  ;;  %v12688_v32 = vld [vmem:[%s17638_s8 + $0x2e0] ss:$28 sps:$4 sm:$0xff]   ;;  %v12693_v10 = vld [vmem:[%s17638_s8 + $0x314] ss:$28 sps:$4 sm:$0xff]  }
 0x437   : > { %v5005_v24 = vpack.c.bf16 %v4979_v29, %v4978_v48 }
 0x438   : > { %v4865_v3 = vpop.permute.xlu0 %4864 }
 0x439   : > { %6918 = vmatpush1.bf16.msra.mxu0 %v12661_v31  ;;  %7304 = vmatpush1.bf16.msra.mxu1 %v12664_v33  ;;  %v4948_v52 = vmul.f32 %v4865_v3, %v572_v35  ;;  %v577_v31 = vld [vmem:[%s15227_s20 + $0x88] sm:$0xff] }
 0x43a   : > { %v4867_v46 = vpop.permute.xlu1 %4866  ;;  %6919 = vmatprep.subr.bf16.mxu0 %v12669_v23  ;;  %7305 = vmatprep.subr.bf16.mxu1 %v12672_v55  ;;  %v12691_v23 = vld [vmem:[%s17638_s8 + $0x310] ss:$28 sps:$4 sm:$0xff]   ;;  %v12694_v55 = vld [vmem:[%s17638_s8 + $0x318] ss:$28 sps:$4 sm:$0xff]  }
 0x43b   : > { %v4949_v14 = vmul.f32 %v4867_v46, %v573_v36  ;;  %10493 = vmatmul.mubr.msk.bf16.gmra.mrb[148].mxu0 %vm5074_vm3, %v5005_v24  ;;  %10510 = vmatmul.mubr.msk.bf16.gmra.mrb[148].mxu1 %vm5074_vm3, %v5005_v24  ;;  %v4980_v57 = vadd.f32 %v4948_v52, %v15057_v12  ;;  %v12687_v12 = vld [vmem:[%s17638_s8 + $0x2dc] ss:$28 sps:$4 sm:$0xff]   ;;  %v578_v24 = vld [vmem:[%s15227_s20 + $0x90] sm:$0xff] }
 0x43c   : > { %5228 = vmatprep.mubr.bf16.mxu0 %v17642_v7  ;;  %5421 = vmatprep.mubr.bf16.mxu1 %v17642_v7 }
 0x43d   : > { %v4981_v0 = vadd.f32 %v4949_v14, %v15065_v26  ;;  %6920 = vmatpush1.bf16.msra.mxu0 %v12667_v38  ;;  %7306 = vmatpush1.bf16.msra.mxu1 %v12670_v39  ;;  %v12684_v26 = vld [vmem:[%s17638_s8 + $0x2ac] ss:$28 sps:$4 sm:$0xff]   ;;  %v579_v39 = vld [vmem:[%s15227_s20 + $0x98] sm:$0xff]  ;;  %v580_v14 = vld [vmem:[%s15227_s20 + $0xa0] sm:$0xff] }
 0x43e   : > { %6921 = vmatprep.subr.bf16.mxu0 %v12675_v51  ;;  %7307 = vmatprep.subr.bf16.mxu1 %v12678_v49 }
 0x43f   : > { %v5006_v34 = vpack.c.bf16 %v4981_v0, %v4980_v57 }
 0x440   : > { %v4869_v62 = vpop.permute.xlu0 %4868 }
 0x441   : > { %6922 = vmatpush1.bf16.msra.mxu0 %v12673_v28  ;;  %7308 = vmatpush1.bf16.msra.mxu1 %v12676_v53  ;;  %v4950_v8 = vmul.f32 %v4869_v62, %v574_v59  ;;  %v581_v28 = vld [vmem:[%s15227_s20 + $0xa8] sm:$0xff]  ;;  %v582_v59 = vld [vmem:[%s15227_s20 + $0xb0] sm:$0xff] }
 0x442   : > { %v4871_v2 = vpop.permute.xlu1 %4870  ;;  %6923 = vmatprep.subr.bf16.mxu0 %v12681_v56  ;;  %7309 = vmatprep.subr.bf16.mxu1 %v12684_v26 }
 0x443   : > { %v4951_v58 = vmul.f32 %v4871_v2, %v575_v63  ;;  %10494 = vmatmul.mubr.msk.bf16.gmra.mrb[152].mxu0 %vm5074_vm3, %v5006_v34  ;;  %10511 = vmatmul.mubr.msk.bf16.gmra.mrb[152].mxu1 %vm5074_vm3, %v5006_v34  ;;  %v4982_v41 = vadd.f32 %v4950_v8, %v15073_v42  ;;  %v583_v63 = vld [vmem:[%s15227_s20 + $0xb8] sm:$0xff]  ;;  %v585_v8 = vld [vmem:[%s15227_s20 + $0xc8] sm:$0xff] }
 0x444   : > { %5238 = vmatprep.mubr.bf16.mxu0 %v17642_v7  ;;  %5431 = vmatprep.mubr.bf16.mxu1 %v17642_v7 }
 0x445   : > { %v4983_v61 = vadd.f32 %v4951_v58, %v15081_v47  ;;  %6924 = vmatpush1.bf16.msra.mxu0 %v12679_v44  ;;  %7310 = vmatpush1.bf16.msra.mxu1 %v12682_v1  ;;  %v12696_v47 = vld [vmem:[%s17638_s8 + $0x31c] ss:$28 sps:$4 sm:$0xff]  }
 0x446   : > { %6925 = vmatprep.subr.bf16.mxu0 %v12687_v12  ;;  %7311 = vmatprep.subr.bf16.mxu1 %v12690_v4  ;;  %v584_v12 = vld [vmem:[%s15227_s20 + $0xc0] sm:$0xff] }
 0x447   : > { %v5007_v33 = vpack.c.bf16 %v4983_v61, %v4982_v41 }
 0x448   : > { %v4873_v29 = vpop.permute.xlu0 %4872 }
 0x449   : > { %6926 = vmatpush1.bf16.msra.mxu0 %v12685_v9  ;;  %7312 = vmatpush1.bf16.msra.mxu1 %v12688_v32  ;;  %v4952_v42 = vmul.f32 %v4873_v29, %v576_v27  ;;  %v586_v29 = vld [vmem:[%s15227_s20 + $0xd0] sm:$0xff] }
 0x44a   : > { %v4875_v48 = vpop.permute.xlu1 %4874  ;;  %6927 = vmatprep.subr.bf16.mxu0 %v12693_v10  ;;  %7313 = vmatprep.subr.bf16.mxu1 %v12696_v47  ;;  %v12699_v10 = vld [vmem:[%s17638_s8 + $0x34c] ss:$28 sps:$4 sm:$0xff]  }
 0x44b   : > { %v4953_v35 = vmul.f32 %v4875_v48, %v577_v31  ;;  %10495 = vmatmul.mubr.msk.bf16.gmra.mrb[156].mxu0 %vm5074_vm3, %v5007_v33  ;;  %10512 = vmatmul.mubr.msk.bf16.gmra.mrb[156].mxu1 %vm5074_vm3, %v5007_v33  ;;  %v4984_v36 = vadd.f32 %v4952_v42, %v15089_v6  ;;  %v12700_v47 = vld [vmem:[%s17638_s8 + $0x350] ss:$28 sps:$4 sm:$0xff]   ;;  %v587_v33 = vld [vmem:[%s15227_s20 + $0xd8] sm:$0xff] }
 0x44c   : > { %5248 = vmatprep.mubr.bf16.mxu0 %v17642_v7  ;;  %5441 = vmatprep.mubr.bf16.mxu1 %v17642_v7 }
 0x44d   : > { %v4985_v3 = vadd.f32 %v4953_v35, %v15097_v11  ;;  %6928 = vmatpush1.bf16.msra.mxu0 %v12691_v23  ;;  %7314 = vmatpush1.bf16.msra.mxu1 %v12694_v55 }
 0x44e   : > { %6929 = vmatprep.subr.bf16.mxu0 %v12699_v10 }
 0x44f   : > { %v5008_v46 = vpack.c.bf16 %v4985_v3, %v4984_v36  ;;  %v12708_v3 = vld [vmem:[%s17638_s8 + $0x38c] ss:$28 sps:$4 sm:$0xff]   ;;  %v588_v36 = vld [vmem:[%s15227_s20 + $0xe0] sm:$0xff] }
 0x450   : > { %v4877_v38 = vpop.permute.xlu0 %4876 }
 0x451   : > { %v4954_v49 = vmul.f32 %v4877_v38, %v578_v24  ;;  %v589_v38 = vld [vmem:[%s15227_s20 + $0xe8] sm:$0xff] }
 0x452   : > { %v4879_v51 = vpop.permute.xlu1 %4878 }
 0x453   : > { %v4955_v52 = vmul.f32 %v4879_v51, %v579_v39  ;;  %10496 = vmatmul.mubr.msk.bf16.gmra.mrb[160].mxu0 %vm5074_vm3, %v5008_v46  ;;  %10513 = vmatmul.mubr.msk.bf16.gmra.mrb[160].mxu1 %vm5074_vm3, %v5008_v46  ;;  %v4986_v6 = vadd.f32 %v4954_v49, %v15105_v25 }
 0x454   : > { %5258 = vmatprep.mubr.bf16.mxu0 %v17642_v7  ;;  %5451 = vmatprep.mubr.bf16.mxu1 %v17642_v7 }
 0x455   : > { %v4987_v11 = vadd.f32 %v4955_v52, %v15113_v45  ;;  %v590_v52 = vld [vmem:[%s15227_s20 + $0xf0] sm:$0xff] }
 0x457   : > { %v5009_v53 = vpack.c.bf16 %v4987_v11, %v4986_v6  ;;  %v591_v6 = vld [vmem:[%s15227_s20 + $0xf8] sm:$0xff] }
 0x458   : > { %v4881_v0 = vpop.permute.xlu0 %4880 }
 0x459   : > { %v4956_v26 = vmul.f32 %v4881_v0, %v580_v14 }
 0x45a   : > { %v4883_v56 = vpop.permute.xlu1 %4882 }
 0x45b   : > { %v4957_v57 = vmul.f32 %v4883_v56, %v581_v28  ;;  %10497 = vmatmul.mubr.msk.bf16.gmra.mrb[164].mxu0 %vm5074_vm3, %v5009_v53  ;;  %10514 = vmatmul.mubr.msk.bf16.gmra.mrb[164].mxu1 %vm5074_vm3, %v5009_v53  ;;  %v4988_v25 = vadd.f32 %v4956_v26, %v15121_v5  ;;  %v5022_v26 = vld [vmem:[%s17637_s7] sm:$0xf] }
 0x45c   : > { %5268 = vmatprep.mubr.bf16.mxu0 %v17642_v7  ;;  %5461 = vmatprep.mubr.bf16.mxu1 %v17642_v7 }
 0x45d   : > { %v4989_v45 = vadd.f32 %v4957_v57, %v15129_v13  ;;  %v15555_v57 = vrot.slane %v5022_v26, %v14757_v17 }
 0x45f   : > { %v5010_v34 = vpack.c.bf16 %v4989_v45, %v4988_v25  ;;  %v15558_v45 = vrot.slane %v5022_v26, %v14760_v18  ;;  %v15561_v25 = vrot.slane %v5022_v26, %v14766_v20 }
 0x460   : > { %v4885_v62 = vpop.permute.xlu0 %4884 }
 0x461   : > { %v4958_v1 = vmul.f32 %v4885_v62, %v582_v59 }
 0x462   : > { %v4887_v44 = vpop.permute.xlu1 %4886 }
 0x463   : > { %v4959_v2 = vmul.f32 %v4887_v44, %v583_v63  ;;  %10498 = vmatmul.mubr.msk.bf16.gmra.mrb[168].mxu0 %vm5074_vm3, %v5010_v34  ;;  %10515 = vmatmul.mubr.msk.bf16.gmra.mrb[168].mxu1 %vm5074_vm3, %v5010_v34  ;;  %v4990_v5 = vadd.f32 %v4958_v1, %v15137_v40  ;;  %v12702_v40 = vld [vmem:[%s17638_s8 + $0x354] ss:$28 sps:$4 sm:$0xff]  }
 0x464   : > { %5278 = vmatprep.mubr.bf16.mxu0 %v17642_v7  ;;  %5471 = vmatprep.mubr.bf16.mxu1 %v17642_v7 }
 0x465   : > { %v4991_v13 = vadd.f32 %v4959_v2, %v15145_v50  ;;  %v12697_v50 = vld [vmem:[%s17638_s8 + $0x348] ss:$28 sps:$4 sm:$0xff]   ;;  %7315 = vmatprep.subr.bf16.mxu1 %v12702_v40 }
 0x466   : > { %6930 = vmatpush1.bf16.msra.mxu0 %v12697_v50  ;;  %7316 = vmatpush1.bf16.msra.mxu1 %v12700_v47 }
 0x467   : > { %v5011_v58 = vpack.c.bf16 %v4991_v13, %v4990_v5  ;;  %7478 = vmatprep.subr.bf16.mxu1 %v12708_v3 }
 0x468   : > { %v4889_v4 = vpop.permute.xlu0 %4888 }
 0x469   : > { %v4960_v9 = vmul.f32 %v4889_v4, %v584_v12 }
 0x46a   : > { %v4891_v61 = vpop.permute.xlu1 %4890 }
 0x46b   : > { %v4961_v32 = vmul.f32 %v4891_v61, %v585_v8  ;;  %10499 = vmatmul.mubr.msk.bf16.gmra.mrb[172].mxu0 %vm5074_vm3, %v5011_v58  ;;  %10516 = vmatmul.mubr.msk.bf16.gmra.mrb[172].mxu1 %vm5074_vm3, %v5011_v58  ;;  %v4992_v27 = vadd.f32 %v4960_v9, %v15153_v15  ;;  %v12705_v15 = vld [vmem:[%s17638_s8 + $0x384] ss:$28 sps:$4 sm:$0xff]  }
 0x46c   : > { %5288 = vmatprep.mubr.bf16.mxu0 %v17642_v7  ;;  %5481 = vmatprep.mubr.bf16.mxu1 %v17642_v7 }
 0x46d   : > { %v4993_v41 = vadd.f32 %v4961_v32, %v15161_v30  ;;  %7092 = vmatprep.subr.bf16.mxu0 %v12705_v15  ;;  %v12706_v15 = vld [vmem:[%s17638_s8 + $0x388] ss:$28 sps:$4 sm:$0xff]  }
 0x46f   : > { %v5012_v23 = vpack.c.bf16 %v4993_v41, %v4992_v27 }
 0x470   : > { %v4893_v31 = vpop.permute.xlu0 %4892 }
 0x471   : > { %v4962_v48 = vmul.f32 %v4893_v31, %v586_v29 }
 0x472   : > { %v4895_v55 = vpop.permute.xlu1 %4894 }
 0x473   : > { %v4963_v42 = vmul.f32 %v4895_v55, %v587_v33  ;;  %10500 = vmatmul.mubr.msk.bf16.gmra.mrb[176].mxu0 %vm5074_vm3, %v5012_v23  ;;  %10517 = vmatmul.mubr.msk.bf16.gmra.mrb[176].mxu1 %vm5074_vm3, %v5012_v23  ;;  %v4994_v35 = vadd.f32 %v4962_v48, %v15169_v54 }
 0x474   : > { %5298 = vmatprep.mubr.bf16.mxu0 %v17642_v7  ;;  %5491 = vmatprep.mubr.bf16.mxu1 %v17642_v7 }
 0x475   : > { %v4995_v30 = vadd.f32 %v4963_v42, %v15177_v60 }
 0x477   : > { %v5013_v39 = vpack.c.bf16 %v4995_v30, %v4994_v35  ;;  %v12703_v30 = vld [vmem:[%s17638_s8 + $0x380] ss:$28 sps:$4 sm:$0xff]  }
 0x478   : > { %v4897_v24 = vpop.permute.xlu0 %4896 }
 0x479   : > { %v4964_v60 = vmul.f32 %v4897_v24, %v588_v36 }
 0x47a   : > { %v4899_v46 = vpop.permute.xlu1 %4898 }
 0x47b   : > { %v4965_v51 = vmul.f32 %v4899_v46, %v589_v38  ;;  %10501 = vmatmul.mubr.msk.bf16.gmra.mrb[180].mxu0 %vm5074_vm3, %v5013_v39  ;;  %10518 = vmatmul.mubr.msk.bf16.gmra.mrb[180].mxu1 %vm5074_vm3, %v5013_v39  ;;  %v4996_v49 = vadd.f32 %v4964_v60, %v15191_v37  ;;  %v12711_v38 = vld [vmem:[%s17638_s8 + $0x3bc] ss:$28 sps:$4 sm:$0xff]   ;;  %v12714_v39 = vld [vmem:[%s17638_s8 + $0x3c4] ss:$28 sps:$4 sm:$0xff]  }
 0x47c   : > { %5308 = vmatprep.mubr.bf16.mxu0 %v17642_v7  ;;  %5501 = vmatprep.mubr.bf16.mxu1 %v17642_v7 }
 0x47d   : > { %v4997_v54 = vadd.f32 %v4965_v51, %v15199_v43 }
 0x47f   : > { %v5014_v14 = vpack.c.bf16 %v4997_v54, %v4996_v49 }
 0x480   : > { %v4901_v11 = vpop.permute.xlu0 %4900 }
 0x481   : > { %v4966_v28 = vmul.f32 %v4901_v11, %v590_v52 }
 0x482   : > { %v4903_v0 = vpop.permute.xlu1 %4902 }
 0x483   : > { %v4967_v53 = vmul.f32 %v4903_v0, %v591_v6  ;;  %10502 = vmatmul.mubr.msk.bf16.gmra.mrb[184].mxu0 %vm5074_vm3, %v5014_v14  ;;  %10519 = vmatmul.mubr.msk.bf16.gmra.mrb[184].mxu1 %vm5074_vm3, %v5014_v14  ;;  %v4998_v43 = vadd.f32 %v4966_v28, %v15207_v19  ;;  %v15564_v19 = vrot.slane %v5022_v26, %v14769_v21  ;;  %v12709_v28 = vld [vmem:[%s17638_s8 + $0x3b8] ss:$28 sps:$4 sm:$0xff]  }
 0x484   : > { %5318 = vmatprep.mubr.bf16.mxu0 %v17642_v7  ;;  %5511 = vmatprep.mubr.bf16.mxu1 %v17642_v7 }
 0x485   : > { %v4999_v56 = vadd.f32 %v4967_v53, %v15215_v22  ;;  %v12712_v53 = vld [vmem:[%s17638_s8 + $0x3c0] ss:$28 sps:$4 sm:$0xff]  }
 0x487   : > { %v5015_v37 = vpack.c.bf16 %v4999_v56, %v4998_v43  ;;  %v12717_v56 = vld [vmem:[%s17638_s8 + $0x3f4] ss:$28 sps:$4 sm:$0xff]  }
 0x48b   : > { %10503 = vmatmul.mubr.msk.bf16.gmra.mrb[188].mxu0 %vm5074_vm3, %v5015_v37  ;;  %10520 = vmatmul.mubr.msk.bf16.gmra.mrb[188].mxu1 %vm5074_vm3, %v5015_v37 }
 0x4e6   : > { %v5170_v22 = vpop.f32.mrb[128].mxu0  ;;  %v5363_v59 = vpop.f32.mrb[128].mxu1 }
 0x4e7   : > { %v5171_v62 = vadd.f32 %v5170_v22, %v15555_v57  ;;  %v5364_v63 = vadd.f32 %v5363_v59, %v15558_v45  ;;  %v5172_v34 = vpop.f32.mrb[129].mxu0  ;;  %v5365_v44 = vpop.f32.mrb[129].mxu1  ;;  %v12720_v59 = vld [vmem:[%s17638_s8 + $0x3fc] ss:$28 sps:$4 sm:$0xff]  }
 0x4e8   : > { %v5173_v1 = vadd.f32 %v5172_v34, %v15561_v25  ;;  %v5366_v2 = vadd.f32 %v5365_v44, %v15564_v19  ;;  %v5174_v13 = vpop.f32.mrb[130].mxu0  ;;  %v5367_v5 = vpop.f32.mrb[130].mxu1 }
 0x4e9   : > { %v5175_v12 = vadd.f32 %v5174_v13, %v15555_v57  ;;  %v5368_v4 = vadd.f32 %v5367_v5, %v15558_v45  ;;  %v5176_v8 = vpop.f32.mrb[131].mxu0  ;;  %v5369_v58 = vpop.f32.mrb[131].mxu1  ;;  %v5522_v32 = vmax.f32 %v5171_v62, 0.0  ;;  %v5524_v10 = vmax.f32 %v5364_v63, 0.0 }
 0x4ea   : > { %v5177_v61 = vadd.f32 %v5176_v8, %v15561_v25  ;;  %v5370_v9 = vadd.f32 %v5369_v58, %v15564_v19  ;;  %v5523_v47 = vmax.f32 %v5173_v1, 0.0  ;;  %v5525_v41 = vmax.f32 %v5366_v2, 0.0  ;;  %v12715_v8 = vld [vmem:[%s17638_s8 + $0x3f0] ss:$28 sps:$4 sm:$0xff]   ;;  %v12718_v58 = vld [vmem:[%s17638_s8 + $0x3f8] ss:$28 sps:$4 sm:$0xff]  }
 0x4eb   : > { %v5526_v40 = vmax.f32 %v5175_v12, 0.0  ;;  %v5528_v50 = vmax.f32 %v5368_v4, 0.0 }
 0x4ec   : > { %v5527_v27 = vmax.f32 %v5177_v61, 0.0  ;;  %v5529_v29 = vmax.f32 %v5370_v9, 0.0 }
 0x4ed   : > { %v15574_v31 = vpack.c.bf16 %v5526_v40, %v5522_v32  ;;  %v15576_v33 = vpack.c.bf16 %v5528_v50, %v5524_v10  ;;  %v12723_v40 = vld [vmem:[%s17638_s8 + $0x42c] ss:$28 sps:$4 sm:$0xff]   ;;  %v12726_v50 = vld [vmem:[%s17638_s8 + $0x434] ss:$28 sps:$4 sm:$0xff]  }
 0x4ee   : > { %v15578_v23 = vpack.c.bf16 %v5527_v27, %v5523_v47  ;;  %v15580_v55 = vpack.c.bf16 %v5529_v29, %v5525_v41  ;;  %v5180_v48 = vpop.f32.mrb[132].mxu0  ;;  %v5373_v42 = vpop.f32.mrb[132].mxu1 }
 0x4ef   : > { %v5181_v35 = vadd.f32 %v5180_v48, %v15555_v57  ;;  %v5374_v3 = vadd.f32 %v5373_v42, %v15558_v45  ;;  %v5182_v36 = vpop.f32.mrb[133].mxu0  ;;  %v5375_v24 = vpop.f32.mrb[133].mxu1 }
 0x4f0   : > { %v5183_v46 = vadd.f32 %v5182_v36, %v15561_v25  ;;  %v5376_v60 = vadd.f32 %v5375_v24, %v15564_v19  ;;  %v5184_v51 = vpop.f32.mrb[134].mxu0  ;;  %v5377_v54 = vpop.f32.mrb[134].mxu1  ;;  %6931 = vmatprep.mubr.bf16.mxu0 %v15578_v23  ;;  %7317 = vmatprep.mubr.bf16.mxu1 %v15578_v23  ;;  %v12721_v36 = vld [vmem:[%s17638_s8 + $0x428] ss:$28 sps:$4 sm:$0xff]   ;;  %v12724_v24 = vld [vmem:[%s17638_s8 + $0x430] ss:$28 sps:$4 sm:$0xff]  }
 0x4f1   : > { %v5185_v49 = vadd.f32 %v5184_v51, %v15555_v57  ;;  %v5378_v52 = vadd.f32 %v5377_v54, %v15558_v45  ;;  %v5186_v11 = vpop.f32.mrb[135].mxu0  ;;  %v5379_v6 = vpop.f32.mrb[135].mxu1  ;;  %6932 = vmatmul.mubr.bf16.vlgmr.msra.gmra.mrb[192].mxu0 %v15574_v31  ;;  %7318 = vmatmul.mubr.bf16.vlgmr.msra.gmra.mrb[192].mxu1 %v15574_v31  ;;  %v5530_v43 = vmax.f32 %v5181_v35, 0.0  ;;  %v5532_v37 = vmax.f32 %v5374_v3, 0.0  ;;  %v12732_v54 = vld [vmem:[%s17638_s8 + $0x46c] ss:$28 sps:$4 sm:$0xff]  }
 0x4f2   : > { %v5187_v14 = vadd.f32 %v5186_v11, %v15561_v25  ;;  %v5380_v0 = vadd.f32 %v5379_v6, %v15564_v19  ;;  %7093 = vmatpush1.bf16.msra.mxu0 %v12703_v30  ;;  %7479 = vmatpush1.bf16.msra.mxu1 %v12706_v15  ;;  %v5531_v62 = vmax.f32 %v5183_v46, 0.0  ;;  %v5533_v63 = vmax.f32 %v5376_v60, 0.0 }
 0x4f3   : > { %v5534_v26 = vmax.f32 %v5185_v49, 0.0  ;;  %v5536_v22 = vmax.f32 %v5378_v52, 0.0  ;;  %7094 = vmatprep.subr.bf16.mxu0 %v12711_v38  ;;  %7480 = vmatprep.subr.bf16.mxu1 %v12714_v39  ;;  %v12729_v38 = vld [vmem:[%s17638_s8 + $0x464] ss:$28 sps:$4 sm:$0xff]  }
 0x4f4   : > { %v5535_v34 = vmax.f32 %v5187_v14, 0.0  ;;  %v5537_v44 = vmax.f32 %v5380_v0, 0.0 }
 0x4f5   : > { %v15618_v1 = vpack.c.bf16 %v5534_v26, %v5530_v43  ;;  %v15620_v2 = vpack.c.bf16 %v5536_v22, %v5532_v37  ;;  %v12727_v37 = vld [vmem:[%s17638_s8 + $0x460] ss:$28 sps:$4 sm:$0xff]   ;;  %v12730_v26 = vld [vmem:[%s17638_s8 + $0x468] ss:$28 sps:$4 sm:$0xff]  }
 0x4f6   : > { %v15622_v13 = vpack.c.bf16 %v5535_v34, %v5531_v62  ;;  %v15624_v5 = vpack.c.bf16 %v5537_v44, %v5533_v63  ;;  %v5190_v12 = vpop.f32.mrb[136].mxu0  ;;  %v5383_v4 = vpop.f32.mrb[136].mxu1  ;;  %7095 = vmatpush1.bf16.msra.mxu0 %v12709_v28  ;;  %7481 = vmatpush1.bf16.msra.mxu1 %v12712_v53  ;;  %v12735_v34 = vld [vmem:[%s17638_s8 + $0x49c] ss:$28 sps:$4 sm:$0xff]   ;;  %v12738_v44 = vld [vmem:[%s17638_s8 + $0x4a4] ss:$28 sps:$4 sm:$0xff]  }
 0x4f7   : > { %v5191_v61 = vadd.f32 %v5190_v12, %v15555_v57  ;;  %v5384_v9 = vadd.f32 %v5383_v4, %v15558_v45  ;;  %v5192_v32 = vpop.f32.mrb[137].mxu0  ;;  %v5385_v10 = vpop.f32.mrb[137].mxu1  ;;  %7096 = vmatprep.subr.bf16.mxu0 %v12717_v56  ;;  %7482 = vmatprep.subr.bf16.mxu1 %v12720_v59 }
 0x4f8   : > { %v5193_v47 = vadd.f32 %v5192_v32, %v15561_v25  ;;  %v5386_v41 = vadd.f32 %v5385_v10, %v15564_v19  ;;  %v5194_v27 = vpop.f32.mrb[138].mxu0  ;;  %v5387_v29 = vpop.f32.mrb[138].mxu1  ;;  %6941 = vmatprep.mubr.bf16.mxu0 %v15622_v13  ;;  %7327 = vmatprep.mubr.bf16.mxu1 %v15622_v13 }
 0x4f9   : > { %v5195_v48 = vadd.f32 %v5194_v27, %v15555_v57  ;;  %v5388_v42 = vadd.f32 %v5387_v29, %v15558_v45  ;;  %v5196_v30 = vpop.f32.mrb[139].mxu0  ;;  %v5389_v15 = vpop.f32.mrb[139].mxu1  ;;  %6942 = vmatmul.mubr.bf16.gmra.mrb[196].mxu0 %v15618_v1  ;;  %7328 = vmatmul.mubr.bf16.gmra.mrb[196].mxu1 %v15618_v1  ;;  %v5538_v39 = vmax.f32 %v5191_v61, 0.0  ;;  %v5540_v46 = vmax.f32 %v5384_v9, 0.0  ;;  %v12741_v27 = vld [vmem:[%s17638_s8 + $0x4d4] ss:$28 sps:$4 sm:$0xff]  }
 0x4fa   : > { %v5197_v35 = vadd.f32 %v5196_v30, %v15561_v25  ;;  %v5390_v3 = vadd.f32 %v5389_v15, %v15564_v19  ;;  %7097 = vmatpush1.bf16.msra.mxu0 %v12715_v8  ;;  %7483 = vmatpush1.bf16.msra.mxu1 %v12718_v58  ;;  %v5539_v49 = vmax.f32 %v5193_v47, 0.0  ;;  %v5541_v52 = vmax.f32 %v5386_v41, 0.0  ;;  %v12733_v47 = vld [vmem:[%s17638_s8 + $0x498] ss:$28 sps:$4 sm:$0xff]   ;;  %v12736_v41 = vld [vmem:[%s17638_s8 + $0x4a0] ss:$28 sps:$4 sm:$0xff]  }
 0x4fb   : > { %v5542_v60 = vmax.f32 %v5195_v48, 0.0  ;;  %v5544_v51 = vmax.f32 %v5388_v42, 0.0  ;;  %7098 = vmatprep.subr.bf16.mxu0 %v12723_v40  ;;  %7484 = vmatprep.subr.bf16.mxu1 %v12726_v50  ;;  %v12744_v15 = vld [vmem:[%s17638_s8 + $0x4dc] ss:$28 sps:$4 sm:$0xff]  }
 0x4fc   : > { %v5543_v11 = vmax.f32 %v5197_v35, 0.0  ;;  %v5545_v6 = vmax.f32 %v5390_v3, 0.0 }
 0x4fd   : > { %v15662_v14 = vpack.c.bf16 %v5542_v60, %v5538_v39  ;;  %v15664_v0 = vpack.c.bf16 %v5544_v51, %v5540_v46 }
 0x4fe   : > { %v15666_v28 = vpack.c.bf16 %v5543_v11, %v5539_v49  ;;  %v15668_v53 = vpack.c.bf16 %v5545_v6, %v5541_v52  ;;  %v5200_v56 = vpop.f32.mrb[140].mxu0  ;;  %v5393_v43 = vpop.f32.mrb[140].mxu1  ;;  %7099 = vmatpush1.bf16.msra.mxu0 %v12721_v36  ;;  %7485 = vmatpush1.bf16.msra.mxu1 %v12724_v24  ;;  %v12739_v49 = vld [vmem:[%s17638_s8 + $0x4d0] ss:$28 sps:$4 sm:$0xff]   ;;  %v12742_v52 = vld [vmem:[%s17638_s8 + $0x4d8] ss:$28 sps:$4 sm:$0xff]  }
 0x4ff   : > { %v5201_v22 = vadd.f32 %v5200_v56, %v15555_v57  ;;  %v5394_v59 = vadd.f32 %v5393_v43, %v15558_v45  ;;  %v5202_v62 = vpop.f32.mrb[141].mxu0  ;;  %v5395_v63 = vpop.f32.mrb[141].mxu1  ;;  %7100 = vmatprep.subr.bf16.mxu0 %v12729_v38  ;;  %7486 = vmatprep.subr.bf16.mxu1 %v12732_v54 }
 0x500   : > { %v5203_v12 = vadd.f32 %v5202_v62, %v15561_v25  ;;  %v5396_v4 = vadd.f32 %v5395_v63, %v15564_v19  ;;  %v5204_v8 = vpop.f32.mrb[142].mxu0  ;;  %v5397_v58 = vpop.f32.mrb[142].mxu1  ;;  %6951 = vmatprep.mubr.bf16.mxu0 %v15666_v28  ;;  %7337 = vmatprep.mubr.bf16.mxu1 %v15666_v28 }
 0x501   : > { %v5205_v61 = vadd.f32 %v5204_v8, %v15555_v57  ;;  %v5398_v9 = vadd.f32 %v5397_v58, %v15558_v45  ;;  %v5206_v32 = vpop.f32.mrb[143].mxu0  ;;  %v5399_v10 = vpop.f32.mrb[143].mxu1  ;;  %6952 = vmatmul.mubr.bf16.gmra.mrb[200].mxu0 %v15662_v14  ;;  %7338 = vmatmul.mubr.bf16.gmra.mrb[200].mxu1 %v15662_v14  ;;  %v5546_v29 = vmax.f32 %v5201_v22, 0.0  ;;  %v5548_v48 = vmax.f32 %v5394_v59, 0.0 }
 0x502   : > { %v5207_v40 = vadd.f32 %v5206_v32, %v15561_v25  ;;  %v5400_v50 = vadd.f32 %v5399_v10, %v15564_v19  ;;  %7101 = vmatpush1.bf16.msra.mxu0 %v12727_v37  ;;  %7487 = vmatpush1.bf16.msra.mxu1 %v12730_v26  ;;  %v5547_v35 = vmax.f32 %v5203_v12, 0.0  ;;  %v5549_v3 = vmax.f32 %v5396_v4, 0.0  ;;  %v12747_v37 = vld [vmem:[%s17638_s8 + $0x50c] ss:$28 sps:$4 sm:$0xff]   ;;  %v12750_v26 = vld [vmem:[%s17638_s8 + $0x514] ss:$28 sps:$4 sm:$0xff]  }
 0x503   : > { %v5550_v42 = vmax.f32 %v5205_v61, 0.0  ;;  %v5552_v30 = vmax.f32 %v5398_v9, 0.0  ;;  %7102 = vmatprep.subr.bf16.mxu0 %v12735_v34  ;;  %7488 = vmatprep.subr.bf16.mxu1 %v12738_v44  ;;  %v12745_v61 = vld [vmem:[%s17638_s8 + $0x508] ss:$28 sps:$4 sm:$0xff]   ;;  %v12748_v9 = vld [vmem:[%s17638_s8 + $0x510] ss:$28 sps:$4 sm:$0xff]  }
 0x504   : > { %v5551_v36 = vmax.f32 %v5207_v40, 0.0  ;;  %v5553_v24 = vmax.f32 %v5400_v50, 0.0  ;;  %v12753_v32 = vld [vmem:[%s17638_s8 + $0x544] ss:$28 sps:$4 sm:$0xff]  }
 0x505   : > { %v15706_v38 = vpack.c.bf16 %v5550_v42, %v5546_v29  ;;  %v15708_v39 = vpack.c.bf16 %v5552_v30, %v5548_v48 }
 0x506   : > { %v15710_v46 = vpack.c.bf16 %v5551_v36, %v5547_v35  ;;  %v15712_v60 = vpack.c.bf16 %v5553_v24, %v5549_v3  ;;  %v5210_v51 = vpop.f32.mrb[144].mxu0  ;;  %v5403_v54 = vpop.f32.mrb[144].mxu1  ;;  %7103 = vmatpush1.bf16.msra.mxu0 %v12733_v47  ;;  %7489 = vmatpush1.bf16.msra.mxu1 %v12736_v41  ;;  %v12756_v41 = vld [vmem:[%s17638_s8 + $0x54c] ss:$28 sps:$4 sm:$0xff]  }
 0x507   : > { %v5211_v11 = vadd.f32 %v5210_v51, %v15555_v57  ;;  %v5404_v6 = vadd.f32 %v5403_v54, %v15558_v45  ;;  %v5212_v56 = vpop.f32.mrb[145].mxu0  ;;  %v5405_v43 = vpop.f32.mrb[145].mxu1  ;;  %7104 = vmatprep.subr.bf16.mxu0 %v12741_v27  ;;  %7490 = vmatprep.subr.bf16.mxu1 %v12744_v15  ;;  %v12751_v51 = vld [vmem:[%s17638_s8 + $0x540] ss:$28 sps:$4 sm:$0xff]   ;;  %v12754_v54 = vld [vmem:[%s17638_s8 + $0x548] ss:$28 sps:$4 sm:$0xff]  }
 0x508   : > { %v5213_v22 = vadd.f32 %v5212_v56, %v15561_v25  ;;  %v5406_v59 = vadd.f32 %v5405_v43, %v15564_v19  ;;  %v5214_v62 = vpop.f32.mrb[146].mxu0  ;;  %v5407_v63 = vpop.f32.mrb[146].mxu1  ;;  %6961 = vmatprep.mubr.bf16.mxu0 %v15710_v46  ;;  %7347 = vmatprep.mubr.bf16.mxu1 %v15710_v46  ;;  %v12759_v56 = vld [vmem:[%s17638_s8 + $0x14] ss:$28 sps:$4 sm:$0xff]  }
 0x509   : > { %v5215_v34 = vadd.f32 %v5214_v62, %v15555_v57  ;;  %v5408_v44 = vadd.f32 %v5407_v63, %v15558_v45  ;;  %v5216_v12 = vpop.f32.mrb[147].mxu0  ;;  %v5409_v4 = vpop.f32.mrb[147].mxu1  ;;  %6962 = vmatmul.mubr.bf16.gmra.mrb[204].mxu0 %v15706_v38  ;;  %7348 = vmatmul.mubr.bf16.gmra.mrb[204].mxu1 %v15706_v38  ;;  %v5554_v10 = vmax.f32 %v5211_v11, 0.0  ;;  %v5556_v40 = vmax.f32 %v5404_v6, 0.0  ;;  %v12760_v43 = vld [vmem:[%s17638_s8 + $0x1d8] ss:$28 sps:$4 sm:$0xff]  }
 0x50a   : > { %v5217_v8 = vadd.f32 %v5216_v12, %v15561_v25  ;;  %v5410_v58 = vadd.f32 %v5409_v4, %v15564_v19  ;;  %7105 = vmatpush1.bf16.msra.mxu0 %v12739_v49  ;;  %7491 = vmatpush1.bf16.msra.mxu1 %v12742_v52  ;;  %v5555_v27 = vmax.f32 %v5213_v22, 0.0  ;;  %v5557_v29 = vmax.f32 %v5406_v59, 0.0 }
 0x50b   : > { %v5558_v50 = vmax.f32 %v5215_v34, 0.0  ;;  %v5560_v47 = vmax.f32 %v5408_v44, 0.0  ;;  %7106 = vmatprep.subr.bf16.mxu0 %v12747_v37  ;;  %7492 = vmatprep.subr.bf16.mxu1 %v12750_v26 }
 0x50c   : > { %v5559_v48 = vmax.f32 %v5217_v8, 0.0  ;;  %v5561_v42 = vmax.f32 %v5410_v58, 0.0 }
 0x50d   : > { %v15750_v30 = vpack.c.bf16 %v5558_v50, %v5554_v10  ;;  %v15752_v15 = vpack.c.bf16 %v5560_v47, %v5556_v40 }
 0x50e   : > { %v15754_v35 = vpack.c.bf16 %v5559_v48, %v5555_v27  ;;  %v15756_v3 = vpack.c.bf16 %v5561_v42, %v5557_v29  ;;  %v5220_v36 = vpop.f32.mrb[148].mxu0  ;;  %v5413_v24 = vpop.f32.mrb[148].mxu1  ;;  %7107 = vmatpush1.bf16.msra.mxu0 %v12745_v61  ;;  %7493 = vmatpush1.bf16.msra.mxu1 %v12748_v9 }
 0x50f   : > { %17717 = vst [vmem:[#allocation7_spill] sm:$0xff] %v15750_v30  ;;  %v5221_v49 = vadd.f32 %v5220_v36, %v15555_v57  ;;  %v5414_v52 = vadd.f32 %v5413_v24, %v15558_v45  ;;  %v5222_v11 = vpop.f32.mrb[149].mxu0  ;;  %v5415_v6 = vpop.f32.mrb[149].mxu1  ;;  %7108 = vmatprep.subr.bf16.mxu0 %v12753_v32  ;;  %7494 = vmatprep.subr.bf16.mxu1 %v12756_v41 }
 0x510   : > { %v5223_v37 = vadd.f32 %v5222_v11, %v15561_v25  ;;  %v5416_v26 = vadd.f32 %v5415_v6, %v15564_v19  ;;  %v5224_v22 = vpop.f32.mrb[150].mxu0  ;;  %v5417_v59 = vpop.f32.mrb[150].mxu1  ;;  %6971 = vmatprep.mubr.bf16.mxu0 %v15754_v35  ;;  %7357 = vmatprep.mubr.bf16.mxu1 %v15754_v35 }
 0x511   : > { %v5225_v62 = vadd.f32 %v5224_v22, %v15555_v57  ;;  %v5418_v63 = vadd.f32 %v5417_v59, %v15558_v45  ;;  %v5226_v34 = vpop.f32.mrb[151].mxu0  ;;  %v5419_v44 = vpop.f32.mrb[151].mxu1  ;;  %6972 = vmatmul.mubr.bf16.gmra.mrb[208].mxu0 %v15750_v30  ;;  %7358 = vmatmul.mubr.bf16.gmra.mrb[208].mxu1 %v15750_v30  ;;  %v5562_v8 = vmax.f32 %v5221_v49, 0.0  ;;  %v5564_v58 = vmax.f32 %v5414_v52, 0.0 }
 0x512   : > { %v5227_v12 = vadd.f32 %v5226_v34, %v15561_v25  ;;  %v5420_v4 = vadd.f32 %v5419_v44, %v15564_v19  ;;  %7109 = vmatpush1.bf16.msra.mxu0 %v12751_v51  ;;  %7495 = vmatpush1.bf16.msra.mxu1 %v12754_v54  ;;  %v5563_v32 = vmax.f32 %v5223_v37, 0.0  ;;  %v5565_v10 = vmax.f32 %v5416_v26, 0.0 }
 0x513   : > { %v5566_v61 = vmax.f32 %v5225_v62, 0.0  ;;  %v5568_v9 = vmax.f32 %v5418_v63, 0.0  ;;  %7671 = vmatprep.subr.bf16.mxu0 %v12759_v56  ;;  %11098 = vmatprep.subr.bf16.mxu1 %v12760_v43 }
 0x514   : > { %v5567_v40 = vmax.f32 %v5227_v12, 0.0  ;;  %v5569_v50 = vmax.f32 %v5420_v4, 0.0 }
 0x515   : > { %v15782_v47 = vpack.c.bf16 %v5566_v61, %v5562_v8  ;;  %v15784_v41 = vpack.c.bf16 %v5568_v9, %v5564_v58 }
 0x516   : > { %v15786_v27 = vpack.c.bf16 %v5567_v40, %v5563_v32  ;;  %v15788_v29 = vpack.c.bf16 %v5569_v50, %v5565_v10  ;;  %v5230_v48 = vpop.f32.mrb[152].mxu0  ;;  %v5423_v42 = vpop.f32.mrb[152].mxu1 }
 0x517   : > { %17718 = vst [vmem:[#allocation8_spill] sm:$0xff] %v15782_v47  ;;  %v5231_v36 = vadd.f32 %v5230_v48, %v15555_v57  ;;  %v5424_v24 = vadd.f32 %v5423_v42, %v15558_v45  ;;  %v5232_v51 = vpop.f32.mrb[153].mxu0  ;;  %v5425_v54 = vpop.f32.mrb[153].mxu1 }
 0x518   : > { %17719 = vst [vmem:[#allocation9_spill] sm:$0xff] %v15786_v27  ;;  %v5233_v49 = vadd.f32 %v5232_v51, %v15561_v25  ;;  %v5426_v52 = vadd.f32 %v5425_v54, %v15564_v19  ;;  %v5234_v11 = vpop.f32.mrb[154].mxu0  ;;  %v5427_v6 = vpop.f32.mrb[154].mxu1  ;;  %6981 = vmatprep.mubr.bf16.mxu0 %v15786_v27  ;;  %7367 = vmatprep.mubr.bf16.mxu1 %v15786_v27 }
 0x519   : > { %v5235_v56 = vadd.f32 %v5234_v11, %v15555_v57  ;;  %v5428_v43 = vadd.f32 %v5427_v6, %v15558_v45  ;;  %v5236_v37 = vpop.f32.mrb[155].mxu0  ;;  %v5429_v26 = vpop.f32.mrb[155].mxu1  ;;  %6982 = vmatmul.mubr.bf16.gmra.mrb[212].mxu0 %v15782_v47  ;;  %7368 = vmatmul.mubr.bf16.gmra.mrb[212].mxu1 %v15782_v47  ;;  %v5570_v62 = vmax.f32 %v5231_v36, 0.0  ;;  %v5572_v63 = vmax.f32 %v5424_v24, 0.0 }
 0x51a   : > { %v5237_v22 = vadd.f32 %v5236_v37, %v15561_v25  ;;  %v5430_v59 = vadd.f32 %v5429_v26, %v15564_v19  ;;  %v5571_v12 = vmax.f32 %v5233_v49, 0.0  ;;  %v5573_v4 = vmax.f32 %v5426_v52, 0.0 }
 0x51b   : > { %v5574_v34 = vmax.f32 %v5235_v56, 0.0  ;;  %v5576_v44 = vmax.f32 %v5428_v43, 0.0 }
 0x51c   : > { %v5575_v8 = vmax.f32 %v5237_v22, 0.0  ;;  %v5577_v58 = vmax.f32 %v5430_v59, 0.0 }
 0x51d   : > { %v15802_v61 = vpack.c.bf16 %v5574_v34, %v5570_v62  ;;  %v15804_v9 = vpack.c.bf16 %v5576_v44, %v5572_v63 }
 0x51e   : > { %v15806_v32 = vpack.c.bf16 %v5575_v8, %v5571_v12  ;;  %v15808_v10 = vpack.c.bf16 %v5577_v58, %v5573_v4  ;;  %v5240_v40 = vpop.f32.mrb[156].mxu0  ;;  %v5433_v50 = vpop.f32.mrb[156].mxu1 }
 0x51f   : > { %17720 = vst [vmem:[#allocation10_spill] sm:$0xff] %v15802_v61  ;;  %v5241_v48 = vadd.f32 %v5240_v40, %v15555_v57  ;;  %v5434_v42 = vadd.f32 %v5433_v50, %v15558_v45  ;;  %v5242_v36 = vpop.f32.mrb[157].mxu0  ;;  %v5435_v24 = vpop.f32.mrb[157].mxu1 }
 0x520   : > { %17721 = vst [vmem:[#allocation11_spill] sm:$0xff] %v15806_v32  ;;  %v5243_v51 = vadd.f32 %v5242_v36, %v15561_v25  ;;  %v5436_v54 = vadd.f32 %v5435_v24, %v15564_v19  ;;  %v5244_v49 = vpop.f32.mrb[158].mxu0  ;;  %v5437_v52 = vpop.f32.mrb[158].mxu1  ;;  %6991 = vmatprep.mubr.bf16.mxu0 %v15806_v32  ;;  %7377 = vmatprep.mubr.bf16.mxu1 %v15806_v32 }
 0x521   : > { %v5245_v11 = vadd.f32 %v5244_v49, %v15555_v57  ;;  %v5438_v6 = vadd.f32 %v5437_v52, %v15558_v45  ;;  %v5246_v56 = vpop.f32.mrb[159].mxu0  ;;  %v5439_v43 = vpop.f32.mrb[159].mxu1  ;;  %6992 = vmatmul.mubr.bf16.gmra.mrb[216].mxu0 %v15802_v61  ;;  %7378 = vmatmul.mubr.bf16.gmra.mrb[216].mxu1 %v15802_v61  ;;  %v5578_v22 = vmax.f32 %v5241_v48, 0.0  ;;  %v5580_v59 = vmax.f32 %v5434_v42, 0.0 }
 0x522   : > { %v5247_v37 = vadd.f32 %v5246_v56, %v15561_v25  ;;  %v5440_v26 = vadd.f32 %v5439_v43, %v15564_v19  ;;  %v5579_v34 = vmax.f32 %v5243_v51, 0.0  ;;  %v5581_v44 = vmax.f32 %v5436_v54, 0.0 }
 0x523   : > { %v5582_v62 = vmax.f32 %v5245_v11, 0.0  ;;  %v5584_v63 = vmax.f32 %v5438_v6, 0.0 }
 0x524   : > { %v5583_v12 = vmax.f32 %v5247_v37, 0.0  ;;  %v5585_v4 = vmax.f32 %v5440_v26, 0.0 }
 0x525   : > { %v15822_v8 = vpack.c.bf16 %v5582_v62, %v5578_v22  ;;  %v15824_v58 = vpack.c.bf16 %v5584_v63, %v5580_v59 }
 0x526   : > { %v15826_v40 = vpack.c.bf16 %v5583_v12, %v5579_v34  ;;  %v15828_v50 = vpack.c.bf16 %v5585_v4, %v5581_v44  ;;  %v5250_v36 = vpop.f32.mrb[160].mxu0  ;;  %v5443_v24 = vpop.f32.mrb[160].mxu1 }
 0x527   : > { %17722 = vst [vmem:[#allocation12_spill] sm:$0xff] %v15822_v8  ;;  %v5251_v49 = vadd.f32 %v5250_v36, %v15555_v57  ;;  %v5444_v48 = vadd.f32 %v5443_v24, %v15558_v45  ;;  %v5252_v42 = vpop.f32.mrb[161].mxu0  ;;  %v5445_v52 = vpop.f32.mrb[161].mxu1 }
 0x528   : > { %17723 = vst [vmem:[#allocation13_spill] sm:$0xff] %v15826_v40  ;;  %v5253_v51 = vadd.f32 %v5252_v42, %v15561_v25  ;;  %v5446_v54 = vadd.f32 %v5445_v52, %v15564_v19  ;;  %v5254_v11 = vpop.f32.mrb[162].mxu0  ;;  %v5447_v6 = vpop.f32.mrb[162].mxu1  ;;  %7001 = vmatprep.mubr.bf16.mxu0 %v15826_v40  ;;  %7387 = vmatprep.mubr.bf16.mxu1 %v15826_v40 }
 0x529   : > { %v5255_v56 = vadd.f32 %v5254_v11, %v15555_v57  ;;  %v5448_v43 = vadd.f32 %v5447_v6, %v15558_v45  ;;  %v5256_v37 = vpop.f32.mrb[163].mxu0  ;;  %v5449_v26 = vpop.f32.mrb[163].mxu1  ;;  %7002 = vmatmul.mubr.bf16.gmra.mrb[220].mxu0 %v15822_v8  ;;  %7388 = vmatmul.mubr.bf16.gmra.mrb[220].mxu1 %v15822_v8  ;;  %v5586_v62 = vmax.f32 %v5251_v49, 0.0  ;;  %v5588_v63 = vmax.f32 %v5444_v48, 0.0 }
 0x52a   : > { %v5257_v22 = vadd.f32 %v5256_v37, %v15561_v25  ;;  %v5450_v59 = vadd.f32 %v5449_v26, %v15564_v19  ;;  %v5587_v12 = vmax.f32 %v5253_v51, 0.0  ;;  %v5589_v4 = vmax.f32 %v5446_v54, 0.0 }
 0x52b   : > { %v5590_v34 = vmax.f32 %v5255_v56, 0.0  ;;  %v5592_v44 = vmax.f32 %v5448_v43, 0.0 }
 0x52c   : > { %v5591_v36 = vmax.f32 %v5257_v22, 0.0  ;;  %v5593_v24 = vmax.f32 %v5450_v59, 0.0 }
 0x52d   : > { %v15842_v42 = vpack.c.bf16 %v5590_v34, %v5586_v62  ;;  %v15844_v52 = vpack.c.bf16 %v5592_v44, %v5588_v63 }
 0x52e   : > { %v15846_v11 = vpack.c.bf16 %v5591_v36, %v5587_v12  ;;  %v15848_v6 = vpack.c.bf16 %v5593_v24, %v5589_v4  ;;  %v5260_v7 = vpop.f32.mrb[164].mxu0  ;;  %v5453_v37 = vpop.f32.mrb[164].mxu1 }
 0x52f   : > { %17724 = vst [vmem:[#allocation14_spill] sm:$0xff] %v15842_v42  ;;  %v5261_v26 = vadd.f32 %v5260_v7, %v15555_v57  ;;  %v5454_v49 = vadd.f32 %v5453_v37, %v15558_v45  ;;  %v5262_v48 = vpop.f32.mrb[165].mxu0  ;;  %v5455_v56 = vpop.f32.mrb[165].mxu1 }
 0x530   : > { %17725 = vst [vmem:[#allocation15_spill] sm:$0xff] %v15846_v11  ;;  %v5263_v51 = vadd.f32 %v5262_v48, %v15561_v25  ;;  %v5456_v54 = vadd.f32 %v5455_v56, %v15564_v19  ;;  %v5264_v43 = vpop.f32.mrb[166].mxu0  ;;  %v5457_v22 = vpop.f32.mrb[166].mxu1  ;;  %7011 = vmatprep.mubr.bf16.mxu0 %v15846_v11  ;;  %7397 = vmatprep.mubr.bf16.mxu1 %v15846_v11 }
 0x531   : > { %v5265_v59 = vadd.f32 %v5264_v43, %v15555_v57  ;;  %v5458_v62 = vadd.f32 %v5457_v22, %v15558_v45  ;;  %v5266_v63 = vpop.f32.mrb[167].mxu0  ;;  %v5459_v7 = vpop.f32.mrb[167].mxu1  ;;  %7012 = vmatmul.mubr.bf16.gmra.mrb[224].mxu0 %v15842_v42  ;;  %7398 = vmatmul.mubr.bf16.gmra.mrb[224].mxu1 %v15842_v42  ;;  %v5594_v12 = vmax.f32 %v5261_v26, 0.0  ;;  %v5596_v4 = vmax.f32 %v5454_v49, 0.0 }
 0x532   : > { %v5267_v34 = vadd.f32 %v5266_v63, %v15561_v25  ;;  %v5460_v44 = vadd.f32 %v5459_v7, %v15564_v19  ;;  %v5595_v37 = vmax.f32 %v5263_v51, 0.0  ;;  %v5597_v48 = vmax.f32 %v5456_v54, 0.0 }
 0x533   : > { %v5598_v36 = vmax.f32 %v5265_v59, 0.0  ;;  %v5600_v24 = vmax.f32 %v5458_v62, 0.0 }
 0x534   : > { %v5599_v56 = vmax.f32 %v5267_v34, 0.0  ;;  %v5601_v43 = vmax.f32 %v5460_v44, 0.0 }
 0x535   : > { %v15862_v16 = vpack.c.bf16 %v5598_v36, %v5594_v12  ;;  %v15864_v22 = vpack.c.bf16 %v5600_v24, %v5596_v4 }
 0x536   : > { %v15866_v21 = vpack.c.bf16 %v5599_v56, %v5595_v37  ;;  %v15868_v20 = vpack.c.bf16 %v5601_v43, %v5597_v48  ;;  %v5270_v18 = vpop.f32.mrb[168].mxu0  ;;  %v5463_v63 = vpop.f32.mrb[168].mxu1 }
 0x537   : > { %17726 = vst [vmem:[#allocation16_spill] sm:$0xff] %v15862_v16  ;;  %v5271_v7 = vadd.f32 %v5270_v18, %v15555_v57  ;;  %v5464_v26 = vadd.f32 %v5463_v63, %v15558_v45  ;;  %v5272_v49 = vpop.f32.mrb[169].mxu0  ;;  %v5465_v59 = vpop.f32.mrb[169].mxu1 }
 0x538   : > { %17727 = vst [vmem:[#allocation17_spill] sm:$0xff] %v15866_v21  ;;  %v5273_v51 = vadd.f32 %v5272_v49, %v15561_v25  ;;  %v5466_v54 = vadd.f32 %v5465_v59, %v15564_v19  ;;  %v5274_v62 = vpop.f32.mrb[170].mxu0  ;;  %v5467_v34 = vpop.f32.mrb[170].mxu1  ;;  %7021 = vmatprep.mubr.bf16.mxu0 %v15866_v21  ;;  %7407 = vmatprep.mubr.bf16.mxu1 %v15866_v21 }
 0x539   : > { %v5275_v44 = vadd.f32 %v5274_v62, %v15555_v57  ;;  %v5468_v12 = vadd.f32 %v5467_v34, %v15558_v45  ;;  %v5276_v4 = vpop.f32.mrb[171].mxu0  ;;  %v5469_v18 = vpop.f32.mrb[171].mxu1  ;;  %7022 = vmatmul.mubr.bf16.gmra.mrb[228].mxu0 %v15862_v16  ;;  %7408 = vmatmul.mubr.bf16.gmra.mrb[228].mxu1 %v15862_v16  ;;  %v5602_v37 = vmax.f32 %v5271_v7, 0.0  ;;  %v5604_v48 = vmax.f32 %v5464_v26, 0.0 }
 0x53a   : > { %v5277_v36 = vadd.f32 %v5276_v4, %v15561_v25  ;;  %v5470_v24 = vadd.f32 %v5469_v18, %v15564_v19  ;;  %v5603_v63 = vmax.f32 %v5273_v51, 0.0  ;;  %v5605_v49 = vmax.f32 %v5466_v54, 0.0 }
 0x53b   : > { %v5606_v56 = vmax.f32 %v5275_v44, 0.0  ;;  %v5608_v43 = vmax.f32 %v5468_v12, 0.0 }
 0x53c   : > { %v5607_v59 = vmax.f32 %v5277_v36, 0.0  ;;  %v5609_v62 = vmax.f32 %v5470_v24, 0.0 }
 0x53d   : > { %v15882_v17 = vpack.c.bf16 %v5606_v56, %v5602_v37  ;;  %v15884_v34 = vpack.c.bf16 %v5608_v43, %v5604_v48 }
 0x53e   : > { %v15886_v21 = vpack.c.bf16 %v5607_v59, %v5603_v63  ;;  %v15888_v42 = vpack.c.bf16 %v5609_v62, %v5605_v49  ;;  %v5280_v16 = vpop.f32.mrb[172].mxu0  ;;  %v5473_v4 = vpop.f32.mrb[172].mxu1 }
 0x53f   : > { %17728 = vst [vmem:[#allocation18_spill] sm:$0xff] %v15882_v17  ;;  %17729 = vst [vmem:[#allocation19_spill] sm:$0xff] %v15884_v34  ;;  %v5281_v18 = vadd.f32 %v5280_v16, %v15555_v57  ;;  %v5474_v7 = vadd.f32 %v5473_v4, %v15558_v45  ;;  %v5282_v26 = vpop.f32.mrb[173].mxu0  ;;  %v5475_v44 = vpop.f32.mrb[173].mxu1 }
 0x540   : > { %17730 = vst [vmem:[#allocation20_spill] sm:$0xff] %v15886_v21  ;;  %v5283_v51 = vadd.f32 %v5282_v26, %v15561_v25  ;;  %v5476_v54 = vadd.f32 %v5475_v44, %v15564_v19  ;;  %v5284_v12 = vpop.f32.mrb[174].mxu0  ;;  %v5477_v36 = vpop.f32.mrb[174].mxu1  ;;  %7031 = vmatprep.mubr.bf16.mxu0 %v15886_v21  ;;  %7417 = vmatprep.mubr.bf16.mxu1 %v15886_v21 }
 0x541   : > { %v5285_v24 = vadd.f32 %v5284_v12, %v15555_v57  ;;  %v5478_v37 = vadd.f32 %v5477_v36, %v15558_v45  ;;  %v5286_v48 = vpop.f32.mrb[175].mxu0  ;;  %v5479_v16 = vpop.f32.mrb[175].mxu1  ;;  %7032 = vmatmul.mubr.bf16.gmra.mrb[232].mxu0 %v15882_v17  ;;  %7418 = vmatmul.mubr.bf16.gmra.mrb[232].mxu1 %v15882_v17  ;;  %v5610_v63 = vmax.f32 %v5281_v18, 0.0  ;;  %v5612_v49 = vmax.f32 %v5474_v7, 0.0 }
 0x542   : > { %v5287_v56 = vadd.f32 %v5286_v48, %v15561_v25  ;;  %v5480_v43 = vadd.f32 %v5479_v16, %v15564_v19  ;;  %v5611_v4 = vmax.f32 %v5283_v51, 0.0  ;;  %v5613_v26 = vmax.f32 %v5476_v54, 0.0 }
 0x543   : > { %v5614_v59 = vmax.f32 %v5285_v24, 0.0  ;;  %v5616_v62 = vmax.f32 %v5478_v37, 0.0 }
 0x544   : > { %v5615_v44 = vmax.f32 %v5287_v56, 0.0  ;;  %v5617_v12 = vmax.f32 %v5480_v43, 0.0 }
 0x545   : > { %v15902_v21 = vpack.c.bf16 %v5614_v59, %v5610_v63  ;;  %v15904_v36 = vpack.c.bf16 %v5616_v62, %v5612_v49 }
 0x546   : > { %v15906_v11 = vpack.c.bf16 %v5615_v44, %v5611_v4  ;;  %v15908_v8 = vpack.c.bf16 %v5617_v12, %v5613_v26  ;;  %v5290_v17 = vpop.f32.mrb[176].mxu0  ;;  %v5483_v48 = vpop.f32.mrb[176].mxu1 }
 0x547   : > { %17731 = vst [vmem:[#allocation21_spill] sm:$0xff] %v15902_v21  ;;  %17732 = vst [vmem:[#allocation22_spill] sm:$0xff] %v15904_v36  ;;  %v5291_v16 = vadd.f32 %v5290_v17, %v15555_v57  ;;  %v5484_v18 = vadd.f32 %v5483_v48, %v15558_v45  ;;  %v5292_v7 = vpop.f32.mrb[177].mxu0  ;;  %v5485_v24 = vpop.f32.mrb[177].mxu1 }
 0x548   : > { %17733 = vst [vmem:[#allocation23_spill] sm:$0xff] %v15906_v11  ;;  %17734 = vst [vmem:[#allocation24_spill] sm:$0xff] %v15908_v8  ;;  %v5293_v51 = vadd.f32 %v5292_v7, %v15561_v25  ;;  %v5486_v54 = vadd.f32 %v5485_v24, %v15564_v19  ;;  %v5294_v37 = vpop.f32.mrb[178].mxu0  ;;  %v5487_v56 = vpop.f32.mrb[178].mxu1  ;;  %7041 = vmatprep.mubr.bf16.mxu0 %v15906_v11  ;;  %7427 = vmatprep.mubr.bf16.mxu1 %v15906_v11 }
 0x549   : > { %v5295_v43 = vadd.f32 %v5294_v37, %v15555_v57  ;;  %v5488_v63 = vadd.f32 %v5487_v56, %v15558_v45  ;;  %v5296_v49 = vpop.f32.mrb[179].mxu0  ;;  %v5489_v17 = vpop.f32.mrb[179].mxu1  ;;  %7042 = vmatmul.mubr.bf16.gmra.mrb[236].mxu0 %v15902_v21  ;;  %7428 = vmatmul.mubr.bf16.gmra.mrb[236].mxu1 %v15902_v21  ;;  %v5618_v4 = vmax.f32 %v5291_v16, 0.0  ;;  %v5620_v26 = vmax.f32 %v5484_v18, 0.0 }
 0x54a   : > { %v5297_v59 = vadd.f32 %v5296_v49, %v15561_v25  ;;  %v5490_v62 = vadd.f32 %v5489_v17, %v15564_v19  ;;  %v5619_v48 = vmax.f32 %v5293_v51, 0.0  ;;  %v5621_v7 = vmax.f32 %v5486_v54, 0.0 }
 0x54b   : > { %v5622_v44 = vmax.f32 %v5295_v43, 0.0  ;;  %v5624_v12 = vmax.f32 %v5488_v63, 0.0 }
 0x54c   : > { %v5623_v24 = vmax.f32 %v5297_v59, 0.0  ;;  %v5625_v37 = vmax.f32 %v5490_v62, 0.0 }
 0x54d   : > { %v15922_v11 = vpack.c.bf16 %v5622_v44, %v5618_v4  ;;  %v15924_v56 = vpack.c.bf16 %v5624_v12, %v5620_v26 }
 0x54e   : > { %v15926_v40 = vpack.c.bf16 %v5623_v24, %v5619_v48  ;;  %v15928_v61 = vpack.c.bf16 %v5625_v37, %v5621_v7  ;;  %v5300_v21 = vpop.f32.mrb[180].mxu0  ;;  %v5493_v49 = vpop.f32.mrb[180].mxu1 }
 0x54f   : > { %17735 = vst [vmem:[#allocation25_spill] sm:$0xff] %v15922_v11  ;;  %17736 = vst [vmem:[#allocation26_spill] sm:$0xff] %v15924_v56  ;;  %v5301_v17 = vadd.f32 %v5300_v21, %v15555_v57  ;;  %v5494_v16 = vadd.f32 %v5493_v49, %v15558_v45  ;;  %v5302_v18 = vpop.f32.mrb[181].mxu0  ;;  %v5495_v43 = vpop.f32.mrb[181].mxu1 }
 0x550   : > { %17737 = vst [vmem:[#allocation27_spill] sm:$0xff] %v15926_v40  ;;  %17738 = vst [vmem:[#allocation28_spill] sm:$0xff] %v15928_v61  ;;  %v5303_v51 = vadd.f32 %v5302_v18, %v15561_v25  ;;  %v5496_v54 = vadd.f32 %v5495_v43, %v15564_v19  ;;  %v5304_v63 = vpop.f32.mrb[182].mxu0  ;;  %v5497_v59 = vpop.f32.mrb[182].mxu1  ;;  %7051 = vmatprep.mubr.bf16.mxu0 %v15926_v40  ;;  %7437 = vmatprep.mubr.bf16.mxu1 %v15926_v40 }
 0x551   : > { %v5305_v62 = vadd.f32 %v5304_v63, %v15555_v57  ;;  %v5498_v4 = vadd.f32 %v5497_v59, %v15558_v45  ;;  %v5306_v26 = vpop.f32.mrb[183].mxu0  ;;  %v5499_v21 = vpop.f32.mrb[183].mxu1  ;;  %7052 = vmatmul.mubr.bf16.gmra.mrb[240].mxu0 %v15922_v11  ;;  %7438 = vmatmul.mubr.bf16.gmra.mrb[240].mxu1 %v15922_v11  ;;  %v5626_v48 = vmax.f32 %v5301_v17, 0.0  ;;  %v5628_v7 = vmax.f32 %v5494_v16, 0.0 }
 0x552   : > { %v5307_v44 = vadd.f32 %v5306_v26, %v15561_v25  ;;  %v5500_v12 = vadd.f32 %v5499_v21, %v15564_v19  ;;  %v5627_v49 = vmax.f32 %v5303_v51, 0.0  ;;  %v5629_v18 = vmax.f32 %v5496_v54, 0.0 }
 0x553   : > { %v5630_v24 = vmax.f32 %v5305_v62, 0.0  ;;  %v5632_v37 = vmax.f32 %v5498_v4, 0.0 }
 0x554   : > { %v5631_v43 = vmax.f32 %v5307_v44, 0.0  ;;  %v5633_v63 = vmax.f32 %v5500_v12, 0.0 }
 0x555   : > { %v15942_v40 = vpack.c.bf16 %v5630_v24, %v5626_v48  ;;  %v15944_v59 = vpack.c.bf16 %v5632_v37, %v5628_v7 }
 0x556   : > { %v15946_v32 = vpack.c.bf16 %v5631_v43, %v5627_v49  ;;  %v15948_v47 = vpack.c.bf16 %v5633_v63, %v5629_v18  ;;  %v5310_v11 = vpop.f32.mrb[184].mxu0  ;;  %v5503_v26 = vpop.f32.mrb[184].mxu1 }
 0x557   : > { %17739 = vst [vmem:[#allocation29_spill] sm:$0xff] %v15942_v40  ;;  %17740 = vst [vmem:[#allocation30_spill] sm:$0xff] %v15944_v59  ;;  %v5311_v21 = vadd.f32 %v5310_v11, %v15555_v57  ;;  %v5504_v17 = vadd.f32 %v5503_v26, %v15558_v45  ;;  %v5312_v16 = vpop.f32.mrb[185].mxu0  ;;  %v5505_v62 = vpop.f32.mrb[185].mxu1 }
 0x558   : > { %17741 = vst [vmem:[#allocation31_spill] sm:$0xff] %v15946_v32  ;;  %17742 = vst [vmem:[#allocation32_spill] sm:$0xff] %v15948_v47  ;;  %v5313_v51 = vadd.f32 %v5312_v16, %v15561_v25  ;;  %v5506_v54 = vadd.f32 %v5505_v62, %v15564_v19  ;;  %v5314_v4 = vpop.f32.mrb[186].mxu0  ;;  %v5507_v44 = vpop.f32.mrb[186].mxu1  ;;  %7061 = vmatprep.mubr.bf16.mxu0 %v15946_v32  ;;  %7447 = vmatprep.mubr.bf16.mxu1 %v15946_v32 }
 0x559   : > { %v5315_v12 = vadd.f32 %v5314_v4, %v15555_v57  ;;  %v5508_v48 = vadd.f32 %v5507_v44, %v15558_v45  ;;  %v5316_v7 = vpop.f32.mrb[187].mxu0  ;;  %v5509_v11 = vpop.f32.mrb[187].mxu1  ;;  %7062 = vmatmul.mubr.bf16.gmra.mrb[244].mxu0 %v15942_v40  ;;  %7448 = vmatmul.mubr.bf16.gmra.mrb[244].mxu1 %v15942_v40  ;;  %v5634_v49 = vmax.f32 %v5311_v21, 0.0  ;;  %v5636_v18 = vmax.f32 %v5504_v17, 0.0 }
 0x55a   : > { %v5317_v24 = vadd.f32 %v5316_v7, %v15561_v25  ;;  %v5510_v37 = vadd.f32 %v5509_v11, %v15564_v19  ;;  %v5635_v26 = vmax.f32 %v5313_v51, 0.0  ;;  %v5637_v16 = vmax.f32 %v5506_v54, 0.0 }
 0x55b   : > { %v5638_v43 = vmax.f32 %v5315_v12, 0.0  ;;  %v5640_v63 = vmax.f32 %v5508_v48, 0.0 }
 0x55c   : > { %v5639_v62 = vmax.f32 %v5317_v24, 0.0  ;;  %v5641_v4 = vmax.f32 %v5510_v37, 0.0 }
 0x55d   : > { %v15962_v32 = vpack.c.bf16 %v5638_v43, %v5634_v49  ;;  %v15964_v44 = vpack.c.bf16 %v5640_v63, %v5636_v18 }
 0x55e   : > { %v15966_v27 = vpack.c.bf16 %v5639_v62, %v5635_v26  ;;  %v15968_v30 = vpack.c.bf16 %v5641_v4, %v5637_v16  ;;  %v5320_v40 = vpop.f32.mrb[188].mxu0  ;;  %v5513_v7 = vpop.f32.mrb[188].mxu1 }
 0x55f   : > { %17743 = vst [vmem:[#allocation33_spill] sm:$0xff] %v15964_v44  ;;  %v5321_v11 = vadd.f32 %v5320_v40, %v15555_v57  ;;  %v5514_v21 = vadd.f32 %v5513_v7, %v15558_v45  ;;  %v5322_v17 = vpop.f32.mrb[189].mxu0  ;;  %v5515_v12 = vpop.f32.mrb[189].mxu1 }
 0x560   : > { %17744 = vst [vmem:[#allocation34_spill] sm:$0xff] %v15966_v27  ;;  %17745 = vst [vmem:[#allocation35_spill] sm:$0xff] %v15968_v30  ;;  %v5323_v51 = vadd.f32 %v5322_v17, %v15561_v25  ;;  %v5516_v54 = vadd.f32 %v5515_v12, %v15564_v19  ;;  %v5324_v48 = vpop.f32.mrb[190].mxu0  ;;  %v5517_v24 = vpop.f32.mrb[190].mxu1  ;;  %7071 = vmatprep.mubr.bf16.mxu0 %v15966_v27  ;;  %7457 = vmatprep.mubr.bf16.mxu1 %v15966_v27 }
 0x561   : > { %v5325_v37 = vadd.f32 %v5324_v48, %v15555_v57  ;;  %v5518_v49 = vadd.f32 %v5517_v24, %v15558_v45  ;;  %v5326_v18 = vpop.f32.mrb[191].mxu0  ;;  %v5519_v40 = vpop.f32.mrb[191].mxu1  ;;  %7072 = vmatmul.mubr.bf16.gmra.mrb[248].mxu0 %v15962_v32  ;;  %7458 = vmatmul.mubr.bf16.gmra.mrb[248].mxu1 %v15962_v32  ;;  %v5642_v26 = vmax.f32 %v5321_v11, 0.0  ;;  %v5644_v16 = vmax.f32 %v5514_v21, 0.0  ;;  %v12764_v11 = vld [vmem:[%s17638_s8 + $0x4c] ss:$28 sps:$4 sm:$0xff]  }
 0x562   : > { %v5327_v43 = vadd.f32 %v5326_v18, %v15561_v25  ;;  %v5520_v63 = vadd.f32 %v5519_v40, %v15564_v19  ;;  %v5643_v7 = vmax.f32 %v5323_v51, 0.0  ;;  %v5645_v17 = vmax.f32 %v5516_v54, 0.0  ;;  %v12757_v25 = vld [vmem:[%s17638_s8 + $0x10] ss:$28 sps:$4 sm:$0xff]   ;;  %v12761_v19 = vld [vmem:[%s17638_s8 + $0x18] ss:$28 sps:$4 sm:$0xff]  }
 0x563   : > { %v5646_v62 = vmax.f32 %v5325_v37, 0.0  ;;  %v5648_v4 = vmax.f32 %v5518_v49, 0.0  ;;  %v12768_v21 = vld [vmem:[%s17638_s8 + $0x210] ss:$28 sps:$4 sm:$0xff]   ;;  %v12762_v51 = vld [vmem:[%s17638_s8 + $0x48] ss:$28 sps:$4 sm:$0xff]  }
 0x564   : > { %v5647_v12 = vmax.f32 %v5327_v43, 0.0  ;;  %v5649_v57 = vmax.f32 %v5520_v63, 0.0  ;;  %v12769_v54 = vld [vmem:[%s17638_s8 + $0x50] ss:$28 sps:$4 sm:$0xff]   ;;  %v12767_v37 = vld [vmem:[%s17638_s8 + $0x84] ss:$28 sps:$4 sm:$0xff]  }
 0x565   : > { %v15982_v48 = vpack.c.bf16 %v5646_v62, %v5642_v26  ;;  %v15984_v45 = vpack.c.bf16 %v5648_v4, %v5644_v16  ;;  %v12776_v49 = vld [vmem:[%s17638_s8 + $0x248] ss:$28 sps:$4 sm:$0xff]   ;;  %v12765_v18 = vld [vmem:[%s17638_s8 + $0x80] ss:$28 sps:$4 sm:$0xff]   ;;  %v12770_v26 = vld [vmem:[%s17638_s8 + $0xb8] ss:$28 sps:$4 sm:$0xff]  }
 0x566   : > { %v15986_v24 = vpack.c.bf16 %v5647_v12, %v5643_v7  ;;  %v15988_v27 = vpack.c.bf16 %v5649_v57, %v5645_v17  ;;  %v12777_v40 = vld [vmem:[%s17638_s8 + $0x88] ss:$28 sps:$4 sm:$0xff]   ;;  %v12772_v43 = vld [vmem:[%s17638_s8 + $0xbc] ss:$28 sps:$4 sm:$0xff]   ;;  %v12775_v62 = vld [vmem:[%s17638_s8 + $0xf4] ss:$28 sps:$4 sm:$0xff]  }
 0x567   : > { %17746 = vst [vmem:[#allocation36_spill] sm:$0xff] %v15984_v45  ;;  %v12784_v63 = vld [vmem:[%s17638_s8 + $0x280] ss:$28 sps:$4 sm:$0xff]   ;;  %v12792_v4 = vld [vmem:[%s17638_s8 + $0x2b8] ss:$28 sps:$4 sm:$0xff]  }
 0x568   : > { %17747 = vst [vmem:[#allocation37_spill] sm:$0xff] %v15988_v27  ;;  %7081 = vmatprep.mubr.bf16.mxu0 %v15986_v24  ;;  %7467 = vmatprep.mubr.bf16.mxu1 %v15986_v24  ;;  %v12785_v16 = vld [vmem:[%s17638_s8 + $0xc0] ss:$28 sps:$4 sm:$0xff]   ;;  %v12773_v7 = vld [vmem:[%s17638_s8 + $0xf0] ss:$28 sps:$4 sm:$0xff]  }
 0x569   : > { %7082 = vmatmul.mubr.bf16.gmra.mrb[252].mxu0 %v15982_v48  ;;  %7468 = vmatmul.mubr.bf16.gmra.mrb[252].mxu1 %v15982_v48  ;;  %v12793_v17 = vld [vmem:[%s17638_s8 + $0xf8] ss:$28 sps:$4 sm:$0xff]   ;;  %v12780_v12 = vld [vmem:[%s17638_s8 + $0x12c] ss:$28 sps:$4 sm:$0xff]  }
 0x56a   : > { %10696 = vmatprep.mubr.msk.bf16.mxu0 %vm2350_vm0, %v15580_v55  ;;  %10712 = vmatprep.mubr.msk.bf16.mxu1 %vm2350_vm0, %v15580_v55  ;;  %v12800_v57 = vld [vmem:[%s17638_s8 + $0x2f0] ss:$28 sps:$4 sm:$0xff]  }
 0x571   : > { %7125 = vmatmul.mubr.bf16.vlgmr.msra.gmra.mrb[192].mxu0 %v15576_v33  ;;  %7511 = vmatmul.mubr.bf16.vlgmr.msra.gmra.mrb[192].mxu1 %v15576_v33 }
 0x572   : > { %10697 = vmatprep.mubr.msk.bf16.mxu0 %vm2350_vm0, %v15624_v5  ;;  %10713 = vmatprep.mubr.msk.bf16.mxu1 %vm2350_vm0, %v15624_v5 }
 0x573   : > { %7672 = vmatpush1.bf16.msra.mxu0 %v12757_v25  ;;  %11099 = vmatpush3.bf16.msra.mxu1 %v12761_v19  ;;  %v12778_v25 = vld [vmem:[%s17638_s8 + $0x128] ss:$28 sps:$4 sm:$0xff]   ;;  %v12801_v19 = vld [vmem:[%s17638_s8 + $0x130] ss:$28 sps:$4 sm:$0xff]  }
 0x574   : > { %7673 = vmatprep.subr.bf16.mxu0 %v12764_v11  ;;  %11100 = vmatprep.subr.bf16.mxu1 %v12768_v21  ;;  %v12783_v11 = vld [vmem:[%s17638_s8 + $0x164] ss:$28 sps:$4 sm:$0xff]  }
 0x575   : > { %v12808_v21 = vld [vmem:[%s17638_s8 + $0x328] ss:$28 sps:$4 sm:$0xff]  }
 0x577   : > { %7674 = vmatpush1.bf16.msra.mxu0 %v12762_v51  ;;  %11101 = vmatpush3.bf16.msra.mxu1 %v12769_v54  ;;  %v12781_v51 = vld [vmem:[%s17638_s8 + $0x160] ss:$28 sps:$4 sm:$0xff]   ;;  %v12809_v54 = vld [vmem:[%s17638_s8 + $0x168] ss:$28 sps:$4 sm:$0xff]  }
 0x578   : > { %7675 = vmatprep.subr.bf16.mxu0 %v12767_v37  ;;  %11102 = vmatprep.subr.bf16.mxu1 %v12776_v49  ;;  %v12788_v37 = vld [vmem:[%s17638_s8 + $0x19c] ss:$28 sps:$4 sm:$0xff]  }
 0x579   : > { %7135 = vmatmul.mubr.bf16.gmra.mrb[196].mxu0 %v15620_v2  ;;  %7521 = vmatmul.mubr.bf16.gmra.mrb[196].mxu1 %v15620_v2  ;;  %v12816_v49 = vld [vmem:[%s17638_s8 + $0x360] ss:$28 sps:$4 sm:$0xff]  }
 0x57a   : > { %10698 = vmatprep.mubr.msk.bf16.mxu0 %vm2350_vm0, %v15668_v53  ;;  %10714 = vmatprep.mubr.msk.bf16.mxu1 %vm2350_vm0, %v15668_v53 }
 0x57b   : > { %7676 = vmatpush1.bf16.msra.mxu0 %v12765_v18  ;;  %11103 = vmatpush3.bf16.msra.mxu1 %v12777_v40  ;;  %v12786_v18 = vld [vmem:[%s17638_s8 + $0x198] ss:$28 sps:$4 sm:$0xff]   ;;  %v12817_v40 = vld [vmem:[%s17638_s8 + $0x1a0] ss:$28 sps:$4 sm:$0xff]  }
 0x57c   : > { %7677 = vmatprep.subr.bf16.mxu0 %v12772_v43  ;;  %11104 = vmatprep.subr.bf16.mxu1 %v12784_v63  ;;  %v12791_v43 = vld [vmem:[%s17638_s8 + $0x1d4] ss:$28 sps:$4 sm:$0xff]  }
 0x57d   : > { %v12789_v63 = vld [vmem:[%s17638_s8 + $0x1d0] ss:$28 sps:$4 sm:$0xff]  }
 0x57f   : > { %7678 = vmatpush1.bf16.msra.mxu0 %v12770_v26  ;;  %11105 = vmatpush3.bf16.msra.mxu1 %v12785_v16  ;;  %v12796_v26 = vld [vmem:[%s17638_s8 + $0x20c] ss:$28 sps:$4 sm:$0xff]   ;;  %v17748_v16 = vmov 0  }
 0x580   : > { %7679 = vmatprep.subr.bf16.mxu0 %v12775_v62  ;;  %11106 = vmatprep.subr.bf16.mxu1 %v12792_v4  ;;  %v12794_v62 = vld [vmem:[%s17638_s8 + $0x208] ss:$28 sps:$4 sm:$0xff]  }
 0x581   : > { %7145 = vmatmul.mubr.bf16.gmra.mrb[200].mxu0 %v15664_v0  ;;  %7531 = vmatmul.mubr.bf16.gmra.mrb[200].mxu1 %v15664_v0  ;;  %v12799_v4 = vld [vmem:[%s17638_s8 + $0x244] ss:$28 sps:$4 sm:$0xff]  }
 0x582   : > { %10699 = vmatprep.mubr.msk.bf16.mxu0 %vm2350_vm0, %v15712_v60  ;;  %10715 = vmatprep.mubr.msk.bf16.mxu1 %vm2350_vm0, %v15712_v60 }
 0x583   : > { %7680 = vmatpush1.bf16.msra.mxu0 %v12773_v7  ;;  %11107 = vmatpush3.bf16.msra.mxu1 %v12793_v17  ;;  %v12797_v7 = vld [vmem:[%s17638_s8 + $0x240] ss:$28 sps:$4 sm:$0xff]  }
 0x584   : > { %7681 = vmatprep.subr.bf16.mxu0 %v12780_v12  ;;  %11108 = vmatprep.subr.bf16.mxu1 %v12800_v57  ;;  %v12804_v17 = vld [vmem:[%s17638_s8 + $0x27c] ss:$28 sps:$4 sm:$0xff]   ;;  %v12807_v57 = vld [vmem:[%s17638_s8 + $0x2b4] ss:$28 sps:$4 sm:$0xff]  }
 0x585   : > { %v12802_v12 = vld [vmem:[%s17638_s8 + $0x278] ss:$28 sps:$4 sm:$0xff]  }
 0x587   : > { %7682 = vmatpush1.bf16.msra.mxu0 %v12778_v25  ;;  %11109 = vmatpush3.bf16.msra.mxu1 %v12801_v19  ;;  %v12805_v25 = vld [vmem:[%s17638_s8 + $0x2b0] ss:$28 sps:$4 sm:$0xff]  }
 0x588   : > { %7683 = vmatprep.subr.bf16.mxu0 %v12783_v11  ;;  %11110 = vmatprep.subr.bf16.mxu1 %v12808_v21  ;;  %v12812_v19 = vld [vmem:[%s17638_s8 + $0x2ec] ss:$28 sps:$4 sm:$0xff]   ;;  %v12815_v21 = vld [vmem:[%s17638_s8 + $0x324] ss:$28 sps:$4 sm:$0xff]  }
 0x589   : > { %7155 = vmatmul.mubr.bf16.gmra.mrb[204].mxu0 %v15708_v39  ;;  %7541 = vmatmul.mubr.bf16.gmra.mrb[204].mxu1 %v15708_v39  ;;  %v12810_v11 = vld [vmem:[%s17638_s8 + $0x2e8] ss:$28 sps:$4 sm:$0xff]  }
 0x58a   : > { %10700 = vmatprep.mubr.msk.bf16.mxu0 %vm2350_vm0, %v15756_v3  ;;  %10716 = vmatprep.mubr.msk.bf16.mxu1 %vm2350_vm0, %v15756_v3 }
 0x58b   : > { %7684 = vmatpush1.bf16.msra.mxu0 %v12781_v51  ;;  %11111 = vmatpush3.bf16.msra.mxu1 %v12809_v54  ;;  %v12813_v51 = vld [vmem:[%s17638_s8 + $0x320] ss:$28 sps:$4 sm:$0xff]  }
 0x58c   : > { %7685 = vmatprep.subr.bf16.mxu0 %v12788_v37  ;;  %11112 = vmatprep.subr.bf16.mxu1 %v12816_v49  ;;  %v12820_v54 = vld [vmem:[%s17638_s8 + $0x35c] ss:$28 sps:$4 sm:$0xff]   ;;  %v12823_v49 = vld [vmem:[%s17638_s8 + $0x394] ss:$28 sps:$4 sm:$0xff]  }
 0x58d   : > { %v12818_v37 = vld [vmem:[%s17638_s8 + $0x358] ss:$28 sps:$4 sm:$0xff]  }
 0x58f   : > { %7686 = vmatpush1.bf16.msra.mxu0 %v12786_v18  ;;  %11113 = vmatpush3.bf16.msra.mxu1 %v12817_v40  ;;  %v12821_v18 = vld [vmem:[%s17638_s8 + $0x390] ss:$28 sps:$4 sm:$0xff]   ;;  %v12824_v40 = vld [vmem:[%s17638_s8 + $0x398] ss:$28 sps:$4 sm:$0xff]  }
 0x590   : > { %7687 = vmatprep.subr.bf16.mxu0 %v12791_v43  ;;  %8218 = vmatprep.subr.bf16.mxu1 %v17748_v16  ;;  %v12827_v43 = vld [vmem:[%s17638_s8 + $0x3cc] ss:$28 sps:$4 sm:$0xff]  }
 0x591   : > { %7165 = vmatmul.mubr.bf16.gmra.mrb[208].mxu0 %v15752_v15  ;;  %7551 = vmatmul.mubr.bf16.gmra.mrb[208].mxu1 %v15752_v15 }
 0x592   : > { %10701 = vmatprep.mubr.msk.bf16.mxu0 %vm2350_vm0, %v15788_v29  ;;  %10717 = vmatprep.mubr.msk.bf16.mxu1 %vm2350_vm0, %v15788_v29 }
 0x593   : > { %7688 = vmatpush1.bf16.msra.mxu0 %v12789_v63  ;;  %v12828_v63 = vld [vmem:[%s17638_s8 + $0x3d0] ss:$28 sps:$4 sm:$0xff]  }
 0x594   : > { %7689 = vmatprep.subr.bf16.mxu0 %v12796_v26  ;;  %v12831_v26 = vld [vmem:[%s17638_s8 + $0x404] ss:$28 sps:$4 sm:$0xff]  }
 0x597   : > { %7690 = vmatpush1.bf16.msra.mxu0 %v12794_v62  ;;  %v12835_v62 = vld [vmem:[%s17638_s8 + $0x43c] ss:$28 sps:$4 sm:$0xff]  }
 0x598   : > { %7691 = vmatprep.subr.bf16.mxu0 %v12799_v4  ;;  %v12833_v4 = vld [vmem:[%s17638_s8 + $0x438] ss:$28 sps:$4 sm:$0xff]  }
 0x599   : > { %7175 = vmatmul.mubr.bf16.gmra.mrb[212].mxu0 %v15784_v41  ;;  %7561 = vmatmul.mubr.bf16.gmra.mrb[212].mxu1 %v15784_v41 }
 0x59a   : > { %10702 = vmatprep.mubr.msk.bf16.mxu0 %vm2350_vm0, %v15808_v10  ;;  %10718 = vmatprep.mubr.msk.bf16.mxu1 %vm2350_vm0, %v15808_v10 }
 0x59b   : > { %7692 = vmatpush1.bf16.msra.mxu0 %v12797_v7  ;;  %v12836_v7 = vld [vmem:[%s17638_s8 + $0x440] ss:$28 sps:$4 sm:$0xff]  }
 0x59c   : > { %7693 = vmatprep.subr.bf16.mxu0 %v12804_v17  ;;  %v12840_v17 = vld [vmem:[%s17638_s8 + $0x478] ss:$28 sps:$4 sm:$0xff]  }
 0x59f   : > { %7694 = vmatpush1.bf16.msra.mxu0 %v12802_v12  ;;  %v12843_v12 = vld [vmem:[%s17638_s8 + $0x4ac] ss:$28 sps:$4 sm:$0xff]  }
 0x5a0   : > { %7695 = vmatprep.subr.bf16.mxu0 %v12807_v57  ;;  %v12841_v57 = vld [vmem:[%s17638_s8 + $0x4a8] ss:$28 sps:$4 sm:$0xff]  }
 0x5a1   : > { %7185 = vmatmul.mubr.bf16.gmra.mrb[216].mxu0 %v15804_v9  ;;  %7571 = vmatmul.mubr.bf16.gmra.mrb[216].mxu1 %v15804_v9 }
 0x5a2   : > { %10703 = vmatprep.mubr.msk.bf16.mxu0 %vm2350_vm0, %v15828_v50  ;;  %10719 = vmatprep.mubr.msk.bf16.mxu1 %vm2350_vm0, %v15828_v50 }
 0x5a3   : > { %7696 = vmatpush1.bf16.msra.mxu0 %v12805_v25  ;;  %v12844_v25 = vld [vmem:[%s17638_s8 + $0x4b0] ss:$28 sps:$4 sm:$0xff]  }
 0x5a4   : > { %7697 = vmatprep.subr.bf16.mxu0 %v12812_v19  ;;  %v12848_v19 = vld [vmem:[%s17638_s8 + $0x4e8] ss:$28 sps:$4 sm:$0xff]  }
 0x5a7   : > { %7698 = vmatpush1.bf16.msra.mxu0 %v12810_v11  ;;  %v12851_v11 = vld [vmem:[%s17638_s8 + $0x51c] ss:$28 sps:$4 sm:$0xff]  }
 0x5a8   : > { %7699 = vmatprep.subr.bf16.mxu0 %v12815_v21  ;;  %v12849_v21 = vld [vmem:[%s17638_s8 + $0x518] ss:$28 sps:$4 sm:$0xff]  }
 0x5a9   : > { %7195 = vmatmul.mubr.bf16.gmra.mrb[220].mxu0 %v15824_v58  ;;  %7581 = vmatmul.mubr.bf16.gmra.mrb[220].mxu1 %v15824_v58 }
 0x5aa   : > { %10704 = vmatprep.mubr.msk.bf16.mxu0 %vm2350_vm0, %v15848_v6  ;;  %10720 = vmatprep.mubr.msk.bf16.mxu1 %vm2350_vm0, %v15848_v6 }
 0x5ab   : > { %7700 = vmatpush1.bf16.msra.mxu0 %v12813_v51  ;;  %v12852_v51 = vld [vmem:[%s17638_s8 + $0x520] ss:$28 sps:$4 sm:$0xff]  }
 0x5ac   : > { %7701 = vmatprep.subr.bf16.mxu0 %v12820_v54  ;;  %v12856_v54 = vld [vmem:[%s17638_s8 + $0x558] ss:$28 sps:$4 sm:$0xff]  }
 0x5af   : > { %7702 = vmatpush1.bf16.msra.mxu0 %v12818_v37  ;;  %v17749_v37 = vld [vmem:[#allocation7_spill] sm:$0xff] }
 0x5b0   : > { %7864 = vmatprep.subr.bf16.mxu0 %v12823_v49  ;;  %v17750_v49 = vld [vmem:[#allocation9_spill] sm:$0xff] }
 0x5b1   : > { %7205 = vmatmul.mubr.bf16.gmra.mrb[224].mxu0 %v15844_v52  ;;  %7591 = vmatmul.mubr.bf16.gmra.mrb[224].mxu1 %v15844_v52 }
 0x5b2   : > { %10705 = vmatprep.mubr.msk.bf16.mxu0 %vm2350_vm0, %v15868_v20  ;;  %10721 = vmatprep.mubr.msk.bf16.mxu1 %vm2350_vm0, %v15868_v20 }
 0x5b9   : > { %7215 = vmatmul.mubr.bf16.gmra.mrb[228].mxu0 %v15864_v22  ;;  %7601 = vmatmul.mubr.bf16.gmra.mrb[228].mxu1 %v15864_v22 }
 0x5ba   : > { %10706 = vmatprep.mubr.msk.bf16.mxu0 %vm2350_vm0, %v15888_v42  ;;  %10722 = vmatprep.mubr.msk.bf16.mxu1 %vm2350_vm0, %v15888_v42 }
 0x5c1   : > { %7225 = vmatmul.mubr.bf16.gmra.mrb[232].mxu0 %v15884_v34  ;;  %7611 = vmatmul.mubr.bf16.gmra.mrb[232].mxu1 %v15884_v34 }
 0x5c2   : > { %10707 = vmatprep.mubr.msk.bf16.mxu0 %vm2350_vm0, %v15908_v8  ;;  %10723 = vmatprep.mubr.msk.bf16.mxu1 %vm2350_vm0, %v15908_v8 }
 0x5c9   : > { %7235 = vmatmul.mubr.bf16.gmra.mrb[236].mxu0 %v15904_v36  ;;  %7621 = vmatmul.mubr.bf16.gmra.mrb[236].mxu1 %v15904_v36 }
 0x5ca   : > { %10708 = vmatprep.mubr.msk.bf16.mxu0 %vm2350_vm0, %v15928_v61  ;;  %10724 = vmatprep.mubr.msk.bf16.mxu1 %vm2350_vm0, %v15928_v61 }
 0x5d1   : > { %7245 = vmatmul.mubr.bf16.gmra.mrb[240].mxu0 %v15924_v56  ;;  %7631 = vmatmul.mubr.bf16.gmra.mrb[240].mxu1 %v15924_v56 }
 0x5d2   : > { %10709 = vmatprep.mubr.msk.bf16.mxu0 %vm2350_vm0, %v15948_v47  ;;  %10725 = vmatprep.mubr.msk.bf16.mxu1 %vm2350_vm0, %v15948_v47 }
 0x5d9   : > { %7255 = vmatmul.mubr.bf16.gmra.mrb[244].mxu0 %v15944_v59  ;;  %7641 = vmatmul.mubr.bf16.gmra.mrb[244].mxu1 %v15944_v59 }
 0x5da   : > { %10710 = vmatprep.mubr.msk.bf16.mxu0 %vm2350_vm0, %v15968_v30  ;;  %10726 = vmatprep.mubr.msk.bf16.mxu1 %vm2350_vm0, %v15968_v30 }
 0x5e1   : > { %7265 = vmatmul.mubr.bf16.gmra.mrb[248].mxu0 %v15964_v44  ;;  %7651 = vmatmul.mubr.bf16.gmra.mrb[248].mxu1 %v15964_v44 }
 0x5e2   : > { %10711 = vmatprep.mubr.msk.bf16.mxu0 %vm2350_vm0, %v15988_v27  ;;  %10727 = vmatprep.mubr.msk.bf16.mxu1 %vm2350_vm0, %v15988_v27 }
 0x5e9   : > { %7275 = vmatmul.mubr.bf16.gmra.mrb[252].mxu0 %v15984_v45  ;;  %7661 = vmatmul.mubr.bf16.gmra.mrb[252].mxu1 %v15984_v45 }
 0x5ea   : > { %7703 = vmatprep.mubr.bf16.mxu0 %v15578_v23  ;;  %8089 = vmatprep.mubr.bf16.mxu1 %v15578_v23  ;;  %v12825_v23 = vld [vmem:[%s17638_s8 + $0x3c8] ss:$28 sps:$4 sm:$0xff]  }
 0x5f1   : > { %7704 = vmatmul.mubr.bf16.vlgmr.msra.gmra.mrb[0].mxu0 %v15574_v31  ;;  %8090 = vmatmul.mubr.bf16.vlgmr.msra.gmra.mrb[0].mxu1 %v15574_v31  ;;  %v12829_v31 = vld [vmem:[%s17638_s8 + $0x400] ss:$28 sps:$4 sm:$0xff]  }
 0x5f2   : > { %7713 = vmatprep.mubr.bf16.mxu0 %v15622_v13  ;;  %7865 = vmatpush1.bf16.msra.mxu0 %v12821_v18  ;;  %v17751_v18 = vld [vmem:[#allocation8_spill] sm:$0xff] }
 0x5f3   : > { %8097 = vmatprep.mubr.bf16.mxu1 %v15622_v13  ;;  %8219 = vmatpush1.bf16.msra.mxu1 %v12824_v40  ;;  %v12832_v13 = vld [vmem:[%s17638_s8 + $0x408] ss:$28 sps:$4 sm:$0xff]  }
 0x5f4   : > { %7866 = vmatprep.subr.bf16.mxu0 %v12827_v43  ;;  %8220 = vmatprep.subr.bf16.mxu1 %v17748_v16  ;;  %v17752_v40 = vld [vmem:[#allocation11_spill] sm:$0xff]  ;;  %v17753_v43 = vld [vmem:[#allocation10_spill] sm:$0xff] }
 0x5f6   : > { %7867 = vmatpush1.bf16.msra.mxu0 %v12825_v23  ;;  %v17755_v23 = vld [vmem:[#allocation12_spill] sm:$0xff] }
 0x5f7   : > { %8221 = vmatpush1.bf16.msra.mxu1 %v12828_v63  ;;  %7868 = vmatprep.subr.bf16.mxu0 %v12831_v26  ;;  %v17756_v63 = vld [vmem:[#allocation15_spill] sm:$0xff]  ;;  %v17757_v26 = vld [vmem:[#allocation14_spill] sm:$0xff] }
 0x5f8   : > { %8222 = vmatprep.subr.bf16.mxu1 %v17748_v16 }
 0x5f9   : > { %7714 = vmatmul.mubr.bf16.gmra.mrb[4].mxu0 %v15618_v1  ;;  %8098 = vmatmul.mubr.bf16.gmra.mrb[4].mxu1 %v15618_v1  ;;  %v12839_v1 = vld [vmem:[%s17638_s8 + $0x474] ss:$28 sps:$4 sm:$0xff]  }
 0x5fa   : > { %7723 = vmatprep.mubr.bf16.mxu0 %v15666_v28  ;;  %8105 = vmatprep.mubr.bf16.mxu1 %v15666_v28  ;;  %v12837_v28 = vld [vmem:[%s17638_s8 + $0x470] ss:$28 sps:$4 sm:$0xff]  }
 0x5fb   : > { %7869 = vmatpush1.bf16.msra.mxu0 %v12829_v31  ;;  %8223 = vmatpush1.bf16.msra.mxu1 %v12832_v13  ;;  %v17758_v31 = vld [vmem:[#allocation17_spill] sm:$0xff]  ;;  %v17759_v13 = vld [vmem:[#allocation16_spill] sm:$0xff] }
 0x5fc   : > { %7870 = vmatprep.subr.bf16.mxu0 %v12835_v62  ;;  %8224 = vmatprep.subr.bf16.mxu1 %v17748_v16  ;;  %v17760_v62 = vld [vmem:[#allocation20_spill] sm:$0xff] }
 0x5ff   : > { %7871 = vmatpush1.bf16.msra.mxu0 %v12833_v4  ;;  %8225 = vmatpush1.bf16.msra.mxu1 %v12836_v7  ;;  %v5914_v4 = vld [vmem:[%s17639_s9] sm:$0x7f] }
 0x600   : > { %7872 = vmatprep.subr.bf16.mxu0 %v12839_v1  ;;  %8226 = vmatprep.subr.bf16.mxu1 %v17748_v16  ;;  %v17761_v7 = vld [vmem:[#allocation18_spill] sm:$0xff]  ;;  %v17762_v1 = vld [vmem:[#allocation3_spill] sm:$0xff] }
 0x601   : > { %7724 = vmatmul.mubr.bf16.gmra.mrb[8].mxu0 %v15662_v14  ;;  %8106 = vmatmul.mubr.bf16.gmra.mrb[8].mxu1 %v15662_v14  ;;  %v12847_v14 = vld [vmem:[%s17638_s8 + $0x4e4] ss:$28 sps:$4 sm:$0xff]  }
 0x602   : > { %7733 = vmatprep.mubr.bf16.mxu0 %v15710_v46  ;;  %8113 = vmatprep.mubr.bf16.mxu1 %v15710_v46  ;;  %v12845_v46 = vld [vmem:[%s17638_s8 + $0x4e0] ss:$28 sps:$4 sm:$0xff]  }
 0x603   : > { %7873 = vmatpush1.bf16.msra.mxu0 %v12837_v28  ;;  %8227 = vmatpush1.bf16.msra.mxu1 %v12840_v17  ;;  %v16366_v28 = vrot.slane %v5914_v4, %v17762_v1  ;;  %v17763_v17 = vld [vmem:[#allocation4_spill] sm:$0xff] }
 0x604   : > { %7874 = vmatprep.subr.bf16.mxu0 %v12843_v12  ;;  %8228 = vmatprep.subr.bf16.mxu1 %v17748_v16  ;;  %v16369_v12 = vrot.slane %v5914_v4, %v17763_v17  ;;  %v17767_v17 = vld [vmem:[#allocation21_spill] sm:$0xff] }
 0x607   : > { %7875 = vmatpush1.bf16.msra.mxu0 %v12841_v57  ;;  %8229 = vmatpush1.bf16.msra.mxu1 %v12844_v25  ;;  %v17764_v57 = vld [vmem:[#allocation23_spill] sm:$0xff]  ;;  %v17765_v25 = vld [vmem:[#allocation5_spill] sm:$0xff] }
 0x608   : > { %7876 = vmatprep.subr.bf16.mxu0 %v12847_v14  ;;  %8230 = vmatprep.subr.bf16.mxu1 %v17748_v16  ;;  %v16374_v14 = vrot.slane %v5914_v4, %v17765_v25  ;;  %v17768_v25 = vld [vmem:[#allocation27_spill] sm:$0xff] }
 0x609   : > { %7734 = vmatmul.mubr.bf16.gmra.mrb[12].mxu0 %v15706_v38  ;;  %8114 = vmatmul.mubr.bf16.gmra.mrb[12].mxu1 %v15706_v38  ;;  %v12855_v38 = vld [vmem:[%s17638_s8 + $0x554] ss:$28 sps:$4 sm:$0xff]  }
 0x60a   : > { %7743 = vmatprep.mubr.bf16.mxu0 %v15754_v35  ;;  %8121 = vmatprep.mubr.bf16.mxu1 %v15754_v35  ;;  %v12853_v35 = vld [vmem:[%s17638_s8 + $0x550] ss:$28 sps:$4 sm:$0xff]  }
 0x60b   : > { %7877 = vmatpush1.bf16.msra.mxu0 %v12845_v46  ;;  %8231 = vmatpush1.bf16.msra.mxu1 %v12848_v19  ;;  %v17766_v46 = vld [vmem:[#allocation6_spill] sm:$0xff] }
 0x60c   : > { %7878 = vmatprep.subr.bf16.mxu0 %v12851_v11  ;;  %8232 = vmatprep.subr.bf16.mxu1 %v17748_v16  ;;  %v16377_v19 = vrot.slane %v5914_v4, %v17766_v46 }
 0x60f   : > { %7879 = vmatpush1.bf16.msra.mxu0 %v12849_v21  ;;  %8233 = vmatpush1.bf16.msra.mxu1 %v12852_v51 }
 0x610   : > { %7880 = vmatprep.subr.bf16.mxu0 %v12855_v38  ;;  %8234 = vmatprep.subr.bf16.mxu1 %v17748_v16  ;;  %v17754_v16 = vld [vmem:[#allocation13_spill] sm:$0xff] }
 0x611   : > { %7744 = vmatmul.mubr.bf16.gmra.mrb[16].mxu0 %v17749_v37  ;;  %8122 = vmatmul.mubr.bf16.gmra.mrb[16].mxu1 %v17749_v37 }
 0x612   : > { %7753 = vmatprep.mubr.bf16.mxu0 %v17750_v49  ;;  %8129 = vmatprep.mubr.bf16.mxu1 %v17750_v49 }
 0x613   : > { %7881 = vmatpush1.bf16.msra.mxu0 %v12853_v35  ;;  %8235 = vmatpush1.bf16.msra.mxu1 %v12856_v54 }
 0x619   : > { %7754 = vmatmul.mubr.bf16.gmra.mrb[20].mxu0 %v17751_v18  ;;  %8130 = vmatmul.mubr.bf16.gmra.mrb[20].mxu1 %v17751_v18 }
 0x61a   : > { %7763 = vmatprep.mubr.bf16.mxu0 %v17752_v40  ;;  %8137 = vmatprep.mubr.bf16.mxu1 %v17752_v40 }
 0x621   : > { %7764 = vmatmul.mubr.bf16.gmra.mrb[24].mxu0 %v17753_v43  ;;  %8138 = vmatmul.mubr.bf16.gmra.mrb[24].mxu1 %v17753_v43 }
 0x622   : > { %7773 = vmatprep.mubr.bf16.mxu0 %v17754_v16  ;;  %8145 = vmatprep.mubr.bf16.mxu1 %v17754_v16 }
 0x629   : > { %7774 = vmatmul.mubr.bf16.gmra.mrb[28].mxu0 %v17755_v23  ;;  %8146 = vmatmul.mubr.bf16.gmra.mrb[28].mxu1 %v17755_v23 }
 0x62a   : > { %7783 = vmatprep.mubr.bf16.mxu0 %v17756_v63  ;;  %8153 = vmatprep.mubr.bf16.mxu1 %v17756_v63 }
 0x631   : > { %7784 = vmatmul.mubr.bf16.gmra.mrb[32].mxu0 %v17757_v26  ;;  %8154 = vmatmul.mubr.bf16.gmra.mrb[32].mxu1 %v17757_v26 }
 0x632   : > { %7793 = vmatprep.mubr.bf16.mxu0 %v17758_v31  ;;  %8161 = vmatprep.mubr.bf16.mxu1 %v17758_v31 }
 0x639   : > { %7794 = vmatmul.mubr.bf16.gmra.mrb[36].mxu0 %v17759_v13  ;;  %8162 = vmatmul.mubr.bf16.gmra.mrb[36].mxu1 %v17759_v13 }
 0x63a   : > { %7803 = vmatprep.mubr.bf16.mxu0 %v17760_v62  ;;  %8169 = vmatprep.mubr.bf16.mxu1 %v17760_v62 }
 0x641   : > { %7804 = vmatmul.mubr.bf16.gmra.mrb[40].mxu0 %v17761_v7  ;;  %8170 = vmatmul.mubr.bf16.gmra.mrb[40].mxu1 %v17761_v7 }
 0x642   : > { %7813 = vmatprep.mubr.bf16.mxu0 %v17764_v57  ;;  %8177 = vmatprep.mubr.bf16.mxu1 %v17764_v57 }
 0x644   : > { %v7126_v11 = vpop.f32.mrb[192].mxu0  ;;  %v7512_v21 = vpop.f32.mrb[192].mxu1 }
 0x645   : > { %v11338_v51 = vadd.f32 %v7126_v11, %v16366_v28  ;;  %v11402_v38 = vadd.f32 %v7512_v21, %v16369_v12  ;;  %v7128_v35 = vpop.f32.mrb[193].mxu0  ;;  %v7514_v54 = vpop.f32.mrb[193].mxu1 }
 0x646   : > { %v11339_v37 = vadd.f32 %v7128_v35, %v16374_v14  ;;  %v11403_v49 = vadd.f32 %v7514_v54, %v16377_v19  ;;  %v7130_v18 = vpop.f32.mrb[194].mxu0  ;;  %v7516_v40 = vpop.f32.mrb[194].mxu1 }
 0x647   : > { %v10760_v43 = vmul.f32 -1.442695, %v11338_v51  ;;  %v10762_v16 = vmul.f32 -1.442695, %v11402_v38  ;;  %v11340_v23 = vadd.f32 %v7130_v18, %v16366_v28  ;;  %v11404_v63 = vadd.f32 %v7516_v40, %v16369_v12  ;;  %v7132_v26 = vpop.f32.mrb[195].mxu0  ;;  %v7518_v31 = vpop.f32.mrb[195].mxu1 }
 0x648   : > { %v10761_v13 = vmul.f32 -1.442695, %v11339_v37  ;;  %v10763_v62 = vmul.f32 -1.442695, %v11403_v49  ;;  %v11341_v4 = vadd.f32 %v7132_v26, %v16374_v14  ;;  %v11405_v7 = vadd.f32 %v7518_v31, %v16377_v19 }
 0x649   : > { %12921 = vpow2.f32 %v10760_v43  ;;  %v10767_v1 = vmul.f32 -1.442695, %v11340_v23  ;;  %7814 = vmatmul.mubr.bf16.gmra.mrb[44].mxu0 %v17767_v17  ;;  %8178 = vmatmul.mubr.bf16.gmra.mrb[44].mxu1 %v17767_v17  ;;  %v10769_v57 = vmul.f32 -1.442695, %v11404_v63 }
 0x64a   : > { %12923 = vpow2.f32 %v10762_v16  ;;  %7823 = vmatprep.mubr.bf16.mxu0 %v17768_v25  ;;  %8185 = vmatprep.mubr.bf16.mxu1 %v17768_v25  ;;  %v10768_v46 = vmul.f32 -1.442695, %v11341_v4  ;;  %v10770_v11 = vmul.f32 -1.442695, %v11405_v7  ;;  %v17769_v7 = vld [vmem:[#allocation25_spill] sm:$0xff] }
 0x64b   : > { %12925 = vpow2.f32 %v10761_v13 }
 0x64c   : > { %12927 = vpow2.f32 %v10763_v62  ;;  %v7136_v21 = vpop.f32.mrb[196].mxu0  ;;  %v7522_v51 = vpop.f32.mrb[196].mxu1 }
 0x64d   : > { %12929 = vpow2.f32 %v10767_v1  ;;  %v11342_v38 = vadd.f32 %v7136_v21, %v16366_v28  ;;  %v11406_v35 = vadd.f32 %v7522_v51, %v16369_v12  ;;  %v7138_v54 = vpop.f32.mrb[197].mxu0  ;;  %v7524_v37 = vpop.f32.mrb[197].mxu1  ;;  %v17770_v1 = vld [vmem:[#allocation31_spill] sm:$0xff] }
 0x64e   : > { %12931 = vpow2.f32 %v10769_v57  ;;  %v11343_v49 = vadd.f32 %v7138_v54, %v16374_v14  ;;  %v11407_v18 = vadd.f32 %v7524_v37, %v16377_v19  ;;  %v7140_v40 = vpop.f32.mrb[198].mxu0  ;;  %v7526_v43 = vpop.f32.mrb[198].mxu1 }
 0x64f   : > { %12933 = vpow2.f32 %v10768_v46  ;;  %v10774_v16 = vmul.f32 -1.442695, %v11342_v38  ;;  %v10776_v23 = vmul.f32 -1.442695, %v11406_v35  ;;  %v11344_v63 = vadd.f32 %v7140_v40, %v16366_v28  ;;  %v7142_v26 = vpop.f32.mrb[199].mxu0  ;;  %v7528_v31 = vpop.f32.mrb[199].mxu1 }
 0x650   : > { %12935 = vpow2.f32 %v10770_v11  ;;  %v10775_v13 = vmul.f32 -1.442695, %v11343_v49  ;;  %v10777_v62 = vmul.f32 -1.442695, %v11407_v18 }
 0x651   : > { %12937 = vpow2.f32 %v10774_v16  ;;  %v10781_v4 = vmul.f32 -1.442695, %v11344_v63  ;;  %7824 = vmatmul.mubr.bf16.gmra.mrb[48].mxu0 %v17769_v7  ;;  %8186 = vmatmul.mubr.bf16.gmra.mrb[48].mxu1 %v17769_v7 }
 0x652   : > { %12939 = vpow2.f32 %v10776_v23  ;;  %7833 = vmatprep.mubr.bf16.mxu0 %v17770_v1  ;;  %8193 = vmatprep.mubr.bf16.mxu1 %v17770_v1  ;;  %v17771_v1 = vld [vmem:[#allocation29_spill] sm:$0xff] }
 0x653   : > { %v12922_v17 = vpop.eup %12921  ;;  %12941 = vpow2.f32 %v10775_v13 }
 0x654   : > { %v12924_v57 = vpop.eup %12923  ;;  %v9051_v25 = vadd.f32 1.0, %v12922_v17  ;;  %12943 = vpow2.f32 %v10777_v62  ;;  %v7146_v46 = vpop.f32.mrb[200].mxu0 }
 0x655   : > { %v7532_v11 = vpop.f32.mrb[200].mxu1  ;;  %v12926_v21 = vpop.eup %12925  ;;  %v9053_v51 = vadd.f32 1.0, %v12924_v57  ;;  %12945 = vpow2.f32 %v10781_v4 }
 0x656   : > { %v7148_v38 = vpop.f32.mrb[201].mxu0  ;;  %v16400_v35 = vpop.f32.mrb[201].mxu1  ;;  %12947 = vrcp.f32 %v9051_v25  ;;  %v9052_v37 = vadd.f32 1.0, %v12926_v21  ;;  %v17772_v25 = vld [vmem:[#allocation34_spill] sm:$0xff] }
 0x657   : > { %v12928_v54 = vpop.eup %12927  ;;  %v16402_v49 = vpop.f32.mrb[202].mxu0  ;;  %12949 = vrcp.f32 %v9053_v51  ;;  %v11347_v30 = vadd.f32 %v7148_v38, %v16374_v14 }
 0x658   : > { %v16404_v18 = vpop.f32.mrb[202].mxu1  ;;  %v12930_v40 = vpop.eup %12929  ;;  %v9054_v16 = vadd.f32 1.0, %v12928_v54  ;;  %12951 = vrcp.f32 %v9052_v37  ;;  %v11408_v54 = vadd.f32 %v7526_v43, %v16369_v12  ;;  %v11348_v38 = vadd.f32 %v16402_v49, %v16366_v28 }
 0x659   : > { %v16406_v23 = vpop.f32.mrb[203].mxu0  ;;  %v12932_v63 = vpop.eup %12931  ;;  %v9058_v13 = vadd.f32 1.0, %v12930_v40  ;;  %7834 = vmatmul.mubr.bf16.gmra.mrb[52].mxu0 %v17771_v1  ;;  %8194 = vmatmul.mubr.bf16.gmra.mrb[52].mxu1 %v17771_v1 }
 0x65a   : > { %v16408_v62 = vpop.f32.mrb[203].mxu1  ;;  %v12934_v4 = vpop.eup %12933  ;;  %12953 = vrcp.f32 %v9054_v16  ;;  %v9060_v7 = vadd.f32 1.0, %v12932_v63  ;;  %7843 = vmatprep.mubr.bf16.mxu0 %v17772_v25  ;;  %8201 = vmatprep.mubr.bf16.mxu1 %v17772_v25  ;;  %v11345_v16 = vadd.f32 %v7142_v26, %v16374_v14  ;;  %v11346_v26 = vadd.f32 %v7146_v46, %v16366_v28 }
 0x65b   : > { %v12936_v17 = vpop.eup %12935  ;;  %12955 = vrcp.f32 %v9058_v13  ;;  %v9059_v57 = vadd.f32 1.0, %v12934_v4  ;;  %v11409_v4 = vadd.f32 %v7528_v31, %v16377_v19  ;;  %v11349_v49 = vadd.f32 %v16406_v23, %v16374_v14 }
 0x65c   : > { %v12938_v21 = vpop.eup %12937  ;;  %12957 = vrcp.f32 %v9060_v7  ;;  %v9061_v51 = vadd.f32 1.0, %v12936_v17  ;;  %v16417_v63 = vpop.f32.mrb[204].mxu0  ;;  %v10782_v46 = vmul.f32 -1.442695, %v11345_v16  ;;  %v10788_v16 = vmul.f32 -1.442695, %v11346_v26 }
 0x65d   : > { %v12940_v37 = vpop.eup %12939  ;;  %12959 = vrcp.f32 %v9059_v57  ;;  %v9065_v40 = vadd.f32 1.0, %v12938_v21  ;;  %v16420_v45 = vpop.f32.mrb[204].mxu1  ;;  %v10795_v23 = vmul.f32 -1.442695, %v11348_v38 }
 0x65e   : > { %v12942_v1 = vpop.eup %12941  ;;  %12961 = vrcp.f32 %v9061_v51  ;;  %v9067_v13 = vadd.f32 1.0, %v12940_v37  ;;  %v16422_v25 = vpop.f32.mrb[205].mxu0  ;;  %v10783_v51 = vmul.f32 -1.442695, %v11408_v54  ;;  %v11410_v37 = vadd.f32 %v7532_v11, %v16369_v12 }
 0x65f   : > { %v12944_v7 = vpop.eup %12943  ;;  %12963 = vrcp.f32 %v9065_v40  ;;  %v9066_v43 = vadd.f32 1.0, %v12942_v1  ;;  %v16430_v17 = vpop.f32.mrb[205].mxu1  ;;  %v10784_v54 = vmul.f32 -1.442695, %v11409_v4  ;;  %v11411_v11 = vadd.f32 %v16400_v35, %v16377_v19 }
 0x660   : > { %v16432_v57 = vpop.f32.mrb[206].mxu0  ;;  %v12946_v31 = vpop.eup %12945  ;;  %12965 = vrcp.f32 %v9067_v13  ;;  %v9068_v21 = vadd.f32 1.0, %v12944_v7  ;;  %v10790_v35 = vmul.f32 -1.442695, %v11410_v37  ;;  %v11412_v7 = vadd.f32 %v16404_v18, %v16369_v12 }
 0x661   : > { %v16435_v27 = vpop.f32.mrb[206].mxu1  ;;  %v16437_v44 = vpop.f32.mrb[207].mxu0  ;;  %12967 = vrcp.f32 %v9066_v43  ;;  %v9072_v1 = vadd.f32 1.0, %v12946_v31  ;;  %7844 = vmatmul.mubr.bf16.gmra.mrb[56].mxu0 %v15962_v32  ;;  %8202 = vmatmul.mubr.bf16.gmra.mrb[56].mxu1 %v15962_v32  ;;  %v10791_v31 = vmul.f32 -1.442695, %v11411_v11  ;;  %v11413_v18 = vadd.f32 %v16408_v62, %v16377_v19 }
 0x662   : > { %v12948_v40 = vpop.eup %12947  ;;  %v16440_v59 = vpop.f32.mrb[207].mxu1  ;;  %12969 = vrcp.f32 %v9068_v21  ;;  %7853 = vmatprep.mubr.bf16.mxu0 %v15986_v24  ;;  %8209 = vmatprep.mubr.bf16.mxu1 %v15986_v24  ;;  %v11350_v37 = vadd.f32 %v16417_v63, %v16366_v28  ;;  %v10797_v62 = vmul.f32 -1.442695, %v11412_v7  ;;  %v10796_v63 = vmul.f32 -1.442695, %v11349_v49 }
 0x663   : > { %v12950_v47 = vpop.eup %12949  ;;  %9723 = vst [vmem:[%s16427_s23] sm:$0xff] %v12948_v40  ;;  %12971 = vrcp.f32 %v9072_v1 }
 0x664   : > { %v12952_v13 = vpop.eup %12951  ;;  %9725 = vst [vmem:[%s16427_s23 + $0x10] sm:$0xff] %v12950_v47  ;;  %12973 = vpow2.f32 %v10783_v51  ;;  %v10789_v47 = vmul.f32 -1.442695, %v11347_v30  ;;  %v16458_v43 = vpop.f32.mrb[208].mxu0 }
 0x665   : > { %v12954_v4 = vpop.eup %12953  ;;  %9724 = vst [vmem:[%s16427_s23 + $0x8] sm:$0xff] %v12952_v13  ;;  %12975 = vpow2.f32 %v10782_v46  ;;  %v16460_v26 = vpop.f32.mrb[208].mxu1 }
 0x666   : > { %v12956_v32 = vpop.eup %12955  ;;  %9726 = vst [vmem:[%s16427_s23 + $0x18] sm:$0xff] %v12954_v4  ;;  %12977 = vpow2.f32 %v10784_v54  ;;  %v16465_v21 = vpop.f32.mrb[209].mxu0  ;;  %v11414_v54 = vadd.f32 %v16420_v45, %v16369_v12  ;;  %v10798_v4 = vmul.f32 -1.442695, %v11413_v18  ;;  %v10802_v45 = vmul.f32 -1.442695, %v11350_v37 }
 0x667   : > { %v12958_v24 = vpop.eup %12957  ;;  %9730 = vst [vmem:[%s16427_s23 + $0x38] sm:$0xff] %v12956_v32  ;;  %v16467_v51 = vpop.f32.mrb[209].mxu1  ;;  %12979 = vpow2.f32 %v10788_v16 }
 0x668   : > { %v12960_v30 = vpop.eup %12959  ;;  %9732 = vst [vmem:[%s16427_s23 + $0x48] sm:$0xff] %v12958_v24  ;;  %v16472_v40 = vpop.f32.mrb[210].mxu0  ;;  %12981 = vpow2.f32 %v10790_v35  ;;  %v10804_v32 = vmul.f32 -1.442695, %v11414_v54 }
 0x669   : > { %v16474_v1 = vpop.f32.mrb[210].mxu1  ;;  %v12962_v46 = vpop.eup %12961  ;;  %9731 = vst [vmem:[%s16427_s23 + $0x40] sm:$0xff] %v12960_v30  ;;  %12983 = vpow2.f32 %v10789_v47  ;;  %7854 = vmatmul.mubr.bf16.gmra.mrb[60].mxu0 %v15982_v48  ;;  %8210 = vmatmul.mubr.bf16.gmra.mrb[60].mxu1 %v15982_v48 }
 0x66a   : > { %v16479_v11 = vpop.f32.mrb[211].mxu0  ;;  %v16481_v13 = vpop.f32.mrb[211].mxu1  ;;  %9733 = vst [vmem:[%s16427_s23 + $0x50] sm:$0xff] %v12962_v46  ;;  %12985 = vpow2.f32 %v10791_v31  ;;  %10728 = vmatprep.mubr.msk.bf16.mxu0 %vm2350_vm0, %v15580_v55  ;;  %10744 = vmatprep.mubr.msk.bf16.mxu1 %vm2350_vm0, %v15580_v55 }
 0x66b   : > { %v12964_v16 = vpop.eup %12963  ;;  %12987 = vpow2.f32 %v10795_v23 }
 0x66c   : > { %v12966_v38 = vpop.eup %12965  ;;  %9737 = vst [vmem:[%s16427_s23 + $0x70] sm:$0xff] %v12964_v16  ;;  %12989 = vpow2.f32 %v10797_v62  ;;  %v16494_v49 = vpop.f32.mrb[212].mxu0 }
 0x66d   : > { %v12968_v35 = vpop.eup %12967  ;;  %9739 = vst [vmem:[%s16427_s23 + $0x80] sm:$0xff] %v12966_v38  ;;  %12991 = vpow2.f32 %v10796_v63  ;;  %v16496_v48 = vpop.f32.mrb[212].mxu1 }
 0x66e   : > { %v12970_v7 = vpop.eup %12969  ;;  %9738 = vst [vmem:[%s16427_s23 + $0x78] sm:$0xff] %v12968_v35  ;;  %12993 = vpow2.f32 %v10798_v4  ;;  %v16499_v31 = vpop.f32.mrb[213].mxu0 }
 0x66f   : > { %v12972_v47 = vpop.eup %12971  ;;  %9740 = vst [vmem:[%s16427_s23 + $0x88] sm:$0xff] %v12970_v7  ;;  %v16501_v18 = vpop.f32.mrb[213].mxu1  ;;  %12995 = vpow2.f32 %v10802_v45 }
 0x670   : > { %v12974_v24 = vpop.eup %12973  ;;  %9744 = vst [vmem:[%s16427_s23 + $0xa8] sm:$0xff] %v12972_v47  ;;  %v16503_v23 = vpop.f32.mrb[214].mxu0  ;;  %12997 = vpow2.f32 %v10804_v32 }
 0x671   : > { %v12976_v30 = vpop.eup %12975  ;;  %v9074_v55 = vadd.f32 1.0, %v12974_v24  ;;  %v16505_v37 = vpop.f32.mrb[214].mxu1  ;;  %7897 = vmatmul.mubr.bf16.vlgmr.msra.gmra.mrb[0].mxu0 %v15576_v33  ;;  %8251 = vmatmul.mubr.bf16.vlgmr.msra.gmra.mrb[64].mxu1 %v15576_v33 }
 0x672   : > { %v12978_v46 = vpop.eup %12977  ;;  %v9073_v62 = vadd.f32 1.0, %v12976_v30  ;;  %v16507_v54 = vpop.f32.mrb[215].mxu0  ;;  %10729 = vmatprep.mubr.msk.bf16.mxu0 %vm2350_vm0, %v15624_v5  ;;  %10745 = vmatprep.mubr.msk.bf16.mxu1 %vm2350_vm0, %v15624_v5 }
 0x673   : > { %v12980_v16 = vpop.eup %12979  ;;  %12999 = vrcp.f32 %v9074_v55  ;;  %v9075_v63 = vadd.f32 1.0, %v12978_v46  ;;  %v16509_v38 = vpop.f32.mrb[215].mxu1 }
 0x674   : > { %v12982_v4 = vpop.eup %12981  ;;  %13001 = vrcp.f32 %v9073_v62  ;;  %v9079_v35 = vadd.f32 1.0, %v12980_v16  ;;  %v16517_v55 = vpop.f32.mrb[216].mxu0  ;;  %v11351_v62 = vadd.f32 %v16422_v25, %v16374_v14  ;;  %v11352_v25 = vadd.f32 %v16432_v57, %v16366_v28 }
 0x675   : > { %v12984_v45 = vpop.eup %12983  ;;  %13003 = vrcp.f32 %v9075_v63  ;;  %v9081_v7 = vadd.f32 1.0, %v12982_v4  ;;  %v16521_v16 = vpop.f32.mrb[216].mxu1  ;;  %v11353_v57 = vadd.f32 %v16437_v44, %v16374_v14 }
 0x676   : > { %v12986_v32 = vpop.eup %12985  ;;  %13005 = vrcp.f32 %v9079_v35  ;;  %v9080_v47 = vadd.f32 1.0, %v12984_v45  ;;  %v16523_v63 = vpop.f32.mrb[217].mxu0  ;;  %v11415_v35 = vadd.f32 %v16430_v17, %v16377_v19  ;;  %v11416_v17 = vadd.f32 %v16435_v27, %v16369_v12 }
 0x677   : > { %v12988_v24 = vpop.eup %12987  ;;  %13007 = vrcp.f32 %v9081_v7  ;;  %v9082_v30 = vadd.f32 1.0, %v12986_v32  ;;  %v16527_v45 = vpop.f32.mrb[217].mxu1  ;;  %v11417_v27 = vadd.f32 %v16440_v59, %v16377_v19  ;;  %v10809_v44 = vmul.f32 -1.442695, %v11352_v25 }
 0x678   : > { %v12990_v46 = vpop.eup %12989  ;;  %13009 = vrcp.f32 %v9080_v47  ;;  %v9086_v33 = vadd.f32 1.0, %v12988_v24  ;;  %v16529_v7 = vpop.f32.mrb[218].mxu0  ;;  %v10805_v8 = vmul.f32 -1.442695, %v11415_v35  ;;  %v11418_v59 = vadd.f32 %v16460_v26, %v16369_v12 }
 0x679   : > { %v12992_v4 = vpop.eup %12991  ;;  %13011 = vrcp.f32 %v9082_v30  ;;  %v9088_v5 = vadd.f32 1.0, %v12990_v46  ;;  %v16533_v24 = vpop.f32.mrb[218].mxu1  ;;  %7907 = vmatmul.mubr.bf16.gmra.mrb[4].mxu0 %v15620_v2  ;;  %8259 = vmatmul.mubr.bf16.gmra.mrb[68].mxu1 %v15620_v2  ;;  %v11354_v2 = vadd.f32 %v16458_v43, %v16366_v28  ;;  %v10810_v25 = vmul.f32 -1.442695, %v11353_v57 }
 0x67a   : > { %v12994_v32 = vpop.eup %12993  ;;  %13013 = vrcp.f32 %v9086_v33  ;;  %v9087_v47 = vadd.f32 1.0, %v12992_v4  ;;  %v16535_v56 = vpop.f32.mrb[219].mxu0  ;;  %v10803_v4 = vmul.f32 -1.442695, %v11351_v62  ;;  %10730 = vmatprep.mubr.msk.bf16.mxu0 %vm2350_vm0, %v15668_v53  ;;  %10746 = vmatprep.mubr.msk.bf16.mxu1 %vm2350_vm0, %v15668_v53  ;;  %v10811_v62 = vmul.f32 -1.442695, %v11416_v17 }
 0x67b   : > { %v12996_v61 = vpop.eup %12995  ;;  %13015 = vrcp.f32 %v9088_v5  ;;  %v9089_v30 = vadd.f32 1.0, %v12994_v32  ;;  %v16539_v46 = vpop.f32.mrb[219].mxu1  ;;  %v11355_v43 = vadd.f32 %v16465_v21, %v16374_v14  ;;  %v10812_v26 = vmul.f32 -1.442695, %v11417_v27 }
 0x67c   : > { %v12998_v36 = vpop.eup %12997  ;;  %13017 = vrcp.f32 %v9087_v47  ;;  %v9093_v33 = vadd.f32 1.0, %v12996_v61  ;;  %v16557_v35 = vpop.f32.mrb[220].mxu0  ;;  %v10816_v21 = vmul.f32 -1.442695, %v11354_v2 }
 0x67d   : > { %v13000_v5 = vpop.eup %12999  ;;  %13019 = vrcp.f32 %v9089_v30  ;;  %v9095_v32 = vadd.f32 1.0, %v12998_v36  ;;  %v16559_v47 = vpop.f32.mrb[220].mxu1 }
 0x67e   : > { %v13002_v61 = vpop.eup %13001  ;;  %9746 = vst [vmem:[%s16427_s23 + $0xb8] sm:$0xff] %v13000_v5  ;;  %13021 = vrcp.f32 %v9093_v33  ;;  %v16564_v30 = vpop.f32.mrb[221].mxu0  ;;  %v11419_v5 = vadd.f32 %v16467_v51, %v16377_v19  ;;  %v10818_v51 = vmul.f32 -1.442695, %v11418_v59 }
 0x67f   : > { %v13004_v36 = vpop.eup %13003  ;;  %9745 = vst [vmem:[%s16427_s23 + $0xb0] sm:$0xff] %v13002_v61  ;;  %13023 = vrcp.f32 %v9095_v32  ;;  %v16566_v33 = vpop.f32.mrb[221].mxu1  ;;  %v11356_v61 = vadd.f32 %v16472_v40, %v16366_v28  ;;  %v11357_v40 = vadd.f32 %v16479_v11, %v16374_v14 }
 0x680   : > { %v13006_v53 = vpop.eup %13005  ;;  %9747 = vst [vmem:[%s16427_s23 + $0xc0] sm:$0xff] %v13004_v36  ;;  %13025 = vpow2.f32 %v10803_v4  ;;  %v16571_v32 = vpop.f32.mrb[222].mxu0 }
 0x681   : > { %v13008_v17 = vpop.eup %13007  ;;  %9751 = vst [vmem:[%s16427_s23 + $0xe0] sm:$0xff] %v13006_v53  ;;  %13027 = vpow2.f32 %v10805_v8  ;;  %v16573_v4 = vpop.f32.mrb[222].mxu1  ;;  %v11420_v53 = vadd.f32 %v16474_v1, %v16369_v12  ;;  %7917 = vmatmul.mubr.bf16.gmra.mrb[8].mxu0 %v15664_v0  ;;  %8267 = vmatmul.mubr.bf16.gmra.mrb[72].mxu1 %v15664_v0  ;;  %v10823_v11 = vmul.f32 -1.442695, %v11356_v61 }
 0x682   : > { %v13010_v57 = vpop.eup %13009  ;;  %9753 = vst [vmem:[%s16427_s23 + $0xf0] sm:$0xff] %v13008_v17  ;;  %13029 = vpow2.f32 %v10809_v44  ;;  %v16578_v36 = vpop.f32.mrb[223].mxu0  ;;  %v10817_v44 = vmul.f32 -1.442695, %v11355_v43  ;;  %10731 = vmatprep.mubr.msk.bf16.mxu0 %vm2350_vm0, %v15712_v60  ;;  %10747 = vmatprep.mubr.msk.bf16.mxu1 %vm2350_vm0, %v15712_v60  ;;  %v10824_v17 = vmul.f32 -1.442695, %v11357_v40 }
 0x683   : > { %v16580_v8 = vpop.f32.mrb[223].mxu1  ;;  %v13012_v27 = vpop.eup %13011  ;;  %9752 = vst [vmem:[%s16427_s23 + $0xe8] sm:$0xff] %v13010_v57  ;;  %13031 = vpow2.f32 %v10811_v62  ;;  %v10819_v62 = vmul.f32 -1.442695, %v11419_v5  ;;  %v10825_v0 = vmul.f32 -1.442695, %v11420_v53 }
 0x684   : > { %v13014_v34 = vpop.eup %13013  ;;  %9754 = vst [vmem:[%s16427_s23 + $0xf8] sm:$0xff] %v13012_v27  ;;  %13033 = vpow2.f32 %v10810_v25  ;;  %v16599_v25 = vpop.f32.mrb[224].mxu1 }
 0x685   : > { %v13016_v2 = vpop.eup %13015  ;;  %9758 = vst [vmem:[%s16427_s23 + $0x118] sm:$0xff] %v13014_v34  ;;  %13035 = vpow2.f32 %v10812_v26  ;;  %v16597_v34 = vpop.f32.mrb[224].mxu0 }
 0x686   : > { %v13018_v1 = vpop.eup %13017  ;;  %9760 = vst [vmem:[%s16427_s23 + $0x128] sm:$0xff] %v13016_v2  ;;  %13037 = vpow2.f32 %v10816_v21  ;;  %v16602_v26 = vpop.f32.mrb[225].mxu0 }
 0x687   : > { %v13020_v59 = vpop.eup %13019  ;;  %9759 = vst [vmem:[%s16427_s23 + $0x120] sm:$0xff] %v13018_v1  ;;  %13039 = vpow2.f32 %v10818_v51  ;;  %v16604_v60 = vpop.f32.mrb[225].mxu1 }
 0x688   : > { %v13022_v43 = vpop.eup %13021  ;;  %9761 = vst [vmem:[%s16427_s23 + $0x130] sm:$0xff] %v13020_v59  ;;  %13041 = vpow2.f32 %v10817_v44  ;;  %v16607_v57 = vpop.f32.mrb[226].mxu0 }
 0x689   : > { %v13024_v5 = vpop.eup %13023  ;;  %9765 = vst [vmem:[%s16427_s23 + $0x150] sm:$0xff] %v13022_v43  ;;  %13043 = vpow2.f32 %v10819_v62  ;;  %v16609_v21 = vpop.f32.mrb[226].mxu1  ;;  %7927 = vmatmul.mubr.bf16.gmra.mrb[12].mxu0 %v15708_v39  ;;  %8275 = vmatmul.mubr.bf16.gmra.mrb[76].mxu1 %v15708_v39 }
 0x68a   : > { %v13026_v61 = vpop.eup %13025  ;;  %9767 = vst [vmem:[%s16427_s23 + $0x160] sm:$0xff] %v13024_v5  ;;  %13045 = vpow2.f32 %v10823_v11  ;;  %v16612_v27 = vpop.f32.mrb[227].mxu0  ;;  %10732 = vmatprep.mubr.msk.bf16.mxu0 %vm2350_vm0, %v15756_v3  ;;  %10748 = vmatprep.mubr.msk.bf16.mxu1 %vm2350_vm0, %v15756_v3 }
 0x68b   : > { %v16614_v51 = vpop.f32.mrb[227].mxu1  ;;  %v13028_v53 = vpop.eup %13027  ;;  %v9094_v44 = vadd.f32 1.0, %v13026_v61  ;;  %13047 = vpow2.f32 %v10825_v0 }
 0x68c   : > { %17773 = vst [vmem:[#allocation7_spill] sm:$0xff] %v16614_v51  ;;  %v13030_v40 = vpop.eup %13029  ;;  %v9096_v2 = vadd.f32 1.0, %v13028_v53  ;;  %13049 = vpow2.f32 %v10824_v17  ;;  %v16622_v17 = vpop.f32.mrb[228].mxu0 }
 0x68d   : > { %v13032_v62 = vpop.eup %13031  ;;  %13051 = vrcp.f32 %v9094_v44  ;;  %v9100_v1 = vadd.f32 1.0, %v13030_v40  ;;  %v16624_v61 = vpop.f32.mrb[228].mxu1 }
 0x68e   : > { %v13034_v11 = vpop.eup %13033  ;;  %13053 = vrcp.f32 %v9096_v2  ;;  %v9102_v59 = vadd.f32 1.0, %v13032_v62  ;;  %v16626_v53 = vpop.f32.mrb[229].mxu0 }
 0x68f   : > { %v13036_v0 = vpop.eup %13035  ;;  %13055 = vrcp.f32 %v9100_v1  ;;  %v9101_v43 = vadd.f32 1.0, %v13034_v11  ;;  %17774 = vst [vmem:[#allocation9_spill] sm:$0xff] %v16626_v53  ;;  %v16628_v51 = vpop.f32.mrb[229].mxu1  ;;  %v11421_v1 = vadd.f32 %v16481_v13, %v16377_v19 }
 0x690   : > { %v13038_v5 = vpop.eup %13037  ;;  %13057 = vrcp.f32 %v9102_v59  ;;  %v9103_v39 = vadd.f32 1.0, %v13036_v0  ;;  %17775 = vst [vmem:[#allocation8_spill] sm:$0xff] %v16628_v51  ;;  %v16630_v3 = vpop.f32.mrb[230].mxu0 }
 0x691   : > { %v13040_v44 = vpop.eup %13039  ;;  %13059 = vrcp.f32 %v9101_v43  ;;  %v9107_v40 = vadd.f32 1.0, %v13038_v5  ;;  %17776 = vst [vmem:[#allocation11_spill] sm:$0xff] %v16630_v3  ;;  %v16634_v11 = vpop.f32.mrb[230].mxu1  ;;  %v11358_v43 = vadd.f32 %v16494_v49, %v16366_v28  ;;  %7937 = vmatmul.mubr.bf16.gmra.mrb[16].mxu0 %v15752_v15  ;;  %8283 = vmatmul.mubr.bf16.gmra.mrb[80].mxu1 %v15752_v15  ;;  %v11423_v15 = vadd.f32 %v16501_v18, %v16377_v19 }
 0x692   : > { %v13042_v2 = vpop.eup %13041  ;;  %13061 = vrcp.f32 %v9103_v39  ;;  %v9109_v62 = vadd.f32 1.0, %v13040_v44  ;;  %v16636_v59 = vpop.f32.mrb[231].mxu0  ;;  %v11422_v39 = vadd.f32 %v16496_v48, %v16369_v12  ;;  %10733 = vmatprep.mubr.msk.bf16.mxu0 %vm2350_vm0, %v15788_v29  ;;  %10749 = vmatprep.mubr.msk.bf16.mxu1 %vm2350_vm0, %v15788_v29 }
 0x693   : > { %v13044_v0 = vpop.eup %13043  ;;  %13063 = vrcp.f32 %v9107_v40  ;;  %v9108_v53 = vadd.f32 1.0, %v13042_v2  ;;  %v16640_v5 = vpop.f32.mrb[231].mxu1  ;;  %v11359_v40 = vadd.f32 %v16499_v31, %v16374_v14  ;;  %v10826_v2 = vmul.f32 -1.442695, %v11421_v1 }
 0x694   : > { %17777 = vst [vmem:[#allocation10_spill] sm:$0xff] %v16640_v5  ;;  %v13046_v51 = vpop.eup %13045  ;;  %13065 = vrcp.f32 %v9109_v62  ;;  %v9110_v3 = vadd.f32 1.0, %v13044_v0  ;;  %v10830_v62 = vmul.f32 -1.442695, %v11358_v43  ;;  %v11360_v31 = vadd.f32 %v16503_v23, %v16366_v28  ;;  %v16656_v0 = vpop.f32.mrb[232].mxu0 }
 0x695   : > { %v13048_v13 = vpop.eup %13047  ;;  %13067 = vrcp.f32 %v9108_v53  ;;  %v9114_v44 = vadd.f32 1.0, %v13046_v51  ;;  %v10832_v29 = vmul.f32 -1.442695, %v11422_v39  ;;  %v16661_v1 = vpop.f32.mrb[232].mxu1  ;;  %v10831_v43 = vmul.f32 -1.442695, %v11359_v40 }
 0x696   : > { %v13050_v49 = vpop.eup %13049  ;;  %13069 = vrcp.f32 %v9110_v3  ;;  %v9116_v48 = vadd.f32 1.0, %v13048_v13  ;;  %v11424_v3 = vadd.f32 %v16505_v37, %v16369_v12  ;;  %v16663_v18 = vpop.f32.mrb[233].mxu0  ;;  %v11361_v23 = vadd.f32 %v16507_v54, %v16374_v14 }
 0x697   : > { %v13052_v53 = vpop.eup %13051  ;;  %13071 = vrcp.f32 %v9114_v44  ;;  %v9115_v51 = vadd.f32 1.0, %v13050_v49  ;;  %v16668_v44 = vpop.f32.mrb[233].mxu1  ;;  %v10833_v37 = vmul.f32 -1.442695, %v11423_v15  ;;  %v10837_v54 = vmul.f32 -1.442695, %v11360_v31 }
 0x698   : > { %v13054_v5 = vpop.eup %13053  ;;  %9766 = vst [vmem:[%s16427_s23 + $0x158] sm:$0xff] %v13052_v53  ;;  %13073 = vrcp.f32 %v9116_v48  ;;  %v16670_v49 = vpop.f32.mrb[234].mxu0  ;;  %v11425_v48 = vadd.f32 %v16509_v38, %v16377_v19  ;;  %v10839_v15 = vmul.f32 -1.442695, %v11424_v3  ;;  %v11426_v38 = vadd.f32 %v16521_v16, %v16369_v12 }
 0x699   : > { %v13056_v13 = vpop.eup %13055  ;;  %9768 = vst [vmem:[%s16427_s23 + $0x168] sm:$0xff] %v13054_v5  ;;  %13075 = vrcp.f32 %v9115_v51  ;;  %17778 = vst [vmem:[#allocation13_spill] sm:$0xff] %v16670_v49  ;;  %v16675_v53 = vpop.f32.mrb[234].mxu1  ;;  %v11362_v51 = vadd.f32 %v16517_v55, %v16366_v28  ;;  %7947 = vmatmul.mubr.bf16.gmra.mrb[20].mxu0 %v15784_v41  ;;  %8291 = vmatmul.mubr.bf16.gmra.mrb[84].mxu1 %v15784_v41  ;;  %v10838_v31 = vmul.f32 -1.442695, %v11361_v23 }
 0x69a   : > { %v13058_v39 = vpop.eup %13057  ;;  %9772 = vst [vmem:[%s16427_s23 + $0x188] sm:$0xff] %v13056_v13  ;;  %13077 = vpow2.f32 %v10826_v2  ;;  %v16677_v5 = vpop.f32.mrb[235].mxu0  ;;  %v11363_v55 = vadd.f32 %v16523_v63, %v16374_v14  ;;  %10734 = vmatprep.mubr.msk.bf16.mxu0 %vm2350_vm0, %v15808_v10  ;;  %10750 = vmatprep.mubr.msk.bf16.mxu1 %vm2350_vm0, %v15808_v10  ;;  %v11427_v41 = vadd.f32 %v16527_v45, %v16377_v19  ;;  %v10846_v10 = vmul.f32 -1.442695, %v11426_v38 }
 0x69b   : > { %v13060_v40 = vpop.eup %13059  ;;  %9774 = vst [vmem:[%s16427_s23 + $0x198] sm:$0xff] %v13058_v39  ;;  %13079 = vpow2.f32 %v10830_v62  ;;  %v16682_v49 = vpop.f32.mrb[235].mxu1  ;;  %v10844_v13 = vmul.f32 -1.442695, %v11362_v51 }
 0x69c   : > { %v13062_v2 = vpop.eup %13061  ;;  %9773 = vst [vmem:[%s16427_s23 + $0x190] sm:$0xff] %v13060_v40  ;;  %13081 = vpow2.f32 %v10832_v29  ;;  %v10840_v29 = vmul.f32 -1.442695, %v11425_v48  ;;  %v16700_v63 = vpop.f32.mrb[236].mxu0  ;;  %v10845_v45 = vmul.f32 -1.442695, %v11363_v55 }
 0x69d   : > { %v13064_v62 = vpop.eup %13063  ;;  %9775 = vst [vmem:[%s16427_s23 + $0x1a0] sm:$0xff] %v13062_v2  ;;  %13083 = vpow2.f32 %v10831_v43  ;;  %v16702_v43 = vpop.f32.mrb[236].mxu1  ;;  %v10847_v2 = vmul.f32 -1.442695, %v11427_v41 }
 0x69e   : > { %v13066_v16 = vpop.eup %13065  ;;  %9779 = vst [vmem:[%s16427_s23 + $0x1c0] sm:$0xff] %v13064_v62  ;;  %13085 = vpow2.f32 %v10833_v37  ;;  %v16705_v39 = vpop.f32.mrb[237].mxu0 }
 0x69f   : > { %v13068_v3 = vpop.eup %13067  ;;  %9781 = vst [vmem:[%s16427_s23 + $0x1d0] sm:$0xff] %v13066_v16  ;;  %13087 = vpow2.f32 %v10837_v54  ;;  %v16707_v37 = vpop.f32.mrb[237].mxu1 }
 0x6a0   : > { %v13070_v23 = vpop.eup %13069  ;;  %9780 = vst [vmem:[%s16427_s23 + $0x1c8] sm:$0xff] %v13068_v3  ;;  %13089 = vpow2.f32 %v10839_v15  ;;  %v16710_v40 = vpop.f32.mrb[238].mxu0 }
 0x6a1   : > { %v13072_v48 = vpop.eup %13071  ;;  %9782 = vst [vmem:[%s16427_s23 + $0x1d8] sm:$0xff] %v13070_v23  ;;  %13091 = vpow2.f32 %v10838_v31  ;;  %v16712_v54 = vpop.f32.mrb[238].mxu1  ;;  %7957 = vmatmul.mubr.bf16.gmra.mrb[24].mxu0 %v15804_v9  ;;  %8299 = vmatmul.mubr.bf16.gmra.mrb[88].mxu1 %v15804_v9 }
 0x6a2   : > { %v13074_v51 = vpop.eup %13073  ;;  %9786 = vst [vmem:[%s16427_s23 + $0x1f8] sm:$0xff] %v13072_v48  ;;  %13093 = vpow2.f32 %v10840_v29  ;;  %v16715_v15 = vpop.f32.mrb[239].mxu0  ;;  %10735 = vmatprep.mubr.msk.bf16.mxu0 %vm2350_vm0, %v15828_v50  ;;  %10751 = vmatprep.mubr.msk.bf16.mxu1 %vm2350_vm0, %v15828_v50 }
 0x6a3   : > { %v16717_v38 = vpop.f32.mrb[239].mxu1  ;;  %v13076_v62 = vpop.eup %13075  ;;  %9788 = vst [vmem:[%s16427_s23 + $0x208] sm:$0xff] %v13074_v51  ;;  %13095 = vpow2.f32 %v10844_v13 }
 0x6a4   : > { %v13078_v16 = vpop.eup %13077  ;;  %9787 = vst [vmem:[%s16427_s23 + $0x200] sm:$0xff] %v13076_v62  ;;  %13097 = vpow2.f32 %v10846_v10  ;;  %v16727_v23 = vpop.f32.mrb[240].mxu0 }
 0x6a5   : > { %v13080_v31 = vpop.eup %13079  ;;  %v9117_v55 = vadd.f32 1.0, %v13078_v16  ;;  %13099 = vpow2.f32 %v10845_v45  ;;  %v16729_v10 = vpop.f32.mrb[240].mxu1 }
 0x6a6   : > { %v13082_v29 = vpop.eup %13081  ;;  %v9121_v41 = vadd.f32 1.0, %v13080_v31  ;;  %13101 = vpow2.f32 %v10847_v2  ;;  %17779 = vst [vmem:[#allocation12_spill] sm:$0xff] %v16729_v10  ;;  %v16731_v45 = vpop.f32.mrb[241].mxu0 }
 0x6a7   : > { %v13084_v3 = vpop.eup %13083  ;;  %13103 = vrcp.f32 %v9117_v55  ;;  %v9123_v13 = vadd.f32 1.0, %v13082_v29  ;;  %17780 = vst [vmem:[#allocation15_spill] sm:$0xff] %v16731_v45  ;;  %v16733_v51 = vpop.f32.mrb[241].mxu1 }
 0x6a8   : > { %v13086_v9 = vpop.eup %13085  ;;  %13105 = vrcp.f32 %v9121_v41  ;;  %v9122_v48 = vadd.f32 1.0, %v13084_v3  ;;  %17781 = vst [vmem:[#allocation14_spill] sm:$0xff] %v16733_v51  ;;  %v16735_v16 = vpop.f32.mrb[242].mxu0 }
 0x6a9   : > { %v13088_v62 = vpop.eup %13087  ;;  %13107 = vrcp.f32 %v9123_v13  ;;  %v9124_v50 = vadd.f32 1.0, %v13086_v9  ;;  %v16737_v2 = vpop.f32.mrb[242].mxu1  ;;  %v11364_v13 = vadd.f32 %v16529_v7, %v16366_v28  ;;  %7967 = vmatmul.mubr.bf16.gmra.mrb[28].mxu0 %v15824_v58  ;;  %8307 = vmatmul.mubr.bf16.gmra.mrb[92].mxu1 %v15824_v58  ;;  %v11365_v7 = vadd.f32 %v16535_v56, %v16374_v14 }
 0x6aa   : > { %v13090_v31 = vpop.eup %13089  ;;  %13109 = vrcp.f32 %v9122_v48  ;;  %v9128_v55 = vadd.f32 1.0, %v13088_v62  ;;  %v16739_v29 = vpop.f32.mrb[243].mxu0  ;;  %v11428_v62 = vadd.f32 %v16533_v24, %v16369_v12  ;;  %10736 = vmatprep.mubr.msk.bf16.mxu0 %vm2350_vm0, %v15848_v6  ;;  %10752 = vmatprep.mubr.msk.bf16.mxu1 %vm2350_vm0, %v15848_v6  ;;  %v11366_v6 = vadd.f32 %v16557_v35, %v16366_v28 }
 0x6ab   : > { %v13092_v10 = vpop.eup %13091  ;;  %13111 = vrcp.f32 %v9124_v50  ;;  %v9130_v41 = vadd.f32 1.0, %v13090_v31  ;;  %v16741_v3 = vpop.f32.mrb[243].mxu1  ;;  %v10852_v35 = vmul.f32 -1.442695, %v11365_v7 }
 0x6ac   : > { %17782 = vst [vmem:[#allocation17_spill] sm:$0xff] %v16741_v3  ;;  %v13094_v45 = vpop.eup %13093  ;;  %13113 = vrcp.f32 %v9128_v55  ;;  %v9129_v51 = vadd.f32 1.0, %v13092_v10  ;;  %v16757_v55 = vpop.f32.mrb[244].mxu0  ;;  %v10851_v3 = vmul.f32 -1.442695, %v11364_v13 }
 0x6ad   : > { %v13096_v9 = vpop.eup %13095  ;;  %13115 = vrcp.f32 %v9130_v41  ;;  %v9131_v48 = vadd.f32 1.0, %v13094_v45  ;;  %v11429_v45 = vadd.f32 %v16539_v46, %v16377_v19  ;;  %17783 = vst [vmem:[#allocation16_spill] sm:$0xff] %v16757_v55  ;;  %v11430_v46 = vadd.f32 %v16559_v47, %v16369_v12 }
 0x6ae   : > { %v13098_v10 = vpop.eup %13097  ;;  %13117 = vrcp.f32 %v9129_v51  ;;  %v9135_v50 = vadd.f32 1.0, %v13096_v9  ;;  %v16761_v51 = vpop.f32.mrb[244].mxu1  ;;  %v10858_v7 = vmul.f32 -1.442695, %v11366_v6 }
 0x6af   : > { %v13100_v31 = vpop.eup %13099  ;;  %13119 = vrcp.f32 %v9131_v48  ;;  %v9137_v58 = vadd.f32 1.0, %v13098_v10  ;;  %v16763_v9 = vpop.f32.mrb[245].mxu0  ;;  %v10853_v10 = vmul.f32 -1.442695, %v11428_v62  ;;  %v10854_v47 = vmul.f32 -1.442695, %v11429_v45 }
 0x6b0   : > { %v13102_v24 = vpop.eup %13101  ;;  %13121 = vrcp.f32 %v9135_v50  ;;  %v9136_v41 = vadd.f32 1.0, %v13100_v31  ;;  %17784 = vst [vmem:[#allocation20_spill] sm:$0xff] %v16763_v9  ;;  %v16767_v55 = vpop.f32.mrb[245].mxu1  ;;  %v11367_v31 = vadd.f32 %v16564_v30, %v16374_v14  ;;  %v11368_v30 = vadd.f32 %v16571_v32, %v16366_v28 }
 0x6b1   : > { %v13104_v56 = vpop.eup %13103  ;;  %13123 = vrcp.f32 %v9137_v58  ;;  %v9138_v48 = vadd.f32 1.0, %v13102_v24  ;;  %v16769_v50 = vpop.f32.mrb[246].mxu0  ;;  %v11431_v24 = vadd.f32 %v16566_v33, %v16377_v19  ;;  %7977 = vmatmul.mubr.bf16.gmra.mrb[32].mxu0 %v15844_v52  ;;  %8315 = vmatmul.mubr.bf16.gmra.mrb[96].mxu1 %v15844_v52  ;;  %v10860_v45 = vmul.f32 -1.442695, %v11430_v46 }
 0x6b2   : > { %17785 = vst [vmem:[#allocation18_spill] sm:$0xff] %v16769_v50  ;;  %v13106_v13 = vpop.eup %13105  ;;  %9789 = vst [vmem:[%s16427_s23 + $0x210] sm:$0xff] %v13104_v56  ;;  %13125 = vrcp.f32 %v9136_v41  ;;  %v16774_v9 = vpop.f32.mrb[246].mxu1  ;;  %v11432_v33 = vadd.f32 %v16573_v4, %v16369_v12  ;;  %10737 = vmatprep.mubr.msk.bf16.mxu0 %vm2350_vm0, %v15868_v20  ;;  %10753 = vmatprep.mubr.msk.bf16.mxu1 %vm2350_vm0, %v15868_v20  ;;  %v11369_v52 = vadd.f32 %v16578_v36, %v16374_v14 }
 0x6b3   : > { %v16776_v58 = vpop.f32.mrb[247].mxu0  ;;  %v13108_v62 = vpop.eup %13107  ;;  %9793 = vst [vmem:[%s16427_s23 + $0x230] sm:$0xff] %v13106_v13  ;;  %13127 = vrcp.f32 %v9138_v48  ;;  %v10861_v48 = vmul.f32 -1.442695, %v11431_v24  ;;  %v11433_v4 = vadd.f32 %v16580_v8, %v16377_v19  ;;  %v10865_v13 = vmul.f32 -1.442695, %v11368_v30 }
 0x6b4   : > { %v16781_v50 = vpop.f32.mrb[247].mxu1  ;;  %v13110_v41 = vpop.eup %13109  ;;  %9795 = vst [vmem:[%s16427_s23 + $0x240] sm:$0xff] %v13108_v62  ;;  %13129 = vpow2.f32 %v10851_v3  ;;  %v10859_v3 = vmul.f32 -1.442695, %v11367_v31  ;;  %v11370_v36 = vadd.f32 %v16597_v34, %v16366_v28  ;;  %v10867_v8 = vmul.f32 -1.442695, %v11432_v33 }
 0x6b5   : > { %v13112_v56 = vpop.eup %13111  ;;  %9794 = vst [vmem:[%s16427_s23 + $0x238] sm:$0xff] %v13110_v41  ;;  %13131 = vpow2.f32 %v10853_v10  ;;  %v16801_v10 = vpop.f32.mrb[248].mxu0 }
 0x6b6   : > { %v13114_v32 = vpop.eup %13113  ;;  %9796 = vst [vmem:[%s16427_s23 + $0x248] sm:$0xff] %v13112_v56  ;;  %13133 = vpow2.f32 %v10852_v35  ;;  %v16803_v46 = vpop.f32.mrb[248].mxu1  ;;  %v10872_v33 = vmul.f32 -1.442695, %v11370_v36 }
 0x6b7   : > { %v13116_v6 = vpop.eup %13115  ;;  %9800 = vst [vmem:[%s16427_s23 + $0x268] sm:$0xff] %v13114_v32  ;;  %13135 = vpow2.f32 %v10854_v47  ;;  %v16808_v35 = vpop.f32.mrb[249].mxu0  ;;  %v10868_v32 = vmul.f32 -1.442695, %v11433_v4 }
 0x6b8   : > { %v13118_v20 = vpop.eup %13117  ;;  %9802 = vst [vmem:[%s16427_s23 + $0x278] sm:$0xff] %v13116_v6  ;;  %13137 = vpow2.f32 %v10858_v7  ;;  %v16810_v31 = vpop.f32.mrb[249].mxu1  ;;  %v10866_v7 = vmul.f32 -1.442695, %v11369_v52 }
 0x6b9   : > { %v13120_v62 = vpop.eup %13119  ;;  %9801 = vst [vmem:[%s16427_s23 + $0x270] sm:$0xff] %v13118_v20  ;;  %13139 = vpow2.f32 %v10860_v45  ;;  %v16813_v47 = vpop.f32.mrb[250].mxu0  ;;  %7987 = vmatmul.mubr.bf16.gmra.mrb[36].mxu0 %v15864_v22  ;;  %8323 = vmatmul.mubr.bf16.gmra.mrb[100].mxu1 %v15864_v22 }
 0x6ba   : > { %v16815_v24 = vpop.f32.mrb[250].mxu1  ;;  %v13122_v41 = vpop.eup %13121  ;;  %9803 = vst [vmem:[%s16427_s23 + $0x280] sm:$0xff] %v13120_v62  ;;  %13141 = vpow2.f32 %v10859_v3  ;;  %10738 = vmatprep.mubr.msk.bf16.mxu0 %vm2350_vm0, %v15888_v42  ;;  %10754 = vmatprep.mubr.msk.bf16.mxu1 %vm2350_vm0, %v15888_v42 }
 0x6bb   : > { %v16818_v34 = vpop.f32.mrb[251].mxu0  ;;  %v16820_v30 = vpop.f32.mrb[251].mxu1  ;;  %9807 = vst [vmem:[%s16427_s23 + $0x2a0] sm:$0xff] %v13122_v41  ;;  %13143 = vpow2.f32 %v10861_v48 }
 0x6bc   : > { %v13124_v56 = vpop.eup %13123  ;;  %13145 = vpow2.f32 %v10865_v13  ;;  %v16832_v4 = vpop.f32.mrb[252].mxu0 }
 0x6bd   : > { %v13126_v45 = vpop.eup %13125  ;;  %9809 = vst [vmem:[%s16427_s23 + $0x2b0] sm:$0xff] %v13124_v56  ;;  %13147 = vpow2.f32 %v10867_v8  ;;  %v16834_v20 = vpop.f32.mrb[252].mxu1 }
 0x6be   : > { %v13128_v6 = vpop.eup %13127  ;;  %9808 = vst [vmem:[%s16427_s23 + $0x2a8] sm:$0xff] %v13126_v45  ;;  %13149 = vpow2.f32 %v10866_v7  ;;  %17786 = vst [vmem:[#allocation3_spill] sm:$0xff] %v16834_v20  ;;  %v16836_v36 = vpop.f32.mrb[253].mxu0 }
 0x6bf   : > { %v13130_v3 = vpop.eup %13129  ;;  %9810 = vst [vmem:[%s16427_s23 + $0x2b8] sm:$0xff] %v13128_v6  ;;  %13151 = vpow2.f32 %v10868_v32  ;;  %17787 = vst [vmem:[#allocation4_spill] sm:$0xff] %v16836_v36  ;;  %v16838_v62 = vpop.f32.mrb[253].mxu1 }
 0x6c0   : > { %v13132_v52 = vpop.eup %13131  ;;  %v9142_v48 = vadd.f32 1.0, %v13130_v3  ;;  %13153 = vpow2.f32 %v10872_v33  ;;  %17788 = vst [vmem:[#allocation23_spill] sm:$0xff] %v16838_v62  ;;  %v16840_v41 = vpop.f32.mrb[254].mxu0 }
 0x6c1   : > { %v13134_v22 = vpop.eup %13133  ;;  %v9144_v13 = vadd.f32 1.0, %v13132_v52  ;;  %17789 = vst [vmem:[#allocation5_spill] sm:$0xff] %v16840_v41  ;;  %v16842_v7 = vpop.f32.mrb[254].mxu1 }
 0x6c2   : > { %v13136_v8 = vpop.eup %13135  ;;  %13155 = vrcp.f32 %v9142_v48  ;;  %v9143_v42 = vadd.f32 1.0, %v13134_v22  ;;  %17790 = vst [vmem:[#allocation6_spill] sm:$0xff] %v16842_v7  ;;  %v16844_v45 = vpop.f32.mrb[255].mxu0  ;;  %v11434_v48 = vadd.f32 %v16599_v25, %v16369_v12  ;;  %v17793_v22 = vld [vmem:[#allocation19_spill] sm:$0xff] }
 0x6c3   : > { %v13138_v56 = vpop.eup %13137  ;;  %13157 = vrcp.f32 %v9144_v13  ;;  %v9145_v32 = vadd.f32 1.0, %v13136_v8  ;;  %17791 = vst [vmem:[#allocation21_spill] sm:$0xff] %v16844_v45  ;;  %v16846_v33 = vpop.f32.mrb[255].mxu1  ;;  %7997 = vmatmul.mubr.bf16.gmra.mrb[40].mxu0 %v17793_v22  ;;  %8331 = vmatmul.mubr.bf16.gmra.mrb[104].mxu1 %v17793_v22  ;;  %v17794_v8 = vld [vmem:[#allocation24_spill] sm:$0xff]  ;;  %v11435_v45 = vadd.f32 %v16604_v60, %v16377_v19 }
 0x6c4   : > { %v13140_v6 = vpop.eup %13139  ;;  %13159 = vrcp.f32 %v9143_v42  ;;  %v9149_v3 = vadd.f32 1.0, %v13138_v56  ;;  %17792 = vst [vmem:[#allocation27_spill] sm:$0xff] %v16846_v33  ;;  %10739 = vmatprep.mubr.msk.bf16.mxu0 %vm2350_vm0, %v17794_v8  ;;  %10755 = vmatprep.mubr.msk.bf16.mxu1 %vm2350_vm0, %v17794_v8  ;;  %v11114_v33 = vpop.f32.mrb[0].mxu1 }
 0x6c5   : > { %v13142_v52 = vpop.eup %13141  ;;  %13161 = vrcp.f32 %v9145_v32  ;;  %v9151_v62 = vadd.f32 1.0, %v13140_v6  ;;  %v11371_v32 = vadd.f32 %v16602_v26, %v16374_v14  ;;  %v11115_v41 = vpop.f32.mrb[1].mxu1 }
 0x6c6   : > { %v13144_v7 = vpop.eup %13143  ;;  %13163 = vrcp.f32 %v9149_v3  ;;  %v9150_v13 = vadd.f32 1.0, %v13142_v52  ;;  %v10874_v52 = vmul.f32 -1.442695, %v11434_v48  ;;  %v16862_v26 = vadd.f32 %v11115_v41, %v11114_v33 }
 0x6c7   : > { %v13146_v42 = vpop.eup %13145  ;;  %13165 = vrcp.f32 %v9151_v62  ;;  %v9152_v56 = vadd.f32 1.0, %v13144_v7  ;;  %v11372_v62 = vadd.f32 %v16607_v57, %v16366_v28  ;;  %v11117_v7 = vpop.f32.mrb[2].mxu1  ;;  %v11436_v48 = vadd.f32 %v16609_v21, %v16369_v12 }
 0x6c8   : > { %v13148_v25 = vpop.eup %13147  ;;  %13167 = vrcp.f32 %v9150_v13  ;;  %v9156_v6 = vadd.f32 1.0, %v13146_v42  ;;  %v11118_v60 = vpop.f32.mrb[3].mxu1  ;;  %v10875_v41 = vmul.f32 -1.442695, %v11435_v45 }
 0x6c9   : > { %v13150_v22 = vpop.eup %13149  ;;  %13169 = vrcp.f32 %v9152_v56  ;;  %v9158_v3 = vadd.f32 1.0, %v13148_v25  ;;  %v10873_v56 = vmul.f32 -1.442695, %v11371_v32  ;;  %v16868_v20 = vadd.f32 %v11118_v60, %v11117_v7  ;;  %v17796_v32 = vld [vmem:[#allocation22_spill] sm:$0xff] }
 0x6ca   : > { %v13152_v36 = vpop.eup %13151  ;;  %13171 = vrcp.f32 %v9156_v6  ;;  %v9157_v8 = vadd.f32 1.0, %v13150_v22  ;;  %v11373_v22 = vadd.f32 %v16612_v27, %v16374_v14  ;;  %v11374_v27 = vadd.f32 %v16622_v17, %v16366_v28  ;;  %v17798_v17 = vld [vmem:[#allocation9_spill] sm:$0xff] }
 0x6cb   : > { %v13154_v13 = vpop.eup %13153  ;;  %13173 = vrcp.f32 %v9158_v3  ;;  %v9159_v42 = vadd.f32 1.0, %v13152_v36  ;;  %v17795_v36 = vld [vmem:[#allocation7_spill] sm:$0xff]  ;;  %8007 = vmatmul.mubr.bf16.gmra.mrb[44].mxu0 %v17796_v32  ;;  %8339 = vmatmul.mubr.bf16.gmra.mrb[108].mxu1 %v17796_v32  ;;  %v10879_v3 = vmul.f32 -1.442695, %v11372_v62  ;;  %v10881_v7 = vmul.f32 -1.442695, %v11436_v48 }
 0x6cc   : > { %v13156_v25 = vpop.eup %13155  ;;  %13175 = vrcp.f32 %v9157_v8  ;;  %v9163_v6 = vadd.f32 1.0, %v13154_v13  ;;  %v11437_v33 = vadd.f32 %v17795_v36, %v16377_v19  ;;  %v17797_v8 = vld [vmem:[#allocation28_spill] sm:$0xff]  ;;  %v11438_v13 = vadd.f32 %v16624_v61, %v16369_v12 }
 0x6cd   : > { %v13158_v57 = vpop.eup %13157  ;;  %9814 = vst [vmem:[%s16427_s23 + $0x2d8] sm:$0xff] %v13156_v25  ;;  %13177 = vrcp.f32 %v9159_v42  ;;  %10740 = vmatprep.mubr.msk.bf16.mxu0 %vm2350_vm0, %v17797_v8  ;;  %10756 = vmatprep.mubr.msk.bf16.mxu1 %vm2350_vm0, %v17797_v8  ;;  %v10880_v62 = vmul.f32 -1.442695, %v11373_v22  ;;  %v11375_v60 = vadd.f32 %v17798_v17, %v16374_v14  ;;  %v11120_v25 = vpop.f32.mrb[4].mxu1  ;;  %v10886_v61 = vmul.f32 -1.442695, %v11374_v27 }
 0x6ce   : > { %v13160_v21 = vpop.eup %13159  ;;  %9816 = vst [vmem:[%s16427_s23 + $0x2e8] sm:$0xff] %v13158_v57  ;;  %13179 = vrcp.f32 %v9163_v6  ;;  %v10882_v57 = vmul.f32 -1.442695, %v11437_v33  ;;  %v11121_v48 = vpop.f32.mrb[5].mxu1  ;;  %v11440_v33 = vadd.f32 %v16634_v11, %v16369_v12 }
 0x6cf   : > { %v13162_v45 = vpop.eup %13161  ;;  %9815 = vst [vmem:[%s16427_s23 + $0x2e0] sm:$0xff] %v13160_v21  ;;  %13181 = vpow2.f32 %v10874_v52  ;;  %v17799_v52 = vld [vmem:[#allocation8_spill] sm:$0xff]  ;;  %v16894_v21 = vadd.f32 %v11121_v48, %v11120_v25  ;;  %v11123_v8 = vpop.f32.mrb[6].mxu1 }
 0x6d0   : > { %v13164_v42 = vpop.eup %13163  ;;  %9817 = vst [vmem:[%s16427_s23 + $0x2f0] sm:$0xff] %v13162_v45  ;;  %13183 = vpow2.f32 %v10873_v56  ;;  %v11439_v36 = vadd.f32 %v17799_v52, %v16377_v19  ;;  %v17800_v56 = vld [vmem:[#allocation11_spill] sm:$0xff]  ;;  %v17801_v52 = vld [vmem:[#allocation26_spill] sm:$0xff] }
 0x6d1   : > { %v13166_v6 = vpop.eup %13165  ;;  %9821 = vst [vmem:[%s16427_s23 + $0x310] sm:$0xff] %v13164_v42  ;;  %13185 = vpow2.f32 %v10875_v41  ;;  %v11376_v22 = vadd.f32 %v17800_v56, %v16366_v28  ;;  %v10888_v41 = vmul.f32 -1.442695, %v11438_v13  ;;  %v11124_v42 = vpop.f32.mrb[7].mxu1  ;;  %v17802_v13 = vld [vmem:[#allocation32_spill] sm:$0xff] }
 0x6d2   : > { %v13168_v32 = vpop.eup %13167  ;;  %9823 = vst [vmem:[%s16427_s23 + $0x320] sm:$0xff] %v13166_v6  ;;  %13187 = vpow2.f32 %v10879_v3  ;;  %v10887_v3 = vmul.f32 -1.442695, %v11375_v60  ;;  %v16900_v27 = vadd.f32 %v11124_v42, %v11123_v8  ;;  %v10889_v25 = vmul.f32 -1.442695, %v11439_v36 }
 0x6d3   : > { %v13170_v45 = vpop.eup %13169  ;;  %9822 = vst [vmem:[%s16427_s23 + $0x318] sm:$0xff] %v13168_v32  ;;  %13189 = vpow2.f32 %v10881_v7  ;;  %8017 = vmatmul.mubr.bf16.gmra.mrb[48].mxu0 %v17801_v52  ;;  %8347 = vmatmul.mubr.bf16.gmra.mrb[112].mxu1 %v17801_v52  ;;  %v10893_v11 = vmul.f32 -1.442695, %v11376_v22  ;;  %v10895_v60 = vmul.f32 -1.442695, %v11440_v33 }
 0x6d4   : > { %v13172_v17 = vpop.eup %13171  ;;  %9824 = vst [vmem:[%s16427_s23 + $0x328] sm:$0xff] %v13170_v45  ;;  %13191 = vpow2.f32 %v10880_v62  ;;  %10741 = vmatprep.mubr.msk.bf16.mxu0 %vm2350_vm0, %v17802_v13  ;;  %10757 = vmatprep.mubr.msk.bf16.mxu1 %vm2350_vm0, %v17802_v13  ;;  %v11126_v36 = vpop.f32.mrb[8].mxu1  ;;  %v17804_v13 = vld [vmem:[#allocation35_spill] sm:$0xff] }
 0x6d5   : > { %v13174_v6 = vpop.eup %13173  ;;  %9828 = vst [vmem:[%s16427_s23 + $0x348] sm:$0xff] %v13172_v17  ;;  %13193 = vpow2.f32 %v10882_v57  ;;  %v11127_v32 = vpop.f32.mrb[9].mxu1 }
 0x6d6   : > { %v13176_v7 = vpop.eup %13175  ;;  %9830 = vst [vmem:[%s16427_s23 + $0x358] sm:$0xff] %v13174_v6  ;;  %13195 = vpow2.f32 %v10886_v61  ;;  %v16913_v22 = vadd.f32 %v11127_v32, %v11126_v36  ;;  %v11129_v8 = vpop.f32.mrb[10].mxu1 }
 0x6d7   : > { %v13178_v62 = vpop.eup %13177  ;;  %9829 = vst [vmem:[%s16427_s23 + $0x350] sm:$0xff] %v13176_v7  ;;  %13197 = vpow2.f32 %v10888_v41  ;;  %v11130_v17 = vpop.f32.mrb[11].mxu1 }
 0x6d8   : > { %v13180_v57 = vpop.eup %13179  ;;  %9831 = vst [vmem:[%s16427_s23 + $0x360] sm:$0xff] %v13178_v62  ;;  %13199 = vpow2.f32 %v10887_v3  ;;  %v16915_v6 = vadd.f32 %v11130_v17, %v11129_v8  ;;  %v17805_v17 = vld [vmem:[#allocation10_spill] sm:$0xff] }
 0x6d9   : > { %v13182_v48 = vpop.eup %13181  ;;  %9835 = vst [vmem:[%s16427_s23 + $0x380] sm:$0xff] %v13180_v57  ;;  %13201 = vpow2.f32 %v10889_v25  ;;  %v17803_v25 = vld [vmem:[#allocation30_spill] sm:$0xff] }
 0x6da   : > { %v13184_v61 = vpop.eup %13183  ;;  %v9165_v56 = vadd.f32 1.0, %v13182_v48  ;;  %13203 = vpow2.f32 %v10893_v11 }
 0x6db   : > { %v13186_v45 = vpop.eup %13185  ;;  %v9164_v42 = vadd.f32 1.0, %v13184_v61  ;;  %13205 = vpow2.f32 %v10895_v60  ;;  %8027 = vmatmul.mubr.bf16.gmra.mrb[52].mxu0 %v17803_v25  ;;  %8355 = vmatmul.mubr.bf16.gmra.mrb[116].mxu1 %v17803_v25 }
 0x6dc   : > { %v13188_v41 = vpop.eup %13187  ;;  %13207 = vrcp.f32 %v9165_v56  ;;  %v9166_v33 = vadd.f32 1.0, %v13186_v45  ;;  %10742 = vmatprep.mubr.msk.bf16.mxu0 %vm2350_vm0, %v17804_v13  ;;  %10758 = vmatprep.mubr.msk.bf16.mxu1 %vm2350_vm0, %v17804_v13  ;;  %v11132_v48 = vpop.f32.mrb[12].mxu1  ;;  %v11377_v56 = vadd.f32 %v16636_v59, %v16374_v14 }
 0x6dd   : > { %v13190_v3 = vpop.eup %13189  ;;  %13209 = vrcp.f32 %v9164_v42  ;;  %v9170_v52 = vadd.f32 1.0, %v13188_v41  ;;  %v11133_v8 = vpop.f32.mrb[13].mxu1  ;;  %v11441_v41 = vadd.f32 %v17805_v17, %v16377_v19  ;;  %v17808_v17 = vld [vmem:[#allocation13_spill] sm:$0xff] }
 0x6de   : > { %v13192_v7 = vpop.eup %13191  ;;  %13211 = vrcp.f32 %v9166_v33  ;;  %v9172_v11 = vadd.f32 1.0, %v13190_v3  ;;  %v16927_v33 = vadd.f32 %v11133_v8, %v11132_v48  ;;  %v11135_v3 = vpop.f32.mrb[14].mxu1  ;;  %v10894_v48 = vmul.f32 -1.442695, %v11377_v56 }
 0x6df   : > { %v13194_v62 = vpop.eup %13193  ;;  %13213 = vrcp.f32 %v9170_v52  ;;  %v9171_v60 = vadd.f32 1.0, %v13192_v7  ;;  %v11378_v7 = vadd.f32 %v16656_v0, %v16366_v28 }
 0x6e0   : > { %v13196_v57 = vpop.eup %13195  ;;  %13215 = vrcp.f32 %v9172_v11  ;;  %v9173_v36 = vadd.f32 1.0, %v13194_v62  ;;  %v11136_v11 = vpop.f32.mrb[15].mxu1  ;;  %v11442_v62 = vadd.f32 %v16661_v1, %v16369_v12  ;;  %v11443_v1 = vadd.f32 %v16668_v44, %v16377_v19 }
 0x6e1   : > { %v13198_v32 = vpop.eup %13197  ;;  %13217 = vrcp.f32 %v9171_v60  ;;  %v9177_v61 = vadd.f32 1.0, %v13196_v57  ;;  %v16933_v60 = vadd.f32 %v11136_v11, %v11135_v3  ;;  %v10900_v56 = vmul.f32 -1.442695, %v11378_v7 }
 0x6e2   : > { %v13200_v45 = vpop.eup %13199  ;;  %13219 = vrcp.f32 %v9173_v36  ;;  %v9179_v42 = vadd.f32 1.0, %v13198_v32  ;;  %v11379_v32 = vadd.f32 %v16663_v18, %v16374_v14  ;;  %v11380_v3 = vadd.f32 %v17808_v17, %v16366_v28 }
 0x6e3   : > { %v13202_v52 = vpop.eup %13201  ;;  %13221 = vrcp.f32 %v9177_v61  ;;  %v9178_v25 = vadd.f32 1.0, %v13200_v45  ;;  %v17806_v61 = vld [vmem:[#allocation33_spill] sm:$0xff]  ;;  %v10896_v45 = vmul.f32 -1.442695, %v11441_v41  ;;  %v10902_v41 = vmul.f32 -1.442695, %v11442_v62 }
 0x6e4   : > { %v13204_v13 = vpop.eup %13203  ;;  %13223 = vrcp.f32 %v9179_v42  ;;  %v9180_v59 = vadd.f32 1.0, %v13202_v52  ;;  %8037 = vmatmul.mubr.bf16.gmra.mrb[56].mxu0 %v17806_v61  ;;  %8363 = vmatmul.mubr.bf16.gmra.mrb[120].mxu1 %v17806_v61  ;;  %v17807_v42 = vld [vmem:[#allocation37_spill] sm:$0xff]  ;;  %v11444_v44 = vadd.f32 %v16675_v53, %v16369_v12  ;;  %v11445_v62 = vadd.f32 %v16682_v49, %v16377_v19 }
 0x6e5   : > { %v13206_v57 = vpop.eup %13205  ;;  %13225 = vrcp.f32 %v9178_v25  ;;  %v9184_v36 = vadd.f32 1.0, %v13204_v13  ;;  %10743 = vmatprep.mubr.msk.bf16.mxu0 %vm2350_vm0, %v17807_v42  ;;  %10759 = vmatprep.mubr.msk.bf16.mxu1 %vm2350_vm0, %v17807_v42  ;;  %v11138_v25 = vpop.f32.mrb[16].mxu1  ;;  %v10901_v13 = vmul.f32 -1.442695, %v11379_v32  ;;  %v11446_v49 = vadd.f32 %v16702_v43, %v16369_v12 }
 0x6e6   : > { %v13208_v0 = vpop.eup %13207  ;;  %13227 = vrcp.f32 %v9180_v59  ;;  %v9186_v8 = vadd.f32 1.0, %v13206_v57  ;;  %v11381_v59 = vadd.f32 %v16677_v5, %v16374_v14  ;;  %v11139_v7 = vpop.f32.mrb[17].mxu1  ;;  %v11382_v5 = vadd.f32 %v16700_v63, %v16366_v28 }
 0x6e7   : > { %v13210_v18 = vpop.eup %13209  ;;  %9837 = vst [vmem:[%s16427_s23 + $0x390] sm:$0xff] %v13208_v0  ;;  %13229 = vrcp.f32 %v9184_v36  ;;  %v10903_v36 = vmul.f32 -1.442695, %v11443_v1  ;;  %v16957_v53 = vadd.f32 %v11139_v7, %v11138_v25  ;;  %v11141_v61 = vpop.f32.mrb[18].mxu1  ;;  %v11383_v63 = vadd.f32 %v16705_v39, %v16374_v14 }
 0x6e8   : > { %v13212_v52 = vpop.eup %13211  ;;  %9836 = vst [vmem:[%s16427_s23 + $0x388] sm:$0xff] %v13210_v18  ;;  %13231 = vrcp.f32 %v9186_v8  ;;  %v11142_v32 = vpop.f32.mrb[19].mxu1  ;;  %v10908_v18 = vmul.f32 -1.442695, %v11381_v59 }
 0x6e9   : > { %v13214_v11 = vpop.eup %13213  ;;  %9838 = vst [vmem:[%s16427_s23 + $0x398] sm:$0xff] %v13212_v52  ;;  %13233 = vpow2.f32 %v10894_v48  ;;  %v10907_v48 = vmul.f32 -1.442695, %v11380_v3  ;;  %v16965_v1 = vadd.f32 %v11142_v32, %v11141_v61  ;;  %v10910_v3 = vmul.f32 -1.442695, %v11445_v62 }
 0x6ea   : > { %v13216_v57 = vpop.eup %13215  ;;  %9842 = vst [vmem:[%s16427_s23 + $0x3b8] sm:$0xff] %v13214_v11  ;;  %13235 = vpow2.f32 %v10896_v45  ;;  %v10909_v45 = vmul.f32 -1.442695, %v11444_v44  ;;  %v10914_v52 = vmul.f32 -1.442695, %v11382_v5 }
 0x6eb   : > { %v13218_v0 = vpop.eup %13217  ;;  %9844 = vst [vmem:[%s16427_s23 + $0x3c8] sm:$0xff] %v13216_v57  ;;  %13237 = vpow2.f32 %v10900_v56  ;;  %v17809_v56 = vld [vmem:[#allocation36_spill] sm:$0xff]  ;;  %v10916_v44 = vmul.f32 -1.442695, %v11446_v49  ;;  %v10915_v11 = vmul.f32 -1.442695, %v11383_v63 }
 0x6ec   : > { %v13220_v8 = vpop.eup %13219  ;;  %9843 = vst [vmem:[%s16427_s23 + $0x3c0] sm:$0xff] %v13218_v0  ;;  %13239 = vpow2.f32 %v10902_v41  ;;  %8047 = vmatmul.mubr.bf16.gmra.mrb[60].mxu0 %v17809_v56  ;;  %8371 = vmatmul.mubr.bf16.gmra.mrb[124].mxu1 %v17809_v56  ;;  %v11144_v39 = vpop.f32.mrb[20].mxu1 }
 0x6ed   : > { %v13222_v42 = vpop.eup %13221  ;;  %9845 = vst [vmem:[%s16427_s23 + $0x3d0] sm:$0xff] %v13220_v8  ;;  %13241 = vpow2.f32 %v10901_v13  ;;  %v11145_v13 = vpop.f32.mrb[21].mxu1 }
 0x6ee   : > { %v13224_v17 = vpop.eup %13223  ;;  %9849 = vst [vmem:[%s16427_s23 + $0x3f0] sm:$0xff] %v13222_v42  ;;  %13243 = vpow2.f32 %v10903_v36  ;;  %v16977_v7 = vadd.f32 %v11145_v13, %v11144_v39  ;;  %v11147_v57 = vpop.f32.mrb[22].mxu1  ;;  %v11447_v13 = vadd.f32 %v16707_v37, %v16377_v19  ;;  %v11385_v37 = vadd.f32 %v16715_v15, %v16374_v14 }
 0x6ef   : > { %v13226_v43 = vpop.eup %13225  ;;  %9851 = vst [vmem:[%s16427_s23 + $0x400] sm:$0xff] %v13224_v17  ;;  %13245 = vpow2.f32 %v10907_v48  ;;  %v11148_v62 = vpop.f32.mrb[23].mxu1 }
 0x6f0   : > { %v13228_v41 = vpop.eup %13227  ;;  %9850 = vst [vmem:[%s16427_s23 + $0x3f8] sm:$0xff] %v13226_v43  ;;  %13247 = vpow2.f32 %v10909_v45  ;;  %v16980_v48 = vadd.f32 %v11148_v62, %v11147_v57  ;;  %v11384_v62 = vadd.f32 %v16710_v40, %v16366_v28  ;;  %v10917_v40 = vmul.f32 -1.442695, %v11447_v13 }
 0x6f1   : > { %v13230_v25 = vpop.eup %13229  ;;  %9852 = vst [vmem:[%s16427_s23 + $0x408] sm:$0xff] %v13228_v41  ;;  %13249 = vpow2.f32 %v10908_v18 }
 0x6f2   : > { %v13232_v59 = vpop.eup %13231  ;;  %9856 = vst [vmem:[%s16427_s23 + $0x428] sm:$0xff] %v13230_v25  ;;  %13251 = vpow2.f32 %v10910_v3 }
 0x6f3   : > { %v13234_v36 = vpop.eup %13233  ;;  %9858 = vst [vmem:[%s16427_s23 + $0x438] sm:$0xff] %v13232_v59  ;;  %13253 = vpow2.f32 %v10914_v52 }
 0x6f4   : > { %v13236_v61 = vpop.eup %13235  ;;  %v9185_v0 = vadd.f32 1.0, %v13234_v36  ;;  %13255 = vpow2.f32 %v10916_v44  ;;  %v11150_v56 = vpop.f32.mrb[24].mxu1 }
 0x6f5   : > { %v13238_v5 = vpop.eup %13237  ;;  %v9187_v32 = vadd.f32 1.0, %v13236_v61  ;;  %13257 = vpow2.f32 %v10915_v11  ;;  %v11151_v43 = vpop.f32.mrb[25].mxu1 }
 0x6f6   : > { %v13240_v8 = vpop.eup %13239  ;;  %13259 = vrcp.f32 %v9185_v0  ;;  %v9191_v45 = vadd.f32 1.0, %v13238_v5  ;;  %v16982_v44 = vadd.f32 %v11151_v43, %v11150_v56  ;;  %v11153_v39 = vpop.f32.mrb[26].mxu1 }
 0x6f7   : > { %v13242_v49 = vpop.eup %13241  ;;  %13261 = vrcp.f32 %v9187_v32  ;;  %v9193_v42 = vadd.f32 1.0, %v13240_v8  ;;  %v11154_v59 = vpop.f32.mrb[27].mxu1  ;;  %v11448_v32 = vadd.f32 %v16712_v54, %v16369_v12  ;;  %v11386_v54 = vadd.f32 %v16727_v23, %v16366_v28 }
 0x6f8   : > { %v13244_v18 = vpop.eup %13243  ;;  %13263 = vrcp.f32 %v9191_v45  ;;  %v9192_v63 = vadd.f32 1.0, %v13242_v49  ;;  %v16988_v61 = vadd.f32 %v11154_v59, %v11153_v39 }
 0x6f9   : > { %v13246_v17 = vpop.eup %13245  ;;  %13265 = vrcp.f32 %v9193_v42  ;;  %v9194_v3 = vadd.f32 1.0, %v13244_v18  ;;  %v11449_v18 = vadd.f32 %v16717_v38, %v16377_v19  ;;  %v10923_v15 = vmul.f32 -1.442695, %v11448_v32 }
 0x6fa   : > { %v13248_v52 = vpop.eup %13247  ;;  %13267 = vrcp.f32 %v9192_v63  ;;  %v9198_v41 = vadd.f32 1.0, %v13246_v17  ;;  %v10921_v17 = vmul.f32 -1.442695, %v11384_v62  ;;  %v10922_v38 = vmul.f32 -1.442695, %v11385_v37  ;;  %v17812_v62 = vld [vmem:[#allocation14_spill] sm:$0xff] }
 0x6fb   : > { %v13250_v25 = vpop.eup %13249  ;;  %13269 = vrcp.f32 %v9194_v3  ;;  %v9200_v11 = vadd.f32 1.0, %v13248_v52  ;;  %v17810_v52 = vld [vmem:[#allocation12_spill] sm:$0xff] }
 0x6fc   : > { %v13252_v57 = vpop.eup %13251  ;;  %13271 = vrcp.f32 %v9198_v41  ;;  %v9199_v36 = vadd.f32 1.0, %v13250_v25  ;;  %v11156_v3 = vpop.f32.mrb[28].mxu1  ;;  %v11450_v41 = vadd.f32 %v17810_v52, %v16369_v12 }
 0x6fd   : > { %v13254_v0 = vpop.eup %13253  ;;  %13273 = vrcp.f32 %v9200_v11  ;;  %v9201_v5 = vadd.f32 1.0, %v13252_v57  ;;  %v11157_v39 = vpop.f32.mrb[29].mxu1  ;;  %v17811_v11 = vld [vmem:[#allocation15_spill] sm:$0xff] }
 0x6fe   : > { %v13256_v8 = vpop.eup %13255  ;;  %13275 = vrcp.f32 %v9199_v36  ;;  %v9205_v45 = vadd.f32 1.0, %v13254_v0  ;;  %v11387_v13 = vadd.f32 %v17811_v11, %v16374_v14  ;;  %v17004_v23 = vadd.f32 %v11157_v39, %v11156_v3  ;;  %v11159_v59 = vpop.f32.mrb[30].mxu1 }
 0x6ff   : > { %v13258_v49 = vpop.eup %13257  ;;  %13277 = vrcp.f32 %v9201_v5  ;;  %v9207_v42 = vadd.f32 1.0, %v13256_v8  ;;  %v10924_v36 = vmul.f32 -1.442695, %v11449_v18  ;;  %v11451_v0 = vadd.f32 %v17812_v62, %v16377_v19  ;;  %v11160_v5 = vpop.f32.mrb[31].mxu1 }
 0x700   : > { %v13260_v63 = vpop.eup %13259  ;;  %13279 = vrcp.f32 %v9205_v45  ;;  %v9206_v56 = vadd.f32 1.0, %v13258_v49  ;;  %v10928_v8 = vmul.f32 -1.442695, %v11386_v54  ;;  %v11388_v45 = vadd.f32 %v16735_v16, %v16366_v28  ;;  %v17813_v54 = vld [vmem:[#allocation17_spill] sm:$0xff] }
 0x701   : > { %v13262_v43 = vpop.eup %13261  ;;  %9857 = vst [vmem:[%s16427_s23 + $0x430] sm:$0xff] %v13260_v63  ;;  %13281 = vrcp.f32 %v9207_v42  ;;  %v17012_v37 = vadd.f32 %v11160_v5, %v11159_v59  ;;  %v10930_v42 = vmul.f32 -1.442695, %v11450_v41  ;;  %v10929_v63 = vmul.f32 -1.442695, %v11387_v13 }
 0x702   : > { %v13264_v25 = vpop.eup %13263  ;;  %9859 = vst [vmem:[%s16427_s23 + $0x440] sm:$0xff] %v13262_v43  ;;  %13283 = vrcp.f32 %v9206_v56  ;;  %v11389_v56 = vadd.f32 %v16739_v29, %v16374_v14  ;;  %v10931_v16 = vmul.f32 -1.442695, %v11451_v0  ;;  %v11453_v3 = vadd.f32 %v17813_v54, %v16377_v19 }
 0x703   : > { %v13266_v57 = vpop.eup %13265  ;;  %9863 = vst [vmem:[%s16427_s23 + $0x460] sm:$0xff] %v13264_v25  ;;  %13285 = vpow2.f32 %v10917_v40  ;;  %v11452_v40 = vadd.f32 %v16737_v2, %v16369_v12  ;;  %v10935_v2 = vmul.f32 -1.442695, %v11388_v45 }
 0x704   : > { %v13268_v32 = vpop.eup %13267  ;;  %9865 = vst [vmem:[%s16427_s23 + $0x470] sm:$0xff] %v13266_v57  ;;  %13287 = vpow2.f32 %v10921_v17  ;;  %v10936_v25 = vmul.f32 -1.442695, %v11389_v56  ;;  %v10938_v59 = vmul.f32 -1.442695, %v11453_v3 }
 0x705   : > { %v13270_v49 = vpop.eup %13269  ;;  %9864 = vst [vmem:[%s16427_s23 + $0x468] sm:$0xff] %v13268_v32  ;;  %13289 = vpow2.f32 %v10923_v15  ;;  %v11162_v15 = vpop.f32.mrb[32].mxu1  ;;  %v10937_v41 = vmul.f32 -1.442695, %v11452_v40 }
 0x706   : > { %v13272_v18 = vpop.eup %13271  ;;  %9866 = vst [vmem:[%s16427_s23 + $0x478] sm:$0xff] %v13270_v49  ;;  %13291 = vpow2.f32 %v10922_v38  ;;  %v11163_v29 = vpop.f32.mrb[33].mxu1 }
 0x707   : > { %v13274_v17 = vpop.eup %13273  ;;  %9870 = vst [vmem:[%s16427_s23 + $0x498] sm:$0xff] %v13272_v18  ;;  %13293 = vpow2.f32 %v10924_v36  ;;  %v17026_v38 = vadd.f32 %v11163_v29, %v11162_v15  ;;  %v11165_v11 = vpop.f32.mrb[34].mxu1  ;;  %v17814_v29 = vld [vmem:[#allocation16_spill] sm:$0xff] }
 0x708   : > { %v13276_v43 = vpop.eup %13275  ;;  %9872 = vst [vmem:[%s16427_s23 + $0x4a8] sm:$0xff] %v13274_v17  ;;  %13295 = vpow2.f32 %v10928_v8  ;;  %v11166_v57 = vpop.f32.mrb[35].mxu1 }
 0x709   : > { %v13278_v52 = vpop.eup %13277  ;;  %9871 = vst [vmem:[%s16427_s23 + $0x4a0] sm:$0xff] %v13276_v43  ;;  %13297 = vpow2.f32 %v10930_v42  ;;  %v17030_v62 = vadd.f32 %v11166_v57, %v11165_v11 }
 0x70a   : > { %v13280_v39 = vpop.eup %13279  ;;  %9873 = vst [vmem:[%s16427_s23 + $0x4b0] sm:$0xff] %v13278_v52  ;;  %13299 = vpow2.f32 %v10929_v63 }
 0x70b   : > { %v13282_v13 = vpop.eup %13281  ;;  %9877 = vst [vmem:[%s16427_s23 + $0x4d0] sm:$0xff] %v13280_v39  ;;  %13301 = vpow2.f32 %v10931_v16  ;;  %v11390_v39 = vadd.f32 %v17814_v29, %v16366_v28 }
 0x70c   : > { %v13284_v36 = vpop.eup %13283  ;;  %9879 = vst [vmem:[%s16427_s23 + $0x4e0] sm:$0xff] %v13282_v13  ;;  %13303 = vpow2.f32 %v10935_v2  ;;  %v11168_v40 = vpop.f32.mrb[36].mxu1 }
 0x70d   : > { %v13286_v0 = vpop.eup %13285  ;;  %9878 = vst [vmem:[%s16427_s23 + $0x4d8] sm:$0xff] %v13284_v36  ;;  %13305 = vpow2.f32 %v10937_v41  ;;  %v11169_v56 = vpop.f32.mrb[37].mxu1 }
 0x70e   : > { %v13288_v5 = vpop.eup %13287  ;;  %v9208_v32 = vadd.f32 1.0, %v13286_v0  ;;  %13307 = vpow2.f32 %v10936_v25  ;;  %v17033_v54 = vadd.f32 %v11169_v56, %v11168_v40  ;;  %v11171_v3 = vpop.f32.mrb[38].mxu1  ;;  %v11455_v40 = vadd.f32 %v16767_v55, %v16377_v19 }
 0x70f   : > { %v13290_v8 = vpop.eup %13289  ;;  %v9212_v45 = vadd.f32 1.0, %v13288_v5  ;;  %13309 = vpow2.f32 %v10938_v59  ;;  %v11172_v15 = vpop.f32.mrb[39].mxu1  ;;  %v11454_v59 = vadd.f32 %v16761_v51, %v16369_v12 }
 0x710   : > { %v13292_v49 = vpop.eup %13291  ;;  %13311 = vrcp.f32 %v9208_v32  ;;  %v9214_v42 = vadd.f32 1.0, %v13290_v8  ;;  %v17037_v25 = vadd.f32 %v11172_v15, %v11171_v3  ;;  %v17815_v32 = vld [vmem:[#allocation20_spill] sm:$0xff]  ;;  %v11456_v15 = vadd.f32 %v16774_v9, %v16369_v12 }
 0x711   : > { %v13294_v18 = vpop.eup %13293  ;;  %13313 = vrcp.f32 %v9212_v45  ;;  %v9213_v63 = vadd.f32 1.0, %v13292_v49  ;;  %v11391_v8 = vadd.f32 %v17815_v32, %v16374_v14  ;;  %v10944_v56 = vmul.f32 -1.442695, %v11454_v59 }
 0x712   : > { %v13296_v17 = vpop.eup %13295  ;;  %13315 = vrcp.f32 %v9214_v42  ;;  %v9215_v16 = vadd.f32 1.0, %v13294_v18  ;;  %v10942_v42 = vmul.f32 -1.442695, %v11390_v39  ;;  %v11393_v39 = vadd.f32 %v16776_v58, %v16374_v14 }
 0x713   : > { %v13298_v43 = vpop.eup %13297  ;;  %13317 = vrcp.f32 %v9213_v63  ;;  %v9219_v2 = vadd.f32 1.0, %v13296_v17  ;;  %v17816_v17 = vld [vmem:[#allocation18_spill] sm:$0xff]  ;;  %v10943_v29 = vmul.f32 -1.442695, %v11391_v8  ;;  %v10945_v59 = vmul.f32 -1.442695, %v11455_v40 }
 0x714   : > { %v13300_v52 = vpop.eup %13299  ;;  %13319 = vrcp.f32 %v9215_v16  ;;  %v9221_v41 = vadd.f32 1.0, %v13298_v43  ;;  %v11174_v18 = vpop.f32.mrb[40].mxu1  ;;  %v11392_v16 = vadd.f32 %v17816_v17, %v16366_v28  ;;  %v11457_v9 = vadd.f32 %v16781_v50, %v16377_v19 }
 0x715   : > { %v13302_v11 = vpop.eup %13301  ;;  %13321 = vrcp.f32 %v9219_v2  ;;  %v9220_v13 = vadd.f32 1.0, %v13300_v52  ;;  %v11175_v3 = vpop.f32.mrb[41].mxu1  ;;  %v10951_v32 = vmul.f32 -1.442695, %v11456_v15  ;;  %v11458_v8 = vadd.f32 %v16803_v46, %v16369_v12 }
 0x716   : > { %v13304_v57 = vpop.eup %13303  ;;  %13323 = vrcp.f32 %v9221_v41  ;;  %v9222_v36 = vadd.f32 1.0, %v13302_v11  ;;  %v17049_v52 = vadd.f32 %v11175_v3, %v11174_v18  ;;  %v11177_v55 = vpop.f32.mrb[42].mxu1  ;;  %v10950_v50 = vmul.f32 -1.442695, %v11393_v39 }
 0x717   : > { %v13306_v0 = vpop.eup %13305  ;;  %13325 = vrcp.f32 %v9220_v13  ;;  %v9226_v5 = vadd.f32 1.0, %v13304_v57  ;;  %v11178_v11 = vpop.f32.mrb[43].mxu1  ;;  %v11459_v40 = vadd.f32 %v16810_v31, %v16377_v19 }
 0x718   : > { %v13308_v45 = vpop.eup %13307  ;;  %13327 = vrcp.f32 %v9222_v36  ;;  %v9228_v49 = vadd.f32 1.0, %v13306_v0  ;;  %v17057_v57 = vadd.f32 %v11178_v11, %v11177_v55  ;;  %v10949_v0 = vmul.f32 -1.442695, %v11392_v16 }
 0x719   : > { %v13310_v63 = vpop.eup %13309  ;;  %13329 = vrcp.f32 %v9226_v5  ;;  %v9227_v51 = vadd.f32 1.0, %v13308_v45  ;;  %v11394_v5 = vadd.f32 %v16801_v10, %v16366_v28  ;;  %v10952_v10 = vmul.f32 -1.442695, %v11457_v9 }
 0x71a   : > { %v13312_v43 = vpop.eup %13311  ;;  %13331 = vrcp.f32 %v9228_v49  ;;  %v9229_v2 = vadd.f32 1.0, %v13310_v63  ;;  %v11395_v49 = vadd.f32 %v16808_v35, %v16374_v14  ;;  %v10958_v35 = vmul.f32 -1.442695, %v11458_v8 }
 0x71b   : > { %v13314_v41 = vpop.eup %13313  ;;  %9880 = vst [vmem:[%s16427_s23 + $0x4e8] sm:$0xff] %v13312_v43  ;;  %13333 = vrcp.f32 %v9227_v51  ;;  %v10956_v46 = vmul.f32 -1.442695, %v11394_v5  ;;  %v11396_v51 = vadd.f32 %v16813_v47, %v16366_v28  ;;  %v10959_v47 = vmul.f32 -1.442695, %v11459_v40 }
 0x71c   : > { %v13316_v13 = vpop.eup %13315  ;;  %9884 = vst [vmem:[%s16427_s23 + $0x508] sm:$0xff] %v13314_v41  ;;  %13335 = vrcp.f32 %v9229_v2  ;;  %v11180_v18 = vpop.f32.mrb[44].mxu1  ;;  %v10957_v43 = vmul.f32 -1.442695, %v11395_v49 }
 0x71d   : > { %v13318_v36 = vpop.eup %13317  ;;  %9886 = vst [vmem:[%s16427_s23 + $0x518] sm:$0xff] %v13316_v13  ;;  %13337 = vpow2.f32 %v10942_v42 }
 0x71e   : > { %v13320_v58 = vpop.eup %13319  ;;  %9885 = vst [vmem:[%s16427_s23 + $0x510] sm:$0xff] %v13318_v36  ;;  %13339 = vpow2.f32 %v10944_v56  ;;  %v11181_v56 = vpop.f32.mrb[45].mxu1 }
 0x71f   : > { %v13322_v45 = vpop.eup %13321  ;;  %9887 = vst [vmem:[%s16427_s23 + $0x520] sm:$0xff] %v13320_v58  ;;  %13341 = vpow2.f32 %v10943_v29  ;;  %v17075_v16 = vadd.f32 %v11181_v56, %v11180_v18  ;;  %v11183_v3 = vpop.f32.mrb[46].mxu1  ;;  %v10963_v29 = vmul.f32 -1.442695, %v11396_v51  ;;  %v11460_v51 = vadd.f32 %v16815_v24, %v16369_v12 }
 0x720   : > { %v13324_v42 = vpop.eup %13323  ;;  %9891 = vst [vmem:[%s16427_s23 + $0x540] sm:$0xff] %v13322_v45  ;;  %13343 = vpow2.f32 %v10945_v59  ;;  %v11184_v2 = vpop.f32.mrb[47].mxu1  ;;  %v11461_v24 = vadd.f32 %v16820_v30, %v16377_v19 }
 0x721   : > { %v13326_v63 = vpop.eup %13325  ;;  %9893 = vst [vmem:[%s16427_s23 + $0x550] sm:$0xff] %v13324_v42  ;;  %13345 = vpow2.f32 %v10949_v0  ;;  %v17079_v55 = vadd.f32 %v11184_v2, %v11183_v3 }
 0x722   : > { %v13328_v17 = vpop.eup %13327  ;;  %9892 = vst [vmem:[%s16427_s23 + $0x548] sm:$0xff] %v13326_v63  ;;  %13347 = vpow2.f32 %v10951_v32 }
 0x723   : > { %v13330_v31 = vpop.eup %13329  ;;  %9894 = vst [vmem:[%s16427_s23 + $0x558] sm:$0xff] %v13328_v17  ;;  %13349 = vpow2.f32 %v10950_v50 }
 0x724   : > { %v13332_v15 = vpop.eup %13331  ;;  %9898 = vst [vmem:[%s16427_s23 + $0x578] sm:$0xff] %v13330_v31  ;;  %13351 = vpow2.f32 %v10952_v10  ;;  %v11186_v9 = vpop.f32.mrb[48].mxu1  ;;  %v11397_v31 = vadd.f32 %v16818_v34, %v16374_v14 }
 0x725   : > { %v13334_v41 = vpop.eup %13333  ;;  %9900 = vst [vmem:[%s16427_s23 + $0x588] sm:$0xff] %v13332_v15  ;;  %13353 = vpow2.f32 %v10956_v46  ;;  %v11187_v5 = vpop.f32.mrb[49].mxu1 }
 0x726   : > { %v13336_v39 = vpop.eup %13335  ;;  %9899 = vst [vmem:[%s16427_s23 + $0x580] sm:$0xff] %v13334_v41  ;;  %13355 = vpow2.f32 %v10958_v35  ;;  %v17084_v8 = vadd.f32 %v11187_v5, %v11186_v9  ;;  %v11189_v45 = vpop.f32.mrb[50].mxu1  ;;  %v10964_v5 = vmul.f32 -1.442695, %v11397_v31 }
 0x727   : > { %v13338_v11 = vpop.eup %13337  ;;  %9901 = vst [vmem:[%s16427_s23 + $0x590] sm:$0xff] %v13336_v39  ;;  %13357 = vpow2.f32 %v10957_v43  ;;  %v11190_v42 = vpop.f32.mrb[51].mxu1 }
 0x728   : > { %v13340_v13 = vpop.eup %13339  ;;  %v9233_v59 = vadd.f32 1.0, %v13338_v11  ;;  %13359 = vpow2.f32 %v10959_v47  ;;  %v17086_v18 = vadd.f32 %v11190_v42, %v11189_v45 }
 0x729   : > { %v13342_v36 = vpop.eup %13341  ;;  %v9235_v0 = vadd.f32 1.0, %v13340_v13  ;;  %13361 = vpow2.f32 %v10963_v29  ;;  %v10965_v29 = vmul.f32 -1.442695, %v11460_v51 }
 0x72a   : > { %v13344_v58 = vpop.eup %13343  ;;  %13363 = vrcp.f32 %v9233_v59  ;;  %v9234_v32 = vadd.f32 1.0, %v13342_v36  ;;  %v11398_v59 = vadd.f32 %v16832_v4, %v16366_v28 }
 0x72b   : > { %v13346_v50 = vpop.eup %13345  ;;  %13365 = vrcp.f32 %v9235_v0  ;;  %v9236_v49 = vadd.f32 1.0, %v13344_v58  ;;  %v17817_v58 = vld [vmem:[#allocation3_spill] sm:$0xff] }
 0x72c   : > { %v13348_v10 = vpop.eup %13347  ;;  %13367 = vrcp.f32 %v9234_v32  ;;  %v9240_v40 = vadd.f32 1.0, %v13346_v50  ;;  %v11192_v15 = vpop.f32.mrb[52].mxu1  ;;  %v11462_v32 = vadd.f32 %v17817_v58, %v16369_v12 }
 0x72d   : > { %v13350_v63 = vpop.eup %13349  ;;  %13369 = vrcp.f32 %v9236_v49  ;;  %v9242_v46 = vadd.f32 1.0, %v13348_v10  ;;  %v11193_v39 = vpop.f32.mrb[53].mxu1  ;;  %v17818_v49 = vld [vmem:[#allocation4_spill] sm:$0xff] }
 0x72e   : > { %v13352_v56 = vpop.eup %13351  ;;  %13371 = vrcp.f32 %v9240_v40  ;;  %v9241_v17 = vadd.f32 1.0, %v13350_v63  ;;  %v17096_v34 = vadd.f32 %v11193_v39, %v11192_v15  ;;  %v11195_v9 = vpop.f32.mrb[54].mxu1  ;;  %v11399_v42 = vadd.f32 %v17818_v49, %v16374_v14  ;;  %v17819_v63 = vld [vmem:[#allocation23_spill] sm:$0xff] }
 0x72f   : > { %v13354_v35 = vpop.eup %13353  ;;  %13373 = vrcp.f32 %v9242_v46  ;;  %v9243_v3 = vadd.f32 1.0, %v13352_v56  ;;  %v11196_v30 = vpop.f32.mrb[55].mxu1  ;;  %v10966_v40 = vmul.f32 -1.442695, %v11461_v24  ;;  %v11463_v46 = vadd.f32 %v17819_v63, %v16377_v19 }
 0x730   : > { %v13356_v43 = vpop.eup %13355  ;;  %13375 = vrcp.f32 %v9241_v17  ;;  %v9247_v2 = vadd.f32 1.0, %v13354_v35  ;;  %v17102_v4 = vadd.f32 %v11196_v30, %v11195_v9  ;;  %v10970_v56 = vmul.f32 -1.442695, %v11398_v59  ;;  %v17820_v17 = vld [vmem:[#allocation5_spill] sm:$0xff] }
 0x731   : > { %v13358_v47 = vpop.eup %13357  ;;  %13377 = vrcp.f32 %v9243_v3  ;;  %v9249_v41 = vadd.f32 1.0, %v13356_v43  ;;  %v11400_v35 = vadd.f32 %v17820_v17, %v16366_v28  ;;  %v10972_v31 = vmul.f32 -1.442695, %v11462_v32  ;;  %v17821_v43 = vld [vmem:[#allocation6_spill] sm:$0xff] }
 0x732   : > { %v13360_v11 = vpop.eup %13359  ;;  %13379 = vrcp.f32 %v9247_v2  ;;  %v9248_v13 = vadd.f32 1.0, %v13358_v47  ;;  %v11464_v2 = vadd.f32 %v17821_v43, %v16369_v12  ;;  %v10971_v47 = vmul.f32 -1.442695, %v11399_v42 }
 0x733   : > { %v13362_v36 = vpop.eup %13361  ;;  %13381 = vrcp.f32 %v9249_v41  ;;  %v9250_v0 = vadd.f32 1.0, %v13360_v11  ;;  %v17822_v41 = vld [vmem:[#allocation21_spill] sm:$0xff]  ;;  %v10973_v28 = vmul.f32 -1.442695, %v11463_v46  ;;  %v10977_v12 = vmul.f32 -1.442695, %v11400_v35 }
 0x734   : > { %v13364_v45 = vpop.eup %13363  ;;  %13383 = vrcp.f32 %v9248_v13  ;;  %v9254_v50 = vadd.f32 1.0, %v13362_v36  ;;  %v11401_v24 = vadd.f32 %v17822_v41, %v16374_v14  ;;  %v11198_v39 = vpop.f32.mrb[56].mxu1 }
 0x735   : > { %v13366_v10 = vpop.eup %13365  ;;  %9905 = vst [vmem:[%s16427_s23 + $0x5b0] sm:$0xff] %v13364_v45  ;;  %13385 = vrcp.f32 %v9250_v0  ;;  %v11199_v59 = vpop.f32.mrb[57].mxu1 }
 0x736   : > { %v13368_v51 = vpop.eup %13367  ;;  %9907 = vst [vmem:[%s16427_s23 + $0x5c0] sm:$0xff] %v13366_v10  ;;  %13387 = vrcp.f32 %v9254_v50  ;;  %v17120_v36 = vadd.f32 %v11199_v59, %v11198_v39  ;;  %v11201_v0 = vpop.f32.mrb[58].mxu1  ;;  %v17824_v10 = vld [vmem:[#allocation2_spill] sm:$0xff] }
 0x737   : > { %v13370_v3 = vpop.eup %13369  ;;  %9906 = vst [vmem:[%s16427_s23 + $0x5b8] sm:$0xff] %v13368_v51  ;;  %13389 = vpow2.f32 %v10965_v29  ;;  %v17823_v29 = vld [vmem:[#allocation27_spill] sm:$0xff]  ;;  %v11202_v58 = vpop.f32.mrb[59].mxu1  ;;  %v5934_v17 = vsub.s32 4, %v17824_v10 }
 0x738   : > { %v13372_v15 = vpop.eup %13371  ;;  %9908 = vst [vmem:[%s16427_s23 + $0x5c8] sm:$0xff] %v13370_v3  ;;  %13391 = vpow2.f32 %v10964_v5  ;;  %v11465_v13 = vadd.f32 %v17823_v29, %v16377_v19  ;;  %v10979_v5 = vmul.f32 -1.442695, %v11464_v2  ;;  %v10978_v19 = vmul.f32 -1.442695, %v11401_v24 }
 0x739   : > { %v13374_v11 = vpop.eup %13373  ;;  %9912 = vst [vmem:[%s16427_s23 + $0x5e8] sm:$0xff] %v13372_v15  ;;  %13393 = vpow2.f32 %v10966_v40  ;;  %v17124_v30 = vadd.f32 %v11202_v58, %v11201_v0  ;;  %v5942_v40 = vsub.s32 6, %v17824_v10  ;;  %v5938_v2 = vsub.s32 5, %v17824_v10  ;;  %v13817_v24 = vld [vmem:[%s17639_s9] sm:$0x7f] }
 0x73a   : > { %v13376_v9 = vpop.eup %13375  ;;  %9914 = vst [vmem:[%s16427_s23 + $0x5f8] sm:$0xff] %v13374_v11  ;;  %13395 = vpow2.f32 %v10970_v56  ;;  %v10980_v50 = vmul.f32 -1.442695, %v11465_v13 }
 0x73b   : > { %v13378_v14 = vpop.eup %13377  ;;  %9913 = vst [vmem:[%s16427_s23 + $0x5f0] sm:$0xff] %v13376_v9  ;;  %13397 = vpow2.f32 %v10972_v31  ;;  %v17139_v39 = vrot.slane %v13817_v24, %v5942_v40  ;;  %v17143_v9 = vrot.slane %v13817_v24, %v5934_v17 }
 0x73c   : > { %v13380_v32 = vpop.eup %13379  ;;  %9915 = vst [vmem:[%s16427_s23 + $0x600] sm:$0xff] %v13378_v14  ;;  %13399 = vpow2.f32 %v10971_v47  ;;  %v11204_v46 = vpop.f32.mrb[60].mxu1  ;;  %v17145_v14 = vrot.slane %v13817_v24, %v5938_v2 }
 0x73d   : > { %v13382_v45 = vpop.eup %13381  ;;  %9919 = vst [vmem:[%s16427_s23 + $0x620] sm:$0xff] %v13380_v32  ;;  %13401 = vpow2.f32 %v10973_v28  ;;  %v11205_v56 = vpop.f32.mrb[61].mxu1  ;;  %v8092_v32 = vadd.f32 %v16862_v26, %v17139_v39 }
 0x73e   : > { %v13384_v49 = vpop.eup %13383  ;;  %9921 = vst [vmem:[%s16427_s23 + $0x630] sm:$0xff] %v13382_v45  ;;  %13403 = vpow2.f32 %v10977_v12  ;;  %v17133_v31 = vadd.f32 %v11205_v56, %v11204_v46  ;;  %v11207_v43 = vpop.f32.mrb[62].mxu1 }
 0x73f   : > { %v13386_v42 = vpop.eup %13385  ;;  %9920 = vst [vmem:[%s16427_s23 + $0x628] sm:$0xff] %v13384_v49  ;;  %13405 = vpow2.f32 %v10979_v5  ;;  %v11208_v41 = vpop.f32.mrb[63].mxu1 }
 0x740   : > { %v13388_v63 = vpop.eup %13387  ;;  %9922 = vst [vmem:[%s16427_s23 + $0x638] sm:$0xff] %v13386_v42  ;;  %13407 = vpow2.f32 %v10978_v19  ;;  %v17141_v29 = vadd.f32 %v11208_v41, %v11207_v43 }
 0x741   : > { %v13390_v51 = vpop.eup %13389  ;;  %9926 = vst [vmem:[%s16427_s23 + $0x658] sm:$0xff] %v13388_v63  ;;  %13409 = vpow2.f32 %v10980_v50 }
 0x742   : > { %v13392_v35 = vpop.eup %13391  ;;  %v9256_v3 = vadd.f32 1.0, %v13390_v51 }
 0x743   : > { %v13394_v15 = vpop.eup %13393  ;;  %v9255_v47 = vadd.f32 1.0, %v13392_v35 }
 0x744   : > { %v13396_v11 = vpop.eup %13395  ;;  %13411 = vrcp.f32 %v9256_v3  ;;  %v9257_v28 = vadd.f32 1.0, %v13394_v15  ;;  %v7898_v50 = vpop.f32.mrb[0].mxu0 }
 0x745   : > { %v13398_v13 = vpop.eup %13397  ;;  %13413 = vrcp.f32 %v9255_v47  ;;  %v9261_v59 = vadd.f32 1.0, %v13396_v11  ;;  %v8252_v49 = vpop.f32.mrb[64].mxu1  ;;  %v11466_v40 = vadd.f32 %v7898_v50, %v17143_v9  ;;  %v8095_v47 = vadd.f32 %v16868_v20, %v17139_v39 }
 0x746   : > { %v13400_v12 = vpop.eup %13399  ;;  %13415 = vrcp.f32 %v9257_v28  ;;  %v9263_v0 = vadd.f32 1.0, %v13398_v13  ;;  %v8253_v63 = vadd.f32 %v8252_v49, %v8092_v32  ;;  %v7900_v46 = vpop.f32.mrb[1].mxu0 }
 0x747   : > { %v13402_v5 = vpop.eup %13401  ;;  %13417 = vrcp.f32 %v9261_v59  ;;  %v9262_v58 = vadd.f32 1.0, %v13400_v12  ;;  %v8254_v51 = vpop.f32.mrb[65].mxu1  ;;  %v11467_v35 = vadd.f32 %v7900_v46, %v17145_v14  ;;  %v10764_v15 = vmul.f32 -1.442695, %v11466_v40 }
 0x748   : > { %v13404_v19 = vpop.eup %13403  ;;  %13419 = vrcp.f32 %v9263_v0  ;;  %v9264_v45 = vadd.f32 1.0, %v13402_v5  ;;  %v7902_v3 = vpop.f32.mrb[2].mxu0  ;;  %v10766_v11 = vmul.f32 -1.442695, %v8253_v63 }
 0x749   : > { %v13406_v42 = vpop.eup %13405  ;;  %13421 = vrcp.f32 %v9262_v58  ;;  %v9268_v10 = vadd.f32 1.0, %v13404_v19  ;;  %v8255_v26 = vpop.f32.mrb[66].mxu1  ;;  %v11468_v28 = vadd.f32 %v7902_v3, %v17143_v9  ;;  %v10765_v59 = vmul.f32 -1.442695, %v11467_v35 }
 0x74a   : > { %v13408_v56 = vpop.eup %13407  ;;  %13423 = vrcp.f32 %v9264_v45  ;;  %v9270_v17 = vadd.f32 1.0, %v13406_v42  ;;  %v7904_v41 = vpop.f32.mrb[3].mxu0  ;;  %v8256_v12 = vadd.f32 %v8255_v26, %v8095_v47  ;;  %v8100_v19 = vadd.f32 %v16894_v21, %v17139_v39 }
 0x74b   : > { %v13410_v43 = vpop.eup %13409  ;;  %13425 = vrcp.f32 %v9268_v10  ;;  %v9269_v2 = vadd.f32 1.0, %v13408_v56  ;;  %v8257_v13 = vpop.f32.mrb[67].mxu1  ;;  %v11469_v0 = vadd.f32 %v7904_v41, %v17145_v14  ;;  %v10771_v58 = vmul.f32 -1.442695, %v11468_v28 }
 0x74c   : > { %13427 = vrcp.f32 %v9270_v17  ;;  %v9271_v24 = vadd.f32 1.0, %v13410_v43  ;;  %v10773_v20 = vmul.f32 -1.442695, %v8256_v12  ;;  %v7908_v49 = vpop.f32.mrb[4].mxu0  ;;  %v8260_v42 = vpop.f32.mrb[68].mxu1  ;;  %v8103_v35 = vadd.f32 %v16900_v27, %v17139_v39 }
 0x74d   : > { %13429 = vrcp.f32 %v9269_v2  ;;  %v10772_v50 = vmul.f32 -1.442695, %v11469_v0  ;;  %v11470_v40 = vadd.f32 %v7908_v49, %v17143_v9  ;;  %v8261_v63 = vadd.f32 %v8260_v42, %v8100_v19  ;;  %v7910_v46 = vpop.f32.mrb[5].mxu0  ;;  %v8262_v51 = vpop.f32.mrb[69].mxu1 }
 0x74e   : > { %v13412_v5 = vpop.eup %13411  ;;  %13431 = vrcp.f32 %v9271_v24  ;;  %v11471_v21 = vadd.f32 %v7910_v46, %v17145_v14  ;;  %v7912_v17 = vpop.f32.mrb[6].mxu0  ;;  %v8111_v51 = vadd.f32 %v16915_v6, %v17139_v39  ;;  %v8116_v6 = vadd.f32 %v16927_v33, %v17139_v39 }
 0x74f   : > { %v13414_v32 = vpop.eup %13413  ;;  %9928 = vst [vmem:[%s16427_s23 + $0x668] sm:$0xff] %v13412_v5  ;;  %13433 = vpow2.f32 %v10764_v15  ;;  %v8263_v3 = vpop.f32.mrb[70].mxu1  ;;  %v10778_v43 = vmul.f32 -1.442695, %v11470_v40  ;;  %v10780_v2 = vmul.f32 -1.442695, %v8261_v63  ;;  %v11472_v15 = vadd.f32 %v7912_v17, %v17143_v9 }
 0x750   : > { %v13416_v45 = vpop.eup %13415  ;;  %9927 = vst [vmem:[%s16427_s23 + $0x660] sm:$0xff] %v13414_v32  ;;  %13435 = vpow2.f32 %v10766_v11  ;;  %v7914_v47 = vpop.f32.mrb[7].mxu0  ;;  %v10779_v11 = vmul.f32 -1.442695, %v11471_v21  ;;  %v8264_v28 = vadd.f32 %v8263_v3, %v8103_v35  ;;  %v8108_v32 = vadd.f32 %v16913_v22, %v17139_v39 }
 0x751   : > { %v13418_v10 = vpop.eup %13417  ;;  %9929 = vst [vmem:[%s16427_s23 + $0x670] sm:$0xff] %v13416_v45  ;;  %13437 = vpow2.f32 %v10765_v59  ;;  %v8265_v41 = vpop.f32.mrb[71].mxu1  ;;  %v11473_v27 = vadd.f32 %v7914_v47, %v17145_v14  ;;  %v10785_v59 = vmul.f32 -1.442695, %v11472_v15 }
 0x752   : > { %v13420_v56 = vpop.eup %13419  ;;  %9933 = vst [vmem:[%s16427_s23 + $0x690] sm:$0xff] %v13418_v10  ;;  %13439 = vpow2.f32 %v10771_v58  ;;  %v10787_v0 = vmul.f32 -1.442695, %v8264_v28 }
 0x753   : > { %v13422_v26 = vpop.eup %13421  ;;  %9935 = vst [vmem:[%s16427_s23 + $0x6a0] sm:$0xff] %v13420_v56  ;;  %13441 = vpow2.f32 %v10773_v20  ;;  %v10786_v5 = vmul.f32 -1.442695, %v11473_v27 }
 0x754   : > { %v13424_v24 = vpop.eup %13423  ;;  %9934 = vst [vmem:[%s16427_s23 + $0x698] sm:$0xff] %v13422_v26  ;;  %13443 = vpow2.f32 %v10772_v50  ;;  %v7918_v19 = vpop.f32.mrb[8].mxu0 }
 0x755   : > { %v13426_v13 = vpop.eup %13425  ;;  %9936 = vst [vmem:[%s16427_s23 + $0x6a8] sm:$0xff] %v13424_v24  ;;  %13445 = vpow2.f32 %v10778_v43  ;;  %v8268_v45 = vpop.f32.mrb[72].mxu1 }
 0x756   : > { %v13428_v12 = vpop.eup %13427  ;;  %9940 = vst [vmem:[%s16427_s23 + $0x6c8] sm:$0xff] %v13426_v13  ;;  %13447 = vpow2.f32 %v10780_v2  ;;  %v8269_v49 = vadd.f32 %v8268_v45, %v8108_v32  ;;  %v7920_v42 = vpop.f32.mrb[9].mxu0  ;;  %v11474_v13 = vadd.f32 %v7918_v19, %v17143_v9 }
 0x757   : > { %v13430_v58 = vpop.eup %13429  ;;  %9942 = vst [vmem:[%s16427_s23 + $0x6d8] sm:$0xff] %v13428_v12  ;;  %13449 = vpow2.f32 %v10779_v11  ;;  %v8270_v10 = vpop.f32.mrb[73].mxu1 }
 0x758   : > { %v13432_v20 = vpop.eup %13431  ;;  %9941 = vst [vmem:[%s16427_s23 + $0x6d0] sm:$0xff] %v13430_v58  ;;  %13451 = vpow2.f32 %v10785_v59  ;;  %v7922_v46 = vpop.f32.mrb[10].mxu0  ;;  %v11475_v10 = vadd.f32 %v7920_v42, %v17145_v14 }
 0x759   : > { %v13434_v50 = vpop.eup %13433  ;;  %9943 = vst [vmem:[%s16427_s23 + $0x6e0] sm:$0xff] %v13432_v20  ;;  %13453 = vpow2.f32 %v10787_v0  ;;  %v8271_v56 = vpop.f32.mrb[74].mxu1  ;;  %v11476_v19 = vadd.f32 %v7922_v46, %v17143_v9 }
 0x75a   : > { %v13436_v40 = vpop.eup %13435  ;;  %v9055_v63 = vadd.f32 1.0, %v13434_v50  ;;  %13455 = vpow2.f32 %v10786_v5  ;;  %v7924_v17 = vpop.f32.mrb[11].mxu0  ;;  %v8272_v26 = vadd.f32 %v8271_v56, %v8111_v51  ;;  %v8119_v56 = vadd.f32 %v16933_v60, %v17139_v39 }
 0x75b   : > { %v13438_v22 = vpop.eup %13437  ;;  %v9057_v21 = vadd.f32 1.0, %v13436_v40  ;;  %v8273_v43 = vpop.f32.mrb[75].mxu1  ;;  %v10793_v46 = vmul.f32 -1.442695, %v11475_v10 }
 0x75c   : > { %v13440_v35 = vpop.eup %13439  ;;  %13457 = vrcp.f32 %v9055_v63  ;;  %v9056_v3 = vadd.f32 1.0, %v13438_v22  ;;  %v7928_v59 = vpop.f32.mrb[12].mxu0  ;;  %v10794_v43 = vmul.f32 -1.442695, %v8269_v49  ;;  %v8124_v49 = vadd.f32 %v16957_v53, %v17139_v39 }
 0x75d   : > { %v13442_v2 = vpop.eup %13441  ;;  %13459 = vrcp.f32 %v9057_v21  ;;  %v9062_v15 = vadd.f32 1.0, %v13440_v35  ;;  %v8276_v12 = vpop.f32.mrb[76].mxu1  ;;  %v11478_v60 = vadd.f32 %v7928_v59, %v17143_v9 }
 0x75e   : > { %v13444_v47 = vpop.eup %13443  ;;  %13461 = vrcp.f32 %v9056_v3  ;;  %v9064_v41 = vadd.f32 1.0, %v13442_v2  ;;  %v8277_v58 = vadd.f32 %v8276_v12, %v8116_v6  ;;  %v7930_v32 = vpop.f32.mrb[13].mxu0  ;;  %v10792_v3 = vmul.f32 -1.442695, %v11474_v13 }
 0x75f   : > { %v13446_v24 = vpop.eup %13445  ;;  %13463 = vrcp.f32 %v9062_v15  ;;  %v9063_v11 = vadd.f32 1.0, %v13444_v47  ;;  %v8278_v20 = vpop.f32.mrb[77].mxu1  ;;  %v11477_v15 = vadd.f32 %v7924_v17, %v17145_v14  ;;  %v10801_v17 = vmul.f32 -1.442695, %v8272_v26 }
 0x760   : > { %v13448_v28 = vpop.eup %13447  ;;  %13465 = vrcp.f32 %v9064_v41  ;;  %v9069_v27 = vadd.f32 1.0, %v13446_v24  ;;  %v7932_v40 = vpop.f32.mrb[14].mxu0  ;;  %v10806_v26 = vmul.f32 -1.442695, %v11478_v60 }
 0x761   : > { %v13450_v0 = vpop.eup %13449  ;;  %13467 = vrcp.f32 %v9063_v11  ;;  %v9071_v5 = vadd.f32 1.0, %v13448_v28  ;;  %v8279_v33 = vpop.f32.mrb[78].mxu1  ;;  %v10799_v11 = vmul.f32 -1.442695, %v11476_v19  ;;  %v11479_v28 = vadd.f32 %v7930_v32, %v17145_v14 }
 0x762   : > { %v13452_v45 = vpop.eup %13451  ;;  %13469 = vrcp.f32 %v9069_v27  ;;  %v9070_v50 = vadd.f32 1.0, %v13450_v0  ;;  %v7934_v22 = vpop.f32.mrb[15].mxu0  ;;  %v8280_v47 = vadd.f32 %v8279_v33, %v8119_v56  ;;  %v10800_v59 = vmul.f32 -1.442695, %v11477_v15 }
 0x763   : > { %v13454_v63 = vpop.eup %13453  ;;  %13471 = vrcp.f32 %v9071_v5  ;;  %v9076_v51 = vadd.f32 1.0, %v13452_v45  ;;  %v8281_v2 = vpop.f32.mrb[79].mxu1  ;;  %v11480_v0 = vadd.f32 %v7932_v40, %v17143_v9  ;;  %v10808_v40 = vmul.f32 -1.442695, %v8277_v58 }
 0x764   : > { %v13456_v21 = vpop.eup %13455  ;;  %13473 = vrcp.f32 %v9070_v50  ;;  %v9078_v35 = vadd.f32 1.0, %v13454_v63  ;;  %v7938_v27 = vpop.f32.mrb[16].mxu0  ;;  %v8127_v50 = vadd.f32 %v16965_v1, %v17139_v39  ;;  %v11481_v63 = vadd.f32 %v7934_v22, %v17145_v14 }
 0x765   : > { %13475 = vrcp.f32 %v9076_v51  ;;  %v9077_v42 = vadd.f32 1.0, %v13456_v21  ;;  %v8284_v13 = vpop.f32.mrb[80].mxu1  ;;  %v17197_v53 = vpop.f32.mrb[17].mxu0  ;;  %v10807_v21 = vmul.f32 -1.442695, %v11479_v28  ;;  %v11482_v1 = vadd.f32 %v7938_v27, %v17143_v9 }
 0x766   : > { %v13458_v41 = vpop.eup %13457  ;;  %13477 = vrcp.f32 %v9078_v35  ;;  %v17195_v5 = vadd.f32 %v8284_v13, %v8124_v49  ;;  %v8286_v20 = vpop.f32.mrb[81].mxu1  ;;  %v10815_v22 = vmul.f32 -1.442695, %v8280_v47  ;;  %v8132_v15 = vadd.f32 %v16977_v7, %v17139_v39 }
 0x767   : > { %v13460_v24 = vpop.eup %13459  ;;  %9727 = vst [vmem:[%s16427_s23 + $0x20] sm:$0xff] %v13458_v41  ;;  %13479 = vrcp.f32 %v9077_v42  ;;  %v17200_v32 = vpop.f32.mrb[18].mxu0  ;;  %v10814_v42 = vmul.f32 -1.442695, %v11481_v63 }
 0x768   : > { %v13462_v6 = vpop.eup %13461  ;;  %9729 = vst.msk [vmem:[%s16427_s23 + $0x30] sm:$0xff] %vm2350_vm0, %v13460_v24  ;;  %13481 = vpow2.f32 %v10792_v3  ;;  %v8287_v10 = vpop.f32.mrb[82].mxu1 }
 0x769   : > { %v13464_v12 = vpop.eup %13463  ;;  %9728 = vst [vmem:[%s16427_s23 + $0x28] sm:$0xff] %v13462_v6  ;;  %13483 = vpow2.f32 %v10794_v43  ;;  %v17207_v51 = vpop.f32.mrb[19].mxu0  ;;  %v17211_v35 = vadd.f32 %v8287_v10, %v8127_v50  ;;  %v10813_v43 = vmul.f32 -1.442695, %v11480_v0 }
 0x76a   : > { %v13466_v45 = vpop.eup %13465  ;;  %9734 = vst [vmem:[%s16427_s23 + $0x58] sm:$0xff] %v13464_v12  ;;  %13485 = vpow2.f32 %v10793_v46  ;;  %v8289_v19 = vpop.f32.mrb[83].mxu1  ;;  %v10820_v46 = vmul.f32 -1.442695, %v11482_v1  ;;  %v8135_v12 = vadd.f32 %v16980_v48, %v17139_v39  ;;  %v8140_v48 = vadd.f32 %v16982_v44, %v17139_v39 }
 0x76b   : > { %v13468_v33 = vpop.eup %13467  ;;  %9736 = vst.msk [vmem:[%s16427_s23 + $0x68] sm:$0xff] %vm2350_vm0, %v13466_v45  ;;  %13487 = vpow2.f32 %v10799_v11 }
 0x76c   : > { %v13470_v56 = vpop.eup %13469  ;;  %9735 = vst [vmem:[%s16427_s23 + $0x60] sm:$0xff] %v13468_v33  ;;  %13489 = vpow2.f32 %v10801_v17  ;;  %v17220_v60 = vpop.f32.mrb[20].mxu0 }
 0x76d   : > { %v13472_v3 = vpop.eup %13471  ;;  %9741 = vst [vmem:[%s16427_s23 + $0x90] sm:$0xff] %v13470_v56  ;;  %13491 = vpow2.f32 %v10800_v59  ;;  %v8292_v24 = vpop.f32.mrb[84].mxu1 }
 0x76e   : > { %v13474_v58 = vpop.eup %13473  ;;  %9743 = vst.msk [vmem:[%s16427_s23 + $0xa0] sm:$0xff] %vm2350_vm0, %v13472_v3  ;;  %13493 = vpow2.f32 %v10806_v26  ;;  %v17224_v47 = vadd.f32 %v8292_v24, %v8132_v15  ;;  %v17226_v49 = vpop.f32.mrb[21].mxu0 }
 0x76f   : > { %v13476_v2 = vpop.eup %13475  ;;  %9742 = vst [vmem:[%s16427_s23 + $0x98] sm:$0xff] %v13474_v58  ;;  %13495 = vpow2.f32 %v10808_v40  ;;  %v8294_v6 = vpop.f32.mrb[85].mxu1 }
 0x770   : > { %v13478_v41 = vpop.eup %13477  ;;  %9748 = vst [vmem:[%s16427_s23 + $0xc8] sm:$0xff] %v13476_v2  ;;  %13497 = vpow2.f32 %v10807_v21  ;;  %v17229_v7 = vpop.f32.mrb[22].mxu0  ;;  %v11483_v6 = vadd.f32 %v17197_v53, %v17145_v14  ;;  %v8148_v53 = vadd.f32 %v17004_v23, %v17139_v39 }
 0x771   : > { %v13480_v11 = vpop.eup %13479  ;;  %9750 = vst.msk [vmem:[%s16427_s23 + $0xd8] sm:$0xff] %vm2350_vm0, %v13478_v41  ;;  %13499 = vpow2.f32 %v10813_v43  ;;  %v8295_v28 = vpop.f32.mrb[86].mxu1 }
 0x772   : > { %v13482_v17 = vpop.eup %13481  ;;  %9749 = vst [vmem:[%s16427_s23 + $0xd0] sm:$0xff] %v13480_v11  ;;  %13501 = vpow2.f32 %v10815_v22  ;;  %v17233_v59 = vpop.f32.mrb[23].mxu0  ;;  %v17235_v10 = vadd.f32 %v8295_v28, %v8135_v12  ;;  %v11484_v12 = vadd.f32 %v17200_v32, %v17143_v9 }
 0x773   : > { %v13484_v27 = vpop.eup %13483  ;;  %v9083_v13 = vadd.f32 1.0, %v13482_v17  ;;  %13503 = vpow2.f32 %v10814_v42  ;;  %v8297_v45 = vpop.f32.mrb[87].mxu1  ;;  %v8143_v17 = vadd.f32 %v16988_v61, %v17139_v39 }
 0x774   : > { %v13486_v0 = vpop.eup %13485  ;;  %v9085_v20 = vadd.f32 1.0, %v13484_v27  ;;  %13505 = vpow2.f32 %v10820_v46  ;;  %v17239_v1 = vpop.f32.mrb[24].mxu0  ;;  %v10827_v23 = vmul.f32 -1.442695, %v11484_v12  ;;  %v11489_v12 = vadd.f32 %v17233_v59, %v17145_v14 }
 0x775   : > { %v13488_v26 = vpop.eup %13487  ;;  %13507 = vrcp.f32 %v9083_v13  ;;  %v9084_v50 = vadd.f32 1.0, %v13486_v0  ;;  %v8300_v3 = vpop.f32.mrb[88].mxu1  ;;  %v8156_v59 = vadd.f32 %v17026_v38, %v17139_v39 }
 0x776   : > { %v13490_v33 = vpop.eup %13489  ;;  %13509 = vrcp.f32 %v9085_v20  ;;  %v9090_v40 = vadd.f32 1.0, %v13488_v26  ;;  %v17241_v22 = vadd.f32 %v8300_v3, %v8140_v48  ;;  %v17243_v2 = vpop.f32.mrb[25].mxu0  ;;  %v11486_v48 = vadd.f32 %v17220_v60, %v17143_v9 }
 0x777   : > { %v13492_v63 = vpop.eup %13491  ;;  %13511 = vrcp.f32 %v9084_v50  ;;  %v9092_v19 = vadd.f32 1.0, %v13490_v33  ;;  %v8302_v42 = vpop.f32.mrb[89].mxu1  ;;  %v10822_v33 = vmul.f32 -1.442695, %v17195_v5  ;;  %v10829_v5 = vmul.f32 -1.442695, %v17211_v35 }
 0x778   : > { %v13494_v56 = vpop.eup %13493  ;;  %13513 = vrcp.f32 %v9090_v40  ;;  %v9091_v21 = vadd.f32 1.0, %v13492_v63  ;;  %v17245_v46 = vpop.f32.mrb[26].mxu0  ;;  %v11485_v40 = vadd.f32 %v17207_v51, %v17145_v14  ;;  %v11487_v51 = vadd.f32 %v17226_v49, %v17145_v14 }
 0x779   : > { %v13496_v43 = vpop.eup %13495  ;;  %13515 = vrcp.f32 %v9092_v19  ;;  %v9097_v58 = vadd.f32 1.0, %v13494_v56  ;;  %v8303_v44 = vpop.f32.mrb[90].mxu1  ;;  %v10821_v19 = vmul.f32 -1.442695, %v11483_v6  ;;  %v8151_v35 = vadd.f32 %v17012_v37, %v17139_v39 }
 0x77a   : > { %v13498_v15 = vpop.eup %13497  ;;  %13517 = vrcp.f32 %v9091_v21  ;;  %v9099_v41 = vadd.f32 1.0, %v13496_v43  ;;  %v17251_v28 = vpop.f32.mrb[27].mxu0  ;;  %v17255_v26 = vadd.f32 %v8303_v44, %v8143_v17  ;;  %v11488_v44 = vadd.f32 %v17229_v7, %v17143_v9 }
 0x77b   : > { %v13500_v24 = vpop.eup %13499  ;;  %13519 = vrcp.f32 %v9097_v58  ;;  %v9098_v11 = vadd.f32 1.0, %v13498_v15  ;;  %v8305_v0 = vpop.f32.mrb[91].mxu1  ;;  %v10834_v6 = vmul.f32 -1.442695, %v11486_v48  ;;  %v10836_v7 = vmul.f32 -1.442695, %v17224_v47 }
 0x77c   : > { %v13502_v27 = vpop.eup %13501  ;;  %13521 = vrcp.f32 %v9099_v41  ;;  %v9104_v13 = vadd.f32 1.0, %v13500_v24  ;;  %v17265_v21 = vpop.f32.mrb[28].mxu0  ;;  %v10828_v41 = vmul.f32 -1.442695, %v11485_v40  ;;  %v10843_v47 = vmul.f32 -1.442695, %v17235_v10 }
 0x77d   : > { %v13504_v20 = vpop.eup %13503  ;;  %13523 = vrcp.f32 %v9098_v11  ;;  %v9106_v45 = vadd.f32 1.0, %v13502_v27  ;;  %v8308_v3 = vpop.f32.mrb[92].mxu1  ;;  %v10842_v40 = vmul.f32 -1.442695, %v11489_v12  ;;  %v10850_v38 = vmul.f32 -1.442695, %v17241_v22 }
 0x77e   : > { %v13506_v50 = vpop.eup %13505  ;;  %13525 = vrcp.f32 %v9104_v13  ;;  %v9105_v61 = vadd.f32 1.0, %v13504_v20  ;;  %v17272_v58 = vadd.f32 %v8308_v3, %v8148_v53  ;;  %v17274_v60 = vpop.f32.mrb[29].mxu0  ;;  %v10835_v20 = vmul.f32 -1.442695, %v11487_v51 }
 0x77f   : > { %v13508_v32 = vpop.eup %13507  ;;  %13527 = vrcp.f32 %v9106_v45  ;;  %v9111_v63 = vadd.f32 1.0, %v13506_v50  ;;  %v8310_v42 = vpop.f32.mrb[93].mxu1  ;;  %v11490_v45 = vadd.f32 %v17239_v1, %v17143_v9  ;;  %v10841_v50 = vmul.f32 -1.442695, %v11488_v44 }
 0x780   : > { %v13510_v56 = vpop.eup %13509  ;;  %9755 = vst [vmem:[%s16427_s23 + $0x100] sm:$0xff] %v13508_v32  ;;  %13529 = vrcp.f32 %v9105_v61  ;;  %v17279_v24 = vpop.f32.mrb[30].mxu0 }
 0x781   : > { %v13512_v43 = vpop.eup %13511  ;;  %9757 = vst.msk [vmem:[%s16427_s23 + $0x110] sm:$0xff] %vm2350_vm0, %v13510_v56  ;;  %13531 = vrcp.f32 %v9111_v63  ;;  %v8311_v49 = vpop.f32.mrb[94].mxu1 }
 0x782   : > { %v13514_v15 = vpop.eup %13513  ;;  %9756 = vst [vmem:[%s16427_s23 + $0x108] sm:$0xff] %v13512_v43  ;;  %13533 = vpow2.f32 %v10822_v33  ;;  %v17284_v17 = vpop.f32.mrb[31].mxu0  ;;  %v17291_v37 = vadd.f32 %v8311_v49, %v8151_v35  ;;  %v8159_v43 = vadd.f32 %v17030_v62, %v17139_v39 }
 0x783   : > { %v13516_v11 = vpop.eup %13515  ;;  %9762 = vst [vmem:[%s16427_s23 + $0x138] sm:$0xff] %v13514_v15  ;;  %13535 = vpow2.f32 %v10821_v19  ;;  %v8313_v27 = vpop.f32.mrb[95].mxu1  ;;  %v10848_v19 = vmul.f32 -1.442695, %v11490_v45 }
 0x784   : > { %v13518_v13 = vpop.eup %13517  ;;  %9764 = vst.msk [vmem:[%s16427_s23 + $0x148] sm:$0xff] %vm2350_vm0, %v13516_v11  ;;  %13537 = vpow2.f32 %v10827_v23  ;;  %v17303_v1 = vpop.f32.mrb[32].mxu0  ;;  %v8164_v27 = vadd.f32 %v17033_v54, %v17139_v39 }
 0x785   : > { %v13520_v0 = vpop.eup %13519  ;;  %9763 = vst [vmem:[%s16427_s23 + $0x140] sm:$0xff] %v13518_v13  ;;  %13539 = vpow2.f32 %v10829_v5  ;;  %v8316_v32 = vpop.f32.mrb[96].mxu1 }
 0x786   : > { %v13522_v53 = vpop.eup %13521  ;;  %9769 = vst [vmem:[%s16427_s23 + $0x170] sm:$0xff] %v13520_v0  ;;  %13541 = vpow2.f32 %v10828_v41  ;;  %v17306_v48 = vadd.f32 %v8316_v32, %v8156_v59  ;;  %v17308_v10 = vpop.f32.mrb[33].mxu0 }
 0x787   : > { %v13524_v61 = vpop.eup %13523  ;;  %9771 = vst.msk [vmem:[%s16427_s23 + $0x180] sm:$0xff] %vm2350_vm0, %v13522_v53  ;;  %13543 = vpow2.f32 %v10834_v6  ;;  %v8318_v56 = vpop.f32.mrb[97].mxu1 }
 0x788   : > { %v13526_v33 = vpop.eup %13525  ;;  %9770 = vst [vmem:[%s16427_s23 + $0x178] sm:$0xff] %v13524_v61  ;;  %13545 = vpow2.f32 %v10836_v7  ;;  %v17313_v3 = vpop.f32.mrb[34].mxu0 }
 0x789   : > { %v13528_v63 = vpop.eup %13527  ;;  %9776 = vst [vmem:[%s16427_s23 + $0x1a8] sm:$0xff] %v13526_v33  ;;  %13547 = vpow2.f32 %v10835_v20  ;;  %v8319_v5 = vpop.f32.mrb[98].mxu1 }
 0x78a   : > { %v13530_v23 = vpop.eup %13529  ;;  %9778 = vst.msk [vmem:[%s16427_s23 + $0x1b8] sm:$0xff] %vm2350_vm0, %v13528_v63  ;;  %13549 = vpow2.f32 %v10841_v50  ;;  %v17318_v42 = vpop.f32.mrb[35].mxu0  ;;  %v17321_v44 = vadd.f32 %v8319_v5, %v8159_v43  ;;  %v8167_v63 = vadd.f32 %v17037_v25, %v17139_v39 }
 0x78b   : > { %v13532_v51 = vpop.eup %13531  ;;  %9777 = vst [vmem:[%s16427_s23 + $0x1b0] sm:$0xff] %v13530_v23  ;;  %13551 = vpow2.f32 %v10843_v47  ;;  %v8321_v15 = vpop.f32.mrb[99].mxu1 }
 0x78c   : > { %v13534_v41 = vpop.eup %13533  ;;  %9783 = vst [vmem:[%s16427_s23 + $0x1e0] sm:$0xff] %v13532_v51  ;;  %13553 = vpow2.f32 %v10842_v40  ;;  %v17325_v12 = vpop.f32.mrb[36].mxu0  ;;  %v11492_v15 = vadd.f32 %v17245_v46, %v17143_v9  ;;  %v11494_v46 = vadd.f32 %v17265_v21, %v17143_v9  ;;  %v10857_v21 = vmul.f32 -1.442695, %v17255_v26 }
 0x78d   : > { %v13536_v35 = vpop.eup %13535  ;;  %v9113_v49 = vadd.f32 1.0, %v13534_v41  ;;  %13555 = vpow2.f32 %v10848_v19  ;;  %v8324_v0 = vpop.f32.mrb[100].mxu1 }
 0x78e   : > { %v13538_v22 = vpop.eup %13537  ;;  %v9112_v11 = vadd.f32 1.0, %v13536_v35  ;;  %13557 = vpow2.f32 %v10850_v38  ;;  %v17327_v53 = vadd.f32 %v8324_v0, %v8164_v27  ;;  %v17329_v50 = vpop.f32.mrb[37].mxu0  ;;  %v11491_v38 = vadd.f32 %v17243_v2, %v17145_v14 }
 0x78f   : > { %v13540_v6 = vpop.eup %13539  ;;  %13559 = vrcp.f32 %v9113_v49  ;;  %v9118_v62 = vadd.f32 1.0, %v13538_v22  ;;  %v8326_v61 = vpop.f32.mrb[101].mxu1  ;;  %v8172_v2 = vadd.f32 %v17049_v52, %v17139_v39 }
 0x790   : > { %v13542_v13 = vpop.eup %13541  ;;  %13561 = vrcp.f32 %v9112_v11  ;;  %v9120_v7 = vadd.f32 1.0, %v13540_v6  ;;  %v17331_v33 = vpop.f32.mrb[38].mxu0  ;;  %v11493_v11 = vadd.f32 %v17251_v28, %v17145_v14  ;;  %v10849_v27 = vmul.f32 -1.442695, %v11491_v38 }
 0x791   : > { %v13544_v20 = vpop.eup %13543  ;;  %13563 = vrcp.f32 %v9118_v62  ;;  %v9119_v45 = vadd.f32 1.0, %v13542_v13  ;;  %v8327_v54 = vpop.f32.mrb[102].mxu1 }
 0x792   : > { %v13546_v47 = vpop.eup %13545  ;;  %13565 = vrcp.f32 %v9120_v7  ;;  %v9125_v59 = vadd.f32 1.0, %v13544_v20  ;;  %v17335_v19 = vpop.f32.mrb[39].mxu0  ;;  %v17341_v41 = vadd.f32 %v8327_v54, %v8167_v63 }
 0x793   : > { %v13548_v40 = vpop.eup %13547  ;;  %13567 = vrcp.f32 %v9119_v45  ;;  %v9127_v32 = vadd.f32 1.0, %v13546_v47  ;;  %v8329_v43 = vpop.f32.mrb[103].mxu1  ;;  %v10855_v45 = vmul.f32 -1.442695, %v11492_v15 }
 0x794   : > { %v13550_v56 = vpop.eup %13549  ;;  %13569 = vrcp.f32 %v9125_v59  ;;  %v9126_v23 = vadd.f32 1.0, %v13548_v40  ;;  %v11495_v59 = vadd.f32 %v17274_v60, %v17145_v14  ;;  %v8175_v40 = vadd.f32 %v17057_v57, %v17139_v39 }
 0x795   : > { %v13552_v5 = vpop.eup %13551  ;;  %13571 = vrcp.f32 %v9127_v32  ;;  %v9132_v51 = vadd.f32 1.0, %v13550_v56  ;;  %v10856_v56 = vmul.f32 -1.442695, %v11493_v11  ;;  %v10862_v60 = vmul.f32 -1.442695, %v11494_v46 }
 0x796   : > { %v13554_v35 = vpop.eup %13553  ;;  %13573 = vrcp.f32 %v9126_v23  ;;  %v9134_v25 = vadd.f32 1.0, %v13552_v5  ;;  %v17349_v13 = vpop.f32.mrb[40].mxu0  ;;  %v11496_v23 = vadd.f32 %v17279_v24, %v17143_v9  ;;  %v11497_v24 = vadd.f32 %v17284_v17, %v17145_v14 }
 0x797   : > { %v13556_v49 = vpop.eup %13555  ;;  %13575 = vrcp.f32 %v9132_v51  ;;  %v9133_v22 = vadd.f32 1.0, %v13554_v35  ;;  %v8332_v7 = vpop.f32.mrb[104].mxu1  ;;  %v10864_v51 = vmul.f32 -1.442695, %v17272_v58  ;;  %v10863_v35 = vmul.f32 -1.442695, %v11495_v59 }
 0x798   : > { %v13558_v6 = vpop.eup %13557  ;;  %13577 = vrcp.f32 %v9134_v25  ;;  %v9139_v62 = vadd.f32 1.0, %v13556_v49  ;;  %v17351_v28 = vadd.f32 %v8332_v7, %v8172_v2  ;;  %v17353_v61 = vpop.f32.mrb[41].mxu0  ;;  %v11498_v25 = vadd.f32 %v17303_v1, %v17143_v9 }
 0x799   : > { %v13560_v0 = vpop.eup %13559  ;;  %13579 = vrcp.f32 %v9133_v22  ;;  %v9141_v20 = vadd.f32 1.0, %v13558_v6  ;;  %v8334_v52 = vpop.f32.mrb[105].mxu1  ;;  %v10869_v22 = vmul.f32 -1.442695, %v11496_v23  ;;  %v8180_v11 = vadd.f32 %v17075_v16, %v17139_v39 }
 0x79a   : > { %v13562_v47 = vpop.eup %13561  ;;  %9785 = vst.msk [vmem:[%s16427_s23 + $0x1f0] sm:$0xff] %vm2350_vm0, %v13560_v0  ;;  %13581 = vrcp.f32 %v9139_v62  ;;  %v17360_v54 = vpop.f32.mrb[42].mxu0  ;;  %v10871_v17 = vmul.f32 -1.442695, %v17291_v37  ;;  %v11499_v2 = vadd.f32 %v17308_v10, %v17145_v14  ;;  %v10876_v37 = vmul.f32 -1.442695, %v11498_v25 }
 0x79b   : > { %v8335_v32 = vpop.f32.mrb[106].mxu1  ;;  %v13564_v63 = vpop.eup %13563  ;;  %9784 = vst [vmem:[%s16427_s23 + $0x1e8] sm:$0xff] %v13562_v47  ;;  %13583 = vrcp.f32 %v9141_v20  ;;  %v8183_v20 = vadd.f32 %v17079_v55, %v17139_v39  ;;  %v10878_v47 = vmul.f32 -1.442695, %v17306_v48  ;;  %v8188_v48 = vadd.f32 %v17084_v8, %v17139_v39 }
 0x79c   : > { %v17367_v38 = vpop.f32.mrb[43].mxu0  ;;  %v8337_v26 = vpop.f32.mrb[107].mxu1  ;;  %9790 = vst [vmem:[%s16427_s23 + $0x218] sm:$0xff] %v13564_v63  ;;  %13585 = vpow2.f32 %v10849_v27  ;;  %v17370_v5 = vadd.f32 %v8335_v32, %v8175_v40  ;;  %v10870_v27 = vmul.f32 -1.442695, %v11497_v24 }
 0x79d   : > { %v13566_v43 = vpop.eup %13565  ;;  %13587 = vpow2.f32 %v10855_v45  ;;  %v10877_v32 = vmul.f32 -1.442695, %v11499_v2 }
 0x79e   : > { %v13568_v57 = vpop.eup %13567  ;;  %9792 = vst.msk [vmem:[%s16427_s23 + $0x228] sm:$0xff] %vm2350_vm0, %v13566_v43  ;;  %13589 = vpow2.f32 %v10857_v21  ;;  %v17388_v6 = vpop.f32.mrb[44].mxu0 }
 0x79f   : > { %v13570_v15 = vpop.eup %13569  ;;  %9791 = vst [vmem:[%s16427_s23 + $0x220] sm:$0xff] %v13568_v57  ;;  %13591 = vpow2.f32 %v10856_v56  ;;  %v8340_v1 = vpop.f32.mrb[108].mxu1 }
 0x7a0   : > { %v13572_v49 = vpop.eup %13571  ;;  %9797 = vst [vmem:[%s16427_s23 + $0x250] sm:$0xff] %v13570_v15  ;;  %13593 = vpow2.f32 %v10862_v60  ;;  %v17391_v46 = vadd.f32 %v8340_v1, %v8180_v11  ;;  %v17393_v16 = vpop.f32.mrb[45].mxu0  ;;  %v8191_v1 = vadd.f32 %v17086_v18, %v17139_v39 }
 0x7a1   : > { %v13574_v58 = vpop.eup %13573  ;;  %9799 = vst.msk [vmem:[%s16427_s23 + $0x260] sm:$0xff] %vm2350_vm0, %v13572_v49  ;;  %13595 = vpow2.f32 %v10864_v51  ;;  %v8342_v7 = vpop.f32.mrb[109].mxu1 }
 0x7a2   : > { %v13576_v62 = vpop.eup %13575  ;;  %9798 = vst [vmem:[%s16427_s23 + $0x258] sm:$0xff] %v13574_v58  ;;  %13597 = vpow2.f32 %v10863_v35  ;;  %v17396_v10 = vpop.f32.mrb[46].mxu0 }
 0x7a3   : > { %v13578_v0 = vpop.eup %13577  ;;  %9804 = vst [vmem:[%s16427_s23 + $0x288] sm:$0xff] %v13576_v62  ;;  %v8343_v45 = vpop.f32.mrb[110].mxu1  ;;  %13599 = vpow2.f32 %v10869_v22 }
 0x7a4   : > { %v13580_v52 = vpop.eup %13579  ;;  %9806 = vst.msk [vmem:[%s16427_s23 + $0x298] sm:$0xff] %vm2350_vm0, %v13578_v0  ;;  %v17403_v21 = vpop.f32.mrb[47].mxu0  ;;  %13601 = vpow2.f32 %v10871_v17  ;;  %v17406_v63 = vadd.f32 %v8343_v45, %v8183_v20 }
 0x7a5   : > { %v8345_v59 = vpop.f32.mrb[111].mxu1  ;;  %v13582_v40 = vpop.eup %13581  ;;  %9805 = vst [vmem:[%s16427_s23 + $0x290] sm:$0xff] %v13580_v52  ;;  %13603 = vpow2.f32 %v10870_v27 }
 0x7a6   : > { %v13584_v56 = vpop.eup %13583  ;;  %9811 = vst [vmem:[%s16427_s23 + $0x2c0] sm:$0xff] %v13582_v40  ;;  %13605 = vpow2.f32 %v10876_v37  ;;  %v17413_v57 = vpop.f32.mrb[48].mxu0  ;;  %v11500_v59 = vadd.f32 %v17313_v3, %v17143_v9  ;;  %v11502_v3 = vadd.f32 %v17325_v12, %v17143_v9 }
 0x7a7   : > { %v13586_v55 = vpop.eup %13585  ;;  %9813 = vst.msk [vmem:[%s16427_s23 + $0x2d0] sm:$0xff] %vm2350_vm0, %v13584_v56  ;;  %13607 = vpow2.f32 %v10878_v47  ;;  %v8348_v51 = vpop.f32.mrb[112].mxu1 }
 0x7a8   : > { %v13588_v23 = vpop.eup %13587  ;;  %v9140_v26 = vadd.f32 1.0, %v13586_v55  ;;  %13609 = vpow2.f32 %v10877_v32  ;;  %v17415_v35 = vadd.f32 %v8348_v51, %v8188_v48  ;;  %v17417_v25 = vpop.f32.mrb[49].mxu0  ;;  %v8196_v32 = vadd.f32 %v17096_v34, %v17139_v39 }
 0x7a9   : > { %v13590_v43 = vpop.eup %13589  ;;  %v9146_v60 = vadd.f32 1.0, %v13588_v23  ;;  %v8350_v49 = vpop.f32.mrb[113].mxu1  ;;  %v11501_v23 = vadd.f32 %v17318_v42, %v17145_v14 }
 0x7aa   : > { %v13592_v24 = vpop.eup %13591  ;;  %13611 = vrcp.f32 %v9140_v26  ;;  %v9148_v15 = vadd.f32 1.0, %v13590_v43  ;;  %v17419_v58 = vpop.f32.mrb[50].mxu0 }
 0x7ab   : > { %v13594_v22 = vpop.eup %13593  ;;  %13613 = vrcp.f32 %v9146_v60  ;;  %v9147_v11 = vadd.f32 1.0, %v13592_v24  ;;  %v8351_v8 = vpop.f32.mrb[114].mxu1 }
 0x7ac   : > { %v13596_v17 = vpop.eup %13595  ;;  %13615 = vrcp.f32 %v9148_v15  ;;  %v9153_v2 = vadd.f32 1.0, %v13594_v22  ;;  %v17423_v62 = vpop.f32.mrb[51].mxu0  ;;  %v17425_v45 = vadd.f32 %v8351_v8, %v8191_v1  ;;  %v10883_v22 = vmul.f32 -1.442695, %v11500_v59 }
 0x7ad   : > { %v13598_v27 = vpop.eup %13597  ;;  %13617 = vrcp.f32 %v9147_v11  ;;  %v9155_v7 = vadd.f32 1.0, %v13596_v17  ;;  %v8353_v0 = vpop.f32.mrb[115].mxu1  ;;  %v8199_v11 = vadd.f32 %v17102_v4, %v17139_v39  ;;  %v11503_v1 = vadd.f32 %v17329_v50, %v17145_v14 }
 0x7ae   : > { %v13600_v37 = vpop.eup %13599  ;;  %13619 = vrcp.f32 %v9153_v2  ;;  %v9154_v20 = vadd.f32 1.0, %v13598_v27  ;;  %v17433_v26 = vpop.f32.mrb[52].mxu0  ;;  %v10885_v2 = vmul.f32 -1.442695, %v17321_v44  ;;  %v10884_v0 = vmul.f32 -1.442695, %v11501_v23 }
 0x7af   : > { %v13602_v52 = vpop.eup %13601  ;;  %13621 = vrcp.f32 %v9155_v7  ;;  %v9160_v47 = vadd.f32 1.0, %v13600_v37  ;;  %v8356_v48 = vpop.f32.mrb[116].mxu1  ;;  %v11504_v4 = vadd.f32 %v17331_v33, %v17143_v9  ;;  %v10890_v44 = vmul.f32 -1.442695, %v11502_v3 }
 0x7b0   : > { %v13604_v40 = vpop.eup %13603  ;;  %13623 = vrcp.f32 %v9154_v20  ;;  %v9162_v18 = vadd.f32 1.0, %v13602_v52  ;;  %v17437_v51 = vadd.f32 %v8356_v48, %v8196_v32  ;;  %v17439_v24 = vpop.f32.mrb[53].mxu0  ;;  %v10892_v50 = vmul.f32 -1.442695, %v17327_v53 }
 0x7b1   : > { %v13606_v56 = vpop.eup %13605  ;;  %13625 = vrcp.f32 %v9160_v47  ;;  %v9161_v55 = vadd.f32 1.0, %v13604_v40  ;;  %v8358_v34 = vpop.f32.mrb[117].mxu1  ;;  %v11505_v59 = vadd.f32 %v17335_v19, %v17145_v14  ;;  %v10891_v33 = vmul.f32 -1.442695, %v11503_v1 }
 0x7b2   : > { %v13608_v43 = vpop.eup %13607  ;;  %13627 = vrcp.f32 %v9162_v18  ;;  %v9167_v60 = vadd.f32 1.0, %v13606_v56  ;;  %v17441_v42 = vpop.f32.mrb[54].mxu0  ;;  %v11506_v18 = vadd.f32 %v17349_v13, %v17143_v9  ;;  %v8204_v32 = vadd.f32 %v17120_v36, %v17139_v39 }
 0x7b3   : > { %v13610_v15 = vpop.eup %13609  ;;  %13629 = vrcp.f32 %v9161_v55  ;;  %v9169_v49 = vadd.f32 1.0, %v13608_v43  ;;  %v8359_v8 = vpop.f32.mrb[118].mxu1  ;;  %v10897_v55 = vmul.f32 -1.442695, %v11504_v4  ;;  %v10899_v19 = vmul.f32 -1.442695, %v17341_v41 }
 0x7b4   : > { %v13612_v17 = vpop.eup %13611  ;;  %13631 = vrcp.f32 %v9167_v60  ;;  %v9168_v12 = vadd.f32 1.0, %v13610_v15  ;;  %v17448_v27 = vpop.f32.mrb[55].mxu0  ;;  %v17453_v37 = vadd.f32 %v8359_v8, %v8199_v11  ;;  %v11507_v13 = vadd.f32 %v17353_v61, %v17145_v14 }
 0x7b5   : > { %v13614_v7 = vpop.eup %13613  ;;  %9812 = vst [vmem:[%s16427_s23 + $0x2c8] sm:$0xff] %v13612_v17  ;;  %13633 = vrcp.f32 %v9169_v49  ;;  %v8361_v20 = vpop.f32.mrb[119].mxu1  ;;  %v10898_v34 = vmul.f32 -1.442695, %v11505_v59  ;;  %v11508_v15 = vadd.f32 %v17360_v54, %v17143_v9  ;;  %v8207_v41 = vadd.f32 %v17124_v30, %v17139_v39 }
 0x7b6   : > { %v13616_v52 = vpop.eup %13615  ;;  %9818 = vst [vmem:[%s16427_s23 + $0x2f8] sm:$0xff] %v13614_v7  ;;  %13635 = vrcp.f32 %v9168_v12  ;;  %v10904_v11 = vmul.f32 -1.442695, %v11506_v18  ;;  %v10906_v54 = vmul.f32 -1.442695, %v17351_v28  ;;  %v8212_v20 = vadd.f32 %v17133_v31, %v17139_v39 }
 0x7b7   : > { %v13618_v47 = vpop.eup %13617  ;;  %9820 = vst.msk [vmem:[%s16427_s23 + $0x308] sm:$0xff] %vm2350_vm0, %v13616_v52  ;;  %13637 = vpow2.f32 %v10883_v22  ;;  %v17467_v23 = vpop.f32.mrb[56].mxu0  ;;  %v10905_v1 = vmul.f32 -1.442695, %v11507_v13 }
 0x7b8   : > { %v13620_v40 = vpop.eup %13619  ;;  %9819 = vst [vmem:[%s16427_s23 + $0x300] sm:$0xff] %v13618_v47  ;;  %13639 = vpow2.f32 %v10885_v2  ;;  %v8364_v53 = vpop.f32.mrb[120].mxu1 }
 0x7b9   : > { %v13622_v56 = vpop.eup %13621  ;;  %9825 = vst [vmem:[%s16427_s23 + $0x330] sm:$0xff] %v13620_v40  ;;  %13641 = vpow2.f32 %v10884_v0  ;;  %v17474_v43 = vadd.f32 %v8364_v53, %v8204_v32  ;;  %v17476_v36 = vpop.f32.mrb[57].mxu0  ;;  %v10911_v0 = vmul.f32 -1.442695, %v11508_v15 }
 0x7ba   : > { %v13624_v48 = vpop.eup %13623  ;;  %9827 = vst.msk [vmem:[%s16427_s23 + $0x340] sm:$0xff] %vm2350_vm0, %v13622_v56  ;;  %13643 = vpow2.f32 %v10890_v44  ;;  %v8366_v60 = vpop.f32.mrb[121].mxu1 }
 0x7bb   : > { %v13626_v3 = vpop.eup %13625  ;;  %9826 = vst [vmem:[%s16427_s23 + $0x338] sm:$0xff] %v13624_v48  ;;  %13645 = vpow2.f32 %v10892_v50  ;;  %v17481_v49 = vpop.f32.mrb[58].mxu0  ;;  %v8215_v48 = vadd.f32 %v17141_v29, %v17139_v39 }
 0x7bc   : > { %v8367_v61 = vpop.f32.mrb[122].mxu1  ;;  %v13628_v22 = vpop.eup %13627  ;;  %9832 = vst [vmem:[%s16427_s23 + $0x368] sm:$0xff] %v13626_v3  ;;  %13647 = vpow2.f32 %v10891_v33 }
 0x7bd   : > { %v17486_v8 = vpop.f32.mrb[59].mxu0  ;;  %v8369_v17 = vpop.f32.mrb[123].mxu1  ;;  %9834 = vst.msk [vmem:[%s16427_s23 + $0x378] sm:$0xff] %vm2350_vm0, %v13628_v22  ;;  %13649 = vpow2.f32 %v10897_v55  ;;  %v17491_v2 = vadd.f32 %v8367_v61, %v8207_v41 }
 0x7be   : > { %v13630_v12 = vpop.eup %13629  ;;  %13651 = vpow2.f32 %v10899_v19 }
 0x7bf   : > { %v13632_v30 = vpop.eup %13631  ;;  %9833 = vst [vmem:[%s16427_s23 + $0x370] sm:$0xff] %v13630_v12  ;;  %13653 = vpow2.f32 %v10898_v34  ;;  %v17500_v28 = vpop.f32.mrb[60].mxu0 }
 0x7c0   : > { %v13634_v7 = vpop.eup %13633  ;;  %9839 = vst [vmem:[%s16427_s23 + $0x3a0] sm:$0xff] %v13632_v30  ;;  %13655 = vpow2.f32 %v10904_v11  ;;  %v8372_v44 = vpop.f32.mrb[124].mxu1  ;;  %v11509_v30 = vadd.f32 %v17367_v38, %v17145_v14 }
 0x7c1   : > { %v13636_v4 = vpop.eup %13635  ;;  %9841 = vst.msk [vmem:[%s16427_s23 + $0x3b0] sm:$0xff] %vm2350_vm0, %v13634_v7  ;;  %13657 = vpow2.f32 %v10906_v54  ;;  %v17502_v59 = vadd.f32 %v8372_v44, %v8212_v20  ;;  %v17504_v40 = vpop.f32.mrb[61].mxu0 }
 0x7c2   : > { %v13638_v52 = vpop.eup %13637  ;;  %9840 = vst [vmem:[%s16427_s23 + $0x3a8] sm:$0xff] %v13636_v4  ;;  %13659 = vpow2.f32 %v10905_v1  ;;  %v8374_v33 = vpop.f32.mrb[125].mxu1 }
 0x7c3   : > { %v13640_v47 = vpop.eup %13639  ;;  %v9174_v50 = vadd.f32 1.0, %v13638_v52  ;;  %13661 = vpow2.f32 %v10911_v0  ;;  %v17506_v56 = vpop.f32.mrb[62].mxu0  ;;  %v11510_v0 = vadd.f32 %v17388_v6, %v17143_v9  ;;  %v11512_v6 = vadd.f32 %v17396_v10, %v17143_v9 }
 0x7c4   : > { %v13642_v18 = vpop.eup %13641  ;;  %v9176_v32 = vadd.f32 1.0, %v13640_v47  ;;  %v8375_v31 = vpop.f32.mrb[126].mxu1  ;;  %v10913_v47 = vmul.f32 -1.442695, %v17370_v5  ;;  %v10920_v5 = vmul.f32 -1.442695, %v17391_v46 }
 0x7c5   : > { %v13644_v55 = vpop.eup %13643  ;;  %13663 = vrcp.f32 %v9174_v50  ;;  %v9175_v53 = vadd.f32 1.0, %v13642_v18  ;;  %v17510_v19 = vpop.f32.mrb[63].mxu0  ;;  %v17512_v41 = vadd.f32 %v8375_v31, %v8215_v48  ;;  %v11511_v50 = vadd.f32 %v17393_v16, %v17145_v14 }
 0x7c6   : > { %v13646_v13 = vpop.eup %13645  ;;  %13665 = vrcp.f32 %v9176_v32  ;;  %v9181_v60 = vadd.f32 1.0, %v13644_v55  ;;  %v8377_v3 = vpop.f32.mrb[127].mxu1  ;;  %v10912_v18 = vmul.f32 -1.442695, %v11509_v30  ;;  %v10918_v31 = vmul.f32 -1.442695, %v11510_v0 }
 0x7c7   : > { %v13648_v34 = vpop.eup %13647  ;;  %13667 = vrcp.f32 %v9175_v53  ;;  %v9183_v15 = vadd.f32 1.0, %v13646_v13  ;;  %v11513_v16 = vadd.f32 %v17403_v21, %v17145_v14  ;;  %v10919_v10 = vmul.f32 -1.442695, %v11511_v50 }
 0x7c8   : > { %v13650_v61 = vpop.eup %13649  ;;  %13669 = vrcp.f32 %v9181_v60  ;;  %v9182_v22 = vadd.f32 1.0, %v13648_v34  ;;  %v11514_v48 = vadd.f32 %v17413_v57, %v17143_v9  ;;  %v10925_v60 = vmul.f32 -1.442695, %v11512_v6 }
 0x7c9   : > { %v13652_v11 = vpop.eup %13651  ;;  %13671 = vrcp.f32 %v9183_v15  ;;  %v9188_v17 = vadd.f32 1.0, %v13650_v61  ;;  %v10927_v46 = vmul.f32 -1.442695, %v17406_v63  ;;  %v11515_v21 = vadd.f32 %v17417_v25, %v17145_v14 }
 0x7ca   : > { %v13654_v12 = vpop.eup %13653  ;;  %13673 = vrcp.f32 %v9182_v22  ;;  %v9190_v39 = vadd.f32 1.0, %v13652_v11  ;;  %v10926_v57 = vmul.f32 -1.442695, %v11513_v16  ;;  %v11516_v15 = vadd.f32 %v17419_v58, %v17143_v9 }
 0x7cb   : > { %v13656_v29 = vpop.eup %13655  ;;  %13675 = vrcp.f32 %v9188_v17  ;;  %v9189_v54 = vadd.f32 1.0, %v13654_v12  ;;  %v10932_v22 = vmul.f32 -1.442695, %v11514_v48  ;;  %v10934_v63 = vmul.f32 -1.442695, %v17415_v35 }
 0x7cc   : > { %v13658_v1 = vpop.eup %13657  ;;  %13677 = vrcp.f32 %v9190_v39  ;;  %v9195_v7 = vadd.f32 1.0, %v13656_v29  ;;  %v10933_v17 = vmul.f32 -1.442695, %v11515_v21  ;;  %v10939_v58 = vmul.f32 -1.442695, %v11516_v15 }
 0x7cd   : > { %v13660_v4 = vpop.eup %13659  ;;  %13679 = vrcp.f32 %v9189_v54  ;;  %v9197_v20 = vadd.f32 1.0, %v13658_v1  ;;  %v10941_v29 = vmul.f32 -1.442695, %v17425_v45  ;;  %v11518_v16 = vadd.f32 %v17433_v26, %v17143_v9 }
 0x7ce   : > { %v13662_v52 = vpop.eup %13661  ;;  %13681 = vrcp.f32 %v9195_v7  ;;  %v9196_v44 = vadd.f32 1.0, %v13660_v4  ;;  %v11520_v21 = vadd.f32 %v17441_v42, %v17143_v9 }
 0x7cf   : > { %v13664_v38 = vpop.eup %13663  ;;  %13683 = vrcp.f32 %v9197_v20  ;;  %v9202_v33 = vadd.f32 1.0, %v13662_v52 }
 0x7d0   : > { %v13666_v32 = vpop.eup %13665  ;;  %9846 = vst [vmem:[%s16427_s23 + $0x3d8] sm:$0xff] %v13664_v38  ;;  %13685 = vrcp.f32 %v9196_v44 }
 0x7d1   : > { %v13668_v55 = vpop.eup %13667  ;;  %9848 = vst.msk [vmem:[%s16427_s23 + $0x3e8] sm:$0xff] %vm2350_vm0, %v13666_v32  ;;  %13687 = vrcp.f32 %v9202_v33 }
 0x7d2   : > { %v13670_v53 = vpop.eup %13669  ;;  %9847 = vst [vmem:[%s16427_s23 + $0x3e0] sm:$0xff] %v13668_v55  ;;  %13689 = vpow2.f32 %v10913_v47 }
 0x7d3   : > { %v13672_v13 = vpop.eup %13671  ;;  %9853 = vst [vmem:[%s16427_s23 + $0x410] sm:$0xff] %v13670_v53  ;;  %13691 = vpow2.f32 %v10912_v18 }
 0x7d4   : > { %v13674_v3 = vpop.eup %13673  ;;  %9855 = vst.msk [vmem:[%s16427_s23 + $0x420] sm:$0xff] %vm2350_vm0, %v13672_v13  ;;  %13693 = vpow2.f32 %v10918_v31  ;;  %v11517_v31 = vadd.f32 %v17423_v62, %v17145_v14 }
 0x7d5   : > { %v13676_v34 = vpop.eup %13675  ;;  %9854 = vst [vmem:[%s16427_s23 + $0x418] sm:$0xff] %v13674_v3  ;;  %13695 = vpow2.f32 %v10920_v5 }
 0x7d6   : > { %v13678_v61 = vpop.eup %13677  ;;  %9860 = vst [vmem:[%s16427_s23 + $0x448] sm:$0xff] %v13676_v34  ;;  %13697 = vpow2.f32 %v10919_v10 }
 0x7d7   : > { %v13680_v11 = vpop.eup %13679  ;;  %9862 = vst.msk [vmem:[%s16427_s23 + $0x458] sm:$0xff] %vm2350_vm0, %v13678_v61  ;;  %13699 = vpow2.f32 %v10925_v60  ;;  %v11519_v60 = vadd.f32 %v17439_v24, %v17145_v14  ;;  %v10948_v24 = vmul.f32 -1.442695, %v17437_v51  ;;  %v11521_v61 = vadd.f32 %v17448_v27, %v17145_v14 }
 0x7d8   : > { %v13682_v25 = vpop.eup %13681  ;;  %9861 = vst [vmem:[%s16427_s23 + $0x450] sm:$0xff] %v13680_v11  ;;  %13701 = vpow2.f32 %v10927_v46  ;;  %v10940_v46 = vmul.f32 -1.442695, %v11517_v31  ;;  %v11522_v11 = vadd.f32 %v17467_v23, %v17143_v9  ;;  %v10955_v51 = vmul.f32 -1.442695, %v17453_v37 }
 0x7d9   : > { %v13684_v12 = vpop.eup %13683  ;;  %9867 = vst [vmem:[%s16427_s23 + $0x480] sm:$0xff] %v13682_v25  ;;  %13703 = vpow2.f32 %v10926_v57  ;;  %v10946_v57 = vmul.f32 -1.442695, %v11518_v16  ;;  %v10947_v42 = vmul.f32 -1.442695, %v11519_v60  ;;  %v11523_v27 = vadd.f32 %v17476_v36, %v17145_v14 }
 0x7da   : > { %v13686_v39 = vpop.eup %13685  ;;  %9869 = vst.msk [vmem:[%s16427_s23 + $0x490] sm:$0xff] %vm2350_vm0, %v13684_v12  ;;  %13705 = vpow2.f32 %v10932_v22  ;;  %v10953_v25 = vmul.f32 -1.442695, %v11520_v21  ;;  %v10954_v23 = vmul.f32 -1.442695, %v11521_v61  ;;  %v11525_v36 = vadd.f32 %v17486_v8, %v17145_v14 }
 0x7db   : > { %v13688_v54 = vpop.eup %13687  ;;  %9868 = vst [vmem:[%s16427_s23 + $0x488] sm:$0xff] %v13686_v39  ;;  %13707 = vpow2.f32 %v10934_v63  ;;  %v10962_v37 = vmul.f32 -1.442695, %v17474_v43  ;;  %v10976_v61 = vmul.f32 -1.442695, %v17502_v59 }
 0x7dc   : > { %v13690_v30 = vpop.eup %13689  ;;  %9874 = vst [vmem:[%s16427_s23 + $0x4b8] sm:$0xff] %v13688_v54  ;;  %13709 = vpow2.f32 %v10933_v17  ;;  %v10968_v8 = vmul.f32 -1.442695, %v11525_v36  ;;  %v10983_v59 = vmul.f32 -1.442695, %v17512_v41 }
 0x7dd   : > { %v13692_v35 = vpop.eup %13691  ;;  %v9204_v1 = vadd.f32 1.0, %v13690_v30  ;;  %13711 = vpow2.f32 %v10939_v58  ;;  %v11524_v58 = vadd.f32 %v17481_v49, %v17143_v9  ;;  %v10961_v49 = vmul.f32 -1.442695, %v11523_v27 }
 0x7de   : > { %v13694_v7 = vpop.eup %13693  ;;  %v9203_v0 = vadd.f32 1.0, %v13692_v35  ;;  %13713 = vpow2.f32 %v10941_v29  ;;  %v10960_v29 = vmul.f32 -1.442695, %v11522_v11 }
 0x7df   : > { %v13696_v4 = vpop.eup %13695  ;;  %13715 = vrcp.f32 %v9204_v1  ;;  %v9209_v20 = vadd.f32 1.0, %v13694_v7  ;;  %v10967_v1 = vmul.f32 -1.442695, %v11524_v58 }
 0x7e0   : > { %v13698_v52 = vpop.eup %13697  ;;  %13717 = vrcp.f32 %v9203_v0  ;;  %v9211_v44 = vadd.f32 1.0, %v13696_v4  ;;  %v10969_v0 = vmul.f32 -1.442695, %v17491_v2 }
 0x7e1   : > { %v13700_v47 = vpop.eup %13699  ;;  %13719 = vrcp.f32 %v9209_v20  ;;  %v9210_v45 = vadd.f32 1.0, %v13698_v52 }
 0x7e2   : > { %v13702_v50 = vpop.eup %13701  ;;  %13721 = vrcp.f32 %v9211_v44  ;;  %v9216_v38 = vadd.f32 1.0, %v13700_v47 }
 0x7e3   : > { %v13704_v33 = vpop.eup %13703  ;;  %13723 = vrcp.f32 %v9210_v45  ;;  %v9218_v18 = vadd.f32 1.0, %v13702_v50 }
 0x7e4   : > { %v13706_v6 = vpop.eup %13705  ;;  %13725 = vrcp.f32 %v9216_v38  ;;  %v9217_v32 = vadd.f32 1.0, %v13704_v33 }
 0x7e5   : > { %v13708_v55 = vpop.eup %13707  ;;  %13727 = vrcp.f32 %v9218_v18  ;;  %v9223_v5 = vadd.f32 1.0, %v13706_v6 }
 0x7e6   : > { %v13710_v53 = vpop.eup %13709  ;;  %13729 = vrcp.f32 %v9217_v32  ;;  %v9225_v10 = vadd.f32 1.0, %v13708_v55 }
 0x7e7   : > { %v13712_v48 = vpop.eup %13711  ;;  %13731 = vrcp.f32 %v9223_v5  ;;  %v9224_v13 = vadd.f32 1.0, %v13710_v53 }
 0x7e8   : > { %v13714_v3 = vpop.eup %13713  ;;  %13733 = vrcp.f32 %v9225_v10  ;;  %v9230_v62 = vadd.f32 1.0, %v13712_v48  ;;  %v11526_v10 = vadd.f32 %v17500_v28, %v17143_v9 }
 0x7e9   : > { %v13716_v26 = vpop.eup %13715  ;;  %13735 = vrcp.f32 %v9224_v13  ;;  %v9232_v34 = vadd.f32 1.0, %v13714_v3 }
 0x7ea   : > { %v13718_v15 = vpop.eup %13717  ;;  %9876 = vst.msk [vmem:[%s16427_s23 + $0x4c8] sm:$0xff] %vm2350_vm0, %v13716_v26  ;;  %13737 = vrcp.f32 %v9230_v62  ;;  %v11527_v62 = vadd.f32 %v17504_v40, %v17145_v14  ;;  %v11528_v26 = vadd.f32 %v17506_v56, %v17143_v9  ;;  %v11529_v40 = vadd.f32 %v17510_v19, %v17145_v14 }
 0x7eb   : > { %v13720_v22 = vpop.eup %13719  ;;  %9875 = vst [vmem:[%s16427_s23 + $0x4c0] sm:$0xff] %v13718_v15  ;;  %13739 = vrcp.f32 %v9232_v34 }
 0x7ec   : > { %v13722_v63 = vpop.eup %13721  ;;  %9881 = vst [vmem:[%s16427_s23 + $0x4f0] sm:$0xff] %v13720_v22  ;;  %13741 = vpow2.f32 %v10940_v46  ;;  %v10981_v56 = vmul.f32 -1.442695, %v11528_v26  ;;  %v10982_v14 = vmul.f32 -1.442695, %v11529_v40 }
 0x7ed   : > { %v13724_v17 = vpop.eup %13723  ;;  %9883 = vst.msk [vmem:[%s16427_s23 + $0x500] sm:$0xff] %vm2350_vm0, %v13722_v63  ;;  %13743 = vpow2.f32 %v10946_v57  ;;  %v10974_v57 = vmul.f32 -1.442695, %v11526_v10 }
 0x7ee   : > { %v13726_v12 = vpop.eup %13725  ;;  %9882 = vst [vmem:[%s16427_s23 + $0x4f8] sm:$0xff] %v13724_v17  ;;  %13745 = vpow2.f32 %v10948_v24 }
 0x7ef   : > { %v13728_v39 = vpop.eup %13727  ;;  %9888 = vst [vmem:[%s16427_s23 + $0x528] sm:$0xff] %v13726_v12  ;;  %13747 = vpow2.f32 %v10947_v42  ;;  %v10975_v42 = vmul.f32 -1.442695, %v11527_v62 }
 0x7f0   : > { %v13730_v54 = vpop.eup %13729  ;;  %9890 = vst.msk [vmem:[%s16427_s23 + $0x538] sm:$0xff] %vm2350_vm0, %v13728_v39  ;;  %13749 = vpow2.f32 %v10953_v25 }
 0x7f1   : > { %v13732_v30 = vpop.eup %13731  ;;  %9889 = vst [vmem:[%s16427_s23 + $0x530] sm:$0xff] %v13730_v54  ;;  %13751 = vpow2.f32 %v10955_v51 }
 0x7f2   : > { %v13734_v35 = vpop.eup %13733  ;;  %9895 = vst [vmem:[%s16427_s23 + $0x560] sm:$0xff] %v13732_v30  ;;  %13753 = vpow2.f32 %v10954_v23 }
 0x7f3   : > { %v13736_v7 = vpop.eup %13735  ;;  %9897 = vst.msk [vmem:[%s16427_s23 + $0x570] sm:$0xff] %vm2350_vm0, %v13734_v35  ;;  %13755 = vpow2.f32 %v10960_v29 }
 0x7f4   : > { %v13738_v43 = vpop.eup %13737  ;;  %9896 = vst [vmem:[%s16427_s23 + $0x568] sm:$0xff] %v13736_v7  ;;  %13757 = vpow2.f32 %v10962_v37 }
 0x7f5   : > { %v13740_v4 = vpop.eup %13739  ;;  %9902 = vst [vmem:[%s16427_s23 + $0x598] sm:$0xff] %v13738_v43  ;;  %13759 = vpow2.f32 %v10961_v49 }
 0x7f6   : > { %v13742_v20 = vpop.eup %13741  ;;  %9904 = vst.msk [vmem:[%s16427_s23 + $0x5a8] sm:$0xff] %vm2350_vm0, %v13740_v4  ;;  %13761 = vpow2.f32 %v10967_v1 }
 0x7f7   : > { %v13744_v52 = vpop.eup %13743  ;;  %v9231_v44 = vadd.f32 1.0, %v13742_v20  ;;  %13763 = vpow2.f32 %v10969_v0 }
 0x7f8   : > { %v13746_v47 = vpop.eup %13745  ;;  %v9237_v45 = vadd.f32 1.0, %v13744_v52  ;;  %13765 = vpow2.f32 %v10968_v8 }
 0x7f9   : > { %v13748_v50 = vpop.eup %13747  ;;  %13767 = vrcp.f32 %v9231_v44  ;;  %v9239_v2 = vadd.f32 1.0, %v13746_v47 }
 0x7fa   : > { %v13750_v38 = vpop.eup %13749  ;;  %13769 = vrcp.f32 %v9237_v45  ;;  %v9238_v33 = vadd.f32 1.0, %v13748_v50 }
 0x7fb   : > { %v13752_v18 = vpop.eup %13751  ;;  %13771 = vrcp.f32 %v9239_v2  ;;  %v9244_v6 = vadd.f32 1.0, %v13750_v38 }
 0x7fc   : > { %v13754_v32 = vpop.eup %13753  ;;  %13773 = vrcp.f32 %v9238_v33  ;;  %v9246_v31 = vadd.f32 1.0, %v13752_v18 }
 0x7fd   : > { %v13756_v55 = vpop.eup %13755  ;;  %13775 = vrcp.f32 %v9244_v6  ;;  %v9245_v5 = vadd.f32 1.0, %v13754_v32 }
 0x7fe   : > { %v13758_v16 = vpop.eup %13757  ;;  %13777 = vrcp.f32 %v9246_v31  ;;  %v9251_v53 = vadd.f32 1.0, %v13756_v55 }
 0x7ff   : > { %v13760_v48 = vpop.eup %13759  ;;  %13779 = vrcp.f32 %v9245_v5  ;;  %v9253_v13 = vadd.f32 1.0, %v13758_v16 }
 0x800   : > { %v13762_v60 = vpop.eup %13761  ;;  %13781 = vrcp.f32 %v9251_v53  ;;  %v9252_v3 = vadd.f32 1.0, %v13760_v48 }
 0x801   : > { %v13764_v46 = vpop.eup %13763  ;;  %13783 = vrcp.f32 %v9253_v13  ;;  %v9258_v21 = vadd.f32 1.0, %v13762_v60 }
 0x802   : > { %v13766_v34 = vpop.eup %13765  ;;  %13785 = vrcp.f32 %v9252_v3  ;;  %v9260_v28 = vadd.f32 1.0, %v13764_v46 }
 0x803   : > { %v13768_v15 = vpop.eup %13767  ;;  %13787 = vrcp.f32 %v9258_v21  ;;  %v9259_v24 = vadd.f32 1.0, %v13766_v34 }
 0x804   : > { %v13770_v22 = vpop.eup %13769  ;;  %9903 = vst [vmem:[%s16427_s23 + $0x5a0] sm:$0xff] %v13768_v15  ;;  %13789 = vrcp.f32 %v9260_v28 }
 0x805   : > { %v13772_v9 = vpop.eup %13771  ;;  %9909 = vst [vmem:[%s16427_s23 + $0x5d0] sm:$0xff] %v13770_v22  ;;  %13791 = vrcp.f32 %v9259_v24 }
 0x806   : > { %v13774_v11 = vpop.eup %13773  ;;  %9911 = vst.msk [vmem:[%s16427_s23 + $0x5e0] sm:$0xff] %vm2350_vm0, %v13772_v9  ;;  %13793 = vpow2.f32 %v10974_v57 }
 0x807   : > { %v13776_v63 = vpop.eup %13775  ;;  %9910 = vst [vmem:[%s16427_s23 + $0x5d8] sm:$0xff] %v13774_v11  ;;  %13795 = vpow2.f32 %v10976_v61 }
 0x808   : > { %v13778_v19 = vpop.eup %13777  ;;  %9916 = vst [vmem:[%s16427_s23 + $0x608] sm:$0xff] %v13776_v63  ;;  %13797 = vpow2.f32 %v10975_v42 }
 0x809   : > { %v13780_v25 = vpop.eup %13779  ;;  %9918 = vst.msk [vmem:[%s16427_s23 + $0x618] sm:$0xff] %vm2350_vm0, %v13778_v19  ;;  %13799 = vpow2.f32 %v10981_v56 }
 0x80a   : > { %v13782_v17 = vpop.eup %13781  ;;  %9917 = vst [vmem:[%s16427_s23 + $0x610] sm:$0xff] %v13780_v25  ;;  %13801 = vpow2.f32 %v10983_v59 }
 0x80b   : > { %v13784_v41 = vpop.eup %13783  ;;  %9923 = vst [vmem:[%s16427_s23 + $0x640] sm:$0xff] %v13782_v17  ;;  %13803 = vpow2.f32 %v10982_v14 }
 0x80c   : > { %v13786_v51 = vpop.eup %13785  ;;  %9925 = vst.msk [vmem:[%s16427_s23 + $0x650] sm:$0xff] %vm2350_vm0, %v13784_v41 }
 0x80d   : > { %v13788_v27 = vpop.eup %13787  ;;  %9924 = vst [vmem:[%s16427_s23 + $0x648] sm:$0xff] %v13786_v51 }
 0x80e   : > { %v13790_v12 = vpop.eup %13789  ;;  %9930 = vst [vmem:[%s16427_s23 + $0x678] sm:$0xff] %v13788_v27 }
 0x80f   : > { %v13792_v23 = vpop.eup %13791  ;;  %9932 = vst.msk [vmem:[%s16427_s23 + $0x688] sm:$0xff] %vm2350_vm0, %v13790_v12 }
 0x810   : > { %v13794_v58 = vpop.eup %13793  ;;  %9931 = vst [vmem:[%s16427_s23 + $0x680] sm:$0xff] %v13792_v23 }
 0x811   : > { %v13796_v39 = vpop.eup %13795  ;;  %v9265_v29 = vadd.f32 1.0, %v13794_v58 }
 0x812   : > { %v13798_v54 = vpop.eup %13797  ;;  %v9267_v37 = vadd.f32 1.0, %v13796_v39 }
 0x813   : > { %v13800_v36 = vpop.eup %13799  ;;  %13805 = vrcp.f32 %v9265_v29  ;;  %v9266_v30 = vadd.f32 1.0, %v13798_v54 }
 0x814   : > { %v13802_v49 = vpop.eup %13801  ;;  %13807 = vrcp.f32 %v9267_v37  ;;  %v9272_v35 = vadd.f32 1.0, %v13800_v36 }
 0x815   : > { %v13804_v1 = vpop.eup %13803  ;;  %13809 = vrcp.f32 %v9266_v30  ;;  %v9274_v7 = vadd.f32 1.0, %v13802_v49 }
 0x816   : > { %13811 = vrcp.f32 %v9272_v35  ;;  %v9273_v0 = vadd.f32 1.0, %v13804_v1 }
 0x817   : > { %13813 = vrcp.f32 %v9274_v7 }
 0x818   : > { %13815 = vrcp.f32 %v9273_v0 }
 0x81d   : > { %v13806_v43 = vpop.eup %13805 }
 0x81e   : > { %v13808_v8 = vpop.eup %13807  ;;  %9937 = vst [vmem:[%s16427_s23 + $0x6b0] sm:$0xff] %v13806_v43 }
 0x81f   : > { %v13810_v4 = vpop.eup %13809  ;;  %9939 = vst.msk [vmem:[%s16427_s23 + $0x6c0] sm:$0xff] %vm2350_vm0, %v13808_v8 }
 0x820   : > { %v13812_v20 = vpop.eup %13811  ;;  %9938 = vst [vmem:[%s16427_s23 + $0x6b8] sm:$0xff] %v13810_v4 }
 0x821   : > { %v13814_v52 = vpop.eup %13813  ;;  %9944 = vst [vmem:[%s16427_s23 + $0x6e8] sm:$0xff] %v13812_v20 }
 0x822   : > { %v13816_v44 = vpop.eup %13815  ;;  %9946 = vst.msk [vmem:[%s16427_s23 + $0x6f8] sm:$0xff] %vm2350_vm0, %v13814_v52 }
 0x823   : > { %9945 = vst [vmem:[%s16427_s23 + $0x6f0] sm:$0xff] %v13816_v44 }
 0x824 PF: > { %s22_s17 = sadd.s32 1, %s13824_s17  }
 0x825   : > { %p19_p4 = scmp.ge.s32.totalorder %s22_s17, 4  }
 0x827   :  { %21 = sbr.rel (!%p19_p4) target bundleno = 1 (0x1), region = 105 }

</bundles_post_ra>
